<compile_context>
chip_gen: v7x
topology: tpu7x:2x2x1
jax: 0.10.0
libtpu: 0.0.40
codegen_flags: <defaults>
</compile_context>

<pallas_src>
import jax
import jax.numpy as jnp
from jax import lax
from jax.experimental import pallas as pl
from jax.experimental.pallas import tpu as pltpu


# --------------------------- in-kernel helpers (operate on VMEM values) ---------------------------

def _pad_hw(x, top, bot, left, right):
    """Zero-pad a (H, W, C) value on H/W via concatenation (stays in VMEM, lane dim unchanged)."""
    H, W, C = x.shape
    if top or bot:
        parts = ([jnp.zeros((top, W, C), x.dtype)] if top else []) + [x] + \
                ([jnp.zeros((bot, W, C), x.dtype)] if bot else [])
        x = jnp.concatenate(parts, axis=0)
        H += top + bot
    if left or right:
        parts = ([jnp.zeros((H, left, C), x.dtype)] if left else []) + [x] + \
                ([jnp.zeros((H, right, C), x.dtype)] if right else [])
        x = jnp.concatenate(parts, axis=1)
    return x


def _im2col3x3(x):
    """(H, W, C) -> (H*W, 9*C) patch matrix for a 3x3 / padding=1 convolution.
    Column order: tap-major (dy*3+dx), channel-minor — matches the weight packing below."""
    H, W, C = x.shape
    xp = _pad_hw(x, 1, 1, 1, 1)
    cols = [xp[dy:dy + H, dx:dx + W, :].reshape(H * W, C)
            for dy in range(3) for dx in range(3)]
    return jnp.concatenate(cols, axis=-1)


# --------------------------- the fused Pallas kernel ---------------------------

def _up_double_conv_kernel(x1_ref, x2_ref, wt_ref, bt_ref,
                           w1_ref, s1_ref, t1_ref,
                           w2_ref, s2_ref, t2_ref, o_ref):
    """x1_ref:(1,H,W,Cin)  x2_ref:(1,H2,W2,Cskip)
       wt_ref:(Cin,4*Cmid) [tap k=di*2+dj packed along columns]  bt_ref:(1,4*Cmid)
       w1_ref:(9*(Cskip+Cmid),Cout)  w2_ref:(9*Cout,Cout)  s*/t*:(1,Cout)
       o_ref:(1,H2,W2,Cout)."""
    _, H, W, Cin = x1_ref.shape
    _, H2, W2, Cskip = x2_ref.shape
    Cmid = wt_ref.shape[1] // 4
    Cout = s1_ref.shape[1]

    # --- ConvTranspose2d(kernel=2, stride=2): ONE matmul over all 4 taps ---
    x1_2d = x1_ref[0].reshape(H * W, Cin)                                   # (HW, Cin)
    up_p = jnp.dot(x1_2d, wt_ref[...],
                   preferred_element_type=jnp.float32) + bt_ref[...]        # (HW, 4*Cmid)

    # Scatter the taps into the 2x-upsampled grid using lane-preserving slices/concats (VMEM only).
    t00, t01, t10, t11 = (up_p[:, k * Cmid:(k + 1) * Cmid] for k in range(4))
    row0 = jnp.concatenate([t00.reshape(H * W, 1, Cmid),
                            t01.reshape(H * W, 1, Cmid)], axis=1).reshape(H, 2 * W, Cmid)
    row1 = jnp.concatenate([t10.reshape(H * W, 1, Cmid),
                            t11.reshape(H * W, 1, Cmid)], axis=1).reshape(H, 2 * W, Cmid)
    up = jnp.concatenate([row0.reshape(H, 1, 2 * W, Cmid),
                          row1.reshape(H, 1, 2 * W, Cmid)], axis=1).reshape(2 * H, 2 * W, Cmid)

    # F.pad(x1, [dX//2, dX-dX//2, dY//2, dY-dY//2]) — static pads, done in VMEM.
    dY, dX = H2 - 2 * H, W2 - 2 * W
    if dY or dX:
        up = _pad_hw(up, dY // 2, dY - dY // 2, dX // 2, dX - dX // 2)

    # --- conv1 on concat([x2, up]) via im2col: ONE matmul, contraction = 9*(Cskip+Cmid) ---
    xcat = jnp.concatenate([x2_ref[0], up], axis=-1)                        # (H2, W2, Cskip+Cmid)
    h = jnp.dot(_im2col3x3(xcat), w1_ref[...], preferred_element_type=jnp.float32)
    h = jnp.maximum(h * s1_ref[...] + t1_ref[...], 0.0)                     # folded BN + ReLU

    # --- conv2 (DoubleConv fused: h never leaves VMEM) ---
    y = jnp.dot(_im2col3x3(h.reshape(H2, W2, Cout)), w2_ref[...],
                preferred_element_type=jnp.float32)
    y = jnp.maximum(y * s2_ref[...] + t2_ref[...], 0.0)                     # (H2*W2, Cout)

    o_ref[0] = y.reshape(H2, W2, Cout).astype(o_ref.dtype)


# --------------------------- wrapper ---------------------------

def up_forward(params, x1, x2):
    """Up.forward: x1 (N,H,W,Cin), x2 (N,2H,2W,Cin//2) -> (N,2H,2W,out_channels)."""
    N, H, W, Cin = x1.shape
    _, H2, W2, Cskip = x2.shape
    Cmid = params["up_w"].shape[1] // 4
    Cout = params["c1_scale"].shape[-1]

    return pl.pallas_call(
        _up_double_conv_kernel,
        out_shape=jax.ShapeDtypeStruct((N, H2, W2, Cout), x1.dtype),
        grid_spec=pltpu.PrefetchScalarGridSpec(
            num_scalar_prefetch=0,
            grid=(N,),
            in_specs=[
                pl.BlockSpec((1, H, W, Cin), lambda n: (n, 0, 0, 0)),
                pl.BlockSpec((1, H2, W2, Cskip), lambda n: (n, 0, 0, 0)),
                pl.BlockSpec((Cin, 4 * Cmid), lambda n: (0, 0)),
                pl.BlockSpec((1, 4 * Cmid), lambda n: (0, 0)),
                pl.BlockSpec((9 * (Cskip + Cmid), Cout), lambda n: (0, 0)),
                pl.BlockSpec((1, Cout), lambda n: (0, 0)),
                pl.BlockSpec((1, Cout), lambda n: (0, 0)),
                pl.BlockSpec((9 * Cout, Cout), lambda n: (0, 0)),
                pl.BlockSpec((1, Cout), lambda n: (0, 0)),
                pl.BlockSpec((1, Cout), lambda n: (0, 0)),
            ],
            out_specs=pl.BlockSpec((1, H2, W2, Cout), lambda n: (n, 0, 0, 0)),
        ),
        compiler_params=pltpu.CompilerParams(dimension_semantics=("parallel",)),
    )(x1, x2,
      params["up_w"], params["up_b"].reshape(1, -1),
      params["c1_w"], params["c1_scale"].reshape(1, -1), params["c1_shift"].reshape(1, -1),
      params["c2_w"], params["c2_scale"].reshape(1, -1), params["c2_shift"].reshape(1, -1))


# --------------------------- parameter setup + reference ---------------------------

def make_params(key, in_ch, out_ch, eps=1e-5):
    mid = in_ch // 2
    ks = jax.random.split(key, 6)
    raw = {
        # ConvTranspose2d weight: PyTorch layout (Cin, Cout, kH, kW)
        "Wt": jax.random.normal(ks[0], (in_ch, mid, 2, 2), jnp.float32) * 0.1,
        "bt": jax.random.normal(ks[1], (mid,), jnp.float32) * 0.05,
        # Conv2d weights: PyTorch layout (Cout, Cin, 3, 3)
        "W1": jax.random.normal(ks[2], (out_ch, in_ch, 3, 3), jnp.float32) * 0.1,
        "b1": jax.random.normal(ks[3], (out_ch,), jnp.float32) * 0.05,
        "W2": jax.random.normal(ks[4], (out_ch, out_ch, 3, 3), jnp.float32) * 0.1,
        "b2": jax.random.normal(ks[5], (out_ch,), jnp.float32) * 0.05,
        # BatchNorm (freshly initialized, eval mode): gamma=1, beta=0, mean=0, var=1
        "g1": jnp.ones((out_ch,)), "be1": jnp.zeros((out_ch,)),
        "m1": jnp.zeros((out_ch,)), "v1": jnp.ones((out_ch,)),
        "g2": jnp.ones((out_ch,)), "be2": jnp.zeros((out_ch,)),
        "m2": jnp.zeros((out_ch,)), "v2": jnp.ones((out_ch,)),
    }
    s1 = raw["g1"] / jnp.sqrt(raw["v1"] + eps)
    s2 = raw["g2"] / jnp.sqrt(raw["v2"] + eps)
    packed = {
        # ConvTranspose taps fused into one matmul operand: (Cin, 4*mid), column block k = a*2+b
        "up_w": jnp.transpose(raw["Wt"], (2, 3, 0, 1)).reshape(4, in_ch, mid)
                    .transpose(1, 0, 2).reshape(in_ch, 4 * mid),
        "up_b": jnp.tile(raw["bt"], 4),                                      # bias per tap block
        # im2col-packed conv weights: row index = (dy*3+dx)*Cin + ci  (matches _im2col3x3)
        "c1_w": jnp.transpose(raw["W1"], (2, 3, 1, 0)).reshape(9 * in_ch, out_ch),
        "c1_scale": s1, "c1_shift": raw["be1"] + (raw["b1"] - raw["m1"]) * s1,
        "c2_w": jnp.transpose(raw["W2"], (2, 3, 1, 0)).reshape(9 * out_ch, out_ch),
        "c2_scale": s2, "c2_shift": raw["be2"] + (raw["b2"] - raw["m2"]) * s2,
    }
    return raw, packed


def reference_forward(raw, x1, x2, eps=1e-5):
    # conv-transpose 2x2 stride 2
    N, H, W, Cin = x1.shape
    Cmid = raw["Wt"].shape[1]
    t = jnp.einsum("nhwi,ioab->nhawbo", x1, raw["Wt"]).reshape(N, 2 * H, 2 * W, Cmid)
    up = t + raw["bt"]
    diffY = x2.shape[1] - up.shape[1]
    diffX = x2.shape[2] - up.shape[2]
    up = jnp.pad(up, ((0, 0), (diffY // 2, diffY - diffY // 2),
                      (diffX // 2, diffX - diffX // 2), (0, 0)))
    x = jnp.concatenate([x2, up], axis=-1)

    def conv_bn_relu(x, W, b, g, be, m, v):
        w_hwio = jnp.transpose(W, (2, 3, 1, 0))
        y = lax.conv_general_dilated(x, w_hwio, (1, 1), "SAME",
                                     dimension_numbers=("NHWC", "HWIO", "NHWC")) + b
        y = (y - m) / jnp.sqrt(v + eps) * g + be
        return jnp.maximum(y, 0.0)

    h = conv_bn_relu(x, raw["W1"], raw["b1"], raw["g1"], raw["be1"], raw["m1"], raw["v1"])
    return conv_bn_relu(h, raw["W2"], raw["b2"], raw["g2"], raw["be2"], raw["m2"], raw["v2"])


# --------------------------- main ---------------------------

if __name__ == "__main__":
    in_channels, out_channels = 8, 4
    N, H1, W1 = 2, 8, 8                      # x1 spatial; x2 is 2x larger (standard U-Net skip)

    key = jax.random.PRNGKey(0)
    kx1, kx2, kp = jax.random.split(key, 3)
    # NHWC inputs (equivalent PyTorch NCHW shapes: x1=(2,8,8,8), x2=(2,4,16,16))
    x1 = jax.random.normal(kx1, (N, H1, W1, in_channels), jnp.float32)
    x2 = jax.random.normal(kx2, (N, 2 * H1, 2 * W1, in_channels // 2), jnp.float32)

    raw, packed = make_params(kp, in_channels, out_channels)

    out = jax.jit(up_forward)(packed, x1, x2)
    out = jax.block_until_ready(out)

    ref = reference_forward(raw, x1, x2)
    assert out.shape == (N, 2 * H1, 2 * W1, out_channels), out.shape
    err = float(jnp.max(jnp.abs(out - ref)))
    assert jnp.allclose(out, ref, atol=2e-4, rtol=2e-4), err

    print("KERNEL_OK")
</pallas_src>

<mosaic_0001>
module attributes {stable_mosaic.version = 11 : i64} {
  func.func @_up_double_conv_kernel(%arg0: i32, %arg1: memref<1x8x8x8xf32, #tpu.memory_space<vmem>>, %arg2: memref<1x16x16x4xf32, #tpu.memory_space<vmem>>, %arg3: memref<8x16xf32, #tpu.memory_space<vmem>>, %arg4: memref<1x16xf32, #tpu.memory_space<vmem>>, %arg5: memref<72x4xf32, #tpu.memory_space<vmem>>, %arg6: memref<1x4xf32, #tpu.memory_space<vmem>>, %arg7: memref<1x4xf32, #tpu.memory_space<vmem>>, %arg8: memref<36x4xf32, #tpu.memory_space<vmem>>, %arg9: memref<1x4xf32, #tpu.memory_space<vmem>>, %arg10: memref<1x4xf32, #tpu.memory_space<vmem>>, %arg11: memref<1x16x16x4xf32, #tpu.memory_space<vmem>>) attributes {dimension_semantics = [#tpu.dimension_semantics<parallel>], iteration_bounds = array<i64: 2>, scalar_prefetch = 0 : i64, scratch_operands = 0 : i64, tpu.core_type = #tpu.core_type<tc>, window_params = [{transform_indices = @transform_0, window_bounds = array<i64: 1, 8, 8, 8>}, {transform_indices = @transform_1, window_bounds = array<i64: 1, 16, 16, 4>}, {pipeline_mode = #tpu.pipeline_mode<synchronous>, transform_indices = @transform_2, window_bounds = array<i64: 8, 16>}, {pipeline_mode = #tpu.pipeline_mode<synchronous>, transform_indices = @transform_3, window_bounds = array<i64: 1, 16>}, {pipeline_mode = #tpu.pipeline_mode<synchronous>, transform_indices = @transform_4, window_bounds = array<i64: 72, 4>}, {pipeline_mode = #tpu.pipeline_mode<synchronous>, transform_indices = @transform_5, window_bounds = array<i64: 1, 4>}, {pipeline_mode = #tpu.pipeline_mode<synchronous>, transform_indices = @transform_6, window_bounds = array<i64: 1, 4>}, {pipeline_mode = #tpu.pipeline_mode<synchronous>, transform_indices = @transform_7, window_bounds = array<i64: 36, 4>}, {pipeline_mode = #tpu.pipeline_mode<synchronous>, transform_indices = @transform_8, window_bounds = array<i64: 1, 4>}, {pipeline_mode = #tpu.pipeline_mode<synchronous>, transform_indices = @transform_9, window_bounds = array<i64: 1, 4>}, {transform_indices = @transform_10, window_bounds = array<i64: 1, 16, 16, 4>}]} {
    %c0 = arith.constant 0 : index
    %c0_0 = arith.constant 0 : index
    %c0_1 = arith.constant 0 : index
    %c0_2 = arith.constant 0 : index
    %0 = vector.load %arg1[%c0, %c0_0, %c0_1, %c0_2] : memref<1x8x8x8xf32, #tpu.memory_space<vmem>>, vector<1x8x8x8xf32>
    %1 = vector.shape_cast %0 : vector<1x8x8x8xf32> to vector<8x8x8xf32>
    %2 = vector.shape_cast %1 : vector<8x8x8xf32> to vector<64x8xf32>
    %c0_3 = arith.constant 0 : index
    %c0_4 = arith.constant 0 : index
    %3 = vector.load %arg3[%c0_3, %c0_4] : memref<8x16xf32, #tpu.memory_space<vmem>>, vector<8x16xf32>
    %cst = arith.constant dense<0.000000e+00> : vector<64x16xf32>
    %4 = tpu.matmul %2, %3, %cst {dimension_numbers = #tpu.dot_dimension_numbers<[1], [0], [0], [1], [0, 0, 1, 1], [], []>} : vector<64x8xf32>, vector<8x16xf32>, vector<64x16xf32> -> vector<64x16xf32>
    %c0_5 = arith.constant 0 : index
    %c0_6 = arith.constant 0 : index
    %5 = vector.load %arg4[%c0_5, %c0_6] : memref<1x16xf32, #tpu.memory_space<vmem>>, vector<1x16xf32>
    %6 = vector.broadcast %5 : vector<1x16xf32> to vector<64x16xf32>
    %7 = arith.addf %4, %6 : vector<64x16xf32>
    %8 = vector.extract_strided_slice %7 {offsets = [0, 0], sizes = [64, 4], strides = [1, 1]} : vector<64x16xf32> to vector<64x4xf32>
    %9 = vector.extract_strided_slice %7 {offsets = [0, 4], sizes = [64, 4], strides = [1, 1]} : vector<64x16xf32> to vector<64x4xf32>
    %10 = vector.extract_strided_slice %7 {offsets = [0, 8], sizes = [64, 4], strides = [1, 1]} : vector<64x16xf32> to vector<64x4xf32>
    %11 = vector.extract_strided_slice %7 {offsets = [0, 12], sizes = [64, 4], strides = [1, 1]} : vector<64x16xf32> to vector<64x4xf32>
    %12 = vector.shape_cast %8 : vector<64x4xf32> to vector<64x1x4xf32>
    %13 = vector.shape_cast %9 : vector<64x4xf32> to vector<64x1x4xf32>
    %14 = tpu.concatenate %12, %13 in 1 : vector<64x1x4xf32>, vector<64x1x4xf32> -> vector<64x2x4xf32>
    %15 = vector.shape_cast %14 : vector<64x2x4xf32> to vector<8x16x4xf32>
    %16 = vector.shape_cast %10 : vector<64x4xf32> to vector<64x1x4xf32>
    %17 = vector.shape_cast %11 : vector<64x4xf32> to vector<64x1x4xf32>
    %18 = tpu.concatenate %16, %17 in 1 : vector<64x1x4xf32>, vector<64x1x4xf32> -> vector<64x2x4xf32>
    %19 = vector.shape_cast %18 : vector<64x2x4xf32> to vector<8x16x4xf32>
    %20 = vector.shape_cast %15 : vector<8x16x4xf32> to vector<8x1x16x4xf32>
    %21 = vector.shape_cast %19 : vector<8x16x4xf32> to vector<8x1x16x4xf32>
    %22 = tpu.concatenate %20, %21 in 1 : vector<8x1x16x4xf32>, vector<8x1x16x4xf32> -> vector<8x2x16x4xf32>
    %23 = vector.shape_cast %22 : vector<8x2x16x4xf32> to vector<16x16x4xf32>
    %c0_7 = arith.constant 0 : index
    %c0_8 = arith.constant 0 : index
    %c0_9 = arith.constant 0 : index
    %c0_10 = arith.constant 0 : index
    %24 = vector.load %arg2[%c0_7, %c0_8, %c0_9, %c0_10] : memref<1x16x16x4xf32, #tpu.memory_space<vmem>>, vector<1x16x16x4xf32>
    %25 = vector.shape_cast %24 : vector<1x16x16x4xf32> to vector<16x16x4xf32>
    %26 = tpu.concatenate %25, %23 in 2 : vector<16x16x4xf32>, vector<16x16x4xf32> -> vector<16x16x8xf32>
    %cst_11 = arith.constant 0.000000e+00 : f32
    %27 = vector.broadcast %cst_11 : f32 to vector<1x16x8xf32>
    %cst_12 = arith.constant 0.000000e+00 : f32
    %28 = vector.broadcast %cst_12 : f32 to vector<1x16x8xf32>
    %29 = tpu.concatenate %27, %26, %28 in 0 : vector<1x16x8xf32>, vector<16x16x8xf32>, vector<1x16x8xf32> -> vector<18x16x8xf32>
    %cst_13 = arith.constant 0.000000e+00 : f32
    %30 = vector.broadcast %cst_13 : f32 to vector<18x1x8xf32>
    %cst_14 = arith.constant 0.000000e+00 : f32
    %31 = vector.broadcast %cst_14 : f32 to vector<18x1x8xf32>
    %32 = tpu.concatenate %30, %29, %31 in 1 : vector<18x1x8xf32>, vector<18x16x8xf32>, vector<18x1x8xf32> -> vector<18x18x8xf32>
    %33 = vector.extract_strided_slice %32 {offsets = [0, 0, 0], sizes = [16, 16, 8], strides = [1, 1, 1]} : vector<18x18x8xf32> to vector<16x16x8xf32>
    %34 = vector.shape_cast %33 : vector<16x16x8xf32> to vector<256x8xf32>
    %35 = vector.extract_strided_slice %32 {offsets = [0, 1, 0], sizes = [16, 16, 8], strides = [1, 1, 1]} : vector<18x18x8xf32> to vector<16x16x8xf32>
    %36 = vector.shape_cast %35 : vector<16x16x8xf32> to vector<256x8xf32>
    %37 = vector.extract_strided_slice %32 {offsets = [0, 2, 0], sizes = [16, 16, 8], strides = [1, 1, 1]} : vector<18x18x8xf32> to vector<16x16x8xf32>
    %38 = vector.shape_cast %37 : vector<16x16x8xf32> to vector<256x8xf32>
    %39 = vector.extract_strided_slice %32 {offsets = [1, 0, 0], sizes = [16, 16, 8], strides = [1, 1, 1]} : vector<18x18x8xf32> to vector<16x16x8xf32>
    %40 = vector.shape_cast %39 : vector<16x16x8xf32> to vector<256x8xf32>
    %41 = vector.extract_strided_slice %32 {offsets = [1, 1, 0], sizes = [16, 16, 8], strides = [1, 1, 1]} : vector<18x18x8xf32> to vector<16x16x8xf32>
    %42 = vector.shape_cast %41 : vector<16x16x8xf32> to vector<256x8xf32>
    %43 = vector.extract_strided_slice %32 {offsets = [1, 2, 0], sizes = [16, 16, 8], strides = [1, 1, 1]} : vector<18x18x8xf32> to vector<16x16x8xf32>
    %44 = vector.shape_cast %43 : vector<16x16x8xf32> to vector<256x8xf32>
    %45 = vector.extract_strided_slice %32 {offsets = [2, 0, 0], sizes = [16, 16, 8], strides = [1, 1, 1]} : vector<18x18x8xf32> to vector<16x16x8xf32>
    %46 = vector.shape_cast %45 : vector<16x16x8xf32> to vector<256x8xf32>
    %47 = vector.extract_strided_slice %32 {offsets = [2, 1, 0], sizes = [16, 16, 8], strides = [1, 1, 1]} : vector<18x18x8xf32> to vector<16x16x8xf32>
    %48 = vector.shape_cast %47 : vector<16x16x8xf32> to vector<256x8xf32>
    %49 = vector.extract_strided_slice %32 {offsets = [2, 2, 0], sizes = [16, 16, 8], strides = [1, 1, 1]} : vector<18x18x8xf32> to vector<16x16x8xf32>
    %50 = vector.shape_cast %49 : vector<16x16x8xf32> to vector<256x8xf32>
    %51 = tpu.concatenate %34, %36, %38, %40, %42, %44, %46, %48, %50 in 1 : vector<256x8xf32>, vector<256x8xf32>, vector<256x8xf32>, vector<256x8xf32>, vector<256x8xf32>, vector<256x8xf32>, vector<256x8xf32>, vector<256x8xf32>, vector<256x8xf32> -> vector<256x72xf32>
    %c0_15 = arith.constant 0 : index
    %c0_16 = arith.constant 0 : index
    %52 = vector.load %arg5[%c0_15, %c0_16] : memref<72x4xf32, #tpu.memory_space<vmem>>, vector<72x4xf32>
    %cst_17 = arith.constant dense<0.000000e+00> : vector<256x4xf32>
    %53 = tpu.matmul %51, %52, %cst_17 {dimension_numbers = #tpu.dot_dimension_numbers<[1], [0], [0], [1], [0, 0, 1, 1], [], []>} : vector<256x72xf32>, vector<72x4xf32>, vector<256x4xf32> -> vector<256x4xf32>
    %c0_18 = arith.constant 0 : index
    %c0_19 = arith.constant 0 : index
    %54 = vector.load %arg6[%c0_18, %c0_19] : memref<1x4xf32, #tpu.memory_space<vmem>>, vector<1x4xf32>
    %55 = vector.broadcast %54 : vector<1x4xf32> to vector<256x4xf32>
    %56 = arith.mulf %53, %55 : vector<256x4xf32>
    %c0_20 = arith.constant 0 : index
    %c0_21 = arith.constant 0 : index
    %57 = vector.load %arg7[%c0_20, %c0_21] : memref<1x4xf32, #tpu.memory_space<vmem>>, vector<1x4xf32>
    %58 = vector.broadcast %57 : vector<1x4xf32> to vector<256x4xf32>
    %59 = arith.addf %56, %58 : vector<256x4xf32>
    %cst_22 = arith.constant 0.000000e+00 : f32
    %60 = vector.broadcast %cst_22 : f32 to vector<256x4xf32>
    %61 = arith.maximumf %59, %60 : vector<256x4xf32>
    %62 = vector.shape_cast %61 : vector<256x4xf32> to vector<16x16x4xf32>
    %cst_23 = arith.constant 0.000000e+00 : f32
    %63 = vector.broadcast %cst_23 : f32 to vector<1x16x4xf32>
    %cst_24 = arith.constant 0.000000e+00 : f32
    %64 = vector.broadcast %cst_24 : f32 to vector<1x16x4xf32>
    %65 = tpu.concatenate %63, %62, %64 in 0 : vector<1x16x4xf32>, vector<16x16x4xf32>, vector<1x16x4xf32> -> vector<18x16x4xf32>
    %cst_25 = arith.constant 0.000000e+00 : f32
    %66 = vector.broadcast %cst_25 : f32 to vector<18x1x4xf32>
    %cst_26 = arith.constant 0.000000e+00 : f32
    %67 = vector.broadcast %cst_26 : f32 to vector<18x1x4xf32>
    %68 = tpu.concatenate %66, %65, %67 in 1 : vector<18x1x4xf32>, vector<18x16x4xf32>, vector<18x1x4xf32> -> vector<18x18x4xf32>
    %69 = vector.extract_strided_slice %68 {offsets = [0, 0, 0], sizes = [16, 16, 4], strides = [1, 1, 1]} : vector<18x18x4xf32> to vector<16x16x4xf32>
    %70 = vector.shape_cast %69 : vector<16x16x4xf32> to vector<256x4xf32>
    %71 = vector.extract_strided_slice %68 {offsets = [0, 1, 0], sizes = [16, 16, 4], strides = [1, 1, 1]} : vector<18x18x4xf32> to vector<16x16x4xf32>
    %72 = vector.shape_cast %71 : vector<16x16x4xf32> to vector<256x4xf32>
    %73 = vector.extract_strided_slice %68 {offsets = [0, 2, 0], sizes = [16, 16, 4], strides = [1, 1, 1]} : vector<18x18x4xf32> to vector<16x16x4xf32>
    %74 = vector.shape_cast %73 : vector<16x16x4xf32> to vector<256x4xf32>
    %75 = vector.extract_strided_slice %68 {offsets = [1, 0, 0], sizes = [16, 16, 4], strides = [1, 1, 1]} : vector<18x18x4xf32> to vector<16x16x4xf32>
    %76 = vector.shape_cast %75 : vector<16x16x4xf32> to vector<256x4xf32>
    %77 = vector.extract_strided_slice %68 {offsets = [1, 1, 0], sizes = [16, 16, 4], strides = [1, 1, 1]} : vector<18x18x4xf32> to vector<16x16x4xf32>
    %78 = vector.shape_cast %77 : vector<16x16x4xf32> to vector<256x4xf32>
    %79 = vector.extract_strided_slice %68 {offsets = [1, 2, 0], sizes = [16, 16, 4], strides = [1, 1, 1]} : vector<18x18x4xf32> to vector<16x16x4xf32>
    %80 = vector.shape_cast %79 : vector<16x16x4xf32> to vector<256x4xf32>
    %81 = vector.extract_strided_slice %68 {offsets = [2, 0, 0], sizes = [16, 16, 4], strides = [1, 1, 1]} : vector<18x18x4xf32> to vector<16x16x4xf32>
    %82 = vector.shape_cast %81 : vector<16x16x4xf32> to vector<256x4xf32>
    %83 = vector.extract_strided_slice %68 {offsets = [2, 1, 0], sizes = [16, 16, 4], strides = [1, 1, 1]} : vector<18x18x4xf32> to vector<16x16x4xf32>
    %84 = vector.shape_cast %83 : vector<16x16x4xf32> to vector<256x4xf32>
    %85 = vector.extract_strided_slice %68 {offsets = [2, 2, 0], sizes = [16, 16, 4], strides = [1, 1, 1]} : vector<18x18x4xf32> to vector<16x16x4xf32>
    %86 = vector.shape_cast %85 : vector<16x16x4xf32> to vector<256x4xf32>
    %87 = tpu.concatenate %70, %72, %74, %76, %78, %80, %82, %84, %86 in 1 : vector<256x4xf32>, vector<256x4xf32>, vector<256x4xf32>, vector<256x4xf32>, vector<256x4xf32>, vector<256x4xf32>, vector<256x4xf32>, vector<256x4xf32>, vector<256x4xf32> -> vector<256x36xf32>
    %c0_27 = arith.constant 0 : index
    %c0_28 = arith.constant 0 : index
    %88 = vector.load %arg8[%c0_27, %c0_28] : memref<36x4xf32, #tpu.memory_space<vmem>>, vector<36x4xf32>
    %cst_29 = arith.constant dense<0.000000e+00> : vector<256x4xf32>
    %89 = tpu.matmul %87, %88, %cst_29 {dimension_numbers = #tpu.dot_dimension_numbers<[1], [0], [0], [1], [0, 0, 1, 1], [], []>} : vector<256x36xf32>, vector<36x4xf32>, vector<256x4xf32> -> vector<256x4xf32>
    %c0_30 = arith.constant 0 : index
    %c0_31 = arith.constant 0 : index
    %90 = vector.load %arg9[%c0_30, %c0_31] : memref<1x4xf32, #tpu.memory_space<vmem>>, vector<1x4xf32>
    %91 = vector.broadcast %90 : vector<1x4xf32> to vector<256x4xf32>
    %92 = arith.mulf %89, %91 : vector<256x4xf32>
    %c0_32 = arith.constant 0 : index
    %c0_33 = arith.constant 0 : index
    %93 = vector.load %arg10[%c0_32, %c0_33] : memref<1x4xf32, #tpu.memory_space<vmem>>, vector<1x4xf32>
    %94 = vector.broadcast %93 : vector<1x4xf32> to vector<256x4xf32>
    %95 = arith.addf %92, %94 : vector<256x4xf32>
    %cst_34 = arith.constant 0.000000e+00 : f32
    %96 = vector.broadcast %cst_34 : f32 to vector<256x4xf32>
    %97 = arith.maximumf %95, %96 : vector<256x4xf32>
    %98 = vector.shape_cast %97 : vector<256x4xf32> to vector<16x16x4xf32>
    %c0_35 = arith.constant 0 : index
    %c0_36 = arith.constant 0 : index
    %c0_37 = arith.constant 0 : index
    %c0_38 = arith.constant 0 : index
    %99 = vector.load %arg11[%c0_35, %c0_36, %c0_37, %c0_38] : memref<1x16x16x4xf32, #tpu.memory_space<vmem>>, vector<1x16x16x4xf32>
    %100 = vector.shape_cast %99 : vector<1x16x16x4xf32> to vector<16x16x4xf32>
    %101 = vector.shape_cast %98 : vector<16x16x4xf32> to vector<1x16x16x4xf32>
    tpu.vector_store %arg11[%c0_35, %c0_36, %c0_37, %c0_38], %101 {strides = array<i32>} : memref<1x16x16x4xf32, #tpu.memory_space<vmem>>, vector<1x16x16x4xf32>,
    return
  }
  func.func @transform_0(%arg0: i32) -> (i32, i32, i32, i32) {
    %c0_i32 = arith.constant 0 : i32
    %c0_i32_0 = arith.constant 0 : i32
    %c0_i32_1 = arith.constant 0 : i32
    %c0_i32_2 = arith.constant 0 : i32
    return %arg0, %c0_i32, %c0_i32_0, %c0_i32_1 : i32, i32, i32, i32
  }
  func.func @transform_1(%arg0: i32) -> (i32, i32, i32, i32) {
    %c0_i32 = arith.constant 0 : i32
    %c0_i32_0 = arith.constant 0 : i32
    %c0_i32_1 = arith.constant 0 : i32
    %c0_i32_2 = arith.constant 0 : i32
    return %arg0, %c0_i32, %c0_i32_0, %c0_i32_1 : i32, i32, i32, i32
  }
  func.func @transform_2(%arg0: i32) -> (i32, i32) {
    %c0_i32 = arith.constant 0 : i32
    %c0_i32_0 = arith.constant 0 : i32
    %c0_i32_1 = arith.constant 0 : i32
    return %c0_i32, %c0_i32_0 : i32, i32
  }
  func.func @transform_3(%arg0: i32) -> (i32, i32) {
    %c0_i32 = arith.constant 0 : i32
    %c0_i32_0 = arith.constant 0 : i32
    %c0_i32_1 = arith.constant 0 : i32
    return %c0_i32, %c0_i32_0 : i32, i32
  }
  func.func @transform_4(%arg0: i32) -> (i32, i32) {
    %c0_i32 = arith.constant 0 : i32
    %c0_i32_0 = arith.constant 0 : i32
    %c0_i32_1 = arith.constant 0 : i32
    return %c0_i32, %c0_i32_0 : i32, i32
  }
  func.func @transform_5(%arg0: i32) -> (i32, i32) {
    %c0_i32 = arith.constant 0 : i32
    %c0_i32_0 = arith.constant 0 : i32
    %c0_i32_1 = arith.constant 0 : i32
    return %c0_i32, %c0_i32_0 : i32, i32
  }
  func.func @transform_6(%arg0: i32) -> (i32, i32) {
    %c0_i32 = arith.constant 0 : i32
    %c0_i32_0 = arith.constant 0 : i32
    %c0_i32_1 = arith.constant 0 : i32
    return %c0_i32, %c0_i32_0 : i32, i32
  }
  func.func @transform_7(%arg0: i32) -> (i32, i32) {
    %c0_i32 = arith.constant 0 : i32
    %c0_i32_0 = arith.constant 0 : i32
    %c0_i32_1 = arith.constant 0 : i32
    return %c0_i32, %c0_i32_0 : i32, i32
  }
  func.func @transform_8(%arg0: i32) -> (i32, i32) {
    %c0_i32 = arith.constant 0 : i32
    %c0_i32_0 = arith.constant 0 : i32
    %c0_i32_1 = arith.constant 0 : i32
    return %c0_i32, %c0_i32_0 : i32, i32
  }
  func.func @transform_9(%arg0: i32) -> (i32, i32) {
    %c0_i32 = arith.constant 0 : i32
    %c0_i32_0 = arith.constant 0 : i32
    %c0_i32_1 = arith.constant 0 : i32
    return %c0_i32, %c0_i32_0 : i32, i32
  }
  func.func @transform_10(%arg0: i32) -> (i32, i32, i32, i32) {
    %c0_i32 = arith.constant 0 : i32
    %c0_i32_0 = arith.constant 0 : i32
    %c0_i32_1 = arith.constant 0 : i32
    %c0_i32_2 = arith.constant 0 : i32
    return %arg0, %c0_i32, %c0_i32_0, %c0_i32_1 : i32, i32, i32, i32
  }
}

</mosaic_0001>

<bundles_post_ra>
// kernel: up_forward.1
= control target key start
LH: loop header
LB: loop body
LE: loop exit
PB: predicated region body
PF: predicated region fallthrough
CT: control target
= control target key end

     0   :  { %s6660_s13 = smov 0   ;;  %s11492_s0 = inlined_call_operand.vmem [shape: f32[2,8,8,8], index: 0, kind: input, shape index: {}]   ;;  %s11493_s1 = inlined_call_operand.vmem [shape: f32[2,16,16,4], index: 1, kind: input, shape index: {}]   ;;  %s11494_s2 = inlined_call_operand.vmem [shape: f32[8,16], index: 2, kind: input, shape index: {}]   ;;  %s11495_s3 = inlined_call_operand.vmem [shape: f32[1,16], index: 3, kind: input, shape index: {}]   ;;  %s11496_s4 = inlined_call_operand.vmem [shape: f32[72,4], index: 4, kind: input, shape index: {}]   ;;  %s11497_s5 = inlined_call_operand.vmem [shape: f32[1,4], index: 5, kind: input, shape index: {}]   ;;  %s11498_s6 = inlined_call_operand.vmem [shape: f32[1,4], index: 6, kind: input, shape index: {}]   ;;  %s11499_s7 = inlined_call_operand.vmem [shape: f32[36,4], index: 7, kind: input, shape index: {}]   ;;  %s11500_s8 = inlined_call_operand.vmem [shape: f32[1,4], index: 8, kind: input, shape index: {}]   ;;  %s11501_s9 = inlined_call_operand.vmem [shape: f32[1,4], index: 9, kind: input, shape index: {}]   ;;  %s11502_s10 = inlined_call_operand.vmem [shape: f32[2,16,16,4], index: 10, kind: output, shape index: {}]  }
   0x1 LB: > { %s6162_s14 = sadd.s32 4294967295, %s6586_s13   ;;  %p6166_p0 = scmp.ge.s32.totalorder %s6586_s13, 1  ;;  %s6586_s13 = sphi %s6660_s13, %s20_s13  }
   0x2   : > { %p322_p1 = scmp.lt.s32.totalorder %s6586_s13, 3 }
   0x4   : > { %p323_p2 = pnand %p6166_p0, %p322_p1 }
   0x6   : > { %326 = sbr.rel (%p323_p2) target bundleno = 2172 (0x87c), region = 60 }
   0xd   : > { %v388_v0 = vld [vmem:[%s11494_s2] sm:$0xff]  ;;  %p365_p3 = scmp.lt.s32.totalorder %s6162_s14, 1  ;;  %vm396_vm0 = vcmask 64512   ;;  %v6588_v9 = vmov 0.0   ;;  %vm1438_vm1 = vcmask 1040384   ;;  %vm2598_vm2 = vcmask 1046528  }
   0xe   : > { %6343 = vmatprep.subr.mxu0 %v388_v0  ;;  %v6685_v10 = vrot.slane %v6588_v9, 7  ;;  %vm2679_vm3 = vcmask 1045504   ;;  %s6589_s21 = smov 8   ;;  %s6590_s22 = smov 16   ;;  %v6591_v25 = vmov 1966171168   ;;  %v538_v27 = vlaneseq }
   0xf   : > { %6344 = vmatpush3.msra.mxu0 %v388_v0  ;;  %s12403_s14 = smov (!%p365_p3, %s6162_s14), 1  ;;  %v536_v26 = vunpack.c.l.s4 %v6591_v25  ;;  %v6714_v30 = vld [vmem:[%s11495_s3] ss:$0 sm:$0xff]  ;;  %s6592_s25 = smov 124   ;;  %vm2367_vm4 = vcmask 31744   ;;  %vm3572_vm5 = vcmask 130048  }
  0x10   : > { %s6253_s17 = sshll.u32 %s12403_s14, 6  ;;  %11706 = vst [vmem:[#allocation2_spill] sm:$0xff] %v6685_v10  ;;  %v6689_v11 = vsel %vm1438_vm1, 0.0, %v6685_v10  ;;  %v2549_v12 = vsel %vm1438_vm1, %v6685_v10, 0.0  ;;  %v2600_v14 = vrot.slane %v6685_v10, 1  ;;  %v2681_v17 = vrot.slane %v6685_v10, 2 }
  0x11   : > { %s369_s20 = scalar_lea.vmem %s11492_s0, %s6253_s17  ;;  %11707 = vst [vmem:[#allocation3_spill] sm:$0xff] %v6689_v11  ;;  %v2599_v13 = vrot.slane %v6689_v11, 1  ;;  %v2602_v15 = vrot.slane %v2549_v12, 1  ;;  %v2680_v16 = vrot.slane %v6689_v11, 2  ;;  %v2683_v20 = vrot.slane %v2549_v12, 2  ;;  %s6594_s26 = smov 120  }
  0x12   : > { %v380_v1 = vld [vmem:[%s369_s20] sm:$0xff]  ;;  %v381_v2 = vld [vmem:[%s369_s20 + $0x8] sm:$0xff]  ;;  %v382_v3 = vld [vmem:[%s369_s20 + $0x10] sm:$0xff]  ;;  %v537_v28 = vunpack.c.0.s8 %v536_v26  ;;  %v6709_v29 = vshrl.u32 %v538_v27, 7  ;;  %s6595_s27 = smov 4   ;;  %s6254_s28 = sshll.u32 %s12403_s14, 8 }
  0x13   : > { %6345 = vmatprep.mubr.msk.f32.mxu0 %vm396_vm0, %v380_v1  ;;  %v383_v4 = vld [vmem:[%s369_s20 + $0x18] sm:$0xff]  ;;  %v384_v5 = vld [vmem:[%s369_s20 + $0x20] sm:$0xff]  ;;  %v385_v6 = vld [vmem:[%s369_s20 + $0x28] sm:$0xff]  ;;  %v2601_v18 = vsel %vm2598_vm2, %v2599_v13, %v2600_v14  ;;  %v2603_v19 = vsel %vm2598_vm2, %v2600_v14, %v2602_v15  ;;  %v2682_v22 = vsel %vm2679_vm3, %v2680_v16, %v2681_v17  ;;  %v2684_v23 = vsel %vm2679_vm3, %v2681_v17, %v2683_v20  ;;  %s7694_s11 = scalar_lea.vmem %s11493_s1, %s6254_s28  ;;  %s6596_s12 = smov 24  }
  0x14   : > { %6346 = vmatmul.mubr.msk.f32.vlgmr.msra.gmra.mrb[0].mxu0 %vm396_vm0, %v381_v2  ;;  %v386_v7 = vld [vmem:[%s369_s20 + $0x30] sm:$0xff]  ;;  %v387_v8 = vld [vmem:[%s369_s20 + $0x38] sm:$0xff]  ;;  %v6699_v21 = vpack.i.bf16 %v2603_v19, %v2601_v18  ;;  %v6705_v24 = vpack.i.bf16 %v2684_v23, %v2682_v22  ;;  %v6717_v31 = vsub.s32 %v537_v28, %v6709_v29  ;;  %v6723_v37 = vsub.s32 0, %v6709_v29  ;;  %s6597_s15 = smov 32   ;;  %s6598_s16 = smov 40  }
  0x15   : > { %6348 = vmatprep.mubr.msk.f32.mxu0 %vm396_vm0, %v382_v3  ;;  %s6599_s17 = smov 48   ;;  %s6600_s18 = smov 56   ;;  %vm3605_vm6 = vcmask 195584   ;;  %vm3638_vm7 = vcmask 261120   ;;  %vm3671_vm8 = vcmask 326656   ;;  %vm3737_vm9 = vcmask 457728  }
  0x16   : > { %11708 = vst [vmem:[#allocation4_spill] sm:$0xff] %v6699_v21  ;;  %6531 = vrot.lane.b32.xlu0 %v6699_v21, %s6589_s21  ;;  %11709 = vst [vmem:[#allocation5_spill] sm:$0xff] %v6705_v24  ;;  %6536 = vrot.lane.b32.xlu1 %v6705_v24, %s6590_s22  ;;  %s6601_s23 = smov 64   ;;  %vm3704_vm10 = vcmask 392192   ;;  %vm3770_vm11 = vcmask 523264   ;;  %vm3812_vm12 = vcmask 588800   ;;  %s11242_s24 = scalar_lea.vmem %s11502_s10, %s6254_s28 }
  0x17   : > { %s6602_s20 = smov 12   ;;  %vm5724_vm13 = vcmask 1043456   ;;  %s6604_s19 = smov 28   ;;  %vm5427_vm14 = vcmask 97280   ;;  %vm5492_vm15 = vcmask 162816  }
  0x18   : > { %6349 = vmatmul.mubr.msk.f32.gmra.mrb[2].mxu0 %vm396_vm0, %v383_v4 }
  0x19   : > { %6351 = vmatprep.mubr.msk.f32.mxu0 %vm396_vm0, %v384_v5 }
  0x1c   : > { %6352 = vmatmul.mubr.msk.f32.gmra.mrb[4].mxu0 %vm396_vm0, %v385_v6 }
  0x1d   : > { %6354 = vmatprep.mubr.msk.f32.mxu0 %vm396_vm0, %v386_v7 }
  0x20   : > { %6355 = vmatmul.mubr.msk.f32.gmra.mrb[6].mxu0 %vm396_vm0, %v387_v8 }
  0xe7   : > { %v6347_v32 = vpop.f32.mrb[0].mxu0 }
  0xe8   : > { %v493_v33 = vadd.f32 %v6347_v32, %v6714_v30  ;;  %v487_v34 = vpop.f32.mrb[1].mxu0 }
  0xe9   : > { %v488_v35 = vadd.f32 %v6714_v30, %v487_v34 }
  0xea   : > { %v590_v36 = vrot.slane %v493_v33, %v6717_v31  ;;  %v583_v40 = vcombine.high %v493_v33, %v493_v33 }
  0xeb   : > { %v541_v38 = vrot.slane %v488_v35, %v6717_v31  ;;  %v6350_v39 = vpop.f32.mrb[2].mxu0  ;;  %v534_v54 = vcombine.high %v488_v35, %v488_v35 }
  0xec   : > { %v598_v41 = vcombine.high %v590_v36, %v590_v36  ;;  %v6727_v42 = vrot.slane %v590_v36, %v6717_v31  ;;  %v497_v43 = vpop.f32.mrb[3].mxu0  ;;  %v597_v48 = vrot.slane %v583_v40, %v6717_v31  ;;  %v6766_v63 = vadd.f32 %v6350_v39, %v6714_v30 }
  0xed   : > { %v6730_v44 = vrot.slane %v541_v38, %v6717_v31  ;;  %v549_v57 = vcombine.high %v541_v38, %v541_v38  ;;  %v548_v0 = vrot.slane %v534_v54, %v6717_v31  ;;  %v6829_v38 = vadd.f32 %v6714_v30, %v497_v43 }
  0xee   : > { %v6733_v45 = vrot.slane %v598_v41, %v6717_v31  ;;  %v1025_v46 = vrot.slane %v6727_v42, %v6723_v37  ;;  %v6750_v53 = vcombine.high %v6727_v42, %v6727_v42  ;;  %v599_v56 = vcombine.high %v597_v48, %v597_v48 }
  0xef   : > { %v6353_v47 = vpop.f32.mrb[4].mxu0  ;;  %v6743_v50 = vcombine.high %v6730_v44, %v6730_v44  ;;  %v993_v52 = vrot.slane %v6730_v44, %v6723_v37  ;;  %v6760_v61 = vrot.slane %v597_v48, %v6717_v31  ;;  %v6770_v1 = vrot.slane %v549_v57, %v6717_v31 }
  0xf0   : > { %1262 = vrot.lane.b32.xlu0 %v1025_v46, %s6592_s25  ;;  %v1029_v49 = vrot.slane %v6733_v45, %v6723_v37  ;;  %v507_v51 = vpop.f32.mrb[5].mxu0  ;;  %v6757_v59 = vcombine.high %v6733_v45, %v6733_v45  ;;  %v1033_v62 = vrot.slane %v6750_v53, %v6723_v37  ;;  %v6776_v3 = vrot.slane %v599_v56, %v6717_v31 }
  0xf1   : > { %v1001_v58 = vrot.slane %v6743_v50, %v6723_v37  ;;  %v1041_v4 = vrot.slane %v6760_v61, %v6723_v37  ;;  %v688_v5 = vrot.slane %v6766_v63, %v6717_v31  ;;  %v550_v6 = vcombine.high %v548_v0, %v548_v0 }
  0xf2   : > { %1264 = vrot.lane.b32.xlu1 %v1029_v49, %s6592_s25  ;;  %v1037_v2 = vrot.slane %v6757_v59, %v6723_v37  ;;  %v1045_v7 = vrot.slane %v6776_v3, %v6723_v37  ;;  %v6788_v8 = vcombine.high %v6770_v1, %v6770_v1  ;;  %v513_v9 = vadd.f32 %v6353_v47, %v6714_v30 }
  0xf3   : > { %v6356_v55 = vpop.f32.mrb[6].mxu0  ;;  %v6792_v12 = vrot.slane %v548_v0, %v6717_v31  ;;  %v508_v13 = vadd.f32 %v6714_v30, %v507_v51  ;;  %v997_v14 = vrot.slane %v6770_v1, %v6723_v37  ;;  %v696_v17 = vcombine.high %v688_v5, %v688_v5 }
  0xf4   : > { %1246 = vrot.lane.b32.xlu0 %v993_v52, %s6592_s25  ;;  %v517_v60 = vpop.f32.mrb[7].mxu0  ;;  %v779_v15 = vcombine.high %v513_v9, %v513_v9  ;;  %v6799_v16 = vrot.slane %v513_v9, %v6717_v31  ;;  %v1005_v20 = vrot.slane %v6788_v8, %v6723_v37  ;;  %v6806_v22 = vrot.slane %v550_v6, %v6717_v31 }
  0xf5   : > { %v730_v18 = vcombine.high %v508_v13, %v508_v13  ;;  %v737_v19 = vrot.slane %v508_v13, %v6717_v31  ;;  %v1009_v26 = vrot.slane %v6792_v12, %v6723_v37  ;;  %v6820_v33 = vcombine.high %v6760_v61, %v6760_v61 }
  0xf6   : > { %1250 = vrot.lane.b32.xlu1 %v1001_v58, %s6592_s25  ;;  %v793_v23 = vrot.slane %v779_v15, %v6717_v31  ;;  %v794_v25 = vcombine.high %v6799_v16, %v6799_v16  ;;  %v6838_v41 = vrot.slane %v688_v5, %v6717_v31  ;;  %v1013_v46 = vrot.slane %v6806_v22, %v6723_v37 }
  0xf7   : > { %v744_v27 = vrot.slane %v730_v18, %v6717_v31  ;;  %v745_v28 = vcombine.high %v737_v19, %v737_v19  ;;  %v6815_v32 = vrot.slane %v737_v19, %v6717_v31  ;;  %v6845_v47 = vcombine.high %v6776_v3, %v6776_v3 }
  0xf8   : > { %1266 = vrot.lane.b32.xlu0 %v1033_v62, %s6592_s25  ;;  %v795_v34 = vcombine.high %v793_v23, %v793_v23  ;;  %v6823_v35 = vrot.slane %v793_v23, %v6717_v31  ;;  %v6826_v36 = vrot.slane %v794_v25, %v6717_v31  ;;  %v6848_v48 = vrot.slane %v696_v17, %v6717_v31 }
  0xf9   : > { %v6832_v39 = vrot.slane %v744_v27, %v6717_v31  ;;  %v6835_v40 = vrot.slane %v745_v28, %v6717_v31  ;;  %v746_v43 = vcombine.high %v744_v27, %v744_v27  ;;  %v1049_v49 = vrot.slane %v6820_v33, %v6723_v37 }
  0xfa   : > { %1268 = vrot.lane.b32.xlu1 %v1037_v2, %s6592_s25  ;;  %v6854_v51 = vrot.slane %v795_v34, %v6717_v31  ;;  %v639_v52 = vrot.slane %v6829_v38, %v6717_v31  ;;  %v523_v54 = vadd.f32 %v6356_v55, %v6714_v30  ;;  %v1053_v56 = vrot.slane %v6845_v47, %v6723_v37 }
  0xfb   : > { %v1089_v57 = vrot.slane %v6838_v41, %v6723_v37  ;;  %v518_v58 = vadd.f32 %v6714_v30, %v517_v60  ;;  %v681_v62 = vcombine.high %v6766_v63, %v6766_v63  ;;  %v1093_v55 = vrot.slane %v6848_v48, %v6723_v37 }
  0xfc   : > { %1270 = vrot.lane.b32.xlu0 %v1041_v4, %s6592_s25  ;;  %v877_v0 = vcombine.high %v523_v54, %v523_v54  ;;  %v884_v2 = vrot.slane %v523_v54, %v6717_v31  ;;  %v6869_v4 = vrot.slane %v746_v43, %v6717_v31  ;;  %v6876_v5 = vcombine.high %v6792_v12, %v6792_v12 }
  0xfd   : > { %v828_v6 = vcombine.high %v518_v58, %v518_v58  ;;  %v835_v30 = vrot.slane %v518_v58, %v6717_v31  ;;  %v647_v60 = vcombine.high %v639_v52, %v639_v52  ;;  %v6886_v13 = vcombine.high %v6806_v22, %v6806_v22 }
  0xfe   : > { %1272 = vrot.lane.b32.xlu1 %v1045_v7, %s6592_s25  ;;  %v891_v63 = vrot.slane %v877_v0, %v6717_v31  ;;  %v892_v7 = vcombine.high %v884_v2, %v884_v2  ;;  %v6881_v9 = vrot.slane %v884_v2, %v6717_v31  ;;  %v6899_v23 = vrot.slane %v639_v52, %v6717_v31 }
  0xff   : > { %v843_v15 = vcombine.high %v835_v30, %v835_v30  ;;  %v6890_v17 = vrot.slane %v835_v30, %v6717_v31  ;;  %v1017_v25 = vrot.slane %v6876_v5, %v6723_v37  ;;  %v695_v34 = vrot.slane %v681_v62, %v6717_v31 }
 0x100   : > { %1248 = vrot.lane.b32.xlu0 %v997_v14, %s6592_s25  ;;  %11710 = vst [vmem:[#allocation6_spill] sm:$0xff] %v6881_v9  ;;  %v842_v14 = vrot.slane %v828_v6, %v6717_v31  ;;  %v893_v18 = vcombine.high %v891_v63, %v891_v63  ;;  %v6893_v19 = vrot.slane %v891_v63, %v6717_v31 }
 0x101   : > { %11711 = vst [vmem:[#allocation7_spill] sm:$0xff] %v6890_v17  ;;  %v6908_v27 = vrot.slane %v843_v15, %v6717_v31  ;;  %v1021_v43 = vrot.slane %v6886_v13, %v6723_v37  ;;  %v1057_v52 = vrot.slane %v6899_v23, %v6723_v37  ;;  %v6925_v54 = vcombine.high %v6838_v41, %v6838_v41 }
 0x102   : > { %1252 = vrot.lane.b32.xlu1 %v1005_v20, %s6592_s25  ;;  %11712 = vst [vmem:[#allocation8_spill] sm:$0xff] %v6893_v19  ;;  %v6896_v20 = vrot.slane %v892_v7, %v6717_v31  ;;  %v844_v28 = vcombine.high %v842_v14, %v842_v14  ;;  %v632_v58 = vcombine.high %v6829_v38, %v6829_v38 }
 0x103   : > { %11714 = vst [vmem:[#allocation10_spill] sm:$0xff] %v6908_v27  ;;  %v6937_v0 = vcombine.high %v6848_v48, %v6848_v48  ;;  %v6940_v2 = vrot.slane %v695_v34, %v6717_v31  ;;  %v6957_v63 = vcombine.high %v6899_v23, %v6899_v23  ;;  %v7089_v21 = vcombine.high %v6832_v39, %v6832_v39 }
 0x104   : > { %1254 = vrot.lane.b32.xlu0 %v1009_v26, %s6592_s25  ;;  %11713 = vst [vmem:[#allocation9_spill] sm:$0xff] %v6896_v20  ;;  %v6905_v26 = vrot.slane %v842_v14, %v6717_v31  ;;  %v646_v6 = vrot.slane %v632_v58, %v6717_v31  ;;  %v1221_v24 = vrot.slane %v6896_v20, %v6723_v37 }
 0x105   : > { %v1101_v38 = vrot.slane %v6937_v0, %v6723_v37  ;;  %11717 = vst [vmem:[#allocation13_spill] sm:$0xff] %v7089_v21  ;;  %v1185_v10 = vrot.slane %v6890_v17, %v6723_v37 }
 0x106   : > { %1256 = vrot.lane.b32.xlu1 %v1013_v46, %s6592_s25  ;;  %v6912_v46 = vrot.slane %v647_v60, %v6717_v31  ;;  %v1105_v60 = vrot.slane %v6940_v2, %v6723_v37  ;;  %v648_v7 = vcombine.high %v646_v6, %v646_v6 }
 0x108   : > { %1274 = vrot.lane.b32.xlu0 %v1049_v49, %s6592_s25  ;;  %v6918_v49 = vrot.slane %v893_v18, %v6717_v31  ;;  %v1061_v62 = vrot.slane %v6912_v46, %v6723_v37  ;;  %v6964_v15 = vcombine.high %v6912_v46, %v6912_v46  ;;  %v6967_v18 = vrot.slane %v646_v6, %v6717_v31 }
 0x109   : > { %v1157_v6 = vrot.slane %v6826_v36, %v6723_v37 }
 0x10a   : > { %1276 = vrot.lane.b32.xlu1 %v1053_v56, %s6592_s25  ;;  %11715 = vst [vmem:[#allocation11_spill] sm:$0xff] %v6918_v49  ;;  %v6928_v56 = vrot.slane %v844_v28, %v6717_v31  ;;  %v1069_v28 = vrot.slane %v6964_v15, %v6723_v37 }
 0x10c   : > { %1294 = vrot.lane.b32.xlu0 %v1089_v57, %s6592_s25  ;;  %11716 = vst [vmem:[#allocation12_spill] sm:$0xff] %v6928_v56  ;;  %v697_v57 = vcombine.high %v695_v34, %v695_v34  ;;  %v6976_v34 = vrot.slane %v648_v7, %v6717_v31 }
 0x10e   : > { %1296 = vrot.lane.b32.xlu1 %v1093_v55, %s6592_s25  ;;  %v1097_v55 = vrot.slane %v6925_v54, %v6723_v37  ;;  %v6950_v30 = vrot.slane %v697_v57, %v6717_v31  ;;  %v6987_v57 = vrot.slane %v6799_v16, %v6717_v31  ;;  %v1077_v58 = vrot.slane %v6976_v34, %v6723_v37 }
 0x110   : > { %1258 = vrot.lane.b32.xlu0 %v1017_v25, %s6592_s25  ;;  %v1109_v14 = vrot.slane %v6950_v30, %v6723_v37  ;;  %v1065_v25 = vrot.slane %v6957_v63, %v6723_v37  ;;  %v1153_v16 = vrot.slane %v6987_v57, %v6723_v37 }
 0x112   : > { %1260 = vrot.lane.b32.xlu1 %v1021_v43, %s6592_s25  ;;  %v1073_v43 = vrot.slane %v6967_v18, %v6723_v37 }
 0x114   : > { %1278 = vrot.lane.b32.xlu0 %v1057_v52, %s6592_s25  ;;  %v6983_v52 = vcombine.high %v6940_v2, %v6940_v2 }
 0x116   : > { %1280 = vrot.lane.b32.xlu1 %v1061_v62, %s6592_s25  ;;  %v6994_v62 = vcombine.high %v6950_v30, %v6950_v30 }
 0x118   : > { %1298 = vrot.lane.b32.xlu0 %v1097_v55, %s6592_s25  ;;  %v1113_v55 = vrot.slane %v6983_v52, %v6723_v37  ;;  %v1117_v31 = vrot.slane %v6994_v62, %v6723_v37 }
 0x11a   : > { %1300 = vrot.lane.b32.xlu1 %v1101_v38, %s6592_s25  ;;  %v7009_v38 = vcombine.high %v6967_v18, %v6967_v18 }
 0x11c   : > { %1302 = vrot.lane.b32.xlu0 %v1105_v60, %s6592_s25  ;;  %v7014_v60 = vcombine.high %v6976_v34, %v6976_v34  ;;  %v1081_v7 = vrot.slane %v7009_v38, %v6723_v37 }
 0x11e   : > { %1304 = vrot.lane.b32.xlu1 %v1109_v14, %s6592_s25  ;;  %v1085_v14 = vrot.slane %v7014_v60, %v6723_v37 }
 0x120   : > { %1282 = vrot.lane.b32.xlu0 %v1065_v25, %s6592_s25  ;;  %v1121_v25 = vrot.slane %v6815_v32, %v6723_v37 }
 0x122   : > { %1284 = vrot.lane.b32.xlu1 %v1069_v28, %s6592_s25  ;;  %v7027_v28 = vcombine.high %v6987_v57, %v6987_v57 }
 0x124   : > { %1286 = vrot.lane.b32.xlu0 %v1073_v43, %s6592_s25  ;;  %v1125_v43 = vrot.slane %v6835_v40, %v6723_v37 }
 0x126   : > { %1288 = vrot.lane.b32.xlu1 %v1077_v58, %s6592_s25  ;;  %v7034_v58 = vcombine.high %v6826_v36, %v6826_v36 }
 0x128   : > { %1306 = vrot.lane.b32.xlu0 %v1113_v55, %s6592_s25  ;;  %v1161_v55 = vrot.slane %v7027_v28, %v6723_v37 }
 0x12a   : > { %1308 = vrot.lane.b32.xlu1 %v1117_v31, %s6592_s25  ;;  %v1165_v31 = vrot.slane %v7034_v58, %v6723_v37 }
 0x12c   : > { %1326 = vrot.lane.b32.xlu0 %v1153_v16, %s6592_s25  ;;  %v1169_v16 = vrot.slane %v6823_v35, %v6723_v37 }
 0x12e   : > { %1328 = vrot.lane.b32.xlu1 %v1157_v6, %s6592_s25  ;;  %v7047_v6 = vcombine.high %v6815_v32, %v6815_v32 }
 0x130   : > { %1290 = vrot.lane.b32.xlu0 %v1081_v7, %s6592_s25  ;;  %v1173_v7 = vrot.slane %v6854_v51, %v6723_v37 }
 0x132   : > { %1292 = vrot.lane.b32.xlu1 %v1085_v14, %s6592_s25  ;;  %v7054_v14 = vcombine.high %v6835_v40, %v6835_v40 }
 0x134   : > { %1310 = vrot.lane.b32.xlu0 %v1121_v25, %s6592_s25  ;;  %v1129_v25 = vrot.slane %v7047_v6, %v6723_v37 }
 0x136   : > { %1312 = vrot.lane.b32.xlu1 %v1125_v43, %s6592_s25  ;;  %v1133_v43 = vrot.slane %v7054_v14, %v6723_v37 }
 0x138   : > { %1330 = vrot.lane.b32.xlu0 %v1161_v55, %s6592_s25  ;;  %v1137_v55 = vrot.slane %v6832_v39, %v6723_v37 }
 0x13a   : > { %1332 = vrot.lane.b32.xlu1 %v1165_v31, %s6592_s25  ;;  %v7067_v31 = vcombine.high %v6823_v35, %v6823_v35 }
 0x13c   : > { %1334 = vrot.lane.b32.xlu0 %v1169_v16, %s6592_s25  ;;  %v1141_v16 = vrot.slane %v6869_v4, %v6723_v37 }
 0x13e   : > { %1336 = vrot.lane.b32.xlu1 %v1173_v7, %s6592_s25  ;;  %v7074_v7 = vcombine.high %v6854_v51, %v6854_v51 }
 0x140   : > { %1314 = vrot.lane.b32.xlu0 %v1129_v25, %s6592_s25  ;;  %v1177_v25 = vrot.slane %v7067_v31, %v6723_v37 }
 0x142   : > { %1316 = vrot.lane.b32.xlu1 %v1133_v43, %s6592_s25  ;;  %v1181_v43 = vrot.slane %v7074_v7, %v6723_v37 }
 0x144   : > { %1318 = vrot.lane.b32.xlu0 %v1137_v55, %s6592_s25  ;;  %v1217_v55 = vrot.slane %v6881_v9, %v6723_v37 }
 0x146   : > { %1320 = vrot.lane.b32.xlu1 %v1141_v16, %s6592_s25  ;;  %v7094_v16 = vcombine.high %v6869_v4, %v6869_v4 }
 0x148   : > { %1338 = vrot.lane.b32.xlu0 %v1177_v25, %s6592_s25  ;;  %11718 = vst [vmem:[#allocation14_spill] sm:$0xff] %v7094_v16  ;;  %v1145_v25 = vrot.slane %v7089_v21, %v6723_v37 }
 0x14a   : > { %1340 = vrot.lane.b32.xlu1 %v1181_v43, %s6592_s25  ;;  %v1149_v43 = vrot.slane %v7094_v16, %v6723_v37  ;;  %v7127_v16 = vcombine.high %v6890_v17, %v6890_v17  ;;  %v1201_v17 = vrot.slane %v6905_v26, %v6723_v37 }
 0x14c   : > { %1358 = vrot.lane.b32.xlu0 %v1217_v55, %s6592_s25  ;;  %v7107_v55 = vcombine.high %v6881_v9, %v6881_v9  ;;  %11721 = vst [vmem:[#allocation17_spill] sm:$0xff] %v7127_v16 }
 0x14e   : > { %1360 = vrot.lane.b32.xlu1 %v1221_v24, %s6592_s25  ;;  %11719 = vst [vmem:[#allocation15_spill] sm:$0xff] %v7107_v55  ;;  %v1189_v24 = vrot.slane %v6908_v27, %v6723_v37 }
 0x150   : > { %1322 = vrot.lane.b32.xlu0 %v1145_v25, %s6592_s25  ;;  %v7114_v25 = vcombine.high %v6896_v20, %v6896_v20 }
 0x152   : > { %1324 = vrot.lane.b32.xlu1 %v1149_v43, %s6592_s25  ;;  %11720 = vst [vmem:[#allocation16_spill] sm:$0xff] %v7114_v25  ;;  %v1225_v43 = vrot.slane %v7107_v55, %v6723_v37  ;;  %v1229_v11 = vrot.slane %v7114_v25, %v6723_v37  ;;  %v1237_v55 = vrot.slane %v6918_v49, %v6723_v37 }
 0x153   : > { %v1193_v25 = vrot.slane %v7127_v16, %v6723_v37 }
 0x154   : > { %1342 = vrot.lane.b32.xlu0 %v1185_v10, %s6592_s25  ;;  %v1233_v10 = vrot.slane %v6893_v19, %v6723_v37 }
 0x156   : > { %1344 = vrot.lane.b32.xlu1 %v1189_v24, %s6592_s25  ;;  %v7130_v24 = vpop.permute.xlu0 %6531 }
 0x157   : > { %11722 = vst [vmem:[#allocation18_spill] sm:$0xff] %v7130_v24 }
 0x158   : > { %1362 = vrot.lane.b32.xlu0 %v1225_v43, %s6592_s25  ;;  %v7136_v43 = vcombine.high %v6908_v27, %v6908_v27  ;;  %v7151_v27 = vcombine.high %v6893_v19, %v6893_v19 }
 0x15a   : > { %1364 = vrot.lane.b32.xlu1 %v1229_v11, %s6592_s25  ;;  %11723 = vst [vmem:[#allocation19_spill] sm:$0xff] %v7136_v43  ;;  %v7139_v11 = vpop.permute.xlu1 %6536  ;;  %11725 = vst [vmem:[#allocation21_spill] sm:$0xff] %v7151_v27 }
 0x15b   : > { %11724 = vst [vmem:[#allocation20_spill] sm:$0xff] %v7139_v11 }
 0x15c   : > { %1366 = vrot.lane.b32.xlu0 %v1233_v10, %s6592_s25  ;;  %v1197_v10 = vrot.slane %v7136_v43, %v6723_v37  ;;  %v7158_v43 = vcombine.high %v6918_v49, %v6918_v49 }
 0x15e   : > { %1368 = vrot.lane.b32.xlu1 %v1237_v55, %s6592_s25  ;;  %v6593_v55 = vmov 1983009808   ;;  %11726 = vst [vmem:[#allocation22_spill] sm:$0xff] %v7158_v43 }
 0x15f   : > { %v1730_v11 = vunpack.c.l.s4 %v6593_v55  ;;  %v1241_v55 = vrot.slane %v7151_v27, %v6723_v37 }
 0x160   : > { %1346 = vrot.lane.b32.xlu0 %v1193_v25, %s6592_s25  ;;  %v1205_v25 = vrot.slane %v6928_v56, %v6723_v37 }
 0x161   : > { %v1731_v9 = vunpack.c.0.s8 %v1730_v11 }
 0x162   : > { %v1263_v24 = vpop.permute.xlu0 %1262  ;;  %1348 = vrot.lane.b32.xlu1 %v1197_v10, %s6592_s25 }
 0x163   : > { %v1447_v10 = vsel %vm1438_vm1, %v6727_v42, %v1263_v24  ;;  %v1245_v42 = vrot.slane %v7158_v43, %v6723_v37 }
 0x164   : > { %v1265_v21 = vpop.permute.xlu1 %1264  ;;  %1350 = vrot.lane.b32.xlu0 %v1201_v17, %s6592_s25  ;;  %v7169_v17 = vcombine.high %v6905_v26, %v6905_v26 }
 0x165   : > { %v1448_v16 = vsel %vm1438_vm1, %v6733_v45, %v1265_v21  ;;  %v7176_v21 = vcombine.high %v6928_v56, %v6928_v56 }
 0x166   : > { %v1247_v19 = vpop.permute.xlu0 %1246  ;;  %1352 = vrot.lane.b32.xlu1 %v1205_v25, %s6592_s25  ;;  %11727 = vst [vmem:[#allocation23_spill] sm:$0xff] %v7169_v17  ;;  %v1795_v20 = vcombine.low %v1447_v10, %v1448_v16  ;;  %v1209_v24 = vrot.slane %v7169_v17, %v6723_v37  ;;  %v7182_v25 = vsub.s32 %v1731_v9, %v6709_v29 }
 0x168   : > { %v1251_v49 = vpop.permute.xlu1 %1250  ;;  %1370 = vrot.lane.b32.xlu0 %v1241_v55, %s6592_s25  ;;  %v1213_v55 = vrot.slane %v7176_v21, %v6723_v37  ;;  %v7194_v29 = vrot.slane %v1795_v20, %v7182_v25 }
 0x16a   : > { %v1267_v45 = vpop.permute.xlu0 %1266  ;;  %1372 = vrot.lane.b32.xlu1 %v1245_v42, %s6592_s25 }
 0x16b   : > { %v1449_v43 = vsel %vm1438_vm1, %v6750_v53, %v1267_v45 }
 0x16c   : > { %v1269_v11 = vpop.permute.xlu1 %1268  ;;  %1354 = vrot.lane.b32.xlu0 %v1209_v24, %s6592_s25 }
 0x16d   : > { %v1450_v27 = vsel %vm1438_vm1, %v6757_v59, %v1269_v11  ;;  %v1439_v59 = vsel %vm1438_vm1, %v6730_v44, %v1247_v19 }
 0x16e   : > { %v1271_v56 = vpop.permute.xlu0 %1270  ;;  %1356 = vrot.lane.b32.xlu1 %v1213_v55, %s6592_s25  ;;  %v1796_v42 = vcombine.low %v1449_v43, %v1450_v27 }
 0x170   : > { %v1273_v17 = vpop.permute.xlu1 %1272  ;;  %1583 = vrot.lane.b32.xlu0 %v1447_v10, %s6594_s26  ;;  %v7197_v9 = vrot.slane %v1796_v42, %v7182_v25  ;;  %v1441_v10 = vsel %vm1438_vm1, %v6743_v50, %v1251_v49 }
 0x172   : > { %v1249_v37 = vpop.permute.xlu0 %1248  ;;  %1585 = vrot.lane.b32.xlu1 %v1448_v16, %s6594_s26  ;;  %v1811_v53 = vcombine.low %v7194_v29, %v7197_v9 }
 0x173   : > { %v1440_v45 = vsel %vm1438_vm1, %v6770_v1, %v1249_v37  ;;  %v7234_v37 = vsel %vm1438_vm1, %v6760_v61, %v1271_v56 }
 0x174   : > { %v1253_v24 = vpop.permute.xlu1 %1252  ;;  %1567 = vrot.lane.b32.xlu0 %v1439_v59, %s6594_s26  ;;  %v1727_v20 = vcombine.low %v1439_v59, %v1440_v45 }
 0x175   : > { %v1442_v11 = vsel %vm1438_vm1, %v6788_v8, %v1253_v24 }
 0x176   : > { %v1255_v16 = vpop.permute.xlu0 %1254  ;;  %1569 = vrot.lane.b32.xlu1 %v1440_v45, %s6594_s26  ;;  %v1728_v55 = vcombine.low %v1441_v10, %v1442_v11  ;;  %v7213_v42 = vrot.slane %v1727_v20, %v7182_v25 }
 0x177   : > { %v7221_v19 = vsel %vm1438_vm1, %v6792_v12, %v1255_v16 }
 0x178   : > { %1587 = vrot.lane.b32.xlu0 %v1449_v43, %s6594_s26  ;;  %v1257_v44 = vpop.permute.xlu1 %1256  ;;  %v7217_v1 = vrot.slane %v1728_v55, %v7182_v25 }
 0x179   : > { %v7225_v50 = vsel %vm1438_vm1, %v6806_v22, %v1257_v44  ;;  %v7240_v22 = vsel %vm1438_vm1, %v6776_v3, %v1273_v17 }
 0x17a   : > { %v1275_v8 = vpop.permute.xlu0 %1274  ;;  %1589 = vrot.lane.b32.xlu1 %v1450_v27, %s6594_s26  ;;  %v1743_v49 = vcombine.low %v7213_v42, %v7217_v1  ;;  %v1744_v43 = vcombine.low %v7221_v19, %v7225_v50  ;;  %v11728_v42 = vld [vmem:[#allocation6_spill] sm:$0xff] }
 0x17b   : > { %v7256_v20 = vsel %vm1438_vm1, %v6820_v33, %v1275_v8 }
 0x17c   : > { %1591 = vrot.lane.b32.xlu0 %v7234_v37, %s6594_s26  ;;  %v1277_v12 = vpop.permute.xlu1 %1276 }
 0x17e   : > { %v1295_v59 = vpop.permute.xlu0 %1294  ;;  %1593 = vrot.lane.b32.xlu1 %v7240_v22, %s6594_s26 }
 0x17f   : > { %v1463_v45 = vsel %vm1438_vm1, %v6838_v41, %v1295_v59 }
 0x180   : > { %1571 = vrot.lane.b32.xlu0 %v1441_v10, %s6594_s26  ;;  %v1297_v27 = vpop.permute.xlu1 %1296 }
 0x181   : > { %v1464_v61 = vsel %vm1438_vm1, %v6848_v48, %v1297_v27  ;;  %v7262_v48 = vsel %vm1438_vm1, %v6845_v47, %v1277_v12 }
 0x182   : > { %v1259_v56 = vpop.permute.xlu0 %1258  ;;  %1573 = vrot.lane.b32.xlu1 %v1442_v11, %s6594_s26  ;;  %v1931_v24 = vcombine.low %v1463_v45, %v1464_v61 }
 0x184   : > { %1575 = vrot.lane.b32.xlu0 %v7221_v19, %s6594_s26  ;;  %v1261_v3 = vpop.permute.xlu1 %1260  ;;  %v7281_v12 = vrot.slane %v1931_v24, %v7182_v25 }
 0x186   : > { %v1279_v17 = vpop.permute.xlu0 %1278  ;;  %1577 = vrot.lane.b32.xlu1 %v7225_v50, %s6594_s26 }
 0x187   : > { %v1455_v10 = vsel %vm1438_vm1, %v6899_v23, %v1279_v17 }
 0x188   : > { %1595 = vrot.lane.b32.xlu0 %v7256_v20, %s6594_s26  ;;  %v1281_v41 = vpop.permute.xlu1 %1280 }
 0x189   : > { %v1456_v11 = vsel %vm1438_vm1, %v6912_v46, %v1281_v41  ;;  %v7278_v46 = vsel %vm1438_vm1, %v6876_v5, %v1259_v56 }
 0x18a   : > { %v1299_v16 = vpop.permute.xlu0 %1298  ;;  %1597 = vrot.lane.b32.xlu1 %v7262_v48, %s6594_s26  ;;  %v1863_v33 = vcombine.low %v1455_v10, %v1456_v11 }
 0x18b   : > { %v1465_v44 = vsel %vm1438_vm1, %v6925_v54, %v1299_v16 }
 0x18c   : > { %1615 = vrot.lane.b32.xlu0 %v1463_v45, %s6594_s26  ;;  %v1301_v55 = vpop.permute.xlu1 %1300  ;;  %v7313_v17 = vrot.slane %v1863_v33, %v7182_v25 }
 0x18d   : > { %v1466_v47 = vsel %vm1438_vm1, %v6937_v0, %v1301_v55  ;;  %v7290_v0 = vsel %vm1438_vm1, %v6886_v13, %v1261_v3 }
 0x18e   : > { %v1303_v8 = vpop.permute.xlu0 %1302  ;;  %1617 = vrot.lane.b32.xlu1 %v1464_v61, %s6594_s26  ;;  %v1932_v23 = vcombine.low %v1465_v44, %v1466_v47 }
 0x18f   : > { %v7294_v27 = vsel %vm1438_vm1, %v6940_v2, %v1303_v8 }
 0x190   : > { %1579 = vrot.lane.b32.xlu0 %v7278_v46, %s6594_s26  ;;  %v1305_v59 = vpop.permute.xlu1 %1304  ;;  %v7286_v54 = vrot.slane %v1932_v23, %v7182_v25 }
 0x191   : > { %v7298_v5 = vsel %vm1438_vm1, %v6950_v30, %v1305_v59 }
 0x192   : > { %v1283_v45 = vpop.permute.xlu0 %1282  ;;  %1581 = vrot.lane.b32.xlu1 %v7290_v0, %s6594_s26  ;;  %v1947_v61 = vcombine.low %v7281_v12, %v7286_v54  ;;  %v1948_v56 = vcombine.low %v7294_v27, %v7298_v5 }
 0x193   : > { %v1457_v2 = vsel %vm1438_vm1, %v6957_v63, %v1283_v45 }
 0x194   : > { %1599 = vrot.lane.b32.xlu0 %v1455_v10, %s6594_s26  ;;  %v1285_v13 = vpop.permute.xlu1 %1284 }
 0x195   : > { %v1458_v30 = vsel %vm1438_vm1, %v6964_v15, %v1285_v13 }
 0x196   : > { %v1287_v24 = vpop.permute.xlu0 %1286  ;;  %1601 = vrot.lane.b32.xlu1 %v1456_v11, %s6594_s26  ;;  %v1864_v3 = vcombine.low %v1457_v2, %v1458_v30 }
 0x197   : > { %v1459_v10 = vsel %vm1438_vm1, %v6967_v18, %v1287_v24 }
 0x198   : > { %1619 = vrot.lane.b32.xlu0 %v1465_v44, %s6594_s26  ;;  %v1289_v41 = vpop.permute.xlu1 %1288  ;;  %v7317_v16 = vrot.slane %v1864_v3, %v7182_v25 }
 0x199   : > { %v1460_v63 = vsel %vm1438_vm1, %v6976_v34, %v1289_v41 }
 0x19a   : > { %v1307_v15 = vpop.permute.xlu0 %1306  ;;  %1621 = vrot.lane.b32.xlu1 %v1466_v47, %s6594_s26  ;;  %v1879_v11 = vcombine.low %v7313_v17, %v7317_v16  ;;  %v1880_v33 = vcombine.low %v1459_v10, %v1460_v63  ;;  %v11742_v16 = vld [vmem:[#allocation22_spill] sm:$0xff] }
 0x19c   : > { %1623 = vrot.lane.b32.xlu0 %v7294_v27, %s6594_s26  ;;  %v1309_v55 = vpop.permute.xlu1 %1308 }
 0x19e   : > { %v1327_v44 = vpop.permute.xlu0 %1326  ;;  %1625 = vrot.lane.b32.xlu1 %v7298_v5, %s6594_s26 }
 0x19f   : > { %v1479_v34 = vsel %vm1438_vm1, %v6987_v57, %v1327_v44 }
 0x1a0   : > { %1603 = vrot.lane.b32.xlu0 %v1457_v2, %s6594_s26  ;;  %v1329_v18 = vpop.permute.xlu1 %1328 }
 0x1a1   : > { %v1480_v47 = vsel %vm1438_vm1, %v6826_v36, %v1329_v18  ;;  %v7344_v36 = vsel %vm1438_vm1, %v6983_v52, %v1307_v15  ;;  %v7364_v52 = vsel %vm1438_vm1, %v6994_v62, %v1309_v55 }
 0x1a2   : > { %v1291_v8 = vpop.permute.xlu0 %1290  ;;  %1605 = vrot.lane.b32.xlu1 %v1458_v30, %s6594_s26  ;;  %v2067_v23 = vcombine.low %v1479_v34, %v1480_v47  ;;  %v7350_v30 = vrot.slane %v1880_v33, %v7182_v25 }
 0x1a3   : > { %v1461_v45 = vsel %vm1438_vm1, %v7009_v38, %v1291_v8  ;;  %v1813_v8 = vcombine.low %v7256_v20, %v7262_v48 }
 0x1a4   : > { %1607 = vrot.lane.b32.xlu0 %v1459_v10, %s6594_s26  ;;  %v1293_v59 = vpop.permute.xlu1 %1292  ;;  %v7382_v44 = vrot.slane %v2067_v23, %v7182_v25 }
 0x1a5   : > { %v1462_v13 = vsel %vm1438_vm1, %v7014_v60, %v1293_v59  ;;  %v1812_v59 = vcombine.low %v7234_v37, %v7240_v22 }
 0x1a6   : > { %v1881_v2 = vcombine.low %v1461_v45, %v1462_v13  ;;  %v1311_v24 = vpop.permute.xlu0 %1310  ;;  %1609 = vrot.lane.b32.xlu1 %v1460_v63, %s6594_s26 }
 0x1a7   : > { %v7356_v60 = vsel %vm1438_vm1, %v6815_v32, %v1311_v24  ;;  %v1820_v48 = vrot.slane %v1812_v59, %v7182_v25  ;;  %v11732_v59 = vld [vmem:[#allocation7_spill] sm:$0xff] }
 0x1a8   : > { %v7347_v57 = vrot.slane %v1881_v2, %v7182_v25  ;;  %1627 = vrot.lane.b32.xlu0 %v7344_v36, %s6594_s26  ;;  %v1313_v38 = vpop.permute.xlu1 %1312  ;;  %v1827_v2 = vrot.slane %v1813_v8, %v7182_v25 }
 0x1a9   : > { %v7360_v3 = vsel %vm1438_vm1, %v6835_v40, %v1313_v38 }
 0x1aa   : > { %v1896_v41 = vcombine.low %v7350_v30, %v7347_v57  ;;  %v1999_v10 = vcombine.low %v7356_v60, %v7360_v3  ;;  %v1331_v63 = vpop.permute.xlu0 %1330  ;;  %1629 = vrot.lane.b32.xlu1 %v7364_v52, %s6594_s26  ;;  %v1828_v22 = vcombine.low %v1820_v48, %v1827_v2 }
 0x1ab   : > { %v1481_v40 = vsel %vm1438_vm1, %v7027_v28, %v1331_v63  ;;  %v1745_v63 = vcombine.low %v7278_v46, %v7290_v0 }
 0x1ac   : > { %1647 = vrot.lane.b32.xlu0 %v1479_v34, %s6594_s26  ;;  %v1333_v32 = vpop.permute.xlu1 %1332 }
 0x1ad   : > { %v1482_v62 = vsel %vm1438_vm1, %v7034_v58, %v1333_v32 }
 0x1ae   : > { %v2068_v15 = vcombine.low %v1481_v40, %v1482_v62  ;;  %v1335_v33 = vpop.permute.xlu0 %1334  ;;  %1649 = vrot.lane.b32.xlu1 %v1480_v47, %s6594_s26 }
 0x1b0   : > { %v7379_v55 = vrot.slane %v2068_v15, %v7182_v25  ;;  %1611 = vrot.lane.b32.xlu0 %v1461_v45, %s6594_s26  ;;  %v1337_v18 = vpop.permute.xlu1 %1336 }
 0x1b1   : > { %v7407_v20 = vsel %vm1438_vm1, %v6854_v51, %v1337_v18 }
 0x1b2   : > { %v2083_v34 = vcombine.low %v7382_v44, %v7379_v55  ;;  %v1315_v28 = vpop.permute.xlu0 %1314  ;;  %1613 = vrot.lane.b32.xlu1 %v1462_v13, %s6594_s26  ;;  %v7400_v13 = vsel %vm1438_vm1, %v6823_v35, %v1335_v33 }
 0x1b3   : > { %v7419_v51 = vsel %vm1438_vm1, %v7047_v6, %v1315_v28  ;;  %v1759_v6 = vrot.slane %v1745_v63, %v7182_v25  ;;  %v2084_v57 = vcombine.low %v7400_v13, %v7407_v20 }
 0x1b4   : > { %1631 = vrot.lane.b32.xlu0 %v7356_v60, %s6594_s26  ;;  %v1317_v58 = vpop.permute.xlu1 %1316 }
 0x1b6   : > { %v1319_v47 = vpop.permute.xlu0 %1318  ;;  %1633 = vrot.lane.b32.xlu1 %v7360_v3, %s6594_s26 }
 0x1b7   : > { %v7433_v9 = vsel %vm1438_vm1, %v6832_v39, %v1319_v47  ;;  %v11731_v47 = vld [vmem:[#allocation14_spill] sm:$0xff] }
 0x1b8   : > { %1651 = vrot.lane.b32.xlu0 %v1481_v40, %s6594_s26  ;;  %v1321_v23 = vpop.permute.xlu1 %1320  ;;  %v7427_v40 = vsel %vm1438_vm1, %v7054_v14, %v1317_v58  ;;  %v1752_v14 = vrot.slane %v1744_v43, %v7182_v25 }
 0x1b9   : > { %v7440_v46 = vsel %vm1438_vm1, %v6869_v4, %v1321_v23  ;;  %v2000_v17 = vcombine.low %v7419_v51, %v7427_v40 }
 0x1ba   : > { %v1339_v45 = vpop.permute.xlu0 %1338  ;;  %1653 = vrot.lane.b32.xlu1 %v1482_v62, %s6594_s26  ;;  %v1760_v39 = vcombine.low %v1752_v14, %v1759_v6 }
 0x1bb   : > { %v7455_v4 = vsel %vm1438_vm1, %v7067_v31, %v1339_v45 }
 0x1bc   : > { %1655 = vrot.lane.b32.xlu0 %v7400_v13, %s6594_s26  ;;  %v1341_v24 = vpop.permute.xlu1 %1340  ;;  %v2092_v13 = vrot.slane %v2084_v57, %v7182_v25 }
 0x1bd   : > { %v7461_v50 = vsel %vm1438_vm1, %v7074_v7, %v1341_v24  ;;  %v11730_v7 = vld [vmem:[#allocation13_spill] sm:$0xff]  ;;  %v11733_v24 = vld [vmem:[#allocation10_spill] sm:$0xff] }
 0x1be   : > { %v1359_v37 = vpop.permute.xlu0 %1358  ;;  %1657 = vrot.lane.b32.xlu1 %v7407_v20, %s6594_s26  ;;  %v2016_v20 = vcombine.low %v7433_v9, %v7440_v46 }
 0x1bf   : > { %v7467_v1 = vsel %vm1438_vm1, %v11728_v42, %v1359_v37 }
 0x1c0   : > { %2279 = vrot.lane.b32.xlu0 %v1811_v53, %s6595_s27  ;;  %v1361_v35 = vpop.permute.xlu1 %1360 }
 0x1c2   : > { %v1323_v38 = vpop.permute.xlu0 %1322  ;;  %2281 = vrot.lane.b32.xlu1 %v1828_v22, %s6595_s27  ;;  %v11734_v22 = vld [vmem:[#allocation15_spill] sm:$0xff] }
 0x1c3   : > { %v7479_v28 = vsel %vm1438_vm1, %v11730_v7, %v1323_v38  ;;  %v1949_v38 = vcombine.low %v7344_v36, %v7364_v52  ;;  %v11737_v52 = vld [vmem:[#allocation11_spill] sm:$0xff]  ;;  %v11738_v7 = vld [vmem:[#allocation17_spill] sm:$0xff] }
 0x1c4   : > { %1635 = vrot.lane.b32.xlu0 %v7419_v51, %s6594_s26  ;;  %v1325_v32 = vpop.permute.xlu1 %1324 }
 0x1c5   : > { %v7485_v8 = vsel %vm1438_vm1, %v11731_v47, %v1325_v32  ;;  %v11735_v32 = vld [vmem:[#allocation16_spill] sm:$0xff] }
 0x1c6   : > { %v1343_v29 = vpop.permute.xlu0 %1342  ;;  %1637 = vrot.lane.b32.xlu1 %v7427_v40, %s6594_s26  ;;  %v2014_v40 = vrot.slane %v2000_v17, %v7182_v25 }
 0x1c7   : > { %v7491_v45 = vsel %vm1438_vm1, %v11732_v59, %v1343_v29 }
 0x1c8   : > { %1639 = vrot.lane.b32.xlu0 %v7433_v9, %s6594_s26  ;;  %v1345_v53 = vpop.permute.xlu1 %1344 }
 0x1c9   : > { %v7497_v48 = vsel %vm1438_vm1, %v11733_v24, %v1345_v53  ;;  %v11736_v53 = vld [vmem:[#allocation8_spill] sm:$0xff] }
 0x1ca   : > { %v1363_v0 = vpop.permute.xlu0 %1362  ;;  %1641 = vrot.lane.b32.xlu1 %v7440_v46, %s6594_s26  ;;  %v2135_v55 = vcombine.low %v7491_v45, %v7497_v48 }
 0x1cc   : > { %2271 = vrot.lane.b32.xlu0 %v1743_v49, %s6595_s27  ;;  %v1365_v62 = vpop.permute.xlu1 %1364  ;;  %v11729_v49 = vld [vmem:[#allocation9_spill] sm:$0xff] }
 0x1cd   : > { %v7473_v33 = vsel %vm1438_vm1, %v11729_v49, %v1361_v35  ;;  %v7503_v35 = vsel %vm1438_vm1, %v11734_v22, %v1363_v0  ;;  %v7511_v29 = vsel %vm1438_vm1, %v11735_v32, %v1365_v62  ;;  %v1963_v0 = vrot.slane %v1949_v38, %v7182_v25 }
 0x1ce   : > { %v1367_v15 = vpop.permute.xlu0 %1366  ;;  %2273 = vrot.lane.b32.xlu1 %v1760_v39, %s6595_s27  ;;  %v1956_v62 = vrot.slane %v1948_v56, %v7182_v25  ;;  %v11739_v56 = vld [vmem:[#allocation19_spill] sm:$0xff]  ;;  %v2085_v22 = vcombine.low %v7455_v4, %v7461_v50 }
 0x1cf   : > { %v7519_v14 = vsel %vm1438_vm1, %v11736_v53, %v1367_v15 }
 0x1d0   : > { %1659 = vrot.lane.b32.xlu0 %v7455_v4, %s6594_s26  ;;  %v1369_v19 = vpop.permute.xlu1 %1368  ;;  %v1964_v15 = vcombine.low %v1956_v62, %v1963_v0  ;;  %v2099_v4 = vrot.slane %v2085_v22, %v7182_v25 }
 0x1d1   : > { %v7528_v39 = vsel %vm1438_vm1, %v11737_v52, %v1369_v19 }
 0x1d2   : > { %v1347_v43 = vpop.permute.xlu0 %1346  ;;  %1661 = vrot.lane.b32.xlu1 %v7461_v50, %s6594_s26  ;;  %v2017_v50 = vcombine.low %v7479_v28, %v7485_v8  ;;  %v2220_v60 = vcombine.low %v7519_v14, %v7528_v39 }
 0x1d3   : > { %v1489_v27 = vsel %vm1438_vm1, %v11738_v7, %v1347_v43 }
 0x1d4   : > { %1679 = vrot.lane.b32.xlu0 %v7467_v1, %s6594_s26  ;;  %v1349_v31 = vpop.permute.xlu1 %1348 }
 0x1d5   : > { %v1490_v47 = vsel %vm1438_vm1, %v11739_v56, %v1349_v31 }
 0x1d6   : > { %v1351_v18 = vpop.permute.xlu0 %1350  ;;  %1681 = vrot.lane.b32.xlu1 %v7473_v33, %s6594_s26  ;;  %v2136_v3 = vcombine.low %v1489_v27, %v1490_v47 }
 0x1d7   : > { %v7559_v12 = vsel %vm1438_vm1, %v6905_v26, %v1351_v18  ;;  %v11741_v18 = vld [vmem:[#allocation21_spill] sm:$0xff] }
 0x1d8   : > { %1643 = vrot.lane.b32.xlu0 %v7479_v28, %s6594_s26  ;;  %v1353_v58 = vpop.permute.xlu1 %1352  ;;  %v2007_v28 = vrot.slane %v1999_v10, %v7182_v25  ;;  %v2150_v62 = vrot.slane %v2136_v3, %v7182_v25 }
 0x1da   : > { %v1371_v23 = vpop.permute.xlu0 %1370  ;;  %1645 = vrot.lane.b32.xlu1 %v7485_v8, %s6594_s26  ;;  %v2100_v8 = vcombine.low %v2092_v13, %v2099_v4  ;;  %v2015_v46 = vcombine.low %v2007_v28, %v2014_v40 }
 0x1dc   : > { %1663 = vrot.lane.b32.xlu0 %v7491_v45, %s6594_s26  ;;  %v1373_v2 = vpop.permute.xlu1 %1372 }
 0x1de   : > { %v1355_v37 = vpop.permute.xlu0 %1354  ;;  %1665 = vrot.lane.b32.xlu1 %v7497_v48, %s6594_s26  ;;  %v2143_v48 = vrot.slane %v2135_v55, %v7182_v25 }
 0x1e0   : > { %1683 = vrot.lane.b32.xlu0 %v7503_v35, %s6594_s26  ;;  %v1357_v63 = vpop.permute.xlu1 %1356 }
 0x1e2   : > { %v7513_v6 = vpop.permute.xlu0 %1583  ;;  %1685 = vrot.lane.b32.xlu1 %v7511_v29, %s6594_s26 }
 0x1e4   : > { %1687 = vrot.lane.b32.xlu0 %v7519_v14, %s6594_s26  ;;  %v7524_v36 = vpop.permute.xlu1 %1585 }
 0x1e5   : > { %v1829_v45 = vcombine.low %v7513_v6, %v7524_v36 }
 0x1e6   : > { %v7534_v42 = vpop.permute.xlu0 %1567  ;;  %1689 = vrot.lane.b32.xlu1 %v7528_v39, %s6594_s26  ;;  %v2228_v39 = vrot.slane %v2220_v60, %v7182_v25 }
 0x1e8   : > { %2295 = vrot.lane.b32.xlu0 %v1947_v61, %s6595_s27  ;;  %v7542_v49 = vpop.permute.xlu1 %1569  ;;  %v11740_v61 = vld [vmem:[#allocation12_spill] sm:$0xff] }
 0x1e9   : > { %v7567_v43 = vsel %vm1438_vm1, %v11740_v61, %v1353_v58  ;;  %v1501_v58 = vsel %vm1438_vm1, %v11741_v18, %v1371_v23  ;;  %v1837_v18 = vrot.slane %v1829_v45, %v7182_v25  ;;  %v1761_v22 = vcombine.low %v7534_v42, %v7542_v49 }
 0x1ea   : > { %v7544_v19 = vpop.permute.xlu0 %1587  ;;  %2297 = vrot.lane.b32.xlu1 %v1964_v15, %s6595_s27  ;;  %v2152_v15 = vcombine.low %v7559_v12, %v7567_v43 }
 0x1eb   : > { %v1769_v42 = vrot.slane %v1761_v22, %v7182_v25 }
 0x1ec   : > { %1667 = vrot.lane.b32.xlu0 %v1489_v27, %s6594_s26  ;;  %v7550_v5 = vpop.permute.xlu1 %1589  ;;  %v2160_v61 = vrot.slane %v2152_v15, %v7182_v25 }
 0x1ed   : > { %v1830_v52 = vcombine.low %v7544_v19, %v7550_v5 }
 0x1ee   : > { %v7554_v59 = vpop.permute.xlu0 %1591  ;;  %1669 = vrot.lane.b32.xlu1 %v1490_v47, %s6594_s26 }
 0x1ef   : > { %v1844_v47 = vrot.slane %v1830_v52, %v7182_v25 }
 0x1f0   : > { %1671 = vrot.lane.b32.xlu0 %v7559_v12, %s6594_s26  ;;  %v7563_v54 = vpop.permute.xlu1 %1593  ;;  %v2151_v12 = vcombine.low %v2143_v48, %v2150_v62 }
 0x1f1   : > { %v1845_v57 = vcombine.low %v1837_v18, %v1844_v47 }
 0x1f2   : > { %v7569_v24 = vpop.permute.xlu0 %1571  ;;  %1673 = vrot.lane.b32.xlu1 %v7567_v43, %s6594_s26  ;;  %v1846_v43 = vcombine.low %v7554_v59, %v7563_v54 }
 0x1f4   : > { %2287 = vrot.lane.b32.xlu0 %v1879_v11, %s6595_s27  ;;  %v7577_v26 = vpop.permute.xlu1 %1573  ;;  %v1502_v11 = vsel %vm1438_vm1, %v11742_v16, %v1373_v2  ;;  %v1494_v2 = vsel %vm1438_vm1, %v7176_v21, %v1357_v63  ;;  %v2203_v21 = vcombine.low %v7467_v1, %v7473_v33  ;;  %v2031_v63 = vrot.slane %v2017_v50, %v7182_v25 }
 0x1f5   : > { %v2221_v53 = vcombine.low %v1501_v58, %v1502_v11  ;;  %v1762_v6 = vcombine.low %v7569_v24, %v7577_v26  ;;  %v1854_v59 = vrot.slane %v1846_v43, %v7182_v25 }
 0x1f6   : > { %v7579_v31 = vpop.permute.xlu0 %1575  ;;  %2289 = vrot.lane.b32.xlu1 %v1896_v41, %s6595_s27  ;;  %v11743_v41 = vld [vmem:[#allocation23_spill] sm:$0xff]  ;;  %v2211_v1 = vrot.slane %v2203_v21, %v7182_v25 }
 0x1f7   : > { %v1493_v23 = vsel %vm1438_vm1, %v11743_v41, %v1355_v37  ;;  %v2204_v37 = vcombine.low %v7503_v35, %v7511_v29  ;;  %v2024_v35 = vrot.slane %v2016_v20, %v7182_v25  ;;  %v2235_v44 = vrot.slane %v2221_v53, %v7182_v25 }
 0x1f8   : > { %1691 = vrot.lane.b32.xlu0 %v1501_v58, %s6594_s26  ;;  %v7590_v38 = vpop.permute.xlu1 %1577  ;;  %v1776_v54 = vrot.slane %v1762_v6, %v7182_v25 }
 0x1f9   : > { %v2218_v29 = vrot.slane %v2204_v37, %v7182_v25  ;;  %v2032_v33 = vcombine.low %v2024_v35, %v2031_v63  ;;  %v2236_v27 = vcombine.low %v2228_v39, %v2235_v44  ;;  %v1778_v24 = vcombine.low %v7579_v31, %v7590_v38  ;;  %v1700_v39 = vld [vmem:[%s7694_s11 + $0x28] sm:$0xff] }
 0x1fa   : > { %v1596_v30 = vpop.permute.xlu0 %1595  ;;  %1693 = vrot.lane.b32.xlu1 %v1502_v11, %s6594_s26  ;;  %v1777_v50 = vcombine.low %v1769_v42, %v1776_v54  ;;  %v1696_v54 = vld [vmem:[%s7694_s11 + $0x8] sm:$0xff] }
 0x1fb   : > { %v2219_v14 = vcombine.low %v2211_v1, %v2218_v29 }
 0x1fc   : > { %1675 = vrot.lane.b32.xlu0 %v1493_v23, %s6594_s26  ;;  %v1598_v51 = vpop.permute.xlu1 %1597 }
 0x1fd   : > { %v1847_v5 = vcombine.low %v1596_v30, %v1598_v51  ;;  %v1786_v51 = vrot.slane %v1778_v24, %v7182_v25 }
 0x1fe   : > { %v7613_v32 = vpop.permute.xlu0 %1615  ;;  %1677 = vrot.lane.b32.xlu1 %v1494_v2, %s6594_s26 }
 0x1ff   : > { %v1861_v17 = vrot.slane %v1847_v5, %v7182_v25 }
 0x200   : > { %2311 = vrot.lane.b32.xlu0 %v2083_v34, %s6595_s27  ;;  %v1618_v9 = vpop.permute.xlu1 %1617  ;;  %v2153_v34 = vcombine.low %v1493_v23, %v1494_v2 }
 0x201   : > { %v1862_v49 = vcombine.low %v1854_v59, %v1861_v17  ;;  %v1965_v41 = vcombine.low %v7613_v32, %v1618_v9 }
 0x202   : > { %v1580_v10 = vpop.permute.xlu0 %1579  ;;  %2313 = vrot.lane.b32.xlu1 %v2100_v8, %s6595_s27  ;;  %v2167_v19 = vrot.slane %v2153_v34, %v7182_v25 }
 0x203   : > { %v1973_v38 = vrot.slane %v1965_v41, %v7182_v25 }
 0x204   : > { %2303 = vrot.lane.b32.xlu0 %v2015_v46, %s6595_s27  ;;  %v1582_v0 = vpop.permute.xlu1 %1581  ;;  %v2168_v58 = vcombine.low %v2160_v61, %v2167_v19 }
 0x205   : > { %v1779_v16 = vcombine.low %v1580_v10, %v1582_v0  ;;  %v1699_v0 = vld [vmem:[%s7694_s11 + $0x20] sm:$0xff] }
 0x206   : > { %v7643_v7 = vpop.permute.xlu0 %1599  ;;  %2305 = vrot.lane.b32.xlu1 %v2032_v33, %s6595_s27 }
 0x207   : > { %v1793_v23 = vrot.slane %v1779_v16, %v7182_v25 }
 0x208   : > { %2327 = vrot.lane.b32.xlu0 %v2219_v14, %s6595_s27  ;;  %v7651_v56 = vpop.permute.xlu1 %1601 }
 0x209   : > { %v1794_v2 = vcombine.low %v1786_v51, %v1793_v23  ;;  %v1897_v62 = vcombine.low %v7643_v7, %v7651_v56 }
 0x20a   : > { %v1620_v36 = vpop.permute.xlu0 %1619  ;;  %2329 = vrot.lane.b32.xlu1 %v2236_v27, %s6595_s27 }
 0x20b   : > { %v1905_v6 = vrot.slane %v1897_v62, %v7182_v25 }
 0x20c   : > { %2319 = vrot.lane.b32.xlu0 %v2151_v12, %s6595_s27  ;;  %v1622_v11 = vpop.permute.xlu1 %1621 }
 0x20d   : > { %v1966_v26 = vcombine.low %v1620_v36, %v1622_v11  ;;  %v1695_v11 = vld [vmem:[%s7694_s11] sm:$0xff] }
 0x20e   : > { %v1624_v30 = vpop.permute.xlu0 %1623  ;;  %2321 = vrot.lane.b32.xlu1 %v2168_v58, %s6595_s27 }
 0x20f   : > { %v1980_v40 = vrot.slane %v1966_v26, %v7182_v25 }
 0x210   : > { %2283 = vrot.lane.b32.xlu0 %v1845_v57, %s6595_s27  ;;  %v1626_v4 = vpop.permute.xlu1 %1625 }
 0x211   : > { %v1981_v20 = vcombine.low %v1973_v38, %v1980_v40  ;;  %v1982_v21 = vcombine.low %v1624_v30, %v1626_v4 }
 0x212   : > { %v1604_v31 = vpop.permute.xlu0 %1603  ;;  %2285 = vrot.lane.b32.xlu1 %v1862_v49, %s6595_s27 }
 0x213   : > { %v1990_v9 = vrot.slane %v1982_v21, %v7182_v25 }
 0x214   : > { %2275 = vrot.lane.b32.xlu0 %v1777_v50, %s6595_s27  ;;  %v1606_v13 = vpop.permute.xlu1 %1605 }
 0x215   : > { %v1898_v52 = vcombine.low %v1604_v31, %v1606_v13 }
 0x216   : > { %v1608_v37 = vpop.permute.xlu0 %1607  ;;  %2277 = vrot.lane.b32.xlu1 %v1794_v2, %s6595_s27 }
 0x217   : > { %v1912_v19 = vrot.slane %v1898_v52, %v7182_v25 }
 0x218   : > { %2299 = vrot.lane.b32.xlu0 %v1981_v20, %s6595_s27  ;;  %v1610_v32 = vpop.permute.xlu1 %1609 }
 0x219   : > { %v1914_v5 = vcombine.low %v1608_v37, %v1610_v32  ;;  %v1913_v18 = vcombine.low %v1905_v6, %v1912_v19 }
 0x21a   : > { %v1628_v28 = vpop.permute.xlu0 %1627 }
 0x21b   : > { %v1922_v58 = vrot.slane %v1914_v5, %v7182_v25  ;;  %v1708_v5 = vld [vmem:[%s7694_s11 + $0x68] sm:$0xff] }
 0x21c   : > { %v1630_v8 = vpop.permute.xlu1 %1629 }
 0x21d   : > { %v1983_v63 = vcombine.low %v1628_v28, %v1630_v8 }
 0x21e   : > { %v1648_v53 = vpop.permute.xlu0 %1647 }
 0x21f   : > { %v1997_v46 = vrot.slane %v1983_v63, %v7182_v25 }
 0x220   : > { %v1650_v35 = vpop.permute.xlu1 %1649 }
 0x221   : > { %v1998_v29 = vcombine.low %v1990_v9, %v1997_v46  ;;  %v2101_v24 = vcombine.low %v1648_v53, %v1650_v35 }
 0x222   : > { %v1612_v60 = vpop.permute.xlu0 %1611 }
 0x223   : > { %2301 = vrot.lane.b32.xlu1 %v1998_v29, %s6595_s27  ;;  %v2109_v51 = vrot.slane %v2101_v24, %v7182_v25 }
 0x224   : > { %v1614_v3 = vpop.permute.xlu1 %1613 }
 0x225   : > { %v1915_v15 = vcombine.low %v1612_v60, %v1614_v3 }
 0x226   : > { %v7684_v10 = vpop.permute.xlu0 %1631 }
 0x227   : > { %v1929_v7 = vrot.slane %v1915_v15, %v7182_v25  ;;  %v1707_v15 = vld [vmem:[%s7694_s11 + $0x60] sm:$0xff] }
 0x228   : > { %v7686_v1 = vpop.permute.xlu1 %1633 }
 0x229   : > { %v1930_v17 = vcombine.low %v1922_v58, %v1929_v7 }
 0x22a   : > { %v1652_v33 = vpop.permute.xlu0 %1651 }
 0x22c   : > { %v1654_v55 = vpop.permute.xlu1 %1653 }
 0x22d   : > { %v2102_v57 = vcombine.low %v1652_v33, %v1654_v55 }
 0x22e   : > { %v7696_v44 = vpop.permute.xlu0 %1655 }
 0x22f   : > { %v2116_v49 = vrot.slane %v2102_v57, %v7182_v25 }
 0x230   : > { %v7698_v34 = vpop.permute.xlu1 %1657 }
 0x231   : > { %v2117_v2 = vcombine.low %v2109_v51, %v2116_v49  ;;  %v2118_v33 = vcombine.low %v7696_v44, %v7698_v34 }
 0x232   : > { %v2280_v14 = vpop.permute.xlu0 %2279 }
 0x233   : > { %v2372_v45 = vsel %vm2367_vm4, %v1699_v0, %v2280_v14  ;;  %v2126_v14 = vrot.slane %v2118_v33, %v7182_v25 }
 0x234   : > { %v2441_v48 = vrot.slane %v2372_v45, 7  ;;  %v2282_v27 = vpop.permute.xlu1 %2281 }
 0x235   : > { %v2373_v47 = vsel %vm2367_vm4, %v1700_v39, %v2282_v27 }
 0x236   : > { %v7708_v12 = vsel %vm1438_vm1, 0.0, %v2441_v48  ;;  %v2442_v61 = vrot.slane %v2373_v47, 7  ;;  %v7710_v43 = vpop.permute.xlu0 %1635  ;;  %v2033_v47 = vcombine.low %v7684_v10, %v7686_v1 }
 0x237   : > { %2972 = vrot.lane.b32.xlu0 %v7708_v12, %s6596_s12  ;;  %v2614_v37 = vrot.slane %v7708_v12, 1 }
 0x238   : > { %v7716_v56 = vpop.permute.xlu1 %1637  ;;  %v7719_v36 = vsel %vm1438_vm1, %v2441_v48, %v2442_v61  ;;  %v2552_v13 = vsel %vm1438_vm1, %v2442_v61, 0.0 }
 0x239   : > { %11744 = vst [vmem:[#allocation6_spill] sm:$0xff] %v7719_v36  ;;  %2974 = vrot.lane.b32.xlu1 %v7719_v36, %s6596_s12  ;;  %v2615_v38 = vrot.slane %v7719_v36, 1  ;;  %v2698_v32 = vrot.slane %v2552_v13, 2  ;;  %v2696_v8 = vrot.slane %v7719_v36, 2  ;;  %v2617_v53 = vrot.slane %v2552_v13, 1 }
 0x23a   : > { %v7724_v22 = vpop.permute.xlu0 %1639  ;;  %v2034_v45 = vcombine.low %v7710_v43, %v7716_v56 }
 0x23b   : > { %2291 = vrot.lane.b32.xlu0 %v1913_v18, %s6595_s27  ;;  %v7755_v21 = vsel %vm2598_vm2, %v2614_v37, %v2615_v38  ;;  %v7767_v46 = vsel %vm2679_vm3, %v2696_v8, %v2698_v32  ;;  %v7776_v3 = vsel %vm2598_vm2, %v2615_v38, %v2617_v53  ;;  %v2695_v38 = vrot.slane %v7708_v12, 2  ;;  %v1704_v37 = vld [vmem:[%s7694_s11 + $0x48] sm:$0xff] }
 0x23c   : > { %v7727_v16 = vpop.permute.xlu1 %1641  ;;  %11747 = vst [vmem:[#allocation14_spill] sm:$0xff] %v7767_v46  ;;  %v2048_v56 = vrot.slane %v2034_v45, %v7182_v25 }
 0x23d   : > { %2293 = vrot.lane.b32.xlu1 %v1930_v17, %s6595_s27 }
 0x23e   : > { %v2272_v59 = vpop.permute.xlu0 %2271 }
 0x23f   : > { %v2368_v26 = vsel %vm2367_vm4, %v1695_v11, %v2272_v59  ;;  %v2041_v11 = vrot.slane %v2033_v47, %v7182_v25 }
 0x240   : > { %v2435_v30 = vrot.slane %v2368_v26, 7  ;;  %v2274_v42 = vpop.permute.xlu1 %2273 }
 0x241   : > { %v2369_v41 = vsel %vm2367_vm4, %v1696_v54, %v2274_v42  ;;  %v2049_v24 = vcombine.low %v2041_v11, %v2048_v56 }
 0x242   : > { %v2436_v23 = vrot.slane %v2369_v41, 7  ;;  %v1660_v4 = vpop.permute.xlu0 %1659  ;;  %v7736_v50 = vsel %vm1438_vm1, 0.0, %v2435_v30  ;;  %v1703_v41 = vld [vmem:[%s7694_s11 + $0x40] sm:$0xff] }
 0x243   : > { %11745 = vst [vmem:[#allocation9_spill] sm:$0xff] %v7736_v50  ;;  %2964 = vrot.lane.b32.xlu0 %v7736_v50, %s6596_s12  ;;  %v2604_v27 = vrot.slane %v7736_v50, 1 }
 0x244   : > { %v1662_v40 = vpop.permute.xlu1 %1661  ;;  %v7742_v31 = vsel %vm1438_vm1, %v2435_v30, %v2436_v23  ;;  %v2550_v48 = vsel %vm1438_vm1, %v2436_v23, 0.0 }
 0x245   : > { %11746 = vst [vmem:[#allocation13_spill] sm:$0xff] %v7742_v31  ;;  %2966 = vrot.lane.b32.xlu1 %v7742_v31, %s6596_s12  ;;  %v2119_v29 = vcombine.low %v1660_v4, %v1662_v40  ;;  %v2605_v34 = vrot.slane %v7742_v31, 1  ;;  %v2688_v6 = vrot.slane %v2550_v48, 2  ;;  %v2686_v7 = vrot.slane %v7742_v31, 2 }
 0x246   : > { %v7748_v20 = vpop.permute.xlu0 %1679  ;;  %v2607_v30 = vrot.slane %v2550_v48, 1 }
 0x247   : > { %2315 = vrot.lane.b32.xlu0 %v2117_v2, %s6595_s27  ;;  %v2133_v0 = vrot.slane %v2119_v29, %v7182_v25  ;;  %v7807_v43 = vsel %vm2598_vm2, %v2604_v27, %v2605_v34  ;;  %v2689_v54 = vsel %vm2679_vm3, %v2686_v7, %v2688_v6  ;;  %v2050_v2 = vcombine.low %v7724_v22, %v7727_v16 }
 0x248   : > { %v7752_v28 = vpop.permute.xlu1 %1681  ;;  %v2608_v40 = vsel %vm2598_vm2, %v2605_v34, %v2607_v30 }
 0x249   : > { %2784 = vrot.lane.b32.xlu1 %v7755_v21, %s6589_s21  ;;  %v2134_v44 = vcombine.low %v2126_v14, %v2133_v0 }
 0x24a   : > { %v7760_v63 = vpop.permute.xlu0 %1643 }
 0x24c   : > { %v7762_v9 = vpop.permute.xlu1 %1645 }
 0x24d   : > { %2882 = vrot.lane.b32.xlu1 %v7767_v46, %s6590_s22  ;;  %v2051_v4 = vcombine.low %v7760_v63, %v7762_v9  ;;  %v7852_v63 = vsel %vm2679_vm3, %v2695_v38, %v2696_v8  ;;  %v2058_v9 = vrot.slane %v2050_v2, %v7182_v25 }
 0x24e   : > { %v7771_v35 = vpop.permute.xlu0 %1663 }
 0x24f   : > { %v2065_v53 = vrot.slane %v2051_v4, %v7182_v25 }
 0x250   : > { %v7773_v60 = vpop.permute.xlu1 %1665 }
 0x251   : > { %3070 = vrot.lane.b32.xlu1 %v7776_v3, %s6597_s15  ;;  %v2066_v16 = vcombine.low %v2058_v9, %v2065_v53  ;;  %v2169_v38 = vcombine.low %v7771_v35, %v7773_v60 }
 0x252   : > { %v7782_v55 = vpop.permute.xlu0 %1683 }
 0x253   : > { %v2177_v35 = vrot.slane %v2169_v38, %v7182_v25 }
 0x254   : > { %v7785_v52 = vpop.permute.xlu1 %1685 }
 0x255   : > { %3166 = vrot.lane.b32.xlu1 %v7767_v46, %s6598_s16  ;;  %v2238_v56 = vcombine.low %v7782_v55, %v7785_v52 }
 0x256   : > { %v7790_v39 = vpop.permute.xlu0 %1687 }
 0x257   : > { %v2252_v55 = vrot.slane %v2238_v56, %v7182_v25 }
 0x258   : > { %v7793_v62 = vpop.permute.xlu1 %1689 }
 0x259   : > { %2317 = vrot.lane.b32.xlu1 %v2134_v44, %s6595_s27 }
 0x25a   : > { %v2296_v19 = vpop.permute.xlu0 %2295 }
 0x25b   : > { %v2380_v61 = vsel %vm2367_vm4, %v1707_v15, %v2296_v19  ;;  %v2685_v19 = vrot.slane %v7736_v50, 2 }
 0x25c   : > { %v2453_v18 = vrot.slane %v2380_v61, 7  ;;  %v2298_v58 = vpop.permute.xlu1 %2297 }
 0x25d   : > { %v2381_v17 = vsel %vm2367_vm4, %v1708_v5, %v2298_v58  ;;  %2776 = vrot.lane.b32.xlu1 %v7807_v43, %s6589_s21  ;;  %v2687_v6 = vsel %vm2679_vm3, %v2685_v19, %v2686_v7 }
 0x25e   : > { %v7814_v10 = vsel %vm1438_vm1, 0.0, %v2453_v18  ;;  %v7816_v1 = vpop.permute.xlu0 %1667  ;;  %v2454_v57 = vrot.slane %v2381_v17, 7  ;;  %v2254_v17 = vcombine.low %v7790_v39, %v7793_v62 }
 0x25f   : > { %2988 = vrot.lane.b32.xlu0 %v7814_v10, %s6596_s12  ;;  %v2634_v44 = vrot.slane %v7814_v10, 1  ;;  %v2715_v19 = vrot.slane %v7814_v10, 2 }
 0x260   : > { %v7821_v59 = vpop.permute.xlu1 %1669  ;;  %v7833_v49 = vsel %vm1438_vm1, %v2453_v18, %v2454_v57  ;;  %v2556_v14 = vsel %vm1438_vm1, %v2454_v57, 0.0  ;;  %v2237_v57 = vcombine.low %v7748_v20, %v7752_v28  ;;  %v2262_v52 = vrot.slane %v2254_v17, %v7182_v25 }
 0x261   : > { %2874 = vrot.lane.b32.xlu1 %v2689_v54, %s6590_s22  ;;  %11748 = vst [vmem:[#allocation7_spill] sm:$0xff] %v7833_v49  ;;  %v2635_v0 = vrot.slane %v7833_v49, 1  ;;  %v2718_v34 = vrot.slane %v2556_v14, 2  ;;  %v2716_v48 = vrot.slane %v7833_v49, 2  ;;  %v2637_v5 = vrot.slane %v2556_v14, 1 }
 0x262   : > { %v7827_v26 = vpop.permute.xlu0 %1671  ;;  %v2245_v39 = vrot.slane %v2237_v57, %v7182_v25 }
 0x263   : > { %2307 = vrot.lane.b32.xlu0 %v2049_v24, %s6595_s27  ;;  %v7879_v45 = vsel %vm2598_vm2, %v2634_v44, %v2635_v0  ;;  %v7889_v47 = vsel %vm2679_vm3, %v2716_v48, %v2718_v34  ;;  %v7900_v58 = vsel %vm2598_vm2, %v2635_v0, %v2637_v5  ;;  %v1711_v0 = vld [vmem:[%s7694_s11 + $0x80] sm:$0xff]  ;;  %v7979_v56 = vsel %vm2679_vm3, %v2715_v19, %v2716_v48 }
 0x264   : > { %v7830_v42 = vpop.permute.xlu1 %1673  ;;  %11749 = vst [vmem:[#allocation10_spill] sm:$0xff] %v7879_v45  ;;  %11750 = vst [vmem:[#allocation15_spill] sm:$0xff] %v7889_v47  ;;  %v2253_v30 = vcombine.low %v2245_v39, %v2252_v55 }
 0x265   : > { %2990 = vrot.lane.b32.xlu1 %v7833_v49, %s6596_s12  ;;  %11751 = vst [vmem:[#allocation16_spill] sm:$0xff] %v7900_v58  ;;  %v2186_v5 = vcombine.low %v7827_v26, %v7830_v42  ;;  %11756 = vst [vmem:[#allocation12_spill] sm:$0xff] %v7979_v56 }
 0x266   : > { %v2288_v23 = vpop.permute.xlu0 %2287 }
 0x267   : > { %v2376_v51 = vsel %vm2367_vm4, %v1703_v41, %v2288_v23  ;;  %2786 = vrot.lane.b32.xlu0 %v7776_v3, %s6589_s21  ;;  %v2170_v41 = vcombine.low %v7816_v1, %v7821_v59 }
 0x268   : > { %v2447_v13 = vrot.slane %v2376_v51, 7  ;;  %v2290_v32 = vpop.permute.xlu1 %2289  ;;  %v1716_v51 = vld [vmem:[%s7694_s11 + $0xa8] sm:$0xff] }
 0x269   : > { %3062 = vrot.lane.b32.xlu1 %v2608_v40, %s6597_s15  ;;  %v2377_v29 = vsel %vm2367_vm4, %v1704_v37, %v2290_v32  ;;  %v2184_v59 = vrot.slane %v2170_v41, %v7182_v25 }
 0x26a   : > { %v7861_v22 = vsel %vm1438_vm1, 0.0, %v2447_v13  ;;  %v2448_v8 = vrot.slane %v2377_v29, 7  ;;  %v1692_v15 = vpop.permute.xlu0 %1691 }
 0x26b   : > { %2880 = vrot.lane.b32.xlu0 %v7852_v63, %s6590_s22  ;;  %v2185_v29 = vcombine.low %v2177_v35, %v2184_v59  ;;  %v1724_v35 = vld [vmem:[%s7694_s11 + $0xe8] sm:$0xff] }
 0x26c   : > { %v7869_v33 = vsel %vm1438_vm1, %v2447_v13, %v2448_v8  ;;  %v1694_v27 = vpop.permute.xlu1 %1693  ;;  %v2554_v23 = vsel %vm1438_vm1, %v2448_v8, 0.0 }
 0x26d   : > { %3158 = vrot.lane.b32.xlu1 %v2689_v54, %s6598_s16  ;;  %v2255_v18 = vcombine.low %v1692_v15, %v1694_v27  ;;  %v1715_v54 = vld [vmem:[%s7694_s11 + $0xa0] sm:$0xff]  ;;  %v2708_v2 = vrot.slane %v2554_v23, 2  ;;  %v2706_v1 = vrot.slane %v7869_v33, 2  ;;  %v2627_v8 = vrot.slane %v2554_v23, 1 }
 0x26e   : > { %v7893_v61 = vpop.permute.xlu0 %1675 }
 0x26f   : > { %2980 = vrot.lane.b32.xlu0 %v7861_v22, %s6596_s12  ;;  %v2269_v7 = vrot.slane %v2255_v18, %v7182_v25  ;;  %v7948_v9 = vsel %vm2679_vm3, %v2706_v1, %v2708_v2  ;;  %v1723_v2 = vld [vmem:[%s7694_s11 + $0xe0] sm:$0xff] }
 0x270   : > { %v1678_v11 = vpop.permute.xlu1 %1677  ;;  %11753 = vst [vmem:[#allocation11_spill] sm:$0xff] %v7948_v9 }
 0x271   : > { %2309 = vrot.lane.b32.xlu1 %v2066_v16, %s6595_s27  ;;  %v2270_v62 = vcombine.low %v2262_v52, %v2269_v7  ;;  %v2187_v34 = vcombine.low %v7893_v61, %v1678_v11  ;;  %v1712_v61 = vld [vmem:[%s7694_s11 + $0x88] sm:$0xff]  ;;  %v2194_v11 = vrot.slane %v2186_v5, %v7182_v25 }
 0x272   : > { %v2312_v24 = vpop.permute.xlu0 %2311 }
 0x273   : > { %3068 = vrot.lane.b32.xlu0 %v7755_v21, %s6597_s15  ;;  %v2388_v20 = vsel %vm2367_vm4, %v1715_v54, %v2312_v24  ;;  %v2201_v17 = vrot.slane %v2187_v34, %v7182_v25 }
 0x274   : > { %v2314_v28 = vpop.permute.xlu1 %2313  ;;  %v2465_v4 = vrot.slane %v2388_v20, 7 }
 0x275   : > { %2982 = vrot.lane.b32.xlu1 %v7869_v33, %s6596_s12  ;;  %v2389_v37 = vsel %vm2367_vm4, %v1716_v51, %v2314_v28  ;;  %v2202_v57 = vcombine.low %v2194_v11, %v2201_v17 }
 0x276   : > { %v7940_v53 = vsel %vm1438_vm1, 0.0, %v2465_v4  ;;  %v2466_v60 = vrot.slane %v2389_v37, 7  ;;  %v2304_v14 = vpop.permute.xlu0 %2303 }
 0x277   : > { %3164 = vrot.lane.b32.xlu0 %v7852_v63, %s6598_s16  ;;  %11752 = vst [vmem:[#allocation8_spill] sm:$0xff] %v7940_v53  ;;  %v2384_v15 = vsel %vm2367_vm4, %v1711_v0, %v2304_v14  ;;  %v2654_v39 = vrot.slane %v7940_v53, 1 }
 0x278   : > { %v2306_v32 = vpop.permute.xlu1 %2305  ;;  %v7957_v44 = vsel %vm1438_vm1, %v2465_v4, %v2466_v60  ;;  %v2459_v18 = vrot.slane %v2384_v15, 7  ;;  %v2560_v55 = vsel %vm1438_vm1, %v2466_v60, 0.0  ;;  %v2705_v4 = vrot.slane %v7861_v22, 2 }
 0x279   : > { %2800 = vrot.lane.b32.xlu1 %v7879_v45, %s6589_s21  ;;  %11754 = vst [vmem:[#allocation17_spill] sm:$0xff] %v7957_v44  ;;  %v2385_v26 = vsel %vm2367_vm4, %v1712_v61, %v2306_v32  ;;  %v2655_v24 = vrot.slane %v7957_v44, 1  ;;  %v2738_v20 = vrot.slane %v2560_v55, 2  ;;  %v2657_v41 = vrot.slane %v2560_v55, 1 }
 0x27a   : > { %v7989_v42 = vsel %vm1438_vm1, 0.0, %v2459_v18  ;;  %v2460_v48 = vrot.slane %v2385_v26, 7  ;;  %v2328_v54 = vpop.permute.xlu0 %2327  ;;  %v8033_v38 = vsel %vm2679_vm3, %v2705_v4, %v2706_v1 }
 0x27b   : > { %2778 = vrot.lane.b32.xlu0 %v2608_v40, %s6589_s21  ;;  %v2624_v40 = vrot.slane %v7861_v22, 1  ;;  %v8011_v28 = vsel %vm2598_vm2, %v2654_v39, %v2655_v24  ;;  %11760 = vst [vmem:[#allocation24_spill] sm:$0xff] %v8033_v38  ;;  %v8039_v59 = vsel %vm2598_vm2, %v2655_v24, %v2657_v41  ;;  %v2644_v60 = vrot.slane %v7989_v42, 1  ;;  %v1720_v24 = vld [vmem:[%s7694_s11 + $0xc8] sm:$0xff] }
 0x27c   : > { %v7952_v16 = vpop.permute.xlu1 %2329  ;;  %v7999_v25 = vsel %vm1438_vm1, %v2459_v18, %v2460_v48  ;;  %11758 = vst [vmem:[#allocation22_spill] sm:$0xff] %v8011_v28  ;;  %11761 = vst [vmem:[#allocation25_spill] sm:$0xff] %v8039_v59  ;;  %v2558_v32 = vsel %vm1438_vm1, %v2460_v48, 0.0  ;;  %v2396_v1 = vsel %vm2367_vm4, %v1723_v2, %v2328_v54  ;;  %v2735_v41 = vrot.slane %v7940_v53, 2 }
 0x27d   : > { %2898 = vrot.lane.b32.xlu1 %v7889_v47, %s6590_s22  ;;  %11757 = vst [vmem:[#allocation21_spill] sm:$0xff] %v7999_v25  ;;  %v2645_v37 = vrot.slane %v7999_v25, 1  ;;  %v2728_v0 = vrot.slane %v2558_v32, 2  ;;  %v2726_v34 = vrot.slane %v7999_v25, 2  ;;  %v2397_v15 = vsel %vm2367_vm4, %v1724_v35, %v7952_v16 }
 0x27e   : > { %v2477_v19 = vrot.slane %v2396_v1, 7  ;;  %v2478_v18 = vrot.slane %v2397_v15, 7  ;;  %v2647_v26 = vrot.slane %v2558_v32, 1 }
 0x27f   : > { %2872 = vrot.lane.b32.xlu0 %v2687_v6, %s6590_s22  ;;  %v8055_v14 = vsel %vm2598_vm2, %v2644_v60, %v2645_v37  ;;  %v8067_v61 = vsel %vm2679_vm3, %v2726_v34, %v2728_v0 }
 0x280   : > { %11762 = vst [vmem:[#allocation26_spill] sm:$0xff] %v8055_v14  ;;  %11764 = vst [vmem:[#allocation28_spill] sm:$0xff] %v8067_v61  ;;  %v8074_v16 = vsel %vm1438_vm1, 0.0, %v2477_v19  ;;  %v8082_v48 = vsel %vm1438_vm1, %v2477_v19, %v2478_v18  ;;  %v2564_v15 = vsel %vm1438_vm1, %v2478_v18, 0.0 }
 0x281   : > { %3086 = vrot.lane.b32.xlu1 %v7900_v58, %s6597_s15  ;;  %11765 = vst [vmem:[#allocation29_spill] sm:$0xff] %v8074_v16  ;;  %11767 = vst [vmem:[#allocation31_spill] sm:$0xff] %v8082_v48  ;;  %v2675_v0 = vrot.slane %v8082_v48, 1  ;;  %v2674_v19 = vrot.slane %v8074_v16, 1 }
 0x283   : > { %3060 = vrot.lane.b32.xlu0 %v7807_v43, %s6597_s15  ;;  %v2625_v43 = vrot.slane %v7869_v33, 1 }
 0x285   : > { %3182 = vrot.lane.b32.xlu1 %v7889_v47, %s6598_s16  ;;  %v7932_v13 = vsel %vm2598_vm2, %v2624_v40, %v2625_v43  ;;  %v7966_v27 = vsel %vm2598_vm2, %v2625_v43, %v2627_v8  ;;  %v2736_v43 = vrot.slane %v7957_v44, 2 }
 0x286   : > { %11755 = vst [vmem:[#allocation19_spill] sm:$0xff] %v7966_v27 }
 0x287   : > { %3156 = vrot.lane.b32.xlu0 %v2687_v6, %s6598_s16  ;;  %v7971_v6 = vpop.permute.xlu1 %2321  ;;  %v8021_v23 = vsel %vm2679_vm3, %v2736_v43, %v2738_v20  ;;  %v8095_v20 = vsel %vm2598_vm2, %v2645_v37, %v2647_v26  ;;  %v8103_v32 = vsel %vm2679_vm3, %v2735_v41, %v2736_v43 }
 0x288   : > { %11770 = vst [vmem:[#allocation34_spill] sm:$0xff] %v8095_v20  ;;  %v2393_v4 = vsel %vm2367_vm4, %v1720_v24, %v7971_v6  ;;  %v8135_v24 = vsel %vm2598_vm2, %v2674_v19, %v2675_v0 }
 0x289   : > { %2333 = vrot.lane.b32.xlu1 %v2270_v62, %s6595_s27  ;;  %v2320_v62 = vpop.permute.xlu0 %2319  ;;  %v2472_v37 = vrot.slane %v2393_v4, 7  ;;  %11776 = vst [vmem:[#allocation40_spill] sm:$0xff] %v8135_v24  ;;  %v2677_v4 = vrot.slane %v2564_v15, 1 }
 0x28b   : > { %2331 = vrot.lane.b32.xlu0 %v2253_v30, %s6595_s27  ;;  %v7991_v7 = vpop.permute.xlu1 %2285 }
 0x28d   : > { %2792 = vrot.lane.b32.xlu1 %v7932_v13, %s6589_s21  ;;  %v8024_v51 = vpop.permute.xlu0 %2283 }
 0x28f   : > { %3004 = vrot.lane.b32.xlu0 %v7940_v53, %s6596_s12  ;;  %v8003_v52 = vpop.permute.xlu1 %2277 }
 0x291   : > { %2890 = vrot.lane.b32.xlu1 %v7948_v9, %s6590_s22 }
 0x293   : > { %2323 = vrot.lane.b32.xlu0 %v2185_v29, %s6595_s27  ;;  %v8048_v29 = vpop.permute.xlu0 %2275 }
 0x295   : > { %3006 = vrot.lane.b32.xlu1 %v7957_v44, %s6596_s12  ;;  %v8014_v30 = vpop.permute.xlu1 %2301 }
 0x297   : > { %2802 = vrot.lane.b32.xlu0 %v7900_v58, %s6589_s21  ;;  %v8069_v17 = vpop.permute.xlu0 %2299 }
 0x299   : > { %3078 = vrot.lane.b32.xlu1 %v7966_v27, %s6597_s15 }
 0x29b   : > { %2896 = vrot.lane.b32.xlu0 %v7979_v56, %s6590_s22 }
 0x29d   : > { %3174 = vrot.lane.b32.xlu1 %v7948_v9, %s6598_s16 }
 0x29f   : > { %2996 = vrot.lane.b32.xlu0 %v7989_v42, %s6596_s12 }
 0x2a1   : > { %2325 = vrot.lane.b32.xlu1 %v2202_v57, %s6595_s27  ;;  %v1719_v57 = vld [vmem:[%s7694_s11 + $0xc0] sm:$0xff] }
 0x2a2   : > { %v2392_v55 = vsel %vm2367_vm4, %v1719_v57, %v2320_v62  ;;  %v2758_v57 = vrot.slane %v2564_v15, 2  ;;  %v8162_v15 = vsel %vm2598_vm2, %v2675_v0, %v2677_v4 }
 0x2a3   : > { %3084 = vrot.lane.b32.xlu0 %v7879_v45, %s6597_s15  ;;  %v2471_v2 = vrot.slane %v2392_v55, 7  ;;  %v2756_v55 = vrot.slane %v8082_v48, 2  ;;  %11781 = vst [vmem:[#allocation45_spill] sm:$0xff] %v8162_v15  ;;  %v1713_v45 = vld [vmem:[%s7694_s11 + $0x90] sm:$0xff] }
 0x2a5   : > { %2998 = vrot.lane.b32.xlu1 %v7999_v25, %s6596_s12  ;;  %v8114_v6 = vsel %vm1438_vm1, 0.0, %v2471_v2  ;;  %v8123_v1 = vsel %vm1438_vm1, %v2471_v2, %v2472_v37  ;;  %v8147_v2 = vsel %vm2679_vm3, %v2756_v55, %v2758_v57 }
 0x2a6   : > { %11772 = vst [vmem:[#allocation36_spill] sm:$0xff] %v8114_v6  ;;  %11775 = vst [vmem:[#allocation39_spill] sm:$0xff] %v8123_v1  ;;  %v2665_v57 = vrot.slane %v8123_v1, 1 }
 0x2a7   : > { %3180 = vrot.lane.b32.xlu0 %v7979_v56, %s6598_s16 }
 0x2a9   : > { %2816 = vrot.lane.b32.xlu1 %v8011_v28, %s6589_s21  ;;  %v8084_v54 = vpop.permute.xlu0 %2972 }
 0x2aa   : > { %11768 = vst [vmem:[#allocation32_spill] sm:$0xff] %v8084_v54 }
 0x2ab   : > { %2794 = vrot.lane.b32.xlu0 %v7966_v27, %s6589_s21  ;;  %v8026_v40 = vpop.permute.xlu1 %2974 }
 0x2ac   : > { %11759 = vst [vmem:[#allocation23_spill] sm:$0xff] %v8026_v40  ;;  %v2746_v40 = vrot.slane %v8123_v1, 2 }
 0x2ad   : > { %2914 = vrot.lane.b32.xlu1 %v8021_v23, %s6590_s22  ;;  %v8105_v62 = vpop.permute.xlu0 %2291 }
 0x2af   : > { %2888 = vrot.lane.b32.xlu0 %v8033_v38, %s6590_s22  ;;  %v8050_v8 = vpop.permute.xlu1 %2293 }
 0x2b1   : > { %3102 = vrot.lane.b32.xlu1 %v8039_v59, %s6597_s15 }
 0x2b3   : > { %3076 = vrot.lane.b32.xlu0 %v7932_v13, %s6597_s15 }
 0x2b5   : > { %2808 = vrot.lane.b32.xlu1 %v8055_v14, %s6589_s21  ;;  %v8116_v60 = vpop.permute.xlu0 %2964 }
 0x2b6   : > { %11773 = vst [vmem:[#allocation37_spill] sm:$0xff] %v8116_v60 }
 0x2b7   : > { %3172 = vrot.lane.b32.xlu0 %v8033_v38, %s6598_s16  ;;  %v8064_v5 = vpop.permute.xlu1 %2966 }
 0x2b8   : > { %11763 = vst [vmem:[#allocation27_spill] sm:$0xff] %v8064_v5 }
 0x2b9   : > { %2906 = vrot.lane.b32.xlu1 %v8067_v61, %s6590_s22  ;;  %v8138_v41 = vpop.permute.xlu0 %2315 }
 0x2bb   : > { %3020 = vrot.lane.b32.xlu0 %v8074_v16, %s6596_s12  ;;  %v8078_v11 = vpop.permute.xlu1 %2784 }
 0x2bc   : > { %11766 = vst [vmem:[#allocation30_spill] sm:$0xff] %v8078_v11 }
 0x2bd   : > { %3022 = vrot.lane.b32.xlu1 %v8082_v48, %s6596_s12 }
 0x2bf   : > { %2818 = vrot.lane.b32.xlu0 %v8039_v59, %s6589_s21  ;;  %v8092_v39 = vpop.permute.xlu1 %2882 }
 0x2c0   : > { %11769 = vst [vmem:[#allocation33_spill] sm:$0xff] %v8092_v39  ;;  %v2725_v39 = vrot.slane %v7989_v42, 2 }
 0x2c1   : > { %3094 = vrot.lane.b32.xlu1 %v8095_v20, %s6597_s15 }
 0x2c3   : > { %2912 = vrot.lane.b32.xlu0 %v8103_v32, %s6590_s22  ;;  %v8109_v35 = vpop.permute.xlu1 %3070 }
 0x2c4   : > { %11771 = vst [vmem:[#allocation35_spill] sm:$0xff] %v8109_v35 }
 0x2c5   : > { %3190 = vrot.lane.b32.xlu1 %v8067_v61, %s6598_s16 }
 0x2c7   : > { %3012 = vrot.lane.b32.xlu0 %v8114_v6, %s6596_s12  ;;  %v8120_v43 = vpop.permute.xlu1 %3166 }
 0x2c8   : > { %11774 = vst [vmem:[#allocation38_spill] sm:$0xff] %v8120_v43  ;;  %v8155_v43 = vsel %vm2679_vm3, %v2725_v39, %v2726_v34  ;;  %v2664_v34 = vrot.slane %v8114_v6, 1 }
 0x2c9   : > { %3014 = vrot.lane.b32.xlu1 %v8123_v1, %s6596_s12  ;;  %11779 = vst [vmem:[#allocation43_spill] sm:$0xff] %v8155_v43 }
 0x2ca   : > { %v8176_v4 = vsel %vm2598_vm2, %v2664_v34, %v2665_v57 }
 0x2cb   : > { %3100 = vrot.lane.b32.xlu0 %v8011_v28, %s6597_s15  ;;  %v8132_v26 = vpop.permute.xlu1 %2317  ;;  %11783 = vst [vmem:[#allocation47_spill] sm:$0xff] %v8176_v4 }
 0x2cd   : > { %2832 = vrot.lane.b32.xlu1 %v8135_v24, %s6589_s21 }
 0x2cf   : > { %2810 = vrot.lane.b32.xlu0 %v8095_v20, %s6589_s21  ;;  %v8144_v18 = vpop.permute.xlu1 %2776  ;;  %v1705_v20 = vld [vmem:[%s7694_s11 + $0x50] sm:$0xff] }
 0x2d0   : > { %11777 = vst [vmem:[#allocation41_spill] sm:$0xff] %v8144_v18 }
 0x2d1   : > { %v8150_v19 = vpop.permute.xlu0 %2988  ;;  %2930 = vrot.lane.b32.xlu1 %v8147_v2, %s6590_s22 }
 0x2d2   : > { %11778 = vst [vmem:[#allocation42_spill] sm:$0xff] %v8150_v19  ;;  %v2562_v19 = vsel %vm1438_vm1, %v2472_v37, 0.0 }
 0x2d3   : > { %2904 = vrot.lane.b32.xlu0 %v8155_v43, %s6590_s22  ;;  %v8159_v35 = vpop.permute.xlu1 %2874  ;;  %v2748_v0 = vrot.slane %v2562_v19, 2  ;;  %v2667_v5 = vrot.slane %v2562_v19, 1 }
 0x2d4   : > { %11780 = vst [vmem:[#allocation44_spill] sm:$0xff] %v8159_v35  ;;  %v1702_v35 = vld [vmem:[%s7694_s11 + $0x38] sm:$0xff] }
 0x2d5   : > { %v8166_v11 = vpop.permute.xlu0 %2307  ;;  %3118 = vrot.lane.b32.xlu1 %v8162_v15, %s6597_s15  ;;  %v8190_v31 = vsel %vm2679_vm3, %v2746_v40, %v2748_v0  ;;  %v2375_v34 = vsel %vm2367_vm4, %v1702_v35, %v7991_v7  ;;  %v1697_v0 = vld [vmem:[%s7694_s11 + $0x10] sm:$0xff]  ;;  %v8207_v60 = vsel %vm2598_vm2, %v2665_v57, %v2667_v5  ;;  %v2755_v7 = vrot.slane %v8074_v16, 2 }
 0x2d6   : > { %11788 = vst [vmem:[#allocation52_spill] sm:$0xff] %v8207_v60 }
 0x2d7   : > { %3092 = vrot.lane.b32.xlu0 %v8055_v14, %s6597_s15  ;;  %v8173_v39 = vpop.permute.xlu1 %2990 }
 0x2d8   : > { %11782 = vst [vmem:[#allocation46_spill] sm:$0xff] %v8173_v39  ;;  %v1701_v39 = vld [vmem:[%s7694_s11 + $0x30] sm:$0xff] }
 0x2d9   : > { %v8179_v37 = vpop.permute.xlu0 %2786  ;;  %2824 = vrot.lane.b32.xlu1 %v8176_v4, %s6589_s21  ;;  %v2374_v18 = vsel %vm2367_vm4, %v1701_v39, %v8024_v51  ;;  %v8217_v39 = vsel %vm2679_vm3, %v2755_v7, %v2756_v55 }
 0x2da   : > { %11784 = vst [vmem:[#allocation48_spill] sm:$0xff] %v8179_v37  ;;  %v1698_v37 = vld [vmem:[%s7694_s11 + $0x18] sm:$0xff]  ;;  %v2444_v51 = vrot.slane %v2374_v18, 7 }
 0x2db   : > { %3188 = vrot.lane.b32.xlu0 %v8155_v43, %s6598_s16  ;;  %v8186_v54 = vpop.permute.xlu1 %3062  ;;  %v2371_v35 = vsel %vm2367_vm4, %v1698_v37, %v8003_v52  ;;  %v1706_v43 = vld [vmem:[%s7694_s11 + $0x58] sm:$0xff] }
 0x2dc   : > { %11785 = vst [vmem:[#allocation49_spill] sm:$0xff] %v8186_v54  ;;  %v2445_v54 = vrot.slane %v2375_v34, 7  ;;  %v2370_v34 = vsel %vm2367_vm4, %v1697_v0, %v8048_v29  ;;  %v2439_v57 = vrot.slane %v2371_v35, 7  ;;  %v8233_v55 = vsel %vm1438_vm1, 0.0, %v2444_v51 }
 0x2dd   : > { %v8194_v50 = vpop.permute.xlu0 %2880  ;;  %2922 = vrot.lane.b32.xlu1 %v8190_v31, %s6590_s22  ;;  %v2438_v18 = vrot.slane %v2370_v34, 7 }
 0x2de   : > { %11786 = vst [vmem:[#allocation50_spill] sm:$0xff] %v8194_v50  ;;  %v8226_v52 = vsel %vm1438_vm1, %v2444_v51, %v2445_v54  ;;  %v2553_v35 = vsel %vm1438_vm1, %v2445_v54, 0.0  ;;  %v2619_v51 = vrot.slane %v8233_v55, 1 }
 0x2df   : > { %2834 = vrot.lane.b32.xlu0 %v8162_v15, %s6589_s21  ;;  %v8203_v19 = vpop.permute.xlu1 %3158  ;;  %11790 = vst [vmem:[#allocation54_spill] sm:$0xff] %v8226_v52  ;;  %v8240_v0 = vsel %vm1438_vm1, %v2438_v18, %v2439_v57  ;;  %v2620_v7 = vrot.slane %v8226_v52, 1  ;;  %v2701_v54 = vrot.slane %v8226_v52, 2 }
 0x2e0   : > { %11787 = vst [vmem:[#allocation51_spill] sm:$0xff] %v8203_v19  ;;  %v2745_v19 = vrot.slane %v8114_v6, 2 }
 0x2e1   : > { %v8212_v50 = vpop.permute.xlu0 %2980  ;;  %3110 = vrot.lane.b32.xlu1 %v8207_v60, %s6597_s15 }
 0x2e2   : > { %11789 = vst [vmem:[#allocation53_spill] sm:$0xff] %v8212_v50  ;;  %v8263_v15 = vsel %vm2679_vm3, %v2745_v19, %v2746_v40  ;;  %v1709_v19 = vld [vmem:[%s7694_s11 + $0x70] sm:$0xff] }
 0x2e3   : > { %2928 = vrot.lane.b32.xlu0 %v8217_v39, %s6590_s22  ;;  %v8223_v5 = vpop.permute.xlu1 %2309 }
 0x2e5   : > { %v8228_v37 = vpop.permute.xlu0 %3068  ;;  %2978 = vrot.lane.b32.xlu1 %v8226_v52, %s6596_s12 }
 0x2e6   : > { %11791 = vst [vmem:[#allocation55_spill] sm:$0xff] %v8228_v37  ;;  %v8254_v37 = vsel %vm2598_vm2, %v2619_v51, %v2620_v7 }
 0x2e7   : > { %3116 = vrot.lane.b32.xlu0 %v8135_v24, %s6597_s15  ;;  %v8237_v29 = vpop.permute.xlu1 %2982 }
 0x2e8   : > { %11792 = vst [vmem:[#allocation56_spill] sm:$0xff] %v8237_v29  ;;  %v2703_v29 = vrot.slane %v2553_v35, 2 }
 0x2e9   : > { %v8244_v50 = vpop.permute.xlu0 %3164  ;;  %2970 = vrot.lane.b32.xlu1 %v8240_v0, %s6596_s12 }
 0x2ea   : > { %11793 = vst [vmem:[#allocation57_spill] sm:$0xff] %v8244_v50  ;;  %v8270_v51 = vsel %vm2679_vm3, %v2701_v54, %v2703_v29  ;;  %v8289_v29 = vsel %vm1438_vm1, 0.0, %v2438_v18 }
 0x2eb   : > { %2826 = vrot.lane.b32.xlu0 %v8207_v60, %s6589_s21  ;;  %v8251_v34 = vpop.permute.xlu1 %2800  ;;  %v2622_v60 = vrot.slane %v2553_v35, 1  ;;  %11797 = vst [vmem:[#allocation61_spill] sm:$0xff] %v8270_v51  ;;  %v2382_v35 = vsel %vm2367_vm4, %v1709_v19, %v8069_v17  ;;  %v2609_v59 = vrot.slane %v8289_v29, 1  ;;  %v2690_v27 = vrot.slane %v8289_v29, 2 }
 0x2ec   : > { %11794 = vst [vmem:[#allocation58_spill] sm:$0xff] %v8251_v34  ;;  %v2456_v18 = vrot.slane %v2382_v35, 7 }
 0x2ed   : > { %v8258_v50 = vpop.permute.xlu0 %2778  ;;  %2788 = vrot.lane.b32.xlu1 %v8254_v37, %s6589_s21 }
 0x2ee   : > { %11795 = vst [vmem:[#allocation59_spill] sm:$0xff] %v8258_v50  ;;  %v8282_v50 = vsel %vm2598_vm2, %v2620_v7, %v2622_v60  ;;  %v2551_v60 = vsel %vm1438_vm1, %v2439_v57, 0.0  ;;  %v2691_v57 = vrot.slane %v8240_v0, 2  ;;  %v8320_v35 = vsel %vm1438_vm1, 0.0, %v2456_v18 }
 0x2ef   : > { %2920 = vrot.lane.b32.xlu0 %v8263_v15, %s6590_s22  ;;  %v8267_v34 = vpop.permute.xlu1 %2898  ;;  %11800 = vst [vmem:[#allocation64_spill] sm:$0xff] %v8282_v50  ;;  %v2693_v19 = vrot.slane %v2551_v60, 2  ;;  %v2612_v58 = vrot.slane %v2551_v60, 1 }
 0x2f0   : > { %11796 = vst [vmem:[#allocation60_spill] sm:$0xff] %v8267_v34 }
 0x2f1   : > { %v8272_v24 = vpop.permute.xlu0 %2872  ;;  %2886 = vrot.lane.b32.xlu1 %v8270_v51, %s6590_s22  ;;  %v8328_v28 = vsel %vm2679_vm3, %v2691_v57, %v2693_v19  ;;  %v2700_v19 = vrot.slane %v8233_v55, 2 }
 0x2f2   : > { %11798 = vst [vmem:[#allocation62_spill] sm:$0xff] %v8272_v24  ;;  %11805 = vst [vmem:[#allocation69_spill] sm:$0xff] %v8328_v28 }
 0x2f3   : > { %3108 = vrot.lane.b32.xlu0 %v8176_v4, %s6597_s15  ;;  %v8278_v40 = vpop.permute.xlu1 %3086 }
 0x2f4   : > { %11799 = vst [vmem:[#allocation63_spill] sm:$0xff] %v8278_v40  ;;  %v2610_v40 = vrot.slane %v8240_v0, 1 }
 0x2f5   : > { %v8284_v34 = vpop.permute.xlu0 %3060  ;;  %3074 = vrot.lane.b32.xlu1 %v8282_v50, %s6597_s15 }
 0x2f6   : > { %11801 = vst [vmem:[#allocation65_spill] sm:$0xff] %v8284_v34  ;;  %v1710_v34 = vld [vmem:[%s7694_s11 + $0x78] sm:$0xff]  ;;  %v8357_v60 = vsel %vm2598_vm2, %v2610_v40, %v2612_v58 }
 0x2f7   : > { %2976 = vrot.lane.b32.xlu0 %v8233_v55, %s6596_s12  ;;  %v8295_v24 = vpop.permute.xlu1 %3182 }
 0x2f8   : > { %11802 = vst [vmem:[#allocation66_spill] sm:$0xff] %v8295_v24  ;;  %v8310_v24 = vsel %vm2598_vm2, %v2609_v59, %v2610_v40 }
 0x2f9   : > { %v8299_v7 = vpop.permute.xlu0 %3156  ;;  %3170 = vrot.lane.b32.xlu1 %v8270_v51, %s6598_s16 }
 0x2fa   : > { %11803 = vst [vmem:[#allocation67_spill] sm:$0xff] %v8299_v7  ;;  %v2383_v7 = vsel %vm2367_vm4, %v1710_v34, %v8014_v30  ;;  %v2378_v34 = vsel %vm2367_vm4, %v1705_v20, %v8105_v62  ;;  %v8350_v20 = vsel %vm2679_vm3, %v2700_v19, %v2701_v54 }
 0x2fb   : > { %2968 = vrot.lane.b32.xlu0 %v8289_v29, %s6596_s12  ;;  %v8307_v17 = vpop.permute.xlu1 %2333  ;;  %v2457_v59 = vrot.slane %v2383_v7, 7 }
 0x2fd   : > { %v8315_v4 = vpop.permute.xlu0 %2331  ;;  %2780 = vrot.lane.b32.xlu1 %v8310_v24, %s6589_s21  ;;  %v8341_v7 = vsel %vm1438_vm1, %v2456_v18, %v2457_v59  ;;  %v2379_v18 = vsel %vm2367_vm4, %v1706_v43, %v8050_v8  ;;  %v2557_v40 = vsel %vm1438_vm1, %v2457_v59, 0.0 }
 0x2fe   : > { %11808 = vst [vmem:[#allocation72_spill] sm:$0xff] %v8341_v7  ;;  %v2451_v19 = vrot.slane %v2379_v18, 7  ;;  %v2640_v43 = vrot.slane %v8341_v7, 1  ;;  %v2639_v18 = vrot.slane %v8320_v35, 1  ;;  %v2642_v14 = vrot.slane %v2557_v40, 1 }
 0x2ff   : > { %2992 = vrot.lane.b32.xlu0 %v8320_v35, %s6596_s12  ;;  %v8324_v61 = vpop.permute.xlu1 %2792 }
 0x300   : > { %11804 = vst [vmem:[#allocation68_spill] sm:$0xff] %v8324_v61 }
 0x301   : > { %v8330_v30 = vpop.permute.xlu0 %3004  ;;  %2878 = vrot.lane.b32.xlu1 %v8328_v28, %s6590_s22 }
 0x302   : > { %11806 = vst [vmem:[#allocation70_spill] sm:$0xff] %v8330_v30  ;;  %v2450_v30 = vrot.slane %v2378_v34, 7 }
 0x303   : > { %2790 = vrot.lane.b32.xlu0 %v8282_v50, %s6589_s21  ;;  %v8338_v47 = vpop.permute.xlu1 %2890  ;;  %v1714_v50 = vld [vmem:[%s7694_s11 + $0x98] sm:$0xff] }
 0x304   : > { %11807 = vst [vmem:[#allocation71_spill] sm:$0xff] %v8338_v47  ;;  %v8366_v34 = vsel %vm1438_vm1, 0.0, %v2450_v30  ;;  %v8381_v8 = vsel %vm1438_vm1, %v2450_v30, %v2451_v19  ;;  %v8395_v30 = vsel %vm2598_vm2, %v2639_v18, %v2640_v43 }
 0x305   : > { %v8344_v61 = vpop.permute.xlu0 %2323  ;;  %2994 = vrot.lane.b32.xlu1 %v8341_v7, %s6596_s12  ;;  %11815 = vst [vmem:[#allocation79_spill] sm:$0xff] %v8395_v30 }
 0x307   : > { %2884 = vrot.lane.b32.xlu0 %v8350_v20, %s6590_s22  ;;  %v8354_v62 = vpop.permute.xlu1 %3006 }
 0x308   : > { %11809 = vst [vmem:[#allocation73_spill] sm:$0xff] %v8354_v62 }
 0x309   : > { %v8361_v47 = vpop.permute.xlu0 %2802  ;;  %3066 = vrot.lane.b32.xlu1 %v8357_v60, %s6597_s15 }
 0x30a   : > { %11810 = vst [vmem:[#allocation74_spill] sm:$0xff] %v8361_v47 }
 0x30b   : > { %2984 = vrot.lane.b32.xlu0 %v8366_v34, %s6596_s12  ;;  %v8370_v54 = vpop.permute.xlu1 %3078 }
 0x30c   : > { %11811 = vst [vmem:[#allocation75_spill] sm:$0xff] %v8370_v54  ;;  %v2721_v54 = vrot.slane %v8341_v7, 2 }
 0x30d   : > { %v8372_v62 = vpop.permute.xlu0 %2896  ;;  %3162 = vrot.lane.b32.xlu1 %v8328_v28, %s6598_s16 }
 0x30e   : > { %11812 = vst [vmem:[#allocation76_spill] sm:$0xff] %v8372_v62 }
 0x30f   : > { %3072 = vrot.lane.b32.xlu0 %v8254_v37, %s6597_s15  ;;  %v8378_v58 = vpop.permute.xlu1 %3174 }
 0x310   : > { %11813 = vst [vmem:[#allocation77_spill] sm:$0xff] %v8378_v58  ;;  %v2723_v58 = vrot.slane %v2557_v40, 2  ;;  %v1717_v40 = vld [vmem:[%s7694_s11 + $0xb0] sm:$0xff] }
 0x311   : > { %v8385_v47 = vpop.permute.xlu0 %2996  ;;  %2986 = vrot.lane.b32.xlu1 %v8381_v8, %s6596_s12 }
 0x312   : > { %11814 = vst [vmem:[#allocation78_spill] sm:$0xff] %v8385_v47  ;;  %v8407_v9 = vsel %vm2679_vm3, %v2721_v54, %v2723_v58  ;;  %v8423_v58 = vsel %vm2598_vm2, %v2640_v43, %v2642_v14  ;;  %v1718_v43 = vld [vmem:[%s7694_s11 + $0xb8] sm:$0xff] }
 0x313   : > { %3168 = vrot.lane.b32.xlu0 %v8350_v20, %s6598_s16  ;;  %v8392_v62 = vpop.permute.xlu1 %2325  ;;  %11818 = vst [vmem:[#allocation82_spill] sm:$0xff] %v8407_v9  ;;  %11821 = vst [vmem:[#allocation85_spill] sm:$0xff] %v8423_v58 }
 0x315   : > { %v8398_v59 = vpop.permute.xlu0 %3084  ;;  %2804 = vrot.lane.b32.xlu1 %v8395_v30, %s6589_s21 }
 0x316   : > { %11816 = vst [vmem:[#allocation80_spill] sm:$0xff] %v8398_v59  ;;  %v8415_v59 = vsel %vm2679_vm3, %v2690_v27, %v2691_v57  ;;  %v2630_v57 = vrot.slane %v8381_v8, 1 }
 0x317   : > { %2782 = vrot.lane.b32.xlu0 %v8357_v60, %s6589_s21  ;;  %v8404_v47 = vpop.permute.xlu1 %2998 }
 0x318   : > { %11817 = vst [vmem:[#allocation81_spill] sm:$0xff] %v8404_v47 }
 0x319   : > { %v8410_v18 = vpop.permute.xlu0 %3180  ;;  %2902 = vrot.lane.b32.xlu1 %v8407_v9, %s6590_s22 }
 0x31a   : > { %11819 = vst [vmem:[#allocation83_spill] sm:$0xff] %v8410_v18  ;;  %v2390_v18 = vsel %vm2367_vm4, %v1717_v40, %v8138_v41 }
 0x31b   : > { %2876 = vrot.lane.b32.xlu0 %v8415_v59, %s6590_s22  ;;  %v8419_v56 = vpop.permute.xlu1 %2816  ;;  %v2468_v14 = vrot.slane %v2390_v18, 7 }
 0x31c   : > { %11820 = vst [vmem:[#allocation84_spill] sm:$0xff] %v8419_v56  ;;  %v2555_v56 = vsel %vm1438_vm1, %v2451_v19, 0.0  ;;  %v2711_v19 = vrot.slane %v8381_v8, 2 }
 0x31d   : > { %v8425_v47 = vpop.permute.xlu0 %2794  ;;  %3090 = vrot.lane.b32.xlu1 %v8423_v58, %s6597_s15  ;;  %v2713_v40 = vrot.slane %v2555_v56, 2  ;;  %v8458_v18 = vsel %vm1438_vm1, 0.0, %v2468_v14  ;;  %v2632_v28 = vrot.slane %v2555_v56, 1 }
 0x31e   : > { %11822 = vst [vmem:[#allocation86_spill] sm:$0xff] %v8425_v47  ;;  %v2629_v47 = vrot.slane %v8366_v34, 1  ;;  %11828 = vst [vmem:[#allocation92_spill] sm:$0xff] %v8458_v18 }
 0x31f   : > { %3064 = vrot.lane.b32.xlu0 %v8310_v24, %s6597_s15  ;;  %v8433_v27 = vpop.permute.xlu1 %2914  ;;  %v8466_v46 = vsel %vm2679_vm3, %v2711_v19, %v2713_v40  ;;  %v2720_v40 = vrot.slane %v8320_v35, 2  ;;  %v8495_v56 = vsel %vm2598_vm2, %v2630_v57, %v2632_v28 }
 0x320   : > { %11823 = vst [vmem:[#allocation87_spill] sm:$0xff] %v8433_v27  ;;  %v8448_v27 = vsel %vm2598_vm2, %v2629_v47, %v2630_v57  ;;  %11830 = vst [vmem:[#allocation94_spill] sm:$0xff] %v8466_v46 }
 0x321   : > { %v8437_v51 = vpop.permute.xlu0 %2888  ;;  %3186 = vrot.lane.b32.xlu1 %v8407_v9, %s6598_s16  ;;  %11826 = vst [vmem:[#allocation90_spill] sm:$0xff] %v8448_v27  ;;  %11837 = vst [vmem:[#allocation101_spill] sm:$0xff] %v8495_v56 }
 0x322   : > { %11824 = vst [vmem:[#allocation88_spill] sm:$0xff] %v8437_v51  ;;  %v2391_v51 = vsel %vm2367_vm4, %v1718_v43, %v8132_v26  ;;  %v2386_v43 = vsel %vm2367_vm4, %v1713_v45, %v8166_v11  ;;  %v8488_v45 = vsel %vm2679_vm3, %v2720_v40, %v2721_v54 }
 0x323   : > { %3160 = vrot.lane.b32.xlu0 %v8415_v59, %s6598_s16  ;;  %v8445_v41 = vpop.permute.xlu1 %3102  ;;  %v2469_v47 = vrot.slane %v2391_v51, 7  ;;  %11835 = vst [vmem:[#allocation99_spill] sm:$0xff] %v8488_v45 }
 0x324   : > { %11825 = vst [vmem:[#allocation89_spill] sm:$0xff] %v8445_v41 }
 0x325   : > { %v8453_v9 = vpop.permute.xlu0 %3076  ;;  %2796 = vrot.lane.b32.xlu1 %v8448_v27, %s6589_s21  ;;  %v8479_v51 = vsel %vm1438_vm1, %v2468_v14, %v2469_v47  ;;  %v2387_v14 = vsel %vm2367_vm4, %v1714_v50, %v8223_v5  ;;  %v2561_v57 = vsel %vm1438_vm1, %v2469_v47, 0.0 }
 0x326   : > { %11827 = vst [vmem:[#allocation91_spill] sm:$0xff] %v8453_v9  ;;  %11833 = vst [vmem:[#allocation97_spill] sm:$0xff] %v8479_v51  ;;  %v2463_v40 = vrot.slane %v2387_v14, 7  ;;  %v2660_v5 = vrot.slane %v8479_v51, 1  ;;  %v2659_v14 = vrot.slane %v8458_v18, 1 }
 0x327   : > { %3008 = vrot.lane.b32.xlu0 %v8458_v18, %s6596_s12  ;;  %v8462_v41 = vpop.permute.xlu1 %2808 }
 0x328   : > { %11829 = vst [vmem:[#allocation93_spill] sm:$0xff] %v8462_v41 }
 0x329   : > { %v8468_v26 = vpop.permute.xlu0 %3172  ;;  %2894 = vrot.lane.b32.xlu1 %v8466_v46, %s6590_s22 }
 0x32a   : > { %11831 = vst [vmem:[#allocation95_spill] sm:$0xff] %v8468_v26  ;;  %v2462_v26 = vrot.slane %v2386_v43, 7 }
 0x32b   : > { %2806 = vrot.lane.b32.xlu0 %v8423_v58, %s6589_s21  ;;  %v8476_v9 = vpop.permute.xlu1 %2906  ;;  %v2710_v58 = vrot.slane %v8366_v34, 2 }
 0x32c   : > { %11832 = vst [vmem:[#allocation96_spill] sm:$0xff] %v8476_v9  ;;  %v8504_v43 = vsel %vm1438_vm1, 0.0, %v2462_v26  ;;  %v8519_v28 = vsel %vm1438_vm1, %v2462_v26, %v2463_v40  ;;  %v2743_v9 = vrot.slane %v2561_v57, 2  ;;  %v8533_v26 = vsel %vm2598_vm2, %v2659_v14, %v2660_v5 }
 0x32d   : > { %v8482_v41 = vpop.permute.xlu0 %3020  ;;  %3010 = vrot.lane.b32.xlu1 %v8479_v51, %s6596_s12  ;;  %11839 = vst [vmem:[#allocation103_spill] sm:$0xff] %v8504_v43  ;;  %11843 = vst [vmem:[#allocation107_spill] sm:$0xff] %v8519_v28 }
 0x32e   : > { %11834 = vst [vmem:[#allocation98_spill] sm:$0xff] %v8482_v41  ;;  %11846 = vst [vmem:[#allocation110_spill] sm:$0xff] %v8533_v26 }
 0x32f   : > { %2900 = vrot.lane.b32.xlu0 %v8488_v45, %s6590_s22  ;;  %v8492_v11 = vpop.permute.xlu1 %3022 }
 0x330   : > { %11836 = vst [vmem:[#allocation100_spill] sm:$0xff] %v8492_v11 }
 0x331   : > { %v8499_v41 = vpop.permute.xlu0 %2818  ;;  %3082 = vrot.lane.b32.xlu1 %v8495_v56, %s6597_s15 }
 0x332   : > { %11838 = vst [vmem:[#allocation102_spill] sm:$0xff] %v8499_v41 }
 0x333   : > { %3000 = vrot.lane.b32.xlu0 %v8504_v43, %s6596_s12  ;;  %v8508_v54 = vpop.permute.xlu1 %3094 }
 0x334   : > { %11840 = vst [vmem:[#allocation104_spill] sm:$0xff] %v8508_v54  ;;  %v2662_v54 = vrot.slane %v2561_v57, 1  ;;  %v1725_v57 = vld [vmem:[%s7694_s11 + $0xf0] sm:$0xff] }
 0x335   : > { %v8510_v11 = vpop.permute.xlu0 %2912  ;;  %3178 = vrot.lane.b32.xlu1 %v8466_v46, %s6598_s16 }
 0x336   : > { %11841 = vst [vmem:[#allocation105_spill] sm:$0xff] %v8510_v11 }
 0x337   : > { %3088 = vrot.lane.b32.xlu0 %v8395_v30, %s6597_s15  ;;  %v8516_v50 = vpop.permute.xlu1 %3190 }
 0x338   : > { %11842 = vst [vmem:[#allocation106_spill] sm:$0xff] %v8516_v50  ;;  %v2741_v50 = vrot.slane %v8479_v51, 2 }
 0x339   : > { %v8523_v41 = vpop.permute.xlu0 %3012  ;;  %3002 = vrot.lane.b32.xlu1 %v8519_v28, %s6596_s12 }
 0x33a   : > { %11844 = vst [vmem:[#allocation108_spill] sm:$0xff] %v8523_v41 }
 0x33b   : > { %3184 = vrot.lane.b32.xlu0 %v8488_v45, %s6598_s16  ;;  %v8530_v11 = vpop.permute.xlu1 %3014 }
 0x33c   : > { %11845 = vst [vmem:[#allocation109_spill] sm:$0xff] %v8530_v11  ;;  %v8545_v11 = vsel %vm2679_vm3, %v2741_v50, %v2743_v9  ;;  %v8561_v9 = vsel %vm2598_vm2, %v2660_v5, %v2662_v54 }
 0x33d   : > { %v8536_v47 = vpop.permute.xlu0 %3100  ;;  %2820 = vrot.lane.b32.xlu1 %v8533_v26, %s6589_s21  ;;  %11852 = vst [vmem:[#allocation116_spill] sm:$0xff] %v8561_v9 }
 0x33e   : > { %11847 = vst [vmem:[#allocation111_spill] sm:$0xff] %v8536_v47  ;;  %v8553_v47 = vsel %vm2679_vm3, %v2710_v58, %v2711_v19  ;;  %v2649_v58 = vrot.slane %v8504_v43, 1  ;;  %v2398_v19 = vsel %vm2367_vm4, %v1725_v57, %v8315_v4 }
 0x33f   : > { %2798 = vrot.lane.b32.xlu0 %v8495_v56, %s6589_s21  ;;  %v8542_v41 = vpop.permute.xlu1 %2832  ;;  %11850 = vst [vmem:[#allocation114_spill] sm:$0xff] %v8553_v47  ;;  %v2480_v4 = vrot.slane %v2398_v19, 7  ;;  %v1722_v19 = vld [vmem:[%s7694_s11 + $0xd8] sm:$0xff] }
 0x340   : > { %11848 = vst [vmem:[#allocation112_spill] sm:$0xff] %v8542_v41  ;;  %v2650_v41 = vrot.slane %v8519_v28, 1 }
 0x341   : > { %v8548_v14 = vpop.permute.xlu0 %2810  ;;  %2918 = vrot.lane.b32.xlu1 %v8545_v11, %s6590_s22 }
 0x342   : > { %11849 = vst [vmem:[#allocation113_spill] sm:$0xff] %v8548_v14  ;;  %v2559_v14 = vsel %vm1438_vm1, %v2463_v40, 0.0  ;;  %v8578_v40 = vsel %vm2598_vm2, %v2649_v58, %v2650_v41 }
 0x343   : > { %2892 = vrot.lane.b32.xlu0 %v8553_v47, %s6590_s22  ;;  %v8557_v46 = vpop.permute.xlu1 %2930  ;;  %v2733_v5 = vrot.slane %v2559_v14, 2 }
 0x344   : > { %11851 = vst [vmem:[#allocation115_spill] sm:$0xff] %v8557_v46  ;;  %v1726_v46 = vld [vmem:[%s7694_s11 + $0xf8] sm:$0xff] }
 0x345   : > { %v8565_v56 = vpop.permute.xlu0 %2904  ;;  %3106 = vrot.lane.b32.xlu1 %v8561_v9, %s6597_s15  ;;  %v2399_v57 = vsel %vm2367_vm4, %v1726_v46, %v8307_v17  ;;  %v2652_v17 = vrot.slane %v2559_v14, 1 }
 0x346   : > { %11853 = vst [vmem:[#allocation117_spill] sm:$0xff] %v8565_v56  ;;  %v11558_v56 = vrot.slane %v8519_v28, 2 }
 0x347   : > { %3080 = vrot.lane.b32.xlu0 %v8448_v27, %s6597_s15  ;;  %v8574_v54 = vpop.permute.xlu1 %3118  ;;  %v8602_v27 = vsel %vm1438_vm1, 0.0, %v2480_v4 }
 0x348   : > { %11854 = vst [vmem:[#allocation118_spill] sm:$0xff] %v8574_v54  ;;  %v8594_v58 = vsel %vm2679_vm3, %v11558_v56, %v2733_v5  ;;  %v2395_v56 = vsel %vm2367_vm4, %v1722_v19, %v8392_v62 }
 0x349   : > { %v8581_v45 = vpop.permute.xlu0 %3092  ;;  %2812 = vrot.lane.b32.xlu1 %v8578_v40, %s6589_s21  ;;  %v2475_v14 = vrot.slane %v2395_v56, 7 }
 0x34a   : > { %11855 = vst [vmem:[#allocation119_spill] sm:$0xff] %v8581_v45  ;;  %v2481_v45 = vrot.slane %v2399_v57, 7 }
 0x34b   : > { %3176 = vrot.lane.b32.xlu0 %v8553_v47, %s6598_s16  ;;  %v8589_v54 = vpop.permute.xlu1 %2824  ;;  %v2740_v47 = vrot.slane %v8458_v18, 2 }
 0x34c   : > { %11856 = vst [vmem:[#allocation120_spill] sm:$0xff] %v8589_v54  ;;  %v1721_v54 = vld [vmem:[%s7694_s11 + $0xd0] sm:$0xff]  ;;  %v8610_v5 = vsel %vm1438_vm1, %v2480_v4, %v2481_v45  ;;  %v8625_v4 = vsel %vm2598_vm2, %v2650_v41, %v2652_v17 }
 0x34d   : > { %v8596_v30 = vpop.permute.xlu0 %3188  ;;  %2910 = vrot.lane.b32.xlu1 %v8594_v58, %s6590_s22  ;;  %v2394_v57 = vsel %vm2367_vm4, %v1721_v54, %v8344_v61  ;;  %v8636_v61 = vsel %vm1438_vm1, %v2481_v45, 0.0  ;;  %v2763_v41 = vrot.slane %v8610_v5, 1 }
 0x34e   : > { %11857 = vst [vmem:[#allocation121_spill] sm:$0xff] %v8596_v30  ;;  %v2474_v19 = vrot.slane %v2394_v57, 7 }
 0x34f   : > { %3024 = vrot.lane.b32.xlu0 %v8602_v27, %s6596_s12  ;;  %v8606_v46 = vpop.permute.xlu1 %2922 }
 0x350   : > { %11858 = vst [vmem:[#allocation122_spill] sm:$0xff] %v8606_v46  ;;  %v8644_v54 = vsel %vm1438_vm1, %v2474_v19, %v2475_v14  ;;  %v8652_v45 = vsel %vm1438_vm1, 0.0, %v2474_v19 }
 0x351   : > { %v8614_v30 = vpop.permute.xlu0 %2834  ;;  %3026 = vrot.lane.b32.xlu1 %v8610_v5, %s6596_s12  ;;  %11863 = vst [vmem:[#allocation127_spill] sm:$0xff] %v8644_v54  ;;  %11865 = vst [vmem:[#allocation129_spill] sm:$0xff] %v8652_v45  ;;  %v2669_v19 = vrot.slane %v8652_v45, 1 }
 0x352   : > { %11859 = vst [vmem:[#allocation123_spill] sm:$0xff] %v8614_v30  ;;  %v8633_v30 = vsel %vm2679_vm3, %v2740_v47, %v2741_v50  ;;  %v2765_v50 = vrot.slane %v8636_v61, 1 }
 0x353   : > { %2822 = vrot.lane.b32.xlu0 %v8561_v9, %s6589_s21  ;;  %v8622_v46 = vpop.permute.xlu1 %3110  ;;  %v2751_v9 = vrot.slane %v8644_v54, 2 }
 0x354   : > { %11860 = vst [vmem:[#allocation124_spill] sm:$0xff] %v8622_v46  ;;  %v8659_v57 = vsel %vm2598_vm2, %v2763_v41, %v2765_v50 }
 0x355   : > { %v8628_v62 = vpop.permute.xlu0 %2928  ;;  %3098 = vrot.lane.b32.xlu1 %v8625_v4, %s6597_s15  ;;  %11867 = vst [vmem:[#allocation131_spill] sm:$0xff] %v8659_v57 }
 0x356   : > { %11861 = vst [vmem:[#allocation125_spill] sm:$0xff] %v8628_v62  ;;  %v2670_v62 = vrot.slane %v8644_v54, 1 }
 0x357   : > { %2916 = vrot.lane.b32.xlu0 %v8633_v30, %s6590_s22  ;;  %v8640_v56 = vpop.permute.xlu1 %2978 }
 0x358   : > { %11862 = vst [vmem:[#allocation126_spill] sm:$0xff] %v8640_v56  ;;  %v8673_v50 = vsel %vm2598_vm2, %v2669_v19, %v2670_v62 }
 0x359   : > { %v8646_v17 = vpop.permute.xlu0 %3116  ;;  %3018 = vrot.lane.b32.xlu1 %v8644_v54, %s6596_s12 }
 0x35a   : > { %11864 = vst [vmem:[#allocation128_spill] sm:$0xff] %v8646_v17  ;;  %v2563_v17 = vsel %vm1438_vm1, %v2475_v14, 0.0 }
 0x35b   : > { %3016 = vrot.lane.b32.xlu0 %v8652_v45, %s6596_s12  ;;  %v8656_v47 = vpop.permute.xlu1 %2970 }
 0x35c   : > { %11866 = vst [vmem:[#allocation130_spill] sm:$0xff] %v8656_v47  ;;  %v2753_v47 = vrot.slane %v2563_v17, 2 }
 0x35d   : > { %v8663_v46 = vpop.permute.xlu0 %2826  ;;  %3122 = vrot.lane.b32.xlu1 %v8659_v57, %s6597_s15 }
 0x35e   : > { %11868 = vst [vmem:[#allocation132_spill] sm:$0xff] %v8663_v46  ;;  %v2672_v46 = vrot.slane %v2563_v17, 1  ;;  %v8685_v57 = vsel %vm2679_vm3, %v2751_v9, %v2753_v47 }
 0x35f   : > { %3104 = vrot.lane.b32.xlu0 %v8533_v26, %s6597_s15  ;;  %v8670_v56 = vpop.permute.xlu1 %2788 }
 0x360   : > { %11869 = vst [vmem:[#allocation133_spill] sm:$0xff] %v8670_v56  ;;  %v2730_v56 = vrot.slane %v8504_v43, 2  ;;  %v8702_v17 = vsel %vm2598_vm2, %v2670_v62, %v2672_v46 }
 0x361   : > { %v8676_v38 = vpop.permute.xlu0 %2920  ;;  %2828 = vrot.lane.b32.xlu1 %v8673_v50, %s6589_s21 }
 0x362   : > { %11870 = vst [vmem:[#allocation134_spill] sm:$0xff] %v8676_v38  ;;  %v11873_v38 = vrot.slane %v8519_v28, 2 }
 0x363   : > { %2814 = vrot.lane.b32.xlu0 %v8625_v4, %s6589_s21  ;;  %v8682_v14 = vpop.permute.xlu1 %2886 }
 0x364   : > { %11871 = vst [vmem:[#allocation135_spill] sm:$0xff] %v8682_v14  ;;  %v8695_v26 = vsel %vm2679_vm3, %v2730_v56, %v11873_v38 }
 0x365   : > { %v8688_v19 = vpop.permute.xlu0 %3108  ;;  %2926 = vrot.lane.b32.xlu1 %v8685_v57, %s6590_s22 }
 0x366   : > { %11872 = vst [vmem:[#allocation136_spill] sm:$0xff] %v8688_v19  ;;  %v2762_v19 = vrot.slane %v8602_v27, 1 }
 0x367   : > { %2908 = vrot.lane.b32.xlu0 %v8695_v26, %s6590_s22  ;;  %v8699_v14 = vpop.permute.xlu1 %3074 }
 0x368   : > { %11874 = vst [vmem:[#allocation137_spill] sm:$0xff] %v8699_v14  ;;  %v8718_v46 = vsel %vm2598_vm2, %v2762_v19, %v2763_v41 }
 0x369   : > { %v8704_v47 = vpop.permute.xlu0 %2976  ;;  %3114 = vrot.lane.b32.xlu1 %v8702_v17, %s6597_s15 }
 0x36a   : > { %11875 = vst [vmem:[#allocation138_spill] sm:$0xff] %v8704_v47  ;;  %v2750_v47 = vrot.slane %v8652_v45, 2 }
 0x36b   : > { %3096 = vrot.lane.b32.xlu0 %v8578_v40, %s6597_s15  ;;  %v8711_v38 = vpop.permute.xlu1 %3170 }
 0x36c   : > { %11876 = vst [vmem:[#allocation139_spill] sm:$0xff] %v8711_v38  ;;  %v8738_v41 = vsel %vm2679_vm3, %v2750_v47, %v2751_v9  ;;  %v2768_v47 = vrot.slane %v8610_v5, 2 }
 0x36d   : > { %v8713_v56 = vpop.permute.xlu0 %2968  ;;  %3194 = vrot.lane.b32.xlu1 %v8594_v58, %s6598_s16 }
 0x36e   : > { %11877 = vst [vmem:[#allocation140_spill] sm:$0xff] %v8713_v56 }
 0x36f   : > { %3120 = vrot.lane.b32.xlu0 %v8718_v46, %s6597_s15  ;;  %v8722_v62 = vpop.permute.xlu1 %2780 }
 0x370   : > { %11878 = vst [vmem:[#allocation141_spill] sm:$0xff] %v8722_v62 }
 0x371   : > { %v8724_v14 = vpop.permute.xlu0 %2992  ;;  %3198 = vrot.lane.b32.xlu1 %v8021_v23, %s6598_s16 }
 0x372   : > { %11879 = vst [vmem:[#allocation142_spill] sm:$0xff] %v8724_v14 }
 0x373   : > { %2830 = vrot.lane.b32.xlu0 %v8702_v17, %s6589_s21  ;;  %v8730_v38 = vpop.permute.xlu1 %2878 }
 0x374   : > { %11880 = vst [vmem:[#allocation143_spill] sm:$0xff] %v8730_v38 }
 0x375   : > { %v8733_v56 = vpop.permute.xlu0 %2790  ;;  %3202 = vrot.lane.b32.xlu1 %v8545_v11, %s6598_s16 }
 0x376   : > { %11881 = vst [vmem:[#allocation144_spill] sm:$0xff] %v8733_v56 }
 0x377   : > { %2924 = vrot.lane.b32.xlu0 %v8738_v41, %s6590_s22  ;;  %v8742_v19 = vpop.permute.xlu1 %2994 }
 0x378   : > { %11882 = vst [vmem:[#allocation145_spill] sm:$0xff] %v8742_v19 }
 0x379   : > { %v8744_v14 = vpop.permute.xlu0 %2884  ;;  %3206 = vrot.lane.b32.xlu1 %v8190_v31, %s6598_s16 }
 0x37a   : > { %11883 = vst [vmem:[#allocation146_spill] sm:$0xff] %v8744_v14  ;;  %v2770_v14 = vrot.slane %v8636_v61, 2 }
 0x37b   : > { %3112 = vrot.lane.b32.xlu0 %v8673_v50, %s6597_s15  ;;  %v8750_v56 = vpop.permute.xlu1 %3066 }
 0x37c   : > { %11884 = vst [vmem:[#allocation147_spill] sm:$0xff] %v8750_v56  ;;  %v8771_v56 = vsel %vm2679_vm3, %v2768_v47, %v2770_v14 }
 0x37d   : > { %v8752_v38 = vpop.permute.xlu0 %2984  ;;  %3210 = vrot.lane.b32.xlu1 %v8685_v57, %s6598_s16 }
 0x37e   : > { %11885 = vst [vmem:[#allocation148_spill] sm:$0xff] %v8752_v38 }
 0x37f   : > { %3192 = vrot.lane.b32.xlu0 %v8695_v26, %s6598_s16  ;;  %v8758_v9 = vpop.permute.xlu1 %3162 }
 0x380   : > { %11886 = vst [vmem:[#allocation149_spill] sm:$0xff] %v8758_v9 }
 0x381   : > { %v8761_v19 = vpop.permute.xlu0 %3072  ;;  %3214 = vrot.lane.b32.xlu1 %v8147_v2, %s6598_s16 }
 0x382   : > { %11887 = vst [vmem:[#allocation150_spill] sm:$0xff] %v8761_v19 }
 0x383   : > { %3196 = vrot.lane.b32.xlu0 %v8103_v32, %s6598_s16  ;;  %v8768_v38 = vpop.permute.xlu1 %2986 }
 0x384   : > { %11888 = vst [vmem:[#allocation151_spill] sm:$0xff] %v8768_v38 }
 0x385   : > { %v8773_v62 = vpop.permute.xlu0 %3168  ;;  %3218 = vrot.lane.b32.xlu1 %v8771_v56, %s6598_s16 }
 0x386   : > { %11889 = vst [vmem:[#allocation152_spill] sm:$0xff] %v8773_v62  ;;  %v2767_v62 = vrot.slane %v8602_v27, 2 }
 0x387   : > { %3200 = vrot.lane.b32.xlu0 %v8633_v30, %s6598_s16  ;;  %v8779_v19 = vpop.permute.xlu1 %2804 }
 0x388   : > { %11890 = vst [vmem:[#allocation153_spill] sm:$0xff] %v8779_v19 }
 0x389   : > { %v8781_v9 = vpop.permute.xlu0 %2782  ;;  %3254 = vrot.lane.b32.xlu1 %v8240_v0, %s6599_s17 }
 0x38b   : > { %3204 = vrot.lane.b32.xlu0 %v8263_v15, %s6598_s16  ;;  %v8787_v61 = vpop.permute.xlu1 %2902 }
 0x38c   : > { %11891 = vst [vmem:[#allocation154_spill] sm:$0xff] %v8787_v61 }
 0x38d   : > { %v8789_v14 = vpop.permute.xlu0 %2876  ;;  %3258 = vrot.lane.b32.xlu1 %v7719_v36, %s6599_s17  ;;  %v8811_v36 = vsel %vm2679_vm3, %v2767_v62, %v2768_v47 }
 0x38e   : > { %11892 = vst [vmem:[#allocation155_spill] sm:$0xff] %v8789_v14 }
 0x38f   : > { %3208 = vrot.lane.b32.xlu0 %v8738_v41, %s6598_s16  ;;  %v8795_v19 = vpop.permute.xlu1 %3090 }
 0x390   : > { %11893 = vst [vmem:[#allocation156_spill] sm:$0xff] %v8795_v19 }
 0x391   : > { %v8797_v38 = vpop.permute.xlu0 %3064  ;;  %3262 = vrot.lane.b32.xlu1 %v8226_v52, %s6599_s17 }
 0x393   : > { %3212 = vrot.lane.b32.xlu0 %v8217_v39, %s6598_s16  ;;  %v8804_v61 = vpop.permute.xlu1 %3186 }
 0x394   : > { %11894 = vst [vmem:[#allocation157_spill] sm:$0xff] %v8804_v61 }
 0x395   : > { %v8806_v14 = vpop.permute.xlu0 %3160  ;;  %3266 = vrot.lane.b32.xlu1 %v7869_v33, %s6599_s17 }
 0x396   : > { %11895 = vst [vmem:[#allocation158_spill] sm:$0xff] %v8806_v14 }
 0x397   : > { %3216 = vrot.lane.b32.xlu0 %v8811_v36, %s6598_s16  ;;  %v8815_v19 = vpop.permute.xlu1 %2796 }
 0x399   : > { %v8817_v52 = vpop.permute.xlu0 %3008  ;;  %3270 = vrot.lane.b32.xlu1 %v8381_v8, %s6599_s17 }
 0x39a   : > { %11896 = vst [vmem:[#allocation159_spill] sm:$0xff] %v8817_v52 }
 0x39b   : > { %3252 = vrot.lane.b32.xlu0 %v8289_v29, %s6599_s17  ;;  %v8823_v61 = vpop.permute.xlu1 %2894 }
 0x39c   : > { %11897 = vst [vmem:[#allocation160_spill] sm:$0xff] %v8823_v61 }
 0x39d   : > { %v8825_v14 = vpop.permute.xlu0 %2806  ;;  %3274 = vrot.lane.b32.xlu1 %v7833_v49, %s6599_s17 }
 0x39e   : > { %11898 = vst [vmem:[#allocation161_spill] sm:$0xff] %v8825_v14 }
 0x39f   : > { %3256 = vrot.lane.b32.xlu0 %v7708_v12, %s6599_s17  ;;  %v8831_v62 = vpop.permute.xlu1 %3010 }
 0x3a0   : > { %11899 = vst [vmem:[#allocation162_spill] sm:$0xff] %v8831_v62 }
 0x3a1   : > { %v8833_v47 = vpop.permute.xlu0 %2900  ;;  %3278 = vrot.lane.b32.xlu1 %v8341_v7, %s6599_s17 }
 0x3a3   : > { %3260 = vrot.lane.b32.xlu0 %v8233_v55, %s6599_s17  ;;  %v8839_v52 = vpop.permute.xlu1 %3082 }
 0x3a5   : > { %v8841_v61 = vpop.permute.xlu0 %3000  ;;  %3282 = vrot.lane.b32.xlu1 %v7999_v25, %s6599_s17 }
 0x3a6   : > { %11900 = vst [vmem:[#allocation163_spill] sm:$0xff] %v8841_v61 }
 0x3a7   : > { %3264 = vrot.lane.b32.xlu0 %v7861_v22, %s6599_s17  ;;  %v8847_v14 = vpop.permute.xlu1 %3178 }
 0x3a9   : > { %v8849_v62 = vpop.permute.xlu0 %3088  ;;  %3286 = vrot.lane.b32.xlu1 %v8519_v28, %s6599_s17 }
 0x3ab   : > { %3268 = vrot.lane.b32.xlu0 %v8366_v34, %s6599_s17  ;;  %v8855_v7 = vpop.permute.xlu1 %3002 }
 0x3ac   : > { %11901 = vst [vmem:[#allocation164_spill] sm:$0xff] %v8855_v7 }
 0x3ad   : > { %v8857_v49 = vpop.permute.xlu0 %3184  ;;  %3290 = vrot.lane.b32.xlu1 %v7957_v44, %s6599_s17 }
 0x3af   : > { %3272 = vrot.lane.b32.xlu0 %v7814_v10, %s6599_s17  ;;  %v8863_v25 = vpop.permute.xlu1 %2820 }
 0x3b0   : > { %11902 = vst [vmem:[#allocation165_spill] sm:$0xff] %v8863_v25 }
 0x3b1   : > { %v8865_v61 = vpop.permute.xlu0 %2798  ;;  %3294 = vrot.lane.b32.xlu1 %v8479_v51, %s6599_s17 }
 0x3b3   : > { %3276 = vrot.lane.b32.xlu0 %v8320_v35, %s6599_s17  ;;  %v8871_v28 = vpop.permute.xlu1 %2918 }
 0x3b4   : > { %11903 = vst [vmem:[#allocation166_spill] sm:$0xff] %v8871_v28 }
 0x3b5   : > { %v8873_v7 = vpop.permute.xlu0 %2892  ;;  %3298 = vrot.lane.b32.xlu1 %v8123_v1, %s6599_s17 }
 0x3b7   : > { %3280 = vrot.lane.b32.xlu0 %v7989_v42, %s6599_s17  ;;  %v8879_v44 = vpop.permute.xlu1 %3106 }
 0x3b8   : > { %11904 = vst [vmem:[#allocation167_spill] sm:$0xff] %v8879_v44 }
 0x3b9   : > { %v8881_v25 = vpop.permute.xlu0 %3080  ;;  %3302 = vrot.lane.b32.xlu1 %v8644_v54, %s6599_s17 }
 0x3bb   : > { %3284 = vrot.lane.b32.xlu0 %v8504_v43, %s6599_s17  ;;  %v8887_v51 = vpop.permute.xlu1 %2812 }
 0x3bc   : > { %11905 = vst [vmem:[#allocation168_spill] sm:$0xff] %v8887_v51  ;;  %v12005_v51 = vld [vmem:[#allocation140_spill] sm:$0xff] }
 0x3bd   : > { %v8889_v28 = vpop.permute.xlu0 %3176  ;;  %3306 = vrot.lane.b32.xlu1 %v8082_v48, %s6599_s17 }
 0x3bf   : > { %3288 = vrot.lane.b32.xlu0 %v7940_v53, %s6599_s17  ;;  %v8895_v1 = vpop.permute.xlu1 %2910 }
 0x3c0   : > { %11906 = vst [vmem:[#allocation169_spill] sm:$0xff] %v8895_v1 }
 0x3c1   : > { %v8897_v44 = vpop.permute.xlu0 %3024  ;;  %3310 = vrot.lane.b32.xlu1 %v8610_v5, %s6599_s17  ;;  %v3803_v5 = vld [vmem:[%s11496_s4] sm:$0xff] }
 0x3c2   : > { %11907 = vst [vmem:[#allocation170_spill] sm:$0xff] %v8897_v44  ;;  %v3804_v44 = vld [vmem:[%s11496_s4 + $0x8] sm:$0xff] }
 0x3c3   : > { %3292 = vrot.lane.b32.xlu0 %v8458_v18, %s6599_s17  ;;  %v8903_v54 = vpop.permute.xlu1 %3026  ;;  %v3806_v18 = vld [vmem:[%s11496_s4 + $0x18] sm:$0xff] }
 0x3c4   : > { %11908 = vst [vmem:[#allocation171_spill] sm:$0xff] %v8903_v54 }
 0x3c5   : > { %v8905_v43 = vpop.permute.xlu0 %2822  ;;  %3348 = vrot.lane.b32.xlu1 %v8310_v24, %s6600_s18 }
 0x3c6   : > { %11909 = vst [vmem:[#allocation172_spill] sm:$0xff] %v8905_v43  ;;  %v6481_v43 = vpack.c.bf16 %v3804_v44, %v3803_v5  ;;  %v3808_v5 = vld [vmem:[%s11496_s4 + $0x28] sm:$0xff] }
 0x3c7   : > { %3296 = vrot.lane.b32.xlu0 %v8114_v6, %s6599_s17  ;;  %v8911_v48 = vpop.permute.xlu1 %3098  ;;  %v3805_v6 = vld [vmem:[%s11496_s4 + $0x10] sm:$0xff] }
 0x3c8   : > { %11910 = vst [vmem:[#allocation173_spill] sm:$0xff] %v8911_v48  ;;  %6482 = vmatprep.subr.bf16.mxu1 %v6481_v43 }
 0x3c9   : > { %v8919_v54 = vpop.permute.xlu0 %2916  ;;  %3352 = vrot.lane.b32.xlu1 %v7755_v21, %s6600_s18  ;;  %6484 = vmatpush3.bf16.msra.mxu1 %v6481_v43  ;;  %v6485_v21 = vpack.c.bf16 %v3806_v18, %v3805_v6  ;;  %v3807_v43 = vld [vmem:[%s11496_s4 + $0x20] sm:$0xff]  ;;  %v11917_v18 = vld [vmem:[#allocation3_spill] sm:$0xff] }
 0x3ca   : > { %11911 = vst [vmem:[#allocation174_spill] sm:$0xff] %v8919_v54  ;;  %v6489_v6 = vpack.c.bf16 %v3808_v5, %v3807_v43 }
 0x3cb   : > { %3300 = vrot.lane.b32.xlu0 %v8652_v45, %s6599_s17  ;;  %v8925_v24 = vpop.permute.xlu1 %3018  ;;  %6486 = vmatprep.subr.bf16.mxu1 %v6485_v21 }
 0x3cc   : > { %11912 = vst [vmem:[#allocation175_spill] sm:$0xff] %v8925_v24 }
 0x3cd   : > { %v8933_v54 = vpop.permute.xlu0 %3016  ;;  %3356 = vrot.lane.b32.xlu1 %v8254_v37, %s6600_s18  ;;  %6488 = vmatpush3.bf16.msra.mxu1 %v6485_v21  ;;  %v11918_v21 = vld [vmem:[#allocation2_spill] sm:$0xff] }
 0x3ce   : > { %11913 = vst [vmem:[#allocation176_spill] sm:$0xff] %v8933_v54  ;;  %6490 = vmatprep.subr.bf16.mxu1 %v6489_v6 }
 0x3cf   : > { %3304 = vrot.lane.b32.xlu0 %v8074_v16, %s6599_s17  ;;  %v8939_v44 = vpop.permute.xlu1 %3122  ;;  %v3809_v16 = vld [vmem:[%s11496_s4 + $0x30] sm:$0xff] }
 0x3d0   : > { %11914 = vst [vmem:[#allocation177_spill] sm:$0xff] %v8939_v44  ;;  %v8957_v44 = vpack.i.bf16 %v11918_v21, %v11917_v18 }
 0x3d1   : > { %v8947_v24 = vpop.permute.xlu0 %3104  ;;  %3444 = vrot.lane.b32.xlu1 %v8415_v59, %s6601_s23  ;;  %6492 = vmatpush3.bf16.msra.mxu1 %v6489_v6  ;;  %v3810_v59 = vld [vmem:[%s11496_s4 + $0x38] sm:$0xff]  ;;  %v3811_v6 = vld [vmem:[%s11496_s4 + $0x40] sm:$0xff] }
 0x3d2   : > { %11915 = vst [vmem:[#allocation178_spill] sm:$0xff] %v8947_v24  ;;  %11919 = vst [vmem:[#allocation180_spill] sm:$0xff] %v8957_v44 }
 0x3d3   : > { %3308 = vrot.lane.b32.xlu0 %v8602_v27, %s6599_s17  ;;  %v8953_v37 = vpop.permute.xlu1 %2828  ;;  %v6493_v27 = vpack.c.bf16 %v3810_v59, %v3809_v16 }
 0x3d4   : > { %11916 = vst [vmem:[#allocation179_spill] sm:$0xff] %v8953_v37 }
 0x3d5   : > { %v8965_v43 = vpop.permute.xlu0 %2814  ;;  %3448 = vrot.lane.b32.xlu1 %v7852_v63, %s6601_s23  ;;  %6494 = vmatprep.subr.bf16.mxu1 %v6493_v27 }
 0x3d6   : > { %11920 = vst [vmem:[#allocation181_spill] sm:$0xff] %v8965_v43  ;;  %6496 = vmatpush3.bf16.msra.mxu1 %v6493_v27 }
 0x3d7   : > { %6541 = vrot.lane.b32.xlu0 %v8957_v44, %s6599_s17  ;;  %v8971_v5 = vpop.permute.xlu1 %2926  ;;  %6373 = vmatprep.subr.mxu1 %v3811_v6 }
 0x3d8   : > { %11921 = vst [vmem:[#allocation182_spill] sm:$0xff] %v8971_v5  ;;  %v11931_v5 = vld [vmem:[#allocation90_spill] sm:$0xff] }
 0x3d9   : > { %v8976_v45 = vpop.permute.xlu0 %2908  ;;  %3452 = vrot.lane.b32.xlu1 %v8350_v20, %s6601_s23  ;;  %v11927_v20 = vld [vmem:[#allocation24_spill] sm:$0xff] }
 0x3da   : > { %11922 = vst [vmem:[#allocation183_spill] sm:$0xff] %v8976_v45  ;;  %6374 = vmatpush3.msra.mxu1 %v3811_v6  ;;  %v12000_v45 = vld [vmem:[#allocation59_spill] sm:$0xff] }
 0x3db   : > { %3350 = vrot.lane.b32.xlu0 %v8357_v60, %s6600_s18  ;;  %v8982_v63 = vpop.permute.xlu1 %3114  ;;  %v11928_v60 = vld [vmem:[#allocation64_spill] sm:$0xff] }
 0x3dc   : > { %11923 = vst [vmem:[#allocation184_spill] sm:$0xff] %v8982_v63 }
 0x3dd   : > { %v8984_v16 = vpop.permute.xlu0 %3096  ;;  %3360 = vrot.lane.b32.xlu1 %v7932_v13, %s6600_s18  ;;  %v11932_v13 = vld [vmem:[#allocation69_spill] sm:$0xff] }
 0x3de   : > { %11924 = vst [vmem:[#allocation185_spill] sm:$0xff] %v8984_v16 }
 0x3df   : > { %3354 = vrot.lane.b32.xlu0 %v7776_v3, %s6600_s18  ;;  %v8990_v59 = vpop.permute.xlu1 %3194 }
 0x3e0   : > { %11925 = vst [vmem:[#allocation186_spill] sm:$0xff] %v8990_v59  ;;  %v11969_v59 = vld [vmem:[#allocation47_spill] sm:$0xff] }
 0x3e1   : > { %v8992_v27 = vpop.permute.xlu0 %3120  ;;  %3456 = vrot.lane.b32.xlu1 %v11927_v20, %s6601_s23  ;;  %v11936_v20 = vld [vmem:[#allocation14_spill] sm:$0xff] }
 0x3e2   : > { %11926 = vst [vmem:[#allocation187_spill] sm:$0xff] %v8992_v27  ;;  %v11935_v27 = vld [vmem:[#allocation114_spill] sm:$0xff] }
 0x3e3   : > { %3358 = vrot.lane.b32.xlu0 %v11928_v60, %s6600_s18  ;;  %v8998_v44 = vpop.permute.xlu1 %3198 }
 0x3e4   : > { %11929 = vst [vmem:[#allocation24_spill] sm:$0xff] %v8998_v44  ;;  %v11954_v44 = vld [vmem:[#allocation26_spill] sm:$0xff] }
 0x3e5   : > { %v9000_v6 = vpop.permute.xlu0 %2830  ;;  %3364 = vrot.lane.b32.xlu1 %v11931_v5, %s6600_s18  ;;  %v11940_v5 = vld [vmem:[#allocation61_spill] sm:$0xff] }
 0x3e6   : > { %11930 = vst [vmem:[#allocation64_spill] sm:$0xff] %v9000_v6  ;;  %v11939_v6 = vld [vmem:[#allocation10_spill] sm:$0xff] }
 0x3e7   : > { %3446 = vrot.lane.b32.xlu0 %v11932_v13, %s6601_s23  ;;  %v9006_v3 = vpop.permute.xlu1 %3202 }
 0x3e8   : > { %11933 = vst [vmem:[#allocation90_spill] sm:$0xff] %v9006_v3  ;;  %v11951_v3 = vld [vmem:[#allocation99_spill] sm:$0xff] }
 0x3e9   : > { %v9008_v63 = vpop.permute.xlu0 %2924  ;;  %3460 = vrot.lane.b32.xlu1 %v11935_v27, %s6601_s23  ;;  %v11944_v27 = vld [vmem:[#allocation19_spill] sm:$0xff] }
 0x3ea   : > { %11934 = vst [vmem:[#allocation69_spill] sm:$0xff] %v9008_v63  ;;  %v11943_v63 = vld [vmem:[#allocation12_spill] sm:$0xff] }
 0x3eb   : > { %3450 = vrot.lane.b32.xlu0 %v11936_v20, %s6601_s23  ;;  %v9014_v60 = vpop.permute.xlu1 %3206 }
 0x3ec   : > { %11937 = vst [vmem:[#allocation114_spill] sm:$0xff] %v9014_v60 }
 0x3ed   : > { %v9016_v37 = vpop.permute.xlu0 %3112  ;;  %3368 = vrot.lane.b32.xlu1 %v11939_v6, %s6600_s18  ;;  %v11948_v6 = vld [vmem:[#allocation11_spill] sm:$0xff] }
 0x3ee   : > { %11938 = vst [vmem:[#allocation14_spill] sm:$0xff] %v9016_v37  ;;  %v11947_v37 = vld [vmem:[#allocation79_spill] sm:$0xff] }
 0x3ef   : > { %3454 = vrot.lane.b32.xlu0 %v11940_v5, %s6601_s23  ;;  %v9022_v13 = vpop.permute.xlu1 %3210 }
 0x3f0   : > { %11941 = vst [vmem:[#allocation10_spill] sm:$0xff] %v9022_v13 }
 0x3f1   : > { %v9024_v54 = vpop.permute.xlu0 %3192  ;;  %3464 = vrot.lane.b32.xlu1 %v11943_v63, %s6601_s23  ;;  %v11952_v63 = vld [vmem:[#allocation101_spill] sm:$0xff] }
 0x3f2   : > { %11942 = vst [vmem:[#allocation61_spill] sm:$0xff] %v9024_v54  ;;  %v12004_v54 = vld [vmem:[#allocation49_spill] sm:$0xff] }
 0x3f3   : > { %3362 = vrot.lane.b32.xlu0 %v11944_v27, %s6600_s18  ;;  %v9030_v20 = vpop.permute.xlu1 %3214 }
 0x3f4   : > { %11945 = vst [vmem:[#allocation12_spill] sm:$0xff] %v9030_v20 }
 0x3f5   : > { %v9032_v60 = vpop.permute.xlu0 %3196  ;;  %3372 = vrot.lane.b32.xlu1 %v11947_v37, %s6600_s18  ;;  %v11955_v37 = vld [vmem:[#allocation94_spill] sm:$0xff] }
 0x3f6   : > { %11946 = vst [vmem:[#allocation19_spill] sm:$0xff] %v9032_v60  ;;  %v11966_v60 = vld [vmem:[#allocation110_spill] sm:$0xff] }
 0x3f7   : > { %3458 = vrot.lane.b32.xlu0 %v11948_v6, %s6601_s23  ;;  %v9038_v5 = vpop.permute.xlu1 %3218 }
 0x3f8   : > { %11949 = vst [vmem:[#allocation79_spill] sm:$0xff] %v9038_v5 }
 0x3f9   : > { %v9040_v13 = vpop.permute.xlu0 %3200  ;;  %3468 = vrot.lane.b32.xlu1 %v11951_v3, %s6601_s23  ;;  %v11958_v3 = vld [vmem:[#allocation16_spill] sm:$0xff] }
 0x3fa   : > { %11950 = vst [vmem:[#allocation11_spill] sm:$0xff] %v9040_v13  ;;  %v11957_v13 = vld [vmem:[#allocation43_spill] sm:$0xff] }
 0x3fb   : > { %3366 = vrot.lane.b32.xlu0 %v11952_v63, %s6600_s18  ;;  %v9046_v27 = vpop.permute.xlu1 %3254 }
 0x3fd   : > { %v9048_v20 = vpop.permute.xlu0 %3204  ;;  %3376 = vrot.lane.b32.xlu1 %v11954_v44, %s6600_s18  ;;  %v11960_v44 = vld [vmem:[#allocation15_spill] sm:$0xff] }
 0x3fe   : > { %11953 = vst [vmem:[#allocation99_spill] sm:$0xff] %v9048_v20 }
 0x3ff   : > { %3462 = vrot.lane.b32.xlu0 %v11955_v37, %s6601_s23  ;;  %v9054_v6 = vpop.permute.xlu1 %3258 }
 0x401   : > { %v9056_v5 = vpop.permute.xlu0 %3208  ;;  %3472 = vrot.lane.b32.xlu1 %v11957_v13, %s6601_s23  ;;  %v11962_v13 = vld [vmem:[#allocation85_spill] sm:$0xff] }
 0x402   : > { %11956 = vst [vmem:[#allocation101_spill] sm:$0xff] %v9056_v5 }
 0x403   : > { %3370 = vrot.lane.b32.xlu0 %v11958_v3, %s6600_s18  ;;  %v9062_v63 = vpop.permute.xlu1 %3262 }
 0x405   : > { %v9064_v24 = vpop.permute.xlu0 %3212  ;;  %3380 = vrot.lane.b32.xlu1 %v8578_v40, %s6600_s18  ;;  %v11964_v40 = vld [vmem:[#allocation82_spill] sm:$0xff] }
 0x406   : > { %11959 = vst [vmem:[#allocation26_spill] sm:$0xff] %v9064_v24  ;;  %v11963_v24 = vld [vmem:[#allocation22_spill] sm:$0xff] }
 0x407   : > { %3466 = vrot.lane.b32.xlu0 %v11960_v44, %s6601_s23  ;;  %v9070_v37 = vpop.permute.xlu1 %3266 }
 0x409   : > { %v9072_v20 = vpop.permute.xlu0 %3216  ;;  %3476 = vrot.lane.b32.xlu1 %v8695_v26, %s6601_s23  ;;  %v11965_v26 = vld [vmem:[#allocation34_spill] sm:$0xff] }
 0x40a   : > { %11961 = vst [vmem:[#allocation94_spill] sm:$0xff] %v9072_v20 }
 0x40b   : > { %3374 = vrot.lane.b32.xlu0 %v11962_v13, %s6600_s18  ;;  %v9078_v3 = vpop.permute.xlu1 %3270 }
 0x40d   : > { %v9080_v5 = vpop.permute.xlu0 %3252  ;;  %3384 = vrot.lane.b32.xlu1 %v11963_v24, %s6600_s18  ;;  %v11967_v24 = vld [vmem:[#allocation28_spill] sm:$0xff] }
 0x40f   : > { %3470 = vrot.lane.b32.xlu0 %v11964_v40, %s6601_s23  ;;  %v9086_v44 = vpop.permute.xlu1 %3274 }
 0x411   : > { %v9088_v53 = vpop.permute.xlu0 %3256  ;;  %3480 = vrot.lane.b32.xlu1 %v8103_v32, %s6601_s23 }
 0x413   : > { %3378 = vrot.lane.b32.xlu0 %v11965_v26, %s6600_s18  ;;  %v9094_v13 = vpop.permute.xlu1 %3278 }
 0x415   : > { %v9096_v20 = vpop.permute.xlu0 %3260  ;;  %3388 = vrot.lane.b32.xlu1 %v11966_v60, %s6600_s18 }
 0x417   : > { %3474 = vrot.lane.b32.xlu0 %v11967_v24, %s6601_s23  ;;  %v9102_v40 = vpop.permute.xlu1 %3282 }
 0x419   : > { %v9104_v1 = vpop.permute.xlu0 %3264  ;;  %3484 = vrot.lane.b32.xlu1 %v8633_v30, %s6601_s23  ;;  %v11971_v30 = vld [vmem:[#allocation25_spill] sm:$0xff] }
 0x41b   : > { %3382 = vrot.lane.b32.xlu0 %v8625_v4, %s6600_s18  ;;  %v9110_v32 = vpop.permute.xlu1 %3286 }
 0x41c   : > { %11968 = vst [vmem:[#allocation43_spill] sm:$0xff] %v9110_v32  ;;  %v12001_v32 = vld [vmem:[#allocation13_spill] sm:$0xff] }
 0x41d   : > { %v9112_v26 = vpop.permute.xlu0 %3268  ;;  %3392 = vrot.lane.b32.xlu1 %v11969_v59, %s6600_s18 }
 0x41f   : > { %3478 = vrot.lane.b32.xlu0 %v8594_v58, %s6601_s23  ;;  %v9118_v60 = vpop.permute.xlu1 %3290 }
 0x420   : > { %11970 = vst [vmem:[#allocation16_spill] sm:$0xff] %v9118_v60  ;;  %v11976_v60 = vld [vmem:[#allocation40_spill] sm:$0xff] }
 0x421   : > { %v9120_v24 = vpop.permute.xlu0 %3272  ;;  %3488 = vrot.lane.b32.xlu1 %v8263_v15, %s6601_s23  ;;  %v11974_v15 = vld [vmem:[#allocation116_spill] sm:$0xff] }
 0x423   : > { %3386 = vrot.lane.b32.xlu0 %v11971_v30, %s6600_s18  ;;  %v9126_v4 = vpop.permute.xlu1 %3294 }
 0x424   : > { %11972 = vst [vmem:[#allocation15_spill] sm:$0xff] %v9126_v4 }
 0x425   : > { %v9128_v48 = vpop.permute.xlu0 %3276  ;;  %3396 = vrot.lane.b32.xlu1 %v8673_v50, %s6600_s18 }
 0x427   : > { %3482 = vrot.lane.b32.xlu0 %v8021_v23, %s6601_s23  ;;  %v9134_v58 = vpop.permute.xlu1 %3298 }
 0x428   : > { %11973 = vst [vmem:[#allocation85_spill] sm:$0xff] %v9134_v58 }
 0x429   : > { %v9136_v59 = vpop.permute.xlu0 %3280  ;;  %3492 = vrot.lane.b32.xlu1 %v8738_v41, %s6601_s23  ;;  %v11979_v41 = vld [vmem:[#allocation52_spill] sm:$0xff] }
 0x42b   : > { %3390 = vrot.lane.b32.xlu0 %v11974_v15, %s6600_s18  ;;  %v9142_v30 = vpop.permute.xlu1 %3302 }
 0x42c   : > { %11975 = vst [vmem:[#allocation22_spill] sm:$0xff] %v9142_v30 }
 0x42d   : > { %v9144_v4 = vpop.permute.xlu0 %3284  ;;  %3400 = vrot.lane.b32.xlu1 %v11976_v60, %s6600_s18  ;;  %v11982_v60 = vld [vmem:[#allocation18_spill] sm:$0xff] }
 0x42e   : > { %v6533_v58 = vunpack.i.l.bf16 %v11982_v60 }
 0x42f   : > { %3486 = vrot.lane.b32.xlu0 %v8545_v11, %s6601_s23  ;;  %v9150_v23 = vpop.permute.xlu1 %3306 }
 0x430   : > { %11977 = vst [vmem:[#allocation82_spill] sm:$0xff] %v9150_v23 }
 0x431   : > { %v9152_v50 = vpop.permute.xlu0 %3288  ;;  %3496 = vrot.lane.b32.xlu1 %v8217_v39, %s6601_s23  ;;  %v11984_v39 = vld [vmem:[#allocation20_spill] sm:$0xff] }
 0x432   : > { %11978 = vst [vmem:[#allocation34_spill] sm:$0xff] %v9152_v50 }
 0x433   : > { %3394 = vrot.lane.b32.xlu0 %v11979_v41, %s6600_s18  ;;  %v9158_v15 = vpop.permute.xlu1 %3310  ;;  %v6538_v41 = vunpack.i.l.bf16 %v11984_v39 }
 0x434   : > { %11980 = vst [vmem:[#allocation110_spill] sm:$0xff] %v9158_v15  ;;  %v3540_v15 = vsel %vm396_vm0, %v11917_v18, %v6533_v58 }
 0x435   : > { %v9160_v30 = vpop.permute.xlu0 %3292  ;;  %3404 = vrot.lane.b32.xlu1 %v8718_v46, %s6600_s18 }
 0x436   : > { %11981 = vst [vmem:[#allocation28_spill] sm:$0xff] %v9160_v30 }
 0x437   : > { %3490 = vrot.lane.b32.xlu0 %v8190_v31, %s6601_s23  ;;  %v3349_v11 = vpop.permute.xlu1 %3348  ;;  %v11986_v31 = vld [vmem:[#allocation4_spill] sm:$0xff] }
 0x439   : > { %v9167_v23 = vpop.permute.xlu0 %3296  ;;  %3500 = vrot.lane.b32.xlu1 %v8811_v36, %s6601_s23  ;;  %v11987_v36 = vld [vmem:[#allocation37_spill] sm:$0xff] }
 0x43a   : > { %11983 = vst [vmem:[#allocation47_spill] sm:$0xff] %v9167_v23  ;;  %v3573_v23 = vsel %vm3572_vm5, %v3540_v15, %v6538_v41  ;;  %v11991_v15 = vld [vmem:[#allocation45_spill] sm:$0xff] }
 0x43b   : > { %3398 = vrot.lane.b32.xlu0 %v8702_v17, %s6600_s18  ;;  %v9176_v46 = vpop.permute.xlu1 %3352  ;;  %v3606_v43 = vsel %vm3605_vm6, %v3573_v23, %v11987_v36  ;;  %v11988_v17 = vld [vmem:[#allocation65_spill] sm:$0xff] }
 0x43c   : > { %v3639_v18 = vsel %vm3638_vm7, %v3606_v43, %v11988_v17 }
 0x43d   : > { %v9178_v30 = vpop.permute.xlu0 %3300  ;;  %6546 = vrot.lane.b32.xlu1 %v11986_v31, %s6600_s18 }
 0x43e   : > { %11985 = vst [vmem:[#allocation25_spill] sm:$0xff] %v9178_v30  ;;  %v11989_v30 = vld [vmem:[#allocation67_spill] sm:$0xff] }
 0x43f   : > { %3494 = vrot.lane.b32.xlu0 %v8685_v57, %s6601_s23  ;;  %v9187_v58 = vpop.permute.xlu1 %3356  ;;  %v3672_v50 = vsel %vm3671_vm8, %v3639_v18, %v11989_v30 }
 0x440   : > { %v3705_v23 = vsel %vm3704_vm10, %v3672_v50, %v9080_v5  ;;  %v11994_v5 = vld [vmem:[#allocation131_spill] sm:$0xff] }
 0x441   : > { %v9193_v31 = vpop.permute.xlu0 %3304  ;;  %v3738_v57 = vsel %vm3737_vm9, %v3705_v23, %v3349_v11  ;;  %v6534_v11 = vunpack.i.h.bf16 %v11982_v60  ;;  %v3545_v60 = vsel %vm396_vm0, %v8240_v0, %v8781_v9  ;;  %v12003_v9 = vld [vmem:[#allocation62_spill] sm:$0xff] }
 0x442   : > { %11990 = vst [vmem:[#allocation116_spill] sm:$0xff] %v9193_v31  ;;  %v11998_v31 = vld [vmem:[#allocation41_spill] sm:$0xff] }
 0x443   : > { %3402 = vrot.lane.b32.xlu0 %v11991_v15, %s6600_s18  ;;  %v3445_v41 = vpop.permute.xlu1 %3444 }
 0x444   : > { %v3771_v43 = vsel %vm3770_vm11, %v3738_v57, %v3445_v41  ;;  %v6539_v57 = vunpack.i.h.bf16 %v11984_v39  ;;  %v11995_v41 = vld [vmem:[#allocation141_spill] sm:$0xff] }
 0x445   : > { %v9201_v36 = vpop.permute.xlu0 %3308  ;;  %6375 = vmatprep.mubr.msk.f32.mxu1 %vm3812_vm12, %v3771_v43  ;;  %v3544_v43 = vsel %vm396_vm0, %v8289_v29, %v11995_v41  ;;  %v3543_v29 = vsel %vm396_vm0, %v12001_v32, %v12000_v45  ;;  %v12002_v41 = vld [vmem:[#allocation27_spill] sm:$0xff] }
 0x446   : > { %11992 = vst [vmem:[#allocation40_spill] sm:$0xff] %v9201_v36  ;;  %v12008_v45 = vld [vmem:[#allocation51_spill] sm:$0xff] }
 0x447   : > { %3498 = vrot.lane.b32.xlu0 %v8147_v2, %s6601_s23  ;;  %v3449_v18 = vpop.permute.xlu1 %3448  ;;  %v3541_v2 = vsel %vm396_vm0, %v11918_v21, %v6534_v11  ;;  %v11999_v11 = vld [vmem:[#allocation9_spill] sm:$0xff] }
 0x448   : > { %v3574_v39 = vsel %vm3572_vm5, %v3541_v2, %v6539_v57  ;;  %v3542_v21 = vsel %vm396_vm0, %v11999_v11, %v11998_v31  ;;  %v12006_v2 = vld [vmem:[#allocation143_spill] sm:$0xff]  ;;  %v12007_v11 = vld [vmem:[#allocation32_spill] sm:$0xff] }
 0x449   : > { %v9206_v30 = vpop.permute.xlu0 %6541  ;;  %v3607_v0 = vsel %vm3605_vm6, %v3574_v39, %v12002_v41  ;;  %v3578_v31 = vsel %vm3572_vm5, %v3545_v60, %v12006_v2  ;;  %v12009_v39 = vld [vmem:[#allocation44_spill] sm:$0xff]  ;;  %v12013_v2 = vld [vmem:[#allocation55_spill] sm:$0xff] }
 0x44a   : > { %11993 = vst [vmem:[#allocation52_spill] sm:$0xff] %v9206_v30  ;;  %v3576_v41 = vsel %vm3572_vm5, %v3543_v29, %v12009_v39 }
 0x44b   : > { %3406 = vrot.lane.b32.xlu0 %v11994_v5, %s6600_s18  ;;  %v3453_v50 = vpop.permute.xlu1 %3452  ;;  %v11996_v5 = vld [vmem:[#allocation155_spill] sm:$0xff] }
 0x44c   : > { %v3577_v30 = vsel %vm3572_vm5, %v3544_v43, %v11996_v5  ;;  %v3575_v43 = vsel %vm3572_vm5, %v3542_v21, %v12003_v9 }
 0x44d   : > { %v3351_v17 = vpop.permute.xlu0 %3350  ;;  %v3608_v57 = vsel %vm3605_vm6, %v3575_v43, %v12005_v51  ;;  %v3610_v16 = vsel %vm3605_vm6, %v3577_v30, %v12007_v11  ;;  %v12012_v43 = vld [vmem:[#allocation23_spill] sm:$0xff] }
 0x44e   : > { %v3641_v21 = vsel %vm3638_vm7, %v3608_v57, %v8797_v38  ;;  %v3643_v38 = vsel %vm3638_vm7, %v3610_v16, %v12013_v2  ;;  %v12016_v16 = vld [vmem:[#allocation30_spill] sm:$0xff]  ;;  %v12020_v2 = vld [vmem:[#allocation133_spill] sm:$0xff] }
 0x44f   : > { %3502 = vrot.lane.b32.xlu0 %v8771_v56, %s6601_s23  ;;  %v9213_v23 = vpop.permute.xlu1 %3360  ;;  %v11997_v56 = vld [vmem:[#allocation5_spill] sm:$0xff] }
 0x451   : > { %v3355_v15 = vpop.permute.xlu0 %3354 }
 0x453   : > { %6551 = vrot.lane.b32.xlu0 %v11997_v56, %s6601_s23  ;;  %v3457_v36 = vpop.permute.xlu1 %3456  ;;  %v3640_v56 = vsel %vm3638_vm7, %v3607_v0, %v12004_v54  ;;  %v12010_v54 = vld [vmem:[#allocation130_spill] sm:$0xff]  ;;  %s6603_s23 = smov 20  }
 0x454   : > { %v3673_v32 = vsel %vm3671_vm8, %v3640_v56, %v12008_v45  ;;  %v3609_v51 = vsel %vm3605_vm6, %v3576_v41, %v12010_v54  ;;  %v12011_v0 = vld [vmem:[#allocation158_spill] sm:$0xff]  ;;  %v3611_v56 = vsel %vm3605_vm6, %v3578_v31, %v12012_v43  ;;  %v12014_v45 = vld [vmem:[#allocation147_spill] sm:$0xff] }
 0x455   : > { %v3359_v5 = vpop.permute.xlu0 %3358  ;;  %v3674_v60 = vsel %vm3671_vm8, %v3641_v21, %v12011_v0  ;;  %v3706_v30 = vsel %vm3704_vm10, %v3673_v32, %v9046_v27  ;;  %v3642_v39 = vsel %vm3638_vm7, %v3609_v51, %v12014_v45  ;;  %v12015_v32 = vld [vmem:[#allocation149_spill] sm:$0xff]  ;;  %v12017_v51 = vld [vmem:[#allocation35_spill] sm:$0xff]  ;;  %v12022_v45 = vld [vmem:[#allocation146_spill] sm:$0xff] }
 0x456   : > { %v3707_v29 = vsel %vm3704_vm10, %v3674_v60, %v9088_v53  ;;  %v3739_v57 = vsel %vm3737_vm9, %v3706_v30, %v3351_v17  ;;  %v3675_v31 = vsel %vm3671_vm8, %v3642_v39, %v12015_v32  ;;  %v3546_v17 = vsel %vm396_vm0, %v7708_v12, %v12016_v16  ;;  %v12018_v0 = vld [vmem:[#allocation57_spill] sm:$0xff]  ;;  %v12019_v30 = vld [vmem:[#allocation50_spill] sm:$0xff]  ;;  %v12026_v16 = vld [vmem:[#allocation48_spill] sm:$0xff] }
 0x457   : > { %v9253_v9 = vpop.permute.xlu1 %3364  ;;  %v3740_v41 = vsel %vm3737_vm9, %v3707_v29, %v9176_v46  ;;  %v3708_v54 = vsel %vm3704_vm10, %v3675_v31, %v9054_v6  ;;  %v3644_v46 = vsel %vm3638_vm7, %v3611_v56, %v12017_v51  ;;  %v3676_v60 = vsel %vm3671_vm8, %v3643_v38, %v12018_v0  ;;  %v12025_v31 = vld [vmem:[#allocation152_spill] sm:$0xff]  ;;  %v12028_v0 = vld [vmem:[#allocation53_spill] sm:$0xff] }
 0x458   : > { %v3773_v21 = vsel %vm3770_vm11, %v3740_v41, %v3449_v18  ;;  %v3579_v18 = vsel %vm3572_vm5, %v3546_v17, %v12019_v30  ;;  %v3709_v43 = vsel %vm3704_vm10, %v3676_v60, %v9096_v20  ;;  %v3741_v29 = vsel %vm3737_vm9, %v3708_v54, %v3355_v15  ;;  %v12023_v41 = vld [vmem:[#allocation150_spill] sm:$0xff] }
 0x459   : > { %v3447_v11 = vpop.permute.xlu0 %3446  ;;  %v3548_v6 = vsel %vm396_vm0, %v8233_v55, %v12020_v2  ;;  %v3742_v38 = vsel %vm3737_vm9, %v3709_v43, %v9187_v58  ;;  %v12024_v15 = vld [vmem:[#allocation38_spill] sm:$0xff]  ;;  %v12031_v2 = vld [vmem:[#allocation33_spill] sm:$0xff] }
 0x45a   : > { %v3772_v27 = vsel %vm3770_vm11, %v3739_v57, %v3447_v11  ;;  %v12021_v57 = vld [vmem:[#allocation138_spill] sm:$0xff]  ;;  %v3581_v39 = vsel %vm3572_vm5, %v3548_v6, %v12022_v45  ;;  %v3775_v32 = vsel %vm3770_vm11, %v3742_v38, %v3453_v50 }
 0x45b   : > { %6376 = vmatmul.mubr.msk.f32.vlgmr.msra.gmra.mrb[0].mxu1 %vm3812_vm12, %v3772_v27  ;;  %v3461_v53 = vpop.permute.xlu1 %3460  ;;  %v3612_v56 = vsel %vm3605_vm6, %v3579_v18, %v12021_v57  ;;  %v3677_v27 = vsel %vm3671_vm8, %v3644_v46, %v12024_v15  ;;  %v12027_v17 = vld [vmem:[#allocation6_spill] sm:$0xff]  ;;  %v3614_v60 = vsel %vm3605_vm6, %v3581_v39, %v12028_v0  ;;  %v12029_v18 = vld [vmem:[#allocation144_spill] sm:$0xff]  ;;  %v12035_v39 = vld [vmem:[#allocation135_spill] sm:$0xff] }
 0x45c   : > { %6378 = vmatprep.mubr.msk.f32.mxu1 %vm3812_vm12, %v3773_v21  ;;  %v3645_v20 = vsel %vm3638_vm7, %v3612_v56, %v12023_v41  ;;  %v3710_v58 = vsel %vm3704_vm10, %v3677_v27, %v9062_v63  ;;  %v3547_v54 = vsel %vm396_vm0, %v12027_v17, %v12026_v16  ;;  %v12030_v43 = vld [vmem:[#allocation54_spill] sm:$0xff]  ;;  %v12036_v41 = vld [vmem:[#allocation139_spill] sm:$0xff]  ;;  %v12039_v0 = vld [vmem:[#allocation68_spill] sm:$0xff] }
 0x45d   : > { %v3451_v12 = vpop.permute.xlu0 %3450  ;;  %v3678_v21 = vsel %vm3671_vm8, %v3645_v20, %v12025_v31  ;;  %v3743_v50 = vsel %vm3737_vm9, %v3710_v58, %v3359_v5  ;;  %v3580_v5 = vsel %vm3572_vm5, %v3547_v54, %v12031_v2  ;;  %v12032_v6 = vld [vmem:[#allocation126_spill] sm:$0xff]  ;;  %v12043_v2 = vld [vmem:[#allocation77_spill] sm:$0xff] }
 0x45e   : > { %v3774_v11 = vsel %vm3770_vm11, %v3741_v29, %v3451_v12  ;;  %v3711_v51 = vsel %vm3704_vm10, %v3678_v21, %v9104_v1  ;;  %v3549_v29 = vsel %vm396_vm0, %v12030_v43, %v12029_v18  ;;  %v3613_v57 = vsel %vm3605_vm6, %v3580_v5, %v12032_v6  ;;  %v12038_v21 = vld [vmem:[#allocation56_spill] sm:$0xff] }
 0x45f   : > { %6379 = vmatmul.mubr.msk.f32.gmra.mrb[2].mxu1 %vm3812_vm12, %v3774_v11  ;;  %v3369_v55 = vpop.permute.xlu1 %3368  ;;  %v3744_v30 = vsel %vm3737_vm9, %v3711_v51, %v9213_v23  ;;  %v12033_v23 = vld [vmem:[#allocation91_spill] sm:$0xff]  ;;  %v12034_v11 = vld [vmem:[#allocation137_spill] sm:$0xff]  ;;  %v12042_v43 = vld [vmem:[#allocation148_spill] sm:$0xff] }
 0x460   : > { %6381 = vmatprep.mubr.msk.f32.mxu1 %vm3812_vm12, %v3775_v32  ;;  %v3777_v12 = vsel %vm3770_vm11, %v3744_v30, %v3457_v36  ;;  %v3647_v56 = vsel %vm3638_vm7, %v3614_v60, %v12033_v23  ;;  %v3646_v45 = vsel %vm3638_vm7, %v3613_v57, %v12034_v11  ;;  %v3582_v36 = vsel %vm3572_vm5, %v3549_v29, %v12035_v39  ;;  %v12037_v32 = vld [vmem:[#allocation95_spill] sm:$0xff] }
 0x461   : > { %v3455_v46 = vpop.permute.xlu0 %3454  ;;  %v3679_v20 = vsel %vm3671_vm8, %v3646_v45, %v12036_v41  ;;  %v3680_v31 = vsel %vm3671_vm8, %v3647_v56, %v12037_v32  ;;  %v3615_v58 = vsel %vm3605_vm6, %v3582_v36, %v12038_v21  ;;  %v3550_v60 = vsel %vm396_vm0, %v7861_v22, %v12039_v0  ;;  %v12040_v30 = vld [vmem:[#allocation75_spill] sm:$0xff]  ;;  %v12044_v56 = vld [vmem:[#allocation86_spill] sm:$0xff] }
 0x462   : > { %v3776_v63 = vsel %vm3770_vm11, %v3743_v50, %v3455_v46  ;;  %v3712_v27 = vsel %vm3704_vm10, %v3679_v20, %v9070_v37  ;;  %v3713_v16 = vsel %vm3704_vm10, %v3680_v31, %v9112_v26  ;;  %v3648_v26 = vsel %vm3638_vm7, %v3615_v58, %v12040_v30  ;;  %v12047_v41 = vld [vmem:[#allocation151_spill] sm:$0xff]  ;;  %v12052_v30 = vld [vmem:[#allocation58_spill] sm:$0xff] }
 0x463   : > { %6382 = vmatmul.mubr.msk.f32.gmra.mrb[4].mxu1 %vm3812_vm12, %v3776_v63  ;;  %v3465_v1 = vpop.permute.xlu1 %3464  ;;  %v3746_v51 = vsel %vm3737_vm9, %v3713_v16, %v9253_v9  ;;  %v12041_v63 = vld [vmem:[#allocation88_spill] sm:$0xff]  ;;  %v3681_v5 = vsel %vm3671_vm8, %v3648_v26, %v12043_v2  ;;  %v12050_v16 = vld [vmem:[#allocation83_spill] sm:$0xff]  ;;  %v3554_v26 = vsel %vm396_vm0, %v7814_v10, %v12052_v30 }
 0x464   : > { %6384 = vmatprep.mubr.msk.f32.mxu1 %vm3812_vm12, %v3777_v12  ;;  %v3779_v46 = vsel %vm3770_vm11, %v3746_v51, %v3461_v53  ;;  %v3583_v18 = vsel %vm3572_vm5, %v3550_v60, %v12041_v63  ;;  %v3552_v53 = vsel %vm396_vm0, %v8366_v34, %v8815_v19  ;;  %v3714_v23 = vsel %vm3704_vm10, %v3681_v5, %v9078_v3  ;;  %v12053_v63 = vld [vmem:[#allocation63_spill] sm:$0xff] }
 0x465   : > { %v3363_v38 = vpop.permute.xlu0 %3362  ;;  %v3616_v29 = vsel %vm3605_vm6, %v3583_v18, %v12042_v43  ;;  %v3585_v12 = vsel %vm3572_vm5, %v3552_v53, %v8873_v7  ;;  %v3551_v34 = vsel %vm396_vm0, %v7869_v33, %v12044_v56  ;;  %v3553_v3 = vsel %vm396_vm0, %v8381_v8, %v8865_v61  ;;  %v12049_v61 = vld [vmem:[#allocation160_spill] sm:$0xff]  ;;  %v12055_v43 = vld [vmem:[#allocation142_spill] sm:$0xff] }
 0x466   : > { %v3745_v17 = vsel %vm3737_vm9, %v3712_v27, %v3363_v38  ;;  %v3649_v22 = vsel %vm3638_vm7, %v3616_v29, %v8881_v25  ;;  %v12045_v38 = vld [vmem:[#allocation42_spill] sm:$0xff] }
 0x467   : > { %v3373_v15 = vpop.permute.xlu1 %3372  ;;  %v3682_v57 = vsel %vm3671_vm8, %v3649_v22, %v8889_v28  ;;  %v3618_v11 = vsel %vm3605_vm6, %v3585_v12, %v12045_v38  ;;  %v12057_v22 = vld [vmem:[#allocation66_spill] sm:$0xff] }
 0x468   : > { %v3715_v7 = vsel %vm3704_vm10, %v3682_v57, %v9120_v24  ;;  %v12046_v24 = vld [vmem:[#allocation71_spill] sm:$0xff]  ;;  %v12058_v56 = vld [vmem:[#allocation74_spill] sm:$0xff] }
 0x469   : > { %v3459_v54 = vpop.permute.xlu0 %3458  ;;  %v3748_v45 = vsel %vm3737_vm9, %v3715_v7, %v3369_v55  ;;  %v3584_v36 = vsel %vm3572_vm5, %v3551_v34, %v12046_v24  ;;  %v12048_v55 = vld [vmem:[#allocation80_spill] sm:$0xff]  ;;  %v12059_v34 = vld [vmem:[#allocation7_spill] sm:$0xff]  ;;  %v12064_v24 = vld [vmem:[#allocation145_spill] sm:$0xff] }
 0x46a   : > { %v3778_v50 = vsel %vm3770_vm11, %v3745_v17, %v3459_v54  ;;  %v3781_v39 = vsel %vm3770_vm11, %v3748_v45, %v3465_v1  ;;  %v3617_v20 = vsel %vm3605_vm6, %v3584_v36, %v12047_v41  ;;  %v3651_v27 = vsel %vm3638_vm7, %v3618_v11, %v12048_v55  ;;  %v12051_v54 = vld [vmem:[#allocation46_spill] sm:$0xff]  ;;  %v12061_v11 = vld [vmem:[#allocation161_spill] sm:$0xff]  ;;  %v12062_v45 = vld [vmem:[#allocation72_spill] sm:$0xff] }
 0x46b   : > { %6385 = vmatmul.mubr.msk.f32.gmra.mrb[6].mxu1 %vm3812_vm12, %v3778_v50  ;;  %v3469_v37 = vpop.permute.xlu1 %3468  ;;  %v3650_v8 = vsel %vm3638_vm7, %v3617_v20, %v8839_v52  ;;  %v3586_v1 = vsel %vm3572_vm5, %v3553_v3, %v12049_v61  ;;  %v3684_v17 = vsel %vm3671_vm8, %v3651_v27, %v12050_v16  ;;  %v12066_v55 = vld [vmem:[#allocation156_spill] sm:$0xff] }
 0x46c   : > { %6387 = vmatprep.mubr.msk.f32.mxu1 %vm3812_vm12, %v3779_v46  ;;  %v3683_v31 = vsel %vm3671_vm8, %v3650_v8, %v8847_v14  ;;  %v3619_v51 = vsel %vm3605_vm6, %v3586_v1, %v12051_v54  ;;  %v3717_v50 = vsel %vm3704_vm10, %v3684_v17, %v9128_v48  ;;  %v12054_v48 = vld [vmem:[#allocation76_spill] sm:$0xff]  ;;  %v12068_v8 = vld [vmem:[#allocation157_spill] sm:$0xff] }
 0x46d   : > { %v3367_v9 = vpop.permute.xlu0 %3366  ;;  %v3716_v58 = vsel %vm3704_vm10, %v3683_v31, %v9086_v44  ;;  %v3750_v0 = vsel %vm3737_vm9, %v3717_v50, %v3373_v15  ;;  %v3652_v18 = vsel %vm3638_vm7, %v3619_v51, %v12053_v63  ;;  %v12070_v17 = vld [vmem:[#allocation81_spill] sm:$0xff] }
 0x46e   : > { %v3747_v19 = vsel %vm3737_vm9, %v3714_v23, %v3367_v9  ;;  %v3783_v60 = vsel %vm3770_vm11, %v3750_v0, %v3469_v37  ;;  %v3587_v9 = vsel %vm3572_vm5, %v3554_v26, %v12054_v48  ;;  %v12056_v37 = vld [vmem:[#allocation153_spill] sm:$0xff]  ;;  %v3685_v2 = vsel %vm3671_vm8, %v3652_v18, %v12057_v22  ;;  %v12072_v26 = vld [vmem:[#allocation104_spill] sm:$0xff]  ;;  %v12074_v48 = vld [vmem:[#allocation163_spill] sm:$0xff] }
 0x46f   : > { %v3377_v6 = vpop.permute.xlu1 %3376  ;;  %v3620_v29 = vsel %vm3605_vm6, %v3587_v9, %v12055_v43  ;;  %v3556_v53 = vsel %vm396_vm0, %v8320_v35, %v12056_v37  ;;  %v3718_v23 = vsel %vm3704_vm10, %v3685_v2, %v9094_v13  ;;  %v3555_v35 = vsel %vm396_vm0, %v12059_v34, %v12058_v56  ;;  %v12076_v43 = vld [vmem:[#allocation106_spill] sm:$0xff]  ;;  %v12080_v2 = vld [vmem:[#allocation43_spill] sm:$0xff]  ;;  %v12082_v56 = vld [vmem:[#allocation21_spill] sm:$0xff] }
 0x470   : > { %v3589_v12 = vsel %vm3572_vm5, %v3556_v53, %v8833_v47  ;;  %v3653_v10 = vsel %vm3638_vm7, %v3620_v29, %v8849_v62  ;;  %v3557_v13 = vsel %vm396_vm0, %v12062_v45, %v12061_v11  ;;  %v12078_v53 = vld [vmem:[#allocation103_spill] sm:$0xff]  ;;  %v12085_v45 = vld [vmem:[#allocation96_spill] sm:$0xff] }
 0x471   : > { %v3463_v25 = vpop.permute.xlu0 %3462  ;;  %v3686_v57 = vsel %vm3671_vm8, %v3653_v10, %v8857_v49  ;;  %v12079_v10 = vld [vmem:[#allocation61_spill] sm:$0xff] }
 0x472   : > { %v3780_v28 = vsel %vm3770_vm11, %v3747_v19, %v3463_v25  ;;  %v3719_v47 = vsel %vm3704_vm10, %v3686_v57, %v9136_v59  ;;  %v12060_v19 = vld [vmem:[#allocation78_spill] sm:$0xff]  ;;  %v12063_v59 = vld [vmem:[#allocation60_spill] sm:$0xff] }
 0x473   : > { %6388 = vmatmul.mubr.msk.f32.gmra.mrb[8].mxu1 %vm3812_vm12, %v3780_v28  ;;  %v3473_v33 = vpop.permute.xlu1 %3472  ;;  %v3622_v25 = vsel %vm3605_vm6, %v3589_v12, %v12060_v19  ;;  %v3752_v38 = vsel %vm3737_vm9, %v3719_v47, %v3377_v6  ;;  %v12065_v6 = vld [vmem:[#allocation119_spill] sm:$0xff] }
 0x474   : > { %6390 = vmatprep.mubr.msk.f32.mxu1 %vm3812_vm12, %v3781_v39  ;;  %v3785_v28 = vsel %vm3770_vm11, %v3752_v38, %v3473_v33  ;;  %v3588_v39 = vsel %vm3572_vm5, %v3555_v35, %v12063_v59  ;;  %v3655_v41 = vsel %vm3638_vm7, %v3622_v25, %v12065_v6  ;;  %v12083_v35 = vld [vmem:[#allocation183_spill] sm:$0xff]  ;;  %v12088_v6 = vld [vmem:[#allocation181_spill] sm:$0xff] }
 0x475   : > { %v3371_v32 = vpop.permute.xlu0 %3370  ;;  %v3621_v36 = vsel %vm3605_vm6, %v3588_v39, %v12064_v24  ;;  %v12087_v24 = vld [vmem:[#allocation164_spill] sm:$0xff] }
 0x476   : > { %v3749_v52 = vsel %vm3737_vm9, %v3716_v58, %v3371_v32  ;;  %v3654_v27 = vsel %vm3638_vm7, %v3621_v36, %v12066_v55  ;;  %v12067_v32 = vld [vmem:[#allocation154_spill] sm:$0xff]  ;;  %v12069_v58 = vld [vmem:[#allocation121_spill] sm:$0xff] }
 0x477   : > { %v3381_v21 = vpop.permute.xlu1 %3380  ;;  %v3590_v33 = vsel %vm3572_vm5, %v3557_v13, %v12067_v32  ;;  %v3687_v61 = vsel %vm3671_vm8, %v3654_v27, %v12068_v8  ;;  %v3688_v16 = vsel %vm3671_vm8, %v3655_v41, %v12069_v58  ;;  %v12091_v27 = vld [vmem:[#allocation186_spill] sm:$0xff]  ;;  %v12094_v58 = vld [vmem:[#allocation19_spill] sm:$0xff] }
 0x478   : > { %v3720_v31 = vsel %vm3704_vm10, %v3687_v61, %v9102_v40  ;;  %v3623_v54 = vsel %vm3605_vm6, %v3590_v33, %v12070_v17  ;;  %v3721_v51 = vsel %vm3704_vm10, %v3688_v16, %v9144_v4  ;;  %v12073_v4 = vld [vmem:[#allocation117_spill] sm:$0xff]  ;;  %v12092_v33 = vld [vmem:[#allocation111_spill] sm:$0xff]  ;;  %v12095_v17 = vld [vmem:[#allocation16_spill] sm:$0xff] }
 0x479   : > { %v3467_v46 = vpop.permute.xlu0 %3466  ;;  %v3656_v63 = vsel %vm3638_vm7, %v3623_v54, %v12072_v26  ;;  %v12093_v61 = vld [vmem:[#allocation169_spill] sm:$0xff] }
 0x47a   : > { %v3782_v14 = vsel %vm3770_vm11, %v3749_v52, %v3467_v46  ;;  %v3754_v46 = vsel %vm3737_vm9, %v3721_v51, %v3381_v21  ;;  %v3689_v29 = vsel %vm3671_vm8, %v3656_v63, %v12076_v43  ;;  %v12096_v51 = vld [vmem:[#allocation28_spill] sm:$0xff]  ;;  %v12102_v43 = vld [vmem:[#allocation89_spill] sm:$0xff] }
 0x47b   : > { %6391 = vmatmul.mubr.msk.f32.gmra.mrb[10].mxu1 %vm3812_vm12, %v3782_v14  ;;  %v3477_v44 = vpop.permute.xlu1 %3476  ;;  %v3722_v57 = vsel %vm3704_vm10, %v3689_v29, %v12080_v2 }
 0x47c   : > { %6393 = vmatprep.mubr.msk.f32.mxu1 %vm3812_vm12, %v3783_v60  ;;  %v3787_v14 = vsel %vm3770_vm11, %v3754_v46, %v3477_v44  ;;  %v12071_v60 = vld [vmem:[#allocation93_spill] sm:$0xff] }
 0x47d   : > { %v3375_v15 = vpop.permute.xlu0 %3374  ;;  %v3558_v30 = vsel %vm396_vm0, %v7989_v42, %v12071_v60  ;;  %v12075_v44 = vld [vmem:[#allocation185_spill] sm:$0xff]  ;;  %v12077_v42 = vld [vmem:[#allocation168_spill] sm:$0xff] }
 0x47e   : > { %v3751_v7 = vsel %vm3737_vm9, %v3718_v23, %v3375_v15  ;;  %v3591_v18 = vsel %vm3572_vm5, %v3558_v30, %v12073_v4  ;;  %v3560_v12 = vsel %vm396_vm0, %v12078_v53, %v12077_v42  ;;  %v12081_v23 = vld [vmem:[#allocation113_spill] sm:$0xff]  ;;  %v12098_v4 = vld [vmem:[#allocation84_spill] sm:$0xff]  ;;  %v12103_v42 = vld [vmem:[#allocation178_spill] sm:$0xff] }
 0x47f   : > { %v3385_v5 = vpop.permute.xlu1 %3384  ;;  %v3624_v9 = vsel %vm3605_vm6, %v3591_v18, %v12074_v48  ;;  %v3559_v34 = vsel %vm396_vm0, %v12082_v56, %v12081_v23  ;;  %v3593_v47 = vsel %vm3572_vm5, %v3560_v12, %v12083_v35  ;;  %v12097_v30 = vld [vmem:[#allocation73_spill] sm:$0xff]  ;;  %v12099_v18 = vld [vmem:[#allocation8_spill] sm:$0xff]  ;;  %v12108_v56 = vld [vmem:[#allocation15_spill] sm:$0xff] }
 0x480   : > { %v3657_v15 = vsel %vm3638_vm7, %v3624_v9, %v12075_v44  ;;  %v3592_v13 = vsel %vm3572_vm5, %v3559_v34, %v12085_v45  ;;  %v12100_v48 = vld [vmem:[#allocation105_spill] sm:$0xff]  ;;  %v12101_v44 = vld [vmem:[#allocation159_spill] sm:$0xff]  ;;  %v12104_v53 = vld [vmem:[#allocation24_spill] sm:$0xff] }
 0x481   : > { %v3471_v62 = vpop.permute.xlu0 %3470  ;;  %v3690_v22 = vsel %vm3671_vm8, %v3657_v15, %v12079_v10  ;;  %v3625_v36 = vsel %vm3605_vm6, %v3592_v13, %v12087_v24  ;;  %v12105_v10 = vld [vmem:[#allocation165_spill] sm:$0xff]  ;;  %v12113_v24 = vld [vmem:[#allocation87_spill] sm:$0xff] }
 0x482   : > { %v3784_v49 = vsel %vm3770_vm11, %v3751_v7, %v3471_v62  ;;  %v12084_v7 = vld [vmem:[#allocation34_spill] sm:$0xff] }
 0x483   : > { %6394 = vmatmul.mubr.msk.f32.gmra.mrb[12].mxu1 %vm3812_vm12, %v3784_v49  ;;  %v3481_v3 = vpop.permute.xlu1 %3480  ;;  %v3723_v62 = vsel %vm3704_vm10, %v3690_v22, %v12084_v7  ;;  %v12106_v22 = vld [vmem:[#allocation92_spill] sm:$0xff]  ;;  %v12110_v7 = vld [vmem:[#allocation17_spill] sm:$0xff] }
 0x484   : > { %6396 = vmatprep.mubr.msk.f32.mxu1 %vm3812_vm12, %v3785_v28  ;;  %v3756_v38 = vsel %vm3737_vm9, %v3723_v62, %v3385_v5  ;;  %v12086_v28 = vld [vmem:[#allocation70_spill] sm:$0xff]  ;;  %v12089_v5 = vld [vmem:[#allocation107_spill] sm:$0xff]  ;;  %v3564_v2 = vsel %vm396_vm0, %v12106_v22, %v12105_v10 }
 0x485   : > { %v3379_v20 = vpop.permute.xlu0 %3378  ;;  %v3789_v11 = vsel %vm3770_vm11, %v3756_v38, %v3481_v3  ;;  %v3626_v59 = vsel %vm3605_vm6, %v3593_v47, %v12086_v28  ;;  %v3561_v41 = vsel %vm396_vm0, %v12089_v5, %v12088_v6  ;;  %v12090_v3 = vld [vmem:[#allocation173_spill] sm:$0xff]  ;;  %v12109_v47 = vld [vmem:[#allocation102_spill] sm:$0xff]  ;;  %v12112_v38 = vld [vmem:[#allocation47_spill] sm:$0xff] }
 0x486   : > { %v3753_v50 = vsel %vm3737_vm9, %v3720_v31, %v3379_v20  ;;  %v3658_v55 = vsel %vm3638_vm7, %v3625_v36, %v12090_v3  ;;  %v3659_v8 = vsel %vm3638_vm7, %v3626_v59, %v12092_v33  ;;  %v3594_v31 = vsel %vm3572_vm5, %v3561_v41, %v12093_v61  ;;  %v12114_v6 = vld [vmem:[#allocation108_spill] sm:$0xff]  ;;  %v12115_v41 = vld [vmem:[#allocation162_spill] sm:$0xff] }
 0x487   : > { %v3389_v1 = vpop.permute.xlu1 %3388  ;;  %v3691_v32 = vsel %vm3671_vm8, %v3658_v55, %v12091_v27  ;;  %v3692_v16 = vsel %vm3671_vm8, %v3659_v8, %v12094_v58  ;;  %v3627_v26 = vsel %vm3605_vm6, %v3594_v31, %v12097_v30  ;;  %v3563_v62 = vsel %vm396_vm0, %v12110_v7, %v12109_v47  ;;  %v12116_v3 = vld [vmem:[#allocation172_spill] sm:$0xff]  ;;  %v12117_v55 = vld [vmem:[#allocation97_spill] sm:$0xff]  ;;  %v12119_v8 = vld [vmem:[#allocation90_spill] sm:$0xff] }
 0x488   : > { %v3724_v54 = vsel %vm3704_vm10, %v3691_v32, %v12095_v17  ;;  %v3660_v29 = vsel %vm3638_vm7, %v3627_v26, %v12102_v43  ;;  %v3596_v36 = vsel %vm3572_vm5, %v3563_v62, %v12113_v24  ;;  %v12118_v32 = vld [vmem:[#allocation167_spill] sm:$0xff]  ;;  %v12120_v31 = vld [vmem:[#allocation136_spill] sm:$0xff]  ;;  %v12132_v22 = vld [vmem:[#allocation14_spill] sm:$0xff] }
 0x489   : > { %v3475_v52 = vpop.permute.xlu0 %3474  ;;  %v3693_v12 = vsel %vm3671_vm8, %v3660_v29, %v12104_v53  ;;  %v12129_v29 = vld [vmem:[#allocation176_spill] sm:$0xff]  ;;  %v12136_v47 = vld [vmem:[#allocation22_spill] sm:$0xff] }
 0x48a   : > { %v3786_v0 = vsel %vm3770_vm11, %v3753_v50, %v3475_v52  ;;  %v3725_v50 = vsel %vm3704_vm10, %v3692_v16, %v12096_v51  ;;  %v3726_v34 = vsel %vm3704_vm10, %v3693_v12, %v12108_v56  ;;  %v12121_v16 = vld [vmem:[#allocation166_spill] sm:$0xff]  ;;  %v12137_v62 = vld [vmem:[#allocation132_spill] sm:$0xff] }
 0x48b   : > { %6397 = vmatmul.mubr.msk.f32.gmra.mrb[14].mxu1 %vm3812_vm12, %v3786_v0  ;;  %v3485_v40 = vpop.permute.xlu1 %3484  ;;  %v3758_v0 = vsel %vm3737_vm9, %v3725_v50, %v3389_v1  ;;  %v12123_v50 = vld [vmem:[#allocation85_spill] sm:$0xff]  ;;  %v12131_v12 = vld [vmem:[#allocation114_spill] sm:$0xff] }
 0x48c   : > { %6399 = vmatprep.mubr.msk.f32.mxu1 %vm3812_vm12, %v3787_v14  ;;  %v3791_v63 = vsel %vm3770_vm11, %v3758_v0, %v3485_v40 }
 0x48d   : > { %v3383_v21 = vpop.permute.xlu0 %3382 }
 0x48e   : > { %v3755_v19 = vsel %vm3737_vm9, %v3722_v57, %v3383_v21  ;;  %v3562_v21 = vsel %vm396_vm0, %v12099_v18, %v12098_v4  ;;  %v12107_v57 = vld [vmem:[#allocation11_spill] sm:$0xff]  ;;  %v12125_v4 = vld [vmem:[#allocation109_spill] sm:$0xff] }
 0x48f   : > { %v3393_v37 = vpop.permute.xlu1 %3392  ;;  %v3595_v9 = vsel %vm3572_vm5, %v3562_v21, %v12100_v48  ;;  %v12126_v48 = vld [vmem:[#allocation120_spill] sm:$0xff] }
 0x490   : > { %v3628_v15 = vsel %vm3605_vm6, %v3595_v9, %v12101_v44  ;;  %v12127_v9 = vld [vmem:[#allocation36_spill] sm:$0xff] }
 0x491   : > { %v3479_v25 = vpop.permute.xlu0 %3478  ;;  %v3661_v40 = vsel %vm3638_vm7, %v3628_v15, %v12103_v42  ;;  %v12128_v15 = vld [vmem:[#allocation134_spill] sm:$0xff] }
 0x492   : > { %v3788_v49 = vsel %vm3770_vm11, %v3755_v19, %v3479_v25  ;;  %v3694_v23 = vsel %vm3671_vm8, %v3661_v40, %v12107_v57  ;;  %v12111_v19 = vld [vmem:[#allocation174_spill] sm:$0xff]  ;;  %v12130_v40 = vld [vmem:[#allocation124_spill] sm:$0xff]  ;;  %v12133_v57 = vld [vmem:[#allocation179_spill] sm:$0xff] }
 0x493   : > { %6400 = vmatmul.mubr.msk.f32.gmra.mrb[16].mxu1 %vm3812_vm12, %v3788_v49  ;;  %v3489_v39 = vpop.permute.xlu1 %3488  ;;  %v3597_v25 = vsel %vm3572_vm5, %v3564_v2, %v12111_v19  ;;  %v3727_v49 = vsel %vm3704_vm10, %v3694_v23, %v12112_v38  ;;  %v12134_v23 = vld [vmem:[#allocation129_spill] sm:$0xff]  ;;  %v12138_v19 = vld [vmem:[#allocation39_spill] sm:$0xff] }
 0x494   : > { %6402 = vmatprep.mubr.msk.f32.mxu1 %vm3812_vm12, %v3789_v11  ;;  %v3760_v13 = vsel %vm3737_vm9, %v3727_v49, %v3393_v37  ;;  %v3630_v5 = vsel %vm3605_vm6, %v3597_v25, %v12114_v6  ;;  %v3565_v37 = vsel %vm396_vm0, %v12117_v55, %v12116_v3  ;;  %v3568_v56 = vsel %vm396_vm0, %v12134_v23, %v12133_v57  ;;  %v12139_v38 = vld [vmem:[#allocation69_spill] sm:$0xff]  ;;  %v12143_v55 = vld [vmem:[#allocation175_spill] sm:$0xff]  ;;  %v12161_v23 = vld [vmem:[#allocation112_spill] sm:$0xff] }
 0x495   : > { %v3387_v20 = vpop.permute.xlu0 %3386  ;;  %v3793_v59 = vsel %vm3770_vm11, %v3760_v13, %v3489_v39  ;;  %v3663_v58 = vsel %vm3638_vm7, %v3630_v5, %v12120_v31  ;;  %v3598_v17 = vsel %vm3572_vm5, %v3565_v37, %v12121_v16  ;;  %v3567_v25 = vsel %vm396_vm0, %v12138_v19, %v12137_v62  ;;  %v12141_v5 = vld [vmem:[#allocation122_spill] sm:$0xff]  ;;  %v12148_v16 = vld [vmem:[#allocation128_spill] sm:$0xff]  ;;  %v12164_v19 = vld [vmem:[#allocation125_spill] sm:$0xff] }
 0x496   : > { %v3757_v52 = vsel %vm3737_vm9, %v3724_v54, %v3387_v20  ;;  %v3629_v20 = vsel %vm3605_vm6, %v3596_v36, %v12115_v41  ;;  %v12122_v54 = vld [vmem:[#allocation99_spill] sm:$0xff]  ;;  %v3631_v18 = vsel %vm3605_vm6, %v3598_v17, %v12125_v4  ;;  %v3601_v49 = vsel %vm3572_vm5, %v3568_v56, %v12139_v38  ;;  %v12147_v31 = vld [vmem:[#allocation10_spill] sm:$0xff]  ;;  %v12162_v56 = vld [vmem:[#allocation29_spill] sm:$0xff] }
 0x497   : > { %v3397_v14 = vpop.permute.xlu1 %3396  ;;  %v3662_v39 = vsel %vm3638_vm7, %v3629_v20, %v12118_v32  ;;  %v3696_v51 = vsel %vm3671_vm8, %v3663_v58, %v12122_v54  ;;  %v3664_v53 = vsel %vm3638_vm7, %v3631_v18, %v12130_v40  ;;  %v3600_v41 = vsel %vm3572_vm5, %v3567_v25, %v12141_v5  ;;  %v12142_v20 = vld [vmem:[#allocation98_spill] sm:$0xff]  ;;  %v12145_v32 = vld [vmem:[#allocation127_spill] sm:$0xff]  ;;  %v12165_v38 = vld [vmem:[#allocation52_spill] sm:$0xff] }
 0x498   : > { %v3695_v61 = vsel %vm3671_vm8, %v3662_v39, %v12119_v8  ;;  %v3697_v10 = vsel %vm3671_vm8, %v3664_v53, %v12131_v12  ;;  %v3634_v3 = vsel %vm3605_vm6, %v3601_v49, %v12142_v20  ;;  %v3633_v37 = vsel %vm3605_vm6, %v3600_v41, %v12143_v55  ;;  %v12146_v8 = vld [vmem:[#allocation184_spill] sm:$0xff]  ;;  %v12149_v54 = vld [vmem:[#allocation182_spill] sm:$0xff]  ;;  %v12168_v5 = vld [vmem:[#allocation177_spill] sm:$0xff] }
 0x499   : > { %v3483_v46 = vpop.permute.xlu0 %3482  ;;  %v3730_v7 = vsel %vm3704_vm10, %v3697_v10, %v12136_v47  ;;  %v3667_v17 = vsel %vm3638_vm7, %v3634_v3, %v12148_v16  ;;  %v12158_v40 = vld [vmem:[#allocation118_spill] sm:$0xff]  ;;  %v12159_v12 = vld [vmem:[#allocation12_spill] sm:$0xff]  ;;  %v6544_v49 = vunpack.i.h.bf16 %v12165_v38  ;;  %v12169_v20 = vld [vmem:[#allocation187_spill] sm:$0xff] }
 0x49a   : > { %v3790_v60 = vsel %vm3770_vm11, %v3757_v52, %v3483_v46  ;;  %v3728_v52 = vsel %vm3704_vm10, %v3695_v61, %v12123_v50  ;;  %v12124_v46 = vld [vmem:[#allocation25_spill] sm:$0xff]  ;;  %v3666_v61 = vsel %vm3638_vm7, %v3633_v37, %v12146_v8  ;;  %v12150_v50 = vld [vmem:[#allocation26_spill] sm:$0xff]  ;;  %v12170_v55 = vld [vmem:[#allocation79_spill] sm:$0xff] }
 0x49b   : > { %6403 = vmatmul.mubr.msk.f32.gmra.mrb[18].mxu1 %vm3812_vm12, %v3790_v60  ;;  %v3493_v35 = vpop.permute.xlu1 %3492  ;;  %v3729_v0 = vsel %vm3704_vm10, %v3696_v51, %v12124_v46  ;;  %v3699_v58 = vsel %vm3671_vm8, %v3666_v61, %v12147_v31  ;;  %v12151_v46 = vld [vmem:[#allocation82_spill] sm:$0xff] }
 0x49c   : > { %6405 = vmatprep.mubr.msk.f32.mxu1 %vm3812_vm12, %v3791_v63  ;;  %v3762_v26 = vsel %vm3737_vm9, %v3729_v0, %v3397_v14  ;;  %v3732_v0 = vsel %vm3704_vm10, %v3699_v58, %v12151_v46 }
 0x49d   : > { %v3391_v1 = vpop.permute.xlu0 %3390  ;;  %v3795_v21 = vsel %vm3770_vm11, %v3762_v26, %v3493_v35 }
 0x49e   : > { %v3759_v11 = vsel %vm3737_vm9, %v3726_v34, %v3391_v1  ;;  %v3566_v1 = vsel %vm396_vm0, %v12127_v9, %v12126_v48  ;;  %v12135_v34 = vld [vmem:[#allocation101_spill] sm:$0xff]  ;;  %v12153_v48 = vld [vmem:[#allocation100_spill] sm:$0xff] }
 0x49f   : > { %v3401_v33 = vpop.permute.xlu1 %3400  ;;  %v3599_v43 = vsel %vm3572_vm5, %v3566_v1, %v12128_v15  ;;  %v12154_v15 = vld [vmem:[#allocation5_spill] sm:$0xff] }
 0x4a0   : > { %v3632_v42 = vsel %vm3605_vm6, %v3599_v43, %v12129_v29  ;;  %6561 = vrot.lane.b32.xlu0 %v12154_v15, %s6589_s21  ;;  %v12155_v43 = vld [vmem:[#allocation4_spill] sm:$0xff]  ;;  %v12157_v29 = vld [vmem:[#allocation31_spill] sm:$0xff] }
 0x4a1   : > { %v3487_v45 = vpop.permute.xlu0 %3486  ;;  %v3665_v2 = vsel %vm3638_vm7, %v3632_v42, %v12132_v22  ;;  %6556 = vrot.lane.b32.xlu1 %v12155_v43, %s6595_s27  ;;  %v12160_v22 = vld [vmem:[#allocation110_spill] sm:$0xff] }
 0x4a2   : > { %v3792_v28 = vsel %vm3770_vm11, %v3759_v11, %v3487_v45  ;;  %v3698_v35 = vsel %vm3671_vm8, %v3665_v2, %v12135_v34  ;;  %v12140_v11 = vld [vmem:[#allocation116_spill] sm:$0xff]  ;;  %v3570_v34 = vsel %vm396_vm0, %v12162_v56, %v12161_v23 }
 0x4a3   : > { %6406 = vmatmul.mubr.msk.f32.gmra.mrb[20].mxu1 %vm3812_vm12, %v3792_v28  ;;  %v3497_v44 = vpop.permute.xlu1 %3496  ;;  %v3731_v45 = vsel %vm3704_vm10, %v3698_v35, %v12140_v11  ;;  %v12163_v35 = vld [vmem:[#allocation115_spill] sm:$0xff]  ;;  %v3603_v25 = vsel %vm3572_vm5, %v3570_v34, %v12164_v19  ;;  %v6543_v11 = vunpack.i.l.bf16 %v12165_v38 }
 0x4a4   : > { %6408 = vmatprep.mubr.msk.f32.mxu1 %vm3812_vm12, %v3793_v59  ;;  %v3764_v59 = vsel %vm3737_vm9, %v3731_v45, %v3401_v33 }
 0x4a5   : > { %v3395_v27 = vpop.permute.xlu0 %3394  ;;  %v3797_v6 = vsel %vm3770_vm11, %v3764_v59, %v3497_v44  ;;  %v12167_v59 = vld [vmem:[#allocation171_spill] sm:$0xff] }
 0x4a6   : > { %v3761_v60 = vsel %vm3737_vm9, %v3728_v52, %v3395_v27  ;;  %v12144_v27 = vld [vmem:[#allocation64_spill] sm:$0xff]  ;;  %v3700_v52 = vsel %vm3671_vm8, %v3667_v17, %v12150_v50 }
 0x4a7   : > { %v3405_v24 = vpop.permute.xlu1 %3404  ;;  %v3569_v39 = vsel %vm396_vm0, %v12145_v32, %v12144_v27  ;;  %v12171_v27 = vld [vmem:[#allocation94_spill] sm:$0xff] }
 0x4a8   : > { %v3602_v51 = vsel %vm3572_vm5, %v3569_v39, %v12149_v54 }
 0x4a9   : > { %v3491_v30 = vpop.permute.xlu0 %3490  ;;  %v3635_v9 = vsel %vm3605_vm6, %v3602_v51, %v12153_v48  ;;  %v9725_v51 = vld [vmem:[%s11497_s5] ss:$0 sm:$0xff] }
 0x4aa   : > { %v3794_v63 = vsel %vm3770_vm11, %v3761_v60, %v3491_v30  ;;  %v12152_v30 = vld [vmem:[#allocation40_spill] sm:$0xff]  ;;  %v3668_v53 = vsel %vm3638_vm7, %v3635_v9, %v12158_v40 }
 0x4ab   : > { %6409 = vmatmul.mubr.msk.f32.gmra.mrb[22].mxu1 %vm3812_vm12, %v3794_v63  ;;  %v3501_v60 = vpop.permute.xlu1 %3500  ;;  %v3733_v26 = vsel %vm3704_vm10, %v3700_v52, %v12152_v30  ;;  %v3701_v10 = vsel %vm3671_vm8, %v3668_v53, %v12159_v12  ;;  %v9730_v52 = vld [vmem:[%s11498_s6] ss:$0 sm:$0xff] }
 0x4ac   : > { %6411 = vmatprep.mubr.msk.f32.mxu1 %vm3812_vm12, %v3795_v21  ;;  %v3766_v18 = vsel %vm3737_vm9, %v3733_v26, %v3405_v24  ;;  %v3734_v2 = vsel %vm3704_vm10, %v3701_v10, %v12160_v22 }
 0x4ad   : > { %v3399_v14 = vpop.permute.xlu0 %3398  ;;  %v3799_v1 = vsel %vm3770_vm11, %v3766_v18, %v3501_v60 }
 0x4ae   : > { %v3763_v13 = vsel %vm3737_vm9, %v3730_v7, %v3399_v14  ;;  %v12156_v14 = vld [vmem:[#allocation123_spill] sm:$0xff] }
 0x4af   : > { %v3571_v42 = vsel %vm396_vm0, %v12157_v29, %v12156_v14  ;;  %v6547_v57 = vpop.permute.xlu1 %6546 }
 0x4b0   : > { %v3604_v47 = vsel %vm3572_vm5, %v3571_v42, %v12163_v35 }
 0x4b1   : > { %v3495_v28 = vpop.permute.xlu0 %3494  ;;  %v3637_v24 = vsel %vm3605_vm6, %v3604_v47, %v12167_v59 }
 0x4b2   : > { %v3796_v36 = vsel %vm3770_vm11, %v3763_v13, %v3495_v28  ;;  %v12166_v13 = vld [vmem:[#allocation170_spill] sm:$0xff]  ;;  %v3670_v41 = vsel %vm3638_vm7, %v3637_v24, %v12168_v5 }
 0x4b3   : > { %6412 = vmatmul.mubr.msk.f32.gmra.mrb[24].mxu1 %vm3812_vm12, %v3796_v36  ;;  %v3636_v28 = vsel %vm3605_vm6, %v3603_v25, %v12166_v13  ;;  %v6549_v36 = vunpack.i.h.bf16 %v6547_v57  ;;  %v3703_v37 = vsel %vm3671_vm8, %v3670_v41, %v12170_v55 }
 0x4b4   : > { %6414 = vmatprep.mubr.msk.f32.mxu1 %vm3812_vm12, %v3797_v6  ;;  %v6548_v6 = vunpack.i.l.bf16 %v6547_v57  ;;  %v3669_v3 = vsel %vm3638_vm7, %v3636_v28, %v12169_v20  ;;  %v3736_v31 = vsel %vm3704_vm10, %v3703_v37, %v6544_v49 }
 0x4b5   : > { %v3403_v33 = vpop.permute.xlu0 %3402  ;;  %v3702_v32 = vsel %vm3671_vm8, %v3669_v3, %v12171_v27  ;;  %v3769_v16 = vsel %vm3737_vm9, %v3736_v31, %v6549_v36 }
 0x4b6   : > { %v3765_v63 = vsel %vm3737_vm9, %v3732_v0, %v3403_v33  ;;  %v3735_v61 = vsel %vm3704_vm10, %v3702_v32, %v6543_v11 }
 0x4b7   : > { %v3768_v58 = vsel %vm3737_vm9, %v3735_v61, %v6548_v6 }
 0x4b9   : > { %v3499_v4 = vpop.permute.xlu0 %3498 }
 0x4ba   : > { %v3798_v21 = vsel %vm3770_vm11, %v3765_v63, %v3499_v4 }
 0x4bb   : > { %6415 = vmatmul.mubr.msk.f32.gmra.mrb[26].mxu1 %vm3812_vm12, %v3798_v21 }
 0x4bc   : > { %6417 = vmatprep.mubr.msk.f32.mxu1 %vm3812_vm12, %v3799_v1 }
 0x4bd   : > { %v3407_v44 = vpop.permute.xlu0 %3406 }
 0x4be   : > { %v3767_v7 = vsel %vm3737_vm9, %v3734_v2, %v3407_v44 }
 0x4c1   : > { %v3503_v62 = vpop.permute.xlu0 %3502 }
 0x4c2   : > { %v3800_v45 = vsel %vm3770_vm11, %v3767_v7, %v3503_v62 }
 0x4c3   : > { %6418 = vmatmul.mubr.msk.f32.gmra.mrb[28].mxu1 %vm3812_vm12, %v3800_v45 }
 0x4c5   : > { %v6552_v39 = vpop.permute.xlu0 %6551 }
 0x4c6   : > { %v6554_v33 = vunpack.i.h.bf16 %v6552_v39  ;;  %v6553_v8 = vunpack.i.l.bf16 %v6552_v39 }
 0x4c8   : > { %v3801_v17 = vsel %vm3770_vm11, %v3768_v58, %v6553_v8  ;;  %v3802_v54 = vsel %vm3770_vm11, %v3769_v16, %v6554_v33 }
 0x4c9   : > { %6420 = vmatprep.mubr.msk.f32.mxu1 %vm3812_vm12, %v3801_v17 }
 0x4ca   : > { %6421 = vmatmul.mubr.msk.f32.gmra.mrb[30].mxu1 %vm3812_vm12, %v3802_v54 }
 0x52e   : > { %v6377_v50 = vpop.f32.mrb[0].mxu1 }
 0x52f   : > { %v4142_v46 = vmul.f32 %v6377_v50, %v9725_v51  ;;  %v3975_v0 = vpop.f32.mrb[1].mxu1 }
 0x530   : > { %v4141_v60 = vmul.f32 %v9725_v51, %v3975_v0 }
 0x531   : > { %v4181_v30 = vadd.f32 %v9730_v52, %v4142_v46 }
 0x532   : > { %v4180_v26 = vadd.f32 %v9730_v52, %v4141_v60  ;;  %v6380_v63 = vpop.f32.mrb[2].mxu1 }
 0x533   : > { %v4213_v4 = vmax.f32 %v4181_v30, 0.0  ;;  %v4144_v18 = vmul.f32 %v6380_v63, %v9725_v51  ;;  %v3985_v21 = vpop.f32.mrb[3].mxu1 }
 0x534   : > { %v4212_v48 = vmax.f32 %v4180_v26, 0.0  ;;  %v4143_v9 = vmul.f32 %v9725_v51, %v3985_v21 }
 0x535   : > { %v4277_v1 = vrot.slane %v4213_v4, 7  ;;  %v4183_v44 = vadd.f32 %v9730_v52, %v4144_v18 }
 0x536   : > { %v4276_v14 = vrot.slane %v4212_v48, 7  ;;  %v4182_v29 = vadd.f32 %v9730_v52, %v4143_v9  ;;  %v6383_v42 = vpop.f32.mrb[4].mxu1 }
 0x537   : > { %v4387_v40 = vsel %vm1438_vm1, %v4277_v1, 0.0  ;;  %v4215_v53 = vmax.f32 %v4183_v44, 0.0  ;;  %v4146_v12 = vmul.f32 %v6383_v42, %v9725_v51  ;;  %v3995_v10 = vpop.f32.mrb[5].mxu1 }
 0x538   : > { %v4214_v22 = vmax.f32 %v4182_v29, 0.0  ;;  %v4145_v2 = vmul.f32 %v9725_v51, %v3995_v10  ;;  %v4436_v57 = vrot.slane %v4387_v40, 1  ;;  %v9745_v56 = vsel %vm1438_vm1, 0.0, %v4276_v14 }
 0x539   : > { %v4185_v23 = vadd.f32 %v9730_v52, %v4146_v12  ;;  %12172 = vst [vmem:[#allocation18_spill] sm:$0xff] %v9745_v56  ;;  %v9748_v34 = vsel %vm1438_vm1, %v4276_v14, %v4277_v1  ;;  %v4280_v35 = vrot.slane %v4215_v53, 7  ;;  %4787 = vrot.lane.b32.xlu1 %v9745_v56, %s6602_s20  ;;  %v4433_v62 = vrot.slane %v9745_v56, 1 }
 0x53a   : > { %12173 = vst [vmem:[#allocation20_spill] sm:$0xff] %v9748_v34  ;;  %v4279_v47 = vrot.slane %v4214_v22, 7  ;;  %v4184_v7 = vadd.f32 %v9730_v52, %v4145_v2  ;;  %4789 = vrot.lane.b32.xlu0 %v9748_v34, %s6602_s20  ;;  %v4434_v25 = vrot.slane %v9748_v34, 1  ;;  %v4511_v38 = vrot.slane %v4387_v40, 2 }
 0x53b   : > { %v4217_v19 = vmax.f32 %v4185_v23, 0.0  ;;  %v4508_v11 = vrot.slane %v9745_v56, 2  ;;  %v4509_v45 = vrot.slane %v9748_v34, 2  ;;  %v4388_v54 = vsel %vm1438_vm1, %v4280_v35, 0.0 }
 0x53c   : > { %v4216_v49 = vmax.f32 %v4184_v7, 0.0  ;;  %v4437_v13 = vsel %vm2598_vm2, %v4434_v25, %v4436_v57  ;;  %v4435_v28 = vsel %vm2598_vm2, %v4433_v62, %v4434_v25  ;;  %v9766_v6 = vsel %vm1438_vm1, %v4279_v47, %v4280_v35 }
 0x53d   : > { %v4283_v59 = vrot.slane %v4217_v19, 7  ;;  %4601 = vrot.lane.b32.xlu1 %v4437_v13, %s6595_s27  ;;  %v4510_v55 = vsel %vm2679_vm3, %v4508_v11, %v4509_v45  ;;  %v4512_v37 = vsel %vm2679_vm3, %v4509_v45, %v4511_v38  ;;  %v9796_v0 = vsel %vm1438_vm1, 0.0, %v4279_v47 }
 0x53e   : > { %v9761_v24 = vrot.slane %v4216_v49, 7  ;;  %4599 = vrot.lane.b32.xlu0 %v4435_v28, %s6595_s27  ;;  %v6386_v36 = vpop.f32.mrb[6].mxu1  ;;  %v4441_v26 = vrot.slane %v4388_v54, 1  ;;  %v4439_v4 = vrot.slane %v9766_v6, 1  ;;  %v4438_v21 = vrot.slane %v9796_v0, 1 }
 0x53f   : > { %v4148_v5 = vmul.f32 %v6386_v36, %v9725_v51  ;;  %v4005_v41 = vpop.f32.mrb[7].mxu1  ;;  %v4516_v14 = vrot.slane %v4388_v54, 2  ;;  %v4513_v40 = vrot.slane %v9796_v0, 2  ;;  %v4514_v10 = vrot.slane %v9766_v6, 2 }
 0x540   : > { %v4147_v20 = vmul.f32 %v9725_v51, %v4005_v41  ;;  %v9778_v32 = vsel %vm1438_vm1, %v9761_v24, %v4283_v59  ;;  %v9814_v42 = vsel %vm2598_vm2, %v4439_v4, %v4441_v26  ;;  %v9819_v12 = vsel %vm2598_vm2, %v4438_v21, %v4439_v4 }
 0x541   : > { %v4187_v3 = vadd.f32 %v9730_v52, %v4148_v5  ;;  %4695 = vrot.lane.b32.xlu1 %v4510_v55, %s6589_s21  ;;  %v4389_v35 = vsel %vm1438_vm1, %v4283_v59, 0.0  ;;  %v9836_v7 = vsel %vm2679_vm3, %v4513_v40, %v4514_v10  ;;  %v9839_v62 = vsel %vm2679_vm3, %v4514_v10, %v4516_v14 }
 0x542   : > { %v4186_v27 = vadd.f32 %v9730_v52, %v4147_v20  ;;  %4697 = vrot.lane.b32.xlu0 %v4512_v37, %s6589_s21  ;;  %v9843_v19 = vsel %vm1438_vm1, 0.0, %v9761_v24  ;;  %v4446_v45 = vrot.slane %v4389_v35, 1  ;;  %v4444_v59 = vrot.slane %v9778_v32, 1 }
 0x543   : > { %v4219_v39 = vmax.f32 %v4187_v3, 0.0  ;;  %v4443_v24 = vrot.slane %v9843_v19, 1  ;;  %v4521_v20 = vrot.slane %v4389_v35, 2 }
 0x544   : > { %v4218_v33 = vmax.f32 %v4186_v27, 0.0  ;;  %v9870_v27 = vsel %vm2598_vm2, %v4444_v59, %v4446_v45 }
 0x545   : > { %v9780_v8 = vrot.slane %v4219_v39, 7  ;;  %4885 = vrot.lane.b32.xlu1 %v4437_v13, %s6590_s22  ;;  %v9873_v39 = vsel %vm2598_vm2, %v4443_v24, %v4444_v59 }
 0x546   : > { %v9782_v61 = vrot.slane %v4218_v33, 7  ;;  %4883 = vrot.lane.b32.xlu0 %v4435_v28, %s6590_s22  ;;  %v6389_v31 = vpop.f32.mrb[8].mxu1  ;;  %v4519_v33 = vrot.slane %v9778_v32, 2 }
 0x547   : > { %v4150_v58 = vmul.f32 %v6389_v31, %v9725_v51  ;;  %v4015_v16 = vpop.f32.mrb[9].mxu1 }
 0x548   : > { %v4149_v17 = vmul.f32 %v9725_v51, %v4015_v16  ;;  %v9793_v46 = vsel %vm1438_vm1, %v9782_v61, %v9780_v8  ;;  %v9900_v4 = vsel %vm1438_vm1, 0.0, %v9782_v61 }
 0x549   : > { %v4189_v50 = vadd.f32 %v9730_v52, %v4150_v58  ;;  %4981 = vrot.lane.b32.xlu1 %v4512_v37, %s6603_s23  ;;  %v4524_v35 = vrot.slane %v9793_v46, 2 }
 0x54a   : > { %v4188_v60 = vadd.f32 %v9730_v52, %v4149_v17  ;;  %4979 = vrot.lane.b32.xlu0 %v4510_v55, %s6603_s23  ;;  %v4518_v55 = vrot.slane %v9843_v19, 2 }
 0x54b   : > { %v4221_v30 = vmax.f32 %v4189_v50, 0.0 }
 0x54c   : > { %v4220_v63 = vmax.f32 %v4188_v60, 0.0  ;;  %v9886_v60 = vsel %vm2679_vm3, %v4518_v55, %v4519_v33 }
 0x54d   : > { %v9802_v18 = vrot.slane %v4221_v30, 7  ;;  %4791 = vrot.lane.b32.xlu1 %v9796_v0, %s6602_s20  ;;  %v9889_v30 = vsel %vm2679_vm3, %v4519_v33, %v4521_v20 }
 0x54e   : > { %v9805_v48 = vrot.slane %v4220_v63, 7  ;;  %4793 = vrot.lane.b32.xlu0 %v9766_v6, %s6602_s20  ;;  %v6392_v9 = vpop.f32.mrb[10].mxu1  ;;  %v4390_v63 = vsel %vm1438_vm1, %v9780_v8, 0.0  ;;  %v4448_v8 = vrot.slane %v9900_v4, 1 }
 0x54f   : > { %v4152_v1 = vmul.f32 %v6392_v9, %v9725_v51  ;;  %v4025_v44 = vpop.f32.mrb[11].mxu1  ;;  %v4391_v24 = vsel %vm1438_vm1, %v9802_v18, 0.0 }
 0x550   : > { %v4151_v29 = vmul.f32 %v9725_v51, %v4025_v44  ;;  %v9825_v22 = vsel %vm1438_vm1, %v9805_v48, %v9802_v18  ;;  %v4451_v44 = vrot.slane %v4390_v63, 1 }
 0x551   : > { %v4191_v53 = vadd.f32 %v9730_v52, %v4152_v1  ;;  %4605 = vrot.lane.b32.xlu1 %v9814_v42, %s6595_s27 }
 0x552   : > { %v4190_v2 = vadd.f32 %v9730_v52, %v4151_v29  ;;  %4603 = vrot.lane.b32.xlu0 %v9819_v12, %s6595_s27  ;;  %v4449_v29 = vrot.slane %v9793_v46, 1 }
 0x553   : > { %v4223_v57 = vmax.f32 %v4191_v53, 0.0 }
 0x554   : > { %v4222_v23 = vmax.f32 %v4190_v2, 0.0  ;;  %v4526_v2 = vrot.slane %v4390_v63, 2 }
 0x555   : > { %v9833_v47 = vrot.slane %v4223_v57, 7  ;;  %4699 = vrot.lane.b32.xlu1 %v9836_v7, %s6589_s21 }
 0x556   : > { %v9845_v25 = vrot.slane %v4222_v23, 7  ;;  %4701 = vrot.lane.b32.xlu0 %v9839_v62, %s6589_s21  ;;  %v6395_v38 = vpop.f32.mrb[12].mxu1  ;;  %v4523_v23 = vrot.slane %v9900_v4, 2  ;;  %v9946_v20 = vsel %vm2679_vm3, %v4524_v35, %v4526_v2 }
 0x557   : > { %v4154_v49 = vmul.f32 %v6395_v38, %v9725_v51  ;;  %v4035_v11 = vpop.f32.mrb[13].mxu1 }
 0x558   : > { %v4153_v13 = vmul.f32 %v9725_v51, %v4035_v11  ;;  %v9859_v36 = vsel %vm1438_vm1, %v9845_v25, %v9833_v47  ;;  %v9926_v11 = vsel %vm2598_vm2, %v4448_v8, %v4449_v29 }
 0x559   : > { %v4193_v28 = vadd.f32 %v9730_v52, %v4154_v49  ;;  %4795 = vrot.lane.b32.xlu1 %v9843_v19, %s6602_s20  ;;  %v9923_v49 = vsel %vm2598_vm2, %v4449_v29, %v4451_v44 }
 0x55a   : > { %v4192_v5 = vadd.f32 %v9730_v52, %v4153_v13  ;;  %4797 = vrot.lane.b32.xlu0 %v9778_v32, %s6602_s20 }
 0x55b   : > { %v4225_v41 = vmax.f32 %v4193_v28, 0.0 }
 0x55c   : > { %v4224_v3 = vmax.f32 %v4192_v5, 0.0 }
 0x55d   : > { %v9867_v37 = vrot.slane %v4225_v41, 7  ;;  %4609 = vrot.lane.b32.xlu1 %v9870_v27, %s6595_s27  ;;  %v9943_v41 = vsel %vm2679_vm3, %v4523_v23, %v4524_v35 }
 0x55e   : > { %v9876_v31 = vrot.slane %v4224_v3, 7  ;;  %4607 = vrot.lane.b32.xlu0 %v9873_v39, %s6595_s27  ;;  %v6398_v58 = vpop.f32.mrb[14].mxu1  ;;  %v9950_v3 = vsel %vm1438_vm1, 0.0, %v9805_v48  ;;  %v4454_v48 = vrot.slane %v9825_v22, 1 }
 0x55f   : > { %v4156_v16 = vmul.f32 %v6398_v58, %v9725_v51  ;;  %v4045_v17 = vpop.f32.mrb[15].mxu1  ;;  %v4528_v29 = vrot.slane %v9950_v3, 2 }
 0x560   : > { %v4155_v54 = vmul.f32 %v9725_v51, %v4045_v17  ;;  %v9894_v26 = vsel %vm1438_vm1, %v9876_v31, %v9867_v37 }
 0x561   : > { %v4195_v50 = vadd.f32 %v9730_v52, %v4156_v16  ;;  %12174 = vst [vmem:[#allocation37_spill] sm:$0xff] %v9894_v26  ;;  %4703 = vrot.lane.b32.xlu1 %v9886_v60, %s6589_s21  ;;  %v4456_v16 = vrot.slane %v4391_v24, 1  ;;  %v4539_v15 = vrot.slane %v9894_v26, 2 }
 0x562   : > { %v4194_v21 = vadd.f32 %v9730_v52, %v4155_v54  ;;  %4705 = vrot.lane.b32.xlu0 %v9889_v30, %s6589_s21 }
 0x563   : > { %v4227_v9 = vmax.f32 %v4195_v50, 0.0  ;;  %v4453_v50 = vrot.slane %v9950_v3, 1 }
 0x564   : > { %v4226_v1 = vmax.f32 %v4194_v21, 0.0 }
 0x565   : > { %v9907_v14 = vrot.slane %v4227_v9, 7  ;;  %4799 = vrot.lane.b32.xlu1 %v9900_v4, %s6602_s20 }
 0x566   : > { %v9911_v40 = vrot.slane %v4226_v1, 7  ;;  %4801 = vrot.lane.b32.xlu0 %v9793_v46, %s6602_s20  ;;  %v6401_v61 = vpop.f32.mrb[16].mxu1  ;;  %v4531_v1 = vrot.slane %v4391_v24, 2 }
 0x567   : > { %v4158_v53 = vmul.f32 %v6401_v61, %v9725_v51  ;;  %v4055_v10 = vpop.f32.mrb[17].mxu1  ;;  %v9977_v61 = vsel %vm2598_vm2, %v4454_v48, %v4456_v16 }
 0x568   : > { %v4157_v57 = vmul.f32 %v9725_v51, %v4055_v10  ;;  %v9931_v45 = vsel %vm1438_vm1, %v9911_v40, %v9907_v14  ;;  %v4529_v10 = vrot.slane %v9825_v22, 2 }
 0x569   : > { %v4197_v38 = vadd.f32 %v9730_v52, %v4158_v53  ;;  %12175 = vst [vmem:[#allocation65_spill] sm:$0xff] %v9931_v45  ;;  %4613 = vrot.lane.b32.xlu1 %v9923_v49, %s6595_s27  ;;  %v9980_v53 = vsel %vm2598_vm2, %v4453_v50, %v4454_v48  ;;  %v4459_v50 = vrot.slane %v9859_v36, 1 }
 0x56a   : > { %v4196_v13 = vadd.f32 %v9730_v52, %v4157_v57  ;;  %4611 = vrot.lane.b32.xlu0 %v9926_v11, %s6595_s27 }
 0x56b   : > { %v4229_v28 = vmax.f32 %v4197_v38, 0.0 }
 0x56c   : > { %v4228_v59 = vmax.f32 %v4196_v13, 0.0 }
 0x56d   : > { %v9940_v5 = vrot.slane %v4229_v28, 7  ;;  %4707 = vrot.lane.b32.xlu1 %v9943_v41, %s6589_s21  ;;  %v9993_v28 = vsel %vm2679_vm3, %v4528_v29, %v4529_v10 }
 0x56e   : > { %v9952_v55 = vrot.slane %v4228_v59, 7  ;;  %4709 = vrot.lane.b32.xlu0 %v9946_v20, %s6589_s21  ;;  %v6404_v18 = vpop.f32.mrb[18].mxu1  ;;  %v9996_v59 = vsel %vm2679_vm3, %v4529_v10, %v4531_v1 }
 0x56f   : > { %v4160_v33 = vmul.f32 %v6404_v18, %v9725_v51  ;;  %v4065_v58 = vpop.f32.mrb[19].mxu1  ;;  %v4392_v18 = vsel %vm1438_vm1, %v9833_v47, 0.0 }
 0x570   : > { %v4159_v17 = vmul.f32 %v9725_v51, %v4065_v58  ;;  %v9966_v63 = vsel %vm1438_vm1, %v9952_v55, %v9940_v5 }
 0x571   : > { %v4199_v54 = vadd.f32 %v9730_v52, %v4160_v33  ;;  %12176 = vst [vmem:[#allocation67_spill] sm:$0xff] %v9966_v63  ;;  %4803 = vrot.lane.b32.xlu1 %v9950_v3, %s6602_s20  ;;  %v10007_v33 = vsel %vm1438_vm1, 0.0, %v9845_v25 }
 0x572   : > { %v4198_v21 = vadd.f32 %v9730_v52, %v4159_v17  ;;  %4805 = vrot.lane.b32.xlu0 %v9825_v22, %s6602_s20  ;;  %v4458_v47 = vrot.slane %v10007_v33, 1  ;;  %v4533_v10 = vrot.slane %v10007_v33, 2 }
 0x573   : > { %v4231_v9 = vmax.f32 %v4199_v54, 0.0  ;;  %v4461_v54 = vrot.slane %v4392_v18, 1 }
 0x574   : > { %v4230_v44 = vmax.f32 %v4198_v21, 0.0 }
 0x575   : > { %v9974_v8 = vrot.slane %v4231_v9, 7  ;;  %4617 = vrot.lane.b32.xlu1 %v9977_v61, %s6595_s27 }
 0x576   : > { %v9983_v2 = vrot.slane %v4230_v44, 7  ;;  %4615 = vrot.lane.b32.xlu0 %v9980_v53, %s6595_s27  ;;  %v6407_v57 = vpop.f32.mrb[20].mxu1  ;;  %v4536_v44 = vrot.slane %v4392_v18, 2 }
 0x577   : > { %v4162_v23 = vmul.f32 %v6407_v57, %v9725_v51  ;;  %v4075_v35 = vpop.f32.mrb[21].mxu1  ;;  %v4534_v57 = vrot.slane %v9859_v36, 2 }
 0x578   : > { %v4161_v38 = vmul.f32 %v9725_v51, %v4075_v35  ;;  %v10001_v24 = vsel %vm1438_vm1, %v9983_v2, %v9974_v8 }
 0x579   : > { %v4201_v13 = vadd.f32 %v9730_v52, %v4162_v23  ;;  %12177 = vst [vmem:[#allocation45_spill] sm:$0xff] %v10001_v24  ;;  %4711 = vrot.lane.b32.xlu1 %v9993_v28, %s6589_s21 }
 0x57a   : > { %v4200_v58 = vadd.f32 %v9730_v52, %v4161_v38  ;;  %4713 = vrot.lane.b32.xlu0 %v9996_v59, %s6589_s21  ;;  %v10035_v38 = vsel %vm2598_vm2, %v4459_v50, %v4461_v54 }
 0x57b   : > { %v4233_v16 = vmax.f32 %v4201_v13, 0.0  ;;  %v10038_v13 = vsel %vm2598_vm2, %v4458_v47, %v4459_v50  ;;  %v10053_v50 = vsel %vm2679_vm3, %v4534_v57, %v4536_v44  ;;  %v10057_v47 = vsel %vm1438_vm1, 0.0, %v9876_v31 }
 0x57c   : > { %v4232_v17 = vmax.f32 %v4200_v58, 0.0  ;;  %12179 = vst [vmem:[#allocation141_spill] sm:$0xff] %v10053_v50  ;;  %12180 = vst [vmem:[#allocation155_spill] sm:$0xff] %v10057_v47 }
 0x57d   : > { %v10014_v48 = vrot.slane %v4233_v16, 7  ;;  %4807 = vrot.lane.b32.xlu1 %v10007_v33, %s6602_s20  ;;  %v10046_v16 = vsel %vm2679_vm3, %v4533_v10, %v4534_v57 }
 0x57e   : > { %v10018_v21 = vrot.slane %v4232_v17, 7  ;;  %4809 = vrot.lane.b32.xlu0 %v9859_v36, %s6602_s20  ;;  %v6410_v25 = vpop.f32.mrb[22].mxu1  ;;  %v4393_v17 = vsel %vm1438_vm1, %v9867_v37, 0.0 }
 0x57f   : > { %v4164_v9 = vmul.f32 %v6410_v25, %v9725_v51  ;;  %v4085_v1 = vpop.f32.mrb[23].mxu1  ;;  %v4541_v43 = vrot.slane %v4393_v17, 2 }
 0x580   : > { %v10028_v29 = vsel %vm1438_vm1, %v10018_v21, %v10014_v48  ;;  %v4163_v35 = vmul.f32 %v9725_v51, %v4085_v1 }
 0x581   : > { %12178 = vst [vmem:[#allocation131_spill] sm:$0xff] %v10028_v29  ;;  %v4203_v23 = vadd.f32 %v9730_v52, %v4164_v9  ;;  %4621 = vrot.lane.b32.xlu1 %v10035_v38, %s6595_s27 }
 0x582   : > { %4619 = vrot.lane.b32.xlu0 %v10038_v13, %s6595_s27  ;;  %v4202_v58 = vadd.f32 %v9730_v52, %v4163_v35  ;;  %v4464_v35 = vrot.slane %v9894_v26, 1 }
 0x583   : > { %v4235_v18 = vmax.f32 %v4203_v23, 0.0  ;;  %v4466_v23 = vrot.slane %v4393_v17, 1 }
 0x584   : > { %v4234_v25 = vmax.f32 %v4202_v58, 0.0 }
 0x585   : > { %v10050_v54 = vrot.slane %v4235_v18, 7  ;;  %4715 = vrot.lane.b32.xlu1 %v10046_v16, %s6589_s21  ;;  %v4463_v18 = vrot.slane %v10057_v47, 1  ;;  %v10085_v34 = vsel %vm2598_vm2, %v4464_v35, %v4466_v23 }
 0x586   : > { %4717 = vrot.lane.b32.xlu0 %v10053_v50, %s6589_s21  ;;  %v6413_v9 = vpop.f32.mrb[24].mxu1  ;;  %v10063_v1 = vrot.slane %v4234_v25, 7  ;;  %12182 = vst [vmem:[#allocation9_spill] sm:$0xff] %v10085_v34 }
 0x587   : > { %v4166_v37 = vmul.f32 %v6413_v9, %v9725_v51  ;;  %v4095_v10 = vpop.f32.mrb[25].mxu1 }
 0x588   : > { %v4165_v44 = vmul.f32 %v9725_v51, %v4095_v10  ;;  %v10070_v31 = vsel %vm1438_vm1, %v10063_v1, %v10050_v54  ;;  %v4538_v10 = vrot.slane %v10057_v47, 2 }
 0x589   : > { %12181 = vst [vmem:[#allocation41_spill] sm:$0xff] %v10070_v31  ;;  %v4205_v57 = vadd.f32 %v9730_v52, %v4166_v37  ;;  %4811 = vrot.lane.b32.xlu1 %v10057_v47, %s6602_s20 }
 0x58a   : > { %v4204_v58 = vadd.f32 %v9730_v52, %v4165_v44  ;;  %4813 = vrot.lane.b32.xlu0 %v9894_v26, %s6602_s20  ;;  %v10088_v44 = vsel %vm2598_vm2, %v4463_v18, %v4464_v35  ;;  %v10103_v35 = vsel %vm2679_vm3, %v4538_v10, %v4539_v15  ;;  %v4394_v18 = vsel %vm1438_vm1, %v9907_v14, 0.0 }
 0x58b   : > { %v4237_v25 = vmax.f32 %v4205_v57, 0.0  ;;  %12183 = vst [vmem:[#allocation59_spill] sm:$0xff] %v10088_v44  ;;  %12185 = vst [vmem:[#allocation27_spill] sm:$0xff] %v10103_v35  ;;  %v4471_v26 = vrot.slane %v4394_v18, 1 }
 0x58c   : > { %v4236_v9 = vmax.f32 %v4204_v58, 0.0 }
 0x58d   : > { %v10082_v37 = vrot.slane %v4237_v25, 7  ;;  %4625 = vrot.lane.b32.xlu1 %v10085_v34, %s6595_s27  ;;  %v10110_v34 = vsel %vm2679_vm3, %v4539_v15, %v4541_v43  ;;  %v4469_v15 = vrot.slane %v9931_v45, 1 }
 0x58e   : > { %v10090_v56 = vrot.slane %v4236_v9, 7  ;;  %4623 = vrot.lane.b32.xlu0 %v10088_v44, %s6595_s27  ;;  %v6416_v57 = vpop.f32.mrb[26].mxu1  ;;  %12186 = vst [vmem:[#allocation62_spill] sm:$0xff] %v10110_v34  ;;  %v4544_v44 = vrot.slane %v9931_v45, 2 }
 0x58f   : > { %v4168_v58 = vmul.f32 %v6416_v57, %v9725_v51  ;;  %v4105_v17 = vpop.f32.mrb[27].mxu1  ;;  %v10114_v57 = vsel %vm1438_vm1, 0.0, %v9911_v40 }
 0x590   : > { %v10100_v23 = vsel %vm1438_vm1, %v10090_v56, %v10082_v37  ;;  %v4167_v9 = vmul.f32 %v9725_v51, %v4105_v17  ;;  %12187 = vst [vmem:[#allocation49_spill] sm:$0xff] %v10114_v57  ;;  %v4468_v43 = vrot.slane %v10114_v57, 1 }
 0x591   : > { %12184 = vst [vmem:[#allocation13_spill] sm:$0xff] %v10100_v23  ;;  %v4207_v25 = vadd.f32 %v9730_v52, %v4168_v58  ;;  %4719 = vrot.lane.b32.xlu1 %v10103_v35, %s6589_s21 }
 0x592   : > { %4721 = vrot.lane.b32.xlu0 %v10110_v34, %s6589_s21  ;;  %v4206_v14 = vadd.f32 %v9730_v52, %v4167_v9  ;;  %v4546_v34 = vrot.slane %v4394_v18, 2 }
 0x593   : > { %v4239_v10 = vmax.f32 %v4207_v25, 0.0 }
 0x594   : > { %v4238_v17 = vmax.f32 %v4206_v14, 0.0  ;;  %v4543_v14 = vrot.slane %v10114_v57, 2 }
 0x595   : > { %v10121_v58 = vrot.slane %v4239_v10, 7  ;;  %4815 = vrot.lane.b32.xlu1 %v10114_v57, %s6602_s20  ;;  %v4395_v57 = vsel %vm1438_vm1, %v9940_v5, 0.0 }
 0x596   : > { %4817 = vrot.lane.b32.xlu0 %v9931_v45, %s6602_s20  ;;  %v6419_v40 = vpop.f32.mrb[28].mxu1  ;;  %v10129_v35 = vrot.slane %v4238_v17, 7  ;;  %v10142_v17 = vsel %vm2598_vm2, %v4469_v15, %v4471_v26  ;;  %v10157_v26 = vsel %vm2679_vm3, %v4543_v14, %v4544_v44 }
 0x597   : > { %v4170_v25 = vmul.f32 %v6419_v40, %v9725_v51  ;;  %v4115_v9 = vpop.f32.mrb[29].mxu1  ;;  %12189 = vst [vmem:[#allocation143_spill] sm:$0xff] %v10142_v17  ;;  %v10145_v40 = vsel %vm2598_vm2, %v4468_v43, %v4469_v15  ;;  %12191 = vst [vmem:[#allocation51_spill] sm:$0xff] %v10157_v26  ;;  %v10160_v15 = vsel %vm2679_vm3, %v4544_v44, %v4546_v34  ;;  %v4476_v34 = vrot.slane %v4395_v57, 1 }
 0x598   : > { %v4169_v10 = vmul.f32 %v9725_v51, %v4115_v9  ;;  %v10138_v47 = vsel %vm1438_vm1, %v10129_v35, %v10121_v58  ;;  %12190 = vst [vmem:[#allocation32_spill] sm:$0xff] %v10145_v40  ;;  %12192 = vst [vmem:[#allocation44_spill] sm:$0xff] %v10160_v15 }
 0x599   : > { %12188 = vst [vmem:[#allocation140_spill] sm:$0xff] %v10138_v47  ;;  %v4209_v50 = vadd.f32 %v9730_v52, %v4170_v25  ;;  %4629 = vrot.lane.b32.xlu1 %v10142_v17, %s6595_s27 }
 0x59a   : > { %v4208_v18 = vadd.f32 %v9730_v52, %v4169_v10  ;;  %4627 = vrot.lane.b32.xlu0 %v10145_v40, %s6595_s27  ;;  %v10164_v10 = vsel %vm1438_vm1, 0.0, %v9952_v55 }
 0x59b   : > { %v4241_v9 = vmax.f32 %v4209_v50, 0.0  ;;  %12193 = vst [vmem:[#allocation130_spill] sm:$0xff] %v10164_v10 }
 0x59c   : > { %v4240_v45 = vmax.f32 %v4208_v18, 0.0  ;;  %v4474_v18 = vrot.slane %v9966_v63, 1 }
 0x59d   : > { %v10154_v25 = vrot.slane %v4241_v9, 7  ;;  %v6422_v43 = vpop.f32.mrb[30].mxu1  ;;  %4723 = vrot.lane.b32.xlu1 %v10157_v26, %s6589_s21  ;;  %v4473_v9 = vrot.slane %v10164_v10, 1  ;;  %v4549_v26 = vrot.slane %v9966_v63, 2 }
 0x59e   : > { %v10166_v17 = vrot.slane %v4240_v45, 7  ;;  %4725 = vrot.lane.b32.xlu0 %v10160_v15, %s6589_s21  ;;  %v4172_v5 = vmul.f32 %v6422_v43, %v9725_v51  ;;  %v4125_v50 = vpop.f32.mrb[31].mxu1  ;;  %v4548_v15 = vrot.slane %v10164_v10, 2 }
 0x59f   : > { %v4171_v14 = vmul.f32 %v9725_v51, %v4125_v50  ;;  %v4551_v50 = vrot.slane %v4395_v57, 2  ;;  %v10201_v57 = vpop.permute.xlu1 %6556 }
 0x5a0   : > { %v10177_v44 = vsel %vm1438_vm1, %v10166_v17, %v10154_v25  ;;  %v4211_v45 = vadd.f32 %v9730_v52, %v4172_v5 }
 0x5a1   : > { %12194 = vst [vmem:[#allocation158_spill] sm:$0xff] %v10177_v44  ;;  %v4210_v55 = vadd.f32 %v9730_v52, %v4171_v14  ;;  %4819 = vrot.lane.b32.xlu1 %v10164_v10, %s6602_s20  ;;  %v10190_v52 = vsel %vm2598_vm2, %v4474_v18, %v4476_v34  ;;  %v10193_v14 = vsel %vm2598_vm2, %v4473_v9, %v4474_v18 }
 0x5a2   : > { %4821 = vrot.lane.b32.xlu0 %v9966_v63, %s6602_s20  ;;  %v4243_v51 = vmax.f32 %v4211_v45, 0.0  ;;  %12195 = vst [vmem:[#allocation23_spill] sm:$0xff] %v10190_v52  ;;  %12196 = vst [vmem:[#allocation55_spill] sm:$0xff] %v10193_v14  ;;  %v10199_v45 = vpop.permute.xlu0 %6561  ;;  %v10213_v63 = vsel %vm2679_vm3, %v4548_v15, %v4549_v26 }
 0x5a3   : > { %v4242_v43 = vmax.f32 %v4210_v55, 0.0  ;;  %12197 = vst [vmem:[#allocation147_spill] sm:$0xff] %v10199_v45  ;;  %12200 = vst [vmem:[#allocation35_spill] sm:$0xff] %v10213_v63 }
 0x5a4   : > { %v4322_v5 = vrot.slane %v4243_v51, 7 }
 0x5a5   : > { %v4321_v40 = vrot.slane %v4242_v43, 7  ;;  %4633 = vrot.lane.b32.xlu1 %v10190_v52, %s6595_s27 }
 0x5a6   : > { %4631 = vrot.lane.b32.xlu0 %v10193_v14, %s6595_s27  ;;  %v4402_v55 = vsel %vm1438_vm1, %v4322_v5, 0.0  ;;  %v10216_v14 = vsel %vm2679_vm3, %v4549_v26, %v4551_v50 }
 0x5a7   : > { %v10205_v51 = vsel %vm1438_vm1, 0.0, %v4321_v40  ;;  %v10208_v34 = vsel %vm1438_vm1, %v4321_v40, %v4322_v5  ;;  %v4588_v18 = vrot.slane %v4402_v55, 1  ;;  %v4593_v9 = vrot.slane %v4402_v55, 2  ;;  %12201 = vst [vmem:[#allocation57_spill] sm:$0xff] %v10216_v14 }
 0x5a8   : > { %12198 = vst [vmem:[#allocation149_spill] sm:$0xff] %v10205_v51  ;;  %12199 = vst [vmem:[#allocation30_spill] sm:$0xff] %v10208_v34  ;;  %v4585_v43 = vrot.slane %v10205_v51, 1  ;;  %v4590_v52 = vrot.slane %v10205_v51, 2  ;;  %v4586_v10 = vrot.slane %v10208_v34, 1  ;;  %v4591_v45 = vrot.slane %v10208_v34, 2 }
 0x5a9   : > { %v4396_v40 = vsel %vm1438_vm1, %v9974_v8, 0.0  ;;  %v10224_v5 = vsel %vm1438_vm1, 0.0, %v9983_v2  ;;  %4727 = vrot.lane.b32.xlu1 %v10213_v63, %s6589_s21  ;;  %v4479_v51 = vrot.slane %v10001_v24, 1  ;;  %v4398_v63 = vsel %vm1438_vm1, %v10050_v54, 0.0 }
 0x5aa   : > { %12202 = vst [vmem:[#allocation50_spill] sm:$0xff] %v10224_v5  ;;  %4729 = vrot.lane.b32.xlu0 %v10216_v14, %s6589_s21  ;;  %v10231_v26 = vsel %vm2598_vm2, %v4585_v43, %v4586_v10  ;;  %v10234_v15 = vsel %vm2598_vm2, %v4586_v10, %v4588_v18  ;;  %v10237_v50 = vsel %vm2679_vm3, %v4590_v52, %v4591_v45  ;;  %v4481_v34 = vrot.slane %v4396_v40, 1 }
 0x5ab   : > { %12203 = vst [vmem:[#allocation133_spill] sm:$0xff] %v10231_v26  ;;  %12204 = vst [vmem:[#allocation138_spill] sm:$0xff] %v10234_v15  ;;  %v10240_v8 = vsel %vm2679_vm3, %v4591_v45, %v4593_v9  ;;  %v10244_v55 = vpop.permute.xlu1 %4787  ;;  %v4478_v14 = vrot.slane %v10224_v5, 1  ;;  %v4556_v10 = vrot.slane %v4396_v40, 2  ;;  %v4553_v43 = vrot.slane %v10224_v5, 2 }
 0x5ac   : > { %12205 = vst [vmem:[#allocation146_spill] sm:$0xff] %v10237_v50  ;;  %12206 = vst [vmem:[#allocation150_spill] sm:$0xff] %v10240_v8  ;;  %v10242_v2 = vpop.permute.xlu0 %4789  ;;  %v10257_v18 = vsel %vm2598_vm2, %v4479_v51, %v4481_v34  ;;  %v4554_v8 = vrot.slane %v10001_v24, 2  ;;  %v10266_v50 = vsel %vm1438_vm1, 0.0, %v10018_v21  ;;  %v4484_v21 = vrot.slane %v10028_v29, 1 }
 0x5ad   : > { %4823 = vrot.lane.b32.xlu1 %v10224_v5, %s6602_s20  ;;  %12207 = vst [vmem:[#allocation38_spill] sm:$0xff] %v10257_v18  ;;  %v10260_v9 = vsel %vm2598_vm2, %v4478_v14, %v4479_v51  ;;  %12209 = vst [vmem:[#allocation48_spill] sm:$0xff] %v10266_v50  ;;  %v4483_v15 = vrot.slane %v10266_v50, 1  ;;  %v4397_v26 = vsel %vm1438_vm1, %v10014_v48, 0.0  ;;  %v10300_v48 = vsel %vm1438_vm1, 0.0, %v10063_v1 }
 0x5ae   : > { %4825 = vrot.lane.b32.xlu0 %v10001_v24, %s6602_s20  ;;  %12208 = vst [vmem:[#allocation152_spill] sm:$0xff] %v10260_v9  ;;  %v10277_v14 = vsel %vm2679_vm3, %v4553_v43, %v4554_v8  ;;  %v10280_v51 = vsel %vm2679_vm3, %v4554_v8, %v4556_v10  ;;  %v4486_v24 = vrot.slane %v4397_v26, 1  ;;  %v4561_v8 = vrot.slane %v4397_v26, 2  ;;  %12214 = vst [vmem:[#allocation33_spill] sm:$0xff] %v10300_v48 }
 0x5af   : > { %v10254_v45 = vpop.permute.xlu1 %4601  ;;  %12211 = vst [vmem:[#allocation53_spill] sm:$0xff] %v10277_v14  ;;  %12212 = vst [vmem:[#allocation144_spill] sm:$0xff] %v10280_v51  ;;  %v10295_v10 = vsel %vm2598_vm2, %v4483_v15, %v4484_v21  ;;  %v4558_v26 = vrot.slane %v10266_v50, 2  ;;  %v4488_v1 = vrot.slane %v10300_v48, 1  ;;  %v4489_v5 = vrot.slane %v10070_v31, 1 }
 0x5b0   : > { %v10252_v52 = vpop.permute.xlu0 %4599  ;;  %12213 = vst [vmem:[#allocation54_spill] sm:$0xff] %v10295_v10  ;;  %v10312_v15 = vsel %vm2598_vm2, %v4484_v21, %v4486_v24  ;;  %v4564_v54 = vrot.slane %v10070_v31, 2  ;;  %v4494_v31 = vrot.slane %v10100_v23, 1 }
 0x5b1   : > { %4637 = vrot.lane.b32.xlu1 %v10257_v18, %s6595_s27  ;;  %12215 = vst [vmem:[#allocation126_spill] sm:$0xff] %v10312_v15 }
 0x5b2   : > { %4635 = vrot.lane.b32.xlu0 %v10260_v9, %s6595_s27  ;;  %v4559_v9 = vrot.slane %v10028_v29, 2 }
 0x5b3   : > { %v10274_v34 = vpop.permute.xlu1 %4695 }
 0x5b4   : > { %v10272_v40 = vpop.permute.xlu0 %4697  ;;  %v10315_v29 = vsel %vm2679_vm3, %v4559_v9, %v4561_v8  ;;  %v10330_v21 = vsel %vm2679_vm3, %v4558_v26, %v4559_v9  ;;  %v4491_v8 = vrot.slane %v4398_v63, 1 }
 0x5b5   : > { %12210 = vst [vmem:[#allocation6_spill] sm:$0xff] %v10272_v40  ;;  %4731 = vrot.lane.b32.xlu1 %v10277_v14, %s6589_s21  ;;  %12216 = vst [vmem:[#allocation91_spill] sm:$0xff] %v10315_v29  ;;  %v10333_v40 = vsel %vm2598_vm2, %v4488_v1, %v4489_v5 }
 0x5b6   : > { %4733 = vrot.lane.b32.xlu0 %v10280_v51, %s6589_s21  ;;  %12217 = vst [vmem:[#allocation137_spill] sm:$0xff] %v10330_v21  ;;  %12218 = vst [vmem:[#allocation135_spill] sm:$0xff] %v10333_v40  ;;  %v10350_v26 = vsel %vm2598_vm2, %v4489_v5, %v4491_v8 }
 0x5b7   : > { %v10292_v43 = vpop.permute.xlu1 %4885  ;;  %12221 = vst [vmem:[#allocation56_spill] sm:$0xff] %v10350_v26 }
 0x5b8   : > { %v10290_v18 = vpop.permute.xlu0 %4883 }
 0x5b9   : > { %4827 = vrot.lane.b32.xlu1 %v10266_v50, %s6602_s20  ;;  %v4566_v50 = vrot.slane %v4398_v63, 2  ;;  %v4563_v63 = vrot.slane %v10300_v48, 2 }
 0x5ba   : > { %4639 = vrot.lane.b32.xlu0 %v10295_v10, %s6595_s27 }
 0x5bb   : > { %v10308_v14 = vpop.permute.xlu1 %4981  ;;  %v10353_v1 = vsel %vm2679_vm3, %v4564_v54, %v4566_v50  ;;  %v10368_v50 = vsel %vm2679_vm3, %v4563_v63, %v4564_v54 }
 0x5bc   : > { %v10306_v51 = vpop.permute.xlu0 %4979  ;;  %12222 = vst [vmem:[#allocation68_spill] sm:$0xff] %v10353_v1  ;;  %12223 = vst [vmem:[#allocation75_spill] sm:$0xff] %v10368_v50 }
 0x5bd   : > { %4641 = vrot.lane.b32.xlu1 %v10312_v15, %s6595_s27  ;;  %v10338_v15 = vsel %vm1438_vm1, 0.0, %v10090_v56 }
 0x5be   : > { %4737 = vrot.lane.b32.xlu0 %v10315_v29, %s6589_s21  ;;  %12219 = vst [vmem:[#allocation139_spill] sm:$0xff] %v10338_v15  ;;  %v4493_v56 = vrot.slane %v10338_v15, 1 }
 0x5bf   : > { %v10327_v24 = vpop.permute.xlu1 %4791 }
 0x5c0   : > { %v10325_v10 = vpop.permute.xlu0 %4793 }
 0x5c1   : > { %4735 = vrot.lane.b32.xlu1 %v10330_v21, %s6589_s21  ;;  %v4399_v21 = vsel %vm1438_vm1, %v10082_v37, 0.0  ;;  %v4569_v37 = vrot.slane %v10100_v23, 2  ;;  %v4499_v23 = vrot.slane %v10138_v47, 1 }
 0x5c2   : > { %4643 = vrot.lane.b32.xlu0 %v10333_v40, %s6595_s27  ;;  %v4496_v8 = vrot.slane %v4399_v21, 1  ;;  %v4571_v48 = vrot.slane %v4399_v21, 2  ;;  %v4568_v21 = vrot.slane %v10338_v15, 2 }
 0x5c3   : > { %v10346_v9 = vpop.permute.xlu1 %4605 }
 0x5c4   : > { %v10344_v29 = vpop.permute.xlu0 %4603  ;;  %12220 = vst [vmem:[#allocation95_spill] sm:$0xff] %v10346_v9  ;;  %v10371_v9 = vsel %vm2598_vm2, %v4493_v56, %v4494_v31  ;;  %v10388_v63 = vsel %vm2598_vm2, %v4494_v31, %v4496_v8  ;;  %v10391_v56 = vsel %vm2679_vm3, %v4569_v37, %v4571_v48  ;;  %v10406_v48 = vsel %vm2679_vm3, %v4568_v21, %v4569_v37 }
 0x5c5   : > { %4645 = vrot.lane.b32.xlu1 %v10350_v26, %s6595_s27  ;;  %12224 = vst [vmem:[#allocation88_spill] sm:$0xff] %v10371_v9  ;;  %v10376_v26 = vsel %vm1438_vm1, 0.0, %v10129_v35  ;;  %12227 = vst [vmem:[#allocation86_spill] sm:$0xff] %v10388_v63 }
 0x5c6   : > { %4741 = vrot.lane.b32.xlu0 %v10353_v1, %s6589_s21  ;;  %12225 = vst [vmem:[#allocation148_spill] sm:$0xff] %v10376_v26  ;;  %12228 = vst [vmem:[#allocation42_spill] sm:$0xff] %v10391_v56  ;;  %v4498_v35 = vrot.slane %v10376_v26, 1 }
 0x5c7   : > { %v10365_v5 = vpop.permute.xlu1 %4699  ;;  %12229 = vst [vmem:[#allocation71_spill] sm:$0xff] %v10406_v48 }
 0x5c8   : > { %v10363_v40 = vpop.permute.xlu0 %4701 }
 0x5c9   : > { %4739 = vrot.lane.b32.xlu1 %v10368_v50, %s6589_s21  ;;  %v4400_v50 = vsel %vm1438_vm1, %v10121_v58, 0.0  ;;  %v4574_v58 = vrot.slane %v10138_v47, 2  ;;  %v4504_v47 = vrot.slane %v10177_v44, 1 }
 0x5ca   : > { %4647 = vrot.lane.b32.xlu0 %v10371_v9, %s6595_s27  ;;  %v4501_v8 = vrot.slane %v4400_v50, 1  ;;  %v4576_v15 = vrot.slane %v4400_v50, 2  ;;  %v4573_v50 = vrot.slane %v10376_v26, 2 }
 0x5cb   : > { %v10384_v54 = vpop.permute.xlu1 %4795 }
 0x5cc   : > { %v10382_v1 = vpop.permute.xlu0 %4797  ;;  %v10426_v21 = vsel %vm2598_vm2, %v4499_v23, %v4501_v8 }
 0x5cd   : > { %12226 = vst [vmem:[#allocation77_spill] sm:$0xff] %v10382_v1  ;;  %4649 = vrot.lane.b32.xlu1 %v10388_v63, %s6595_s27  ;;  %v10409_v1 = vsel %vm2598_vm2, %v4498_v35, %v4499_v23  ;;  %v10414_v63 = vsel %vm1438_vm1, 0.0, %v10166_v17  ;;  %12233 = vst [vmem:[#allocation83_spill] sm:$0xff] %v10426_v21  ;;  %v10429_v35 = vsel %vm2679_vm3, %v4574_v58, %v4576_v15 }
 0x5ce   : > { %4745 = vrot.lane.b32.xlu0 %v10391_v56, %s6589_s21  ;;  %12230 = vst [vmem:[#allocation151_spill] sm:$0xff] %v10409_v1  ;;  %12231 = vst [vmem:[#allocation80_spill] sm:$0xff] %v10414_v63  ;;  %v4503_v17 = vrot.slane %v10414_v63, 1  ;;  %v10444_v15 = vsel %vm2679_vm3, %v4573_v50, %v4574_v58  ;;  %v5623_v58 = vld [vmem:[%s11499_s7 + $0x8] sm:$0xff] }
 0x5cf   : > { %v10403_v31 = vpop.permute.xlu1 %4609  ;;  %12234 = vst [vmem:[#allocation46_spill] sm:$0xff] %v10429_v35  ;;  %12235 = vst [vmem:[#allocation58_spill] sm:$0xff] %v10444_v15 }
 0x5d0   : > { %v10401_v9 = vpop.permute.xlu0 %4607 }
 0x5d1   : > { %4743 = vrot.lane.b32.xlu1 %v10406_v48, %s6589_s21  ;;  %v4401_v48 = vsel %vm1438_vm1, %v10154_v25, 0.0  ;;  %v4579_v25 = vrot.slane %v10177_v44, 2  ;;  %vm5557_vm1 = vcmask 228352  }
 0x5d2   : > { %4651 = vrot.lane.b32.xlu0 %v10409_v1, %s6595_s27  ;;  %v4506_v8 = vrot.slane %v4401_v48, 1  ;;  %v4581_v26 = vrot.slane %v4401_v48, 2 }
 0x5d3   : > { %v10422_v37 = vpop.permute.xlu1 %4703 }
 0x5d4   : > { %v10420_v56 = vpop.permute.xlu0 %4705  ;;  %v10465_v44 = vsel %vm2598_vm2, %v4504_v47, %v4506_v8 }
 0x5d5   : > { %12232 = vst [vmem:[#allocation160_spill] sm:$0xff] %v10420_v56  ;;  %4653 = vrot.lane.b32.xlu1 %v10426_v21, %s6595_s27  ;;  %v10447_v56 = vsel %vm2598_vm2, %v4503_v17, %v4504_v47  ;;  %12237 = vst [vmem:[#allocation76_spill] sm:$0xff] %v10465_v44  ;;  %v10468_v21 = vsel %vm2679_vm3, %v4579_v25, %v4581_v26  ;;  %v5625_v47 = vld [vmem:[%s11499_s7 + $0x18] sm:$0xff]  ;;  %vm5627_vm2 = vcmask 293888  }
 0x5d6   : > { %4749 = vrot.lane.b32.xlu0 %v10429_v35, %s6589_s21  ;;  %12236 = vst [vmem:[#allocation63_spill] sm:$0xff] %v10447_v56  ;;  %v5622_v35 = vld [vmem:[%s11499_s7] sm:$0xff]  ;;  %12238 = vst [vmem:[#allocation142_spill] sm:$0xff] %v10468_v21 }
 0x5d7   : > { %v10441_v23 = vpop.permute.xlu1 %4799  ;;  %v6497_v48 = vpack.c.bf16 %v5623_v58, %v5622_v35  ;;  %v5624_v35 = vld [vmem:[%s11499_s7 + $0x10] sm:$0xff] }
 0x5d8   : > { %v10439_v1 = vpop.permute.xlu0 %4801  ;;  %v6501_v26 = vpack.c.bf16 %v5625_v47, %v5624_v35 }
 0x5d9   : > { %4747 = vrot.lane.b32.xlu1 %v10444_v15, %s6589_s21  ;;  %6498 = vmatprep.subr.bf16.mxu0 %v6497_v48 }
 0x5da   : > { %4655 = vrot.lane.b32.xlu0 %v10447_v56, %s6595_s27  ;;  %v4578_v56 = vrot.slane %v10414_v63, 2  ;;  %6500 = vmatpush3.bf16.msra.mxu0 %v6497_v48  ;;  %v5626_v48 = vld [vmem:[%s11499_s7 + $0x20] sm:$0xf] }
 0x5db   : > { %v10462_v17 = vpop.permute.xlu1 %4613  ;;  %6502 = vmatprep.subr.bf16.mxu0 %v6501_v26 }
 0x5dc   : > { %v10460_v50 = vpop.permute.xlu0 %4611  ;;  %v10486_v63 = vsel %vm2679_vm3, %v4578_v56, %v4579_v25 }
 0x5dd   : > { %4657 = vrot.lane.b32.xlu1 %v10465_v44, %s6595_s27  ;;  %12239 = vst [vmem:[#allocation153_spill] sm:$0xff] %v10486_v63 }
 0x5de   : > { %4753 = vrot.lane.b32.xlu0 %v10468_v21, %s6589_s21  ;;  %6504 = vmatpush3.bf16.msra.mxu0 %v6501_v26 }
 0x5df   : > { %v10483_v58 = vpop.permute.xlu1 %4707  ;;  %6431 = vmatprep.subr.msk.mxu0 %vm5724_vm13, %v5626_v48 }
 0x5e0   : > { %v10481_v8 = vpop.permute.xlu0 %4709 }
 0x5e1   : > { %4751 = vrot.lane.b32.xlu1 %v10486_v63, %s6589_s21 }
 0x5e2   : > { %5075 = vrot.lane.b32.xlu0 %v9796_v0, %s6596_s12  ;;  %6432 = vmatpush3.msk.msra.mxu0 %vm5724_vm13, %v5626_v48 }
 0x5e3   : > { %v10497_v47 = vpop.permute.xlu1 %4803 }
 0x5e4   : > { %v10495_v35 = vpop.permute.xlu0 %4805 }
 0x5e5   : > { %5077 = vrot.lane.b32.xlu1 %v9766_v6, %s6596_s12 }
 0x5e6   : > { %5171 = vrot.lane.b32.xlu0 %v9819_v12, %s6604_s19 }
 0x5e7   : > { %v10505_v25 = vpop.permute.xlu1 %4617 }
 0x5e8   : > { %v10503_v56 = vpop.permute.xlu0 %4615 }
 0x5e9   : > { %4887 = vrot.lane.b32.xlu1 %v9819_v12, %s6590_s22 }
 0x5ea   : > { %5173 = vrot.lane.b32.xlu0 %v9814_v42, %s6604_s19 }
 0x5eb   : > { %v10513_v21 = vpop.permute.xlu1 %4711 }
 0x5ec   : > { %v10511_v26 = vpop.permute.xlu0 %4713 }
 0x5ed   : > { %5267 = vrot.lane.b32.xlu1 %v9836_v7, %s6597_s15 }
 0x5ee   : > { %4889 = vrot.lane.b32.xlu0 %v9814_v42, %s6590_s22 }
 0x5ef   : > { %v10521_v44 = vpop.permute.xlu1 %4807 }
 0x5f0   : > { %v10519_v48 = vpop.permute.xlu0 %4809 }
 0x5f1   : > { %4983 = vrot.lane.b32.xlu1 %v9836_v7, %s6603_s23 }
 0x5f2   : > { %5269 = vrot.lane.b32.xlu0 %v9839_v62, %s6597_s15 }
 0x5f3   : > { %v10529_v63 = vpop.permute.xlu1 %4621 }
 0x5f4   : > { %v10527_v12 = vpop.permute.xlu0 %4619  ;;  %12241 = vst [vmem:[#allocation74_spill] sm:$0xff] %v10529_v63 }
 0x5f5   : > { %12240 = vst [vmem:[#allocation66_spill] sm:$0xff] %v10527_v12  ;;  %4985 = vrot.lane.b32.xlu1 %v9839_v62, %s6603_s23 }
 0x5f6   : > { %5079 = vrot.lane.b32.xlu0 %v9843_v19, %s6596_s12 }
 0x5f7   : > { %v10537_v15 = vpop.permute.xlu1 %4715 }
 0x5f8   : > { %v10535_v42 = vpop.permute.xlu0 %4717 }
 0x5f9   : > { %12242 = vst [vmem:[#allocation7_spill] sm:$0xff] %v10535_v42  ;;  %5081 = vrot.lane.b32.xlu1 %v9778_v32, %s6596_s12 }
 0x5fa   : > { %5175 = vrot.lane.b32.xlu0 %v9873_v39, %s6604_s19 }
 0x5fb   : > { %v10545_v12 = vpop.permute.xlu1 %4811 }
 0x5fc   : > { %v10543_v7 = vpop.permute.xlu0 %4813 }
 0x5fd   : > { %12243 = vst [vmem:[#allocation78_spill] sm:$0xff] %v10543_v7  ;;  %4891 = vrot.lane.b32.xlu1 %v9873_v39, %s6590_s22 }
 0x5fe   : > { %5177 = vrot.lane.b32.xlu0 %v9870_v27, %s6604_s19 }
 0x5ff   : > { %v10553_v42 = vpop.permute.xlu1 %4625 }
 0x600   : > { %v10551_v62 = vpop.permute.xlu0 %4623 }
 0x601   : > { %12244 = vst [vmem:[#allocation161_spill] sm:$0xff] %v10551_v62  ;;  %5271 = vrot.lane.b32.xlu1 %v9886_v60, %s6597_s15 }
 0x602   : > { %4893 = vrot.lane.b32.xlu0 %v9870_v27, %s6590_s22 }
 0x603   : > { %v10561_v7 = vpop.permute.xlu1 %4719 }
 0x604   : > { %v10559_v63 = vpop.permute.xlu0 %4721 }
 0x605   : > { %12245 = vst [vmem:[#allocation72_spill] sm:$0xff] %v10559_v63  ;;  %4987 = vrot.lane.b32.xlu1 %v9886_v60, %s6603_s23 }
 0x606   : > { %5273 = vrot.lane.b32.xlu0 %v9889_v30, %s6597_s15 }
 0x607   : > { %v10569_v62 = vpop.permute.xlu1 %4815 }
 0x608   : > { %v10567_v39 = vpop.permute.xlu0 %4817 }
 0x609   : > { %12246 = vst [vmem:[#allocation60_spill] sm:$0xff] %v10567_v39  ;;  %4989 = vrot.lane.b32.xlu1 %v9889_v30, %s6603_s23 }
 0x60a   : > { %5083 = vrot.lane.b32.xlu0 %v9900_v4, %s6596_s12 }
 0x60b   : > { %v10577_v63 = vpop.permute.xlu1 %4629 }
 0x60c   : > { %v10575_v27 = vpop.permute.xlu0 %4627  ;;  %12248 = vst [vmem:[#allocation119_spill] sm:$0xff] %v10577_v63 }
 0x60d   : > { %12247 = vst [vmem:[#allocation145_spill] sm:$0xff] %v10575_v27  ;;  %5085 = vrot.lane.b32.xlu1 %v9793_v46, %s6596_s12 }
 0x60e   : > { %5179 = vrot.lane.b32.xlu0 %v9926_v11, %s6604_s19 }
 0x60f   : > { %v10585_v39 = vpop.permute.xlu1 %4723 }
 0x610   : > { %v10583_v60 = vpop.permute.xlu0 %4725  ;;  %12250 = vst [vmem:[#allocation154_spill] sm:$0xff] %v10585_v39  ;;  %v12293_v39 = vld [vmem:[#allocation2_spill] sm:$0xff] }
 0x611   : > { %12249 = vst [vmem:[#allocation156_spill] sm:$0xff] %v10583_v60  ;;  %4895 = vrot.lane.b32.xlu1 %v9926_v11, %s6590_s22 }
 0x612   : > { %5181 = vrot.lane.b32.xlu0 %v9923_v49, %s6604_s19 }
 0x613   : > { %v10593_v27 = vpop.permute.xlu1 %4819 }
 0x614   : > { %v10591_v30 = vpop.permute.xlu0 %4821  ;;  %12252 = vst [vmem:[#allocation121_spill] sm:$0xff] %v10593_v27 }
 0x615   : > { %12251 = vst [vmem:[#allocation157_spill] sm:$0xff] %v10591_v30  ;;  %5275 = vrot.lane.b32.xlu1 %v9943_v41, %s6597_s15 }
 0x616   : > { %4897 = vrot.lane.b32.xlu0 %v9923_v49, %s6590_s22 }
 0x617   : > { %v10601_v60 = vpop.permute.xlu1 %4633 }
 0x618   : > { %v10599_v63 = vpop.permute.xlu0 %4631  ;;  %12254 = vst [vmem:[#allocation93_spill] sm:$0xff] %v10601_v60 }
 0x619   : > { %12253 = vst [vmem:[#allocation81_spill] sm:$0xff] %v10599_v63  ;;  %4991 = vrot.lane.b32.xlu1 %v9943_v41, %s6603_s23 }
 0x61a   : > { %5277 = vrot.lane.b32.xlu0 %v9946_v20, %s6597_s15 }
 0x61b   : > { %v10609_v30 = vpop.permute.xlu1 %4727 }
 0x61c   : > { %v10607_v11 = vpop.permute.xlu0 %4729  ;;  %12256 = vst [vmem:[#allocation117_spill] sm:$0xff] %v10609_v30 }
 0x61d   : > { %12255 = vst [vmem:[#allocation104_spill] sm:$0xff] %v10607_v11  ;;  %4993 = vrot.lane.b32.xlu1 %v9946_v20, %s6603_s23 }
 0x61e   : > { %5087 = vrot.lane.b32.xlu0 %v9950_v3, %s6596_s12 }
 0x61f   : > { %v10617_v63 = vpop.permute.xlu1 %4823 }
 0x620   : > { %v10615_v49 = vpop.permute.xlu0 %4825  ;;  %12258 = vst [vmem:[#allocation185_spill] sm:$0xff] %v10617_v63  ;;  %v6559_v63 = vunpack.i.h.bf16 %v10201_v57 }
 0x621   : > { %12257 = vst [vmem:[#allocation163_spill] sm:$0xff] %v10615_v49  ;;  %5089 = vrot.lane.b32.xlu1 %v9825_v22, %s6596_s12 }
 0x622   : > { %5183 = vrot.lane.b32.xlu0 %v9980_v53, %s6604_s19 }
 0x623   : > { %v10625_v11 = vpop.permute.xlu1 %4637 }
 0x624   : > { %v10623_v41 = vpop.permute.xlu0 %4635  ;;  %12260 = vst [vmem:[#allocation168_spill] sm:$0xff] %v10625_v11  ;;  %v12288_v11 = vld [vmem:[#allocation27_spill] sm:$0xff] }
 0x625   : > { %12259 = vst [vmem:[#allocation106_spill] sm:$0xff] %v10623_v41  ;;  %4899 = vrot.lane.b32.xlu1 %v9980_v53, %s6590_s22 }
 0x626   : > { %5185 = vrot.lane.b32.xlu0 %v9977_v61, %s6604_s19 }
 0x627   : > { %v10633_v49 = vpop.permute.xlu1 %4731 }
 0x628   : > { %v10631_v20 = vpop.permute.xlu0 %4733  ;;  %12262 = vst [vmem:[#allocation61_spill] sm:$0xff] %v10633_v49 }
 0x629   : > { %12261 = vst [vmem:[#allocation103_spill] sm:$0xff] %v10631_v20  ;;  %5279 = vrot.lane.b32.xlu1 %v9993_v28, %s6597_s15 }
 0x62a   : > { %4901 = vrot.lane.b32.xlu0 %v9977_v61, %s6590_s22 }
 0x62b   : > { %v10641_v41 = vpop.permute.xlu1 %4827 }
 0x62c   : > { %v10639_v60 = vpop.permute.xlu0 %4639  ;;  %12264 = vst [vmem:[#allocation113_spill] sm:$0xff] %v10641_v41  ;;  %v12290_v41 = vld [vmem:[#allocation147_spill] sm:$0xff] }
 0x62d   : > { %12263 = vst [vmem:[#allocation43_spill] sm:$0xff] %v10639_v60  ;;  %4995 = vrot.lane.b32.xlu1 %v9993_v28, %s6603_s23  ;;  %v6563_v49 = vunpack.i.l.bf16 %v12290_v41  ;;  %v6564_v27 = vunpack.i.h.bf16 %v12290_v41 }
 0x62e   : > { %5281 = vrot.lane.b32.xlu0 %v9996_v59, %s6597_s15 }
 0x62f   : > { %v10649_v20 = vpop.permute.xlu1 %4641 }
 0x630   : > { %v10647_v53 = vpop.permute.xlu0 %4737  ;;  %12266 = vst [vmem:[#allocation183_spill] sm:$0xff] %v10649_v20 }
 0x631   : > { %12265 = vst [vmem:[#allocation21_spill] sm:$0xff] %v10647_v53  ;;  %4997 = vrot.lane.b32.xlu1 %v9996_v59, %s6603_s23 }
 0x632   : > { %5091 = vrot.lane.b32.xlu0 %v10007_v33, %s6596_s12 }
 0x633   : > { %v10657_v60 = vpop.permute.xlu1 %4735 }
 0x634   : > { %v10655_v61 = vpop.permute.xlu0 %4643  ;;  %12268 = vst [vmem:[#allocation96_spill] sm:$0xff] %v10657_v60  ;;  %v12282_v60 = vld [vmem:[#allocation37_spill] sm:$0xff] }
 0x635   : > { %12267 = vst [vmem:[#allocation34_spill] sm:$0xff] %v10655_v61  ;;  %5093 = vrot.lane.b32.xlu1 %v9859_v36, %s6596_s12 }
 0x636   : > { %5187 = vrot.lane.b32.xlu0 %v10038_v13, %s6604_s19 }
 0x637   : > { %v10665_v53 = vpop.permute.xlu1 %4645 }
 0x638   : > { %v10663_v28 = vpop.permute.xlu0 %4741  ;;  %12270 = vst [vmem:[#allocation164_spill] sm:$0xff] %v10665_v53  ;;  %v12275_v53 = vld [vmem:[#allocation141_spill] sm:$0xff] }
 0x639   : > { %12269 = vst [vmem:[#allocation70_spill] sm:$0xff] %v10663_v28  ;;  %4903 = vrot.lane.b32.xlu1 %v10038_v13, %s6590_s22 }
 0x63a   : > { %5189 = vrot.lane.b32.xlu0 %v10035_v38, %s6604_s19 }
 0x63b   : > { %v10673_v61 = vpop.permute.xlu1 %4739 }
 0x63c   : > { %v10671_v59 = vpop.permute.xlu0 %4647  ;;  %12272 = vst [vmem:[#allocation107_spill] sm:$0xff] %v10673_v61  ;;  %v12278_v61 = vld [vmem:[#allocation155_spill] sm:$0xff] }
 0x63d   : > { %12271 = vst [vmem:[#allocation181_spill] sm:$0xff] %v10671_v59  ;;  %5283 = vrot.lane.b32.xlu1 %v10046_v16, %s6597_s15 }
 0x63e   : > { %4905 = vrot.lane.b32.xlu0 %v10035_v38, %s6590_s22 }
 0x63f   : > { %v10681_v28 = vpop.permute.xlu1 %4649 }
 0x640   : > { %v10679_v20 = vpop.permute.xlu0 %4745  ;;  %12274 = vst [vmem:[#allocation186_spill] sm:$0xff] %v10681_v28  ;;  %v12281_v28 = vld [vmem:[#allocation59_spill] sm:$0xff] }
 0x641   : > { %12273 = vst [vmem:[#allocation173_spill] sm:$0xff] %v10679_v20  ;;  %4999 = vrot.lane.b32.xlu1 %v10046_v16, %s6603_s23 }
 0x642   : > { %5285 = vrot.lane.b32.xlu0 %v12275_v53, %s6597_s15 }
 0x643   : > { %v10689_v59 = vpop.permute.xlu1 %4743 }
 0x644   : > { %v10687_v13 = vpop.permute.xlu0 %4651  ;;  %12277 = vst [vmem:[#allocation169_spill] sm:$0xff] %v10689_v59  ;;  %v12285_v59 = vld [vmem:[#allocation9_spill] sm:$0xff] }
 0x645   : > { %12276 = vst [vmem:[#allocation111_spill] sm:$0xff] %v10687_v13  ;;  %5001 = vrot.lane.b32.xlu1 %v12275_v53, %s6603_s23 }
 0x646   : > { %5095 = vrot.lane.b32.xlu0 %v12278_v61, %s6596_s12 }
 0x647   : > { %v10697_v20 = vpop.permute.xlu1 %4653 }
 0x648   : > { %v10695_v38 = vpop.permute.xlu0 %4749  ;;  %12280 = vst [vmem:[#allocation16_spill] sm:$0xff] %v10697_v20  ;;  %v6558_v20 = vunpack.i.l.bf16 %v10201_v57  ;;  %v12294_v57 = vld [vmem:[#allocation49_spill] sm:$0xff] }
 0x649   : > { %12279 = vst [vmem:[#allocation19_spill] sm:$0xff] %v10695_v38  ;;  %5097 = vrot.lane.b32.xlu1 %v12282_v60, %s6596_s12  ;;  %v5364_v60 = vsel %vm2367_vm4, %v12293_v39, %v6559_v63  ;;  %v12295_v39 = vld [vmem:[#allocation32_spill] sm:$0xff] }
 0x64a   : > { %5191 = vrot.lane.b32.xlu0 %v12281_v28, %s6604_s19  ;;  %v5396_v41 = vsel %vm396_vm0, %v5364_v60, %v6564_v27 }
 0x64b   : > { %v10705_v13 = vpop.permute.xlu1 %4747 }
 0x64c   : > { %v10703_v16 = vpop.permute.xlu0 %4655  ;;  %12284 = vst [vmem:[#allocation73_spill] sm:$0xff] %v10705_v13 }
 0x64d   : > { %12283 = vst [vmem:[#allocation28_spill] sm:$0xff] %v10703_v16  ;;  %4907 = vrot.lane.b32.xlu1 %v12281_v28, %s6590_s22  ;;  %v12291_v28 = vld [vmem:[#allocation3_spill] sm:$0xff] }
 0x64e   : > { %5193 = vrot.lane.b32.xlu0 %v12285_v59, %s6604_s19 }
 0x64f   : > { %v10713_v38 = vpop.permute.xlu1 %4657 }
 0x650   : > { %v10711_v53 = vpop.permute.xlu0 %4753  ;;  %12287 = vst [vmem:[#allocation8_spill] sm:$0xff] %v10713_v38  ;;  %v12292_v38 = vld [vmem:[#allocation62_spill] sm:$0xff] }
 0x651   : > { %12286 = vst [vmem:[#allocation84_spill] sm:$0xff] %v10711_v53  ;;  %5287 = vrot.lane.b32.xlu1 %v12288_v11, %s6597_s15  ;;  %v5363_v53 = vsel %vm2367_vm4, %v12291_v28, %v6558_v20 }
 0x652   : > { %4909 = vrot.lane.b32.xlu0 %v12285_v59, %s6590_s22 }
 0x653   : > { %v10720_v13 = vpop.permute.xlu1 %4751 }
 0x654   : > { %v5076_v16 = vpop.permute.xlu0 %5075  ;;  %12289 = vst [vmem:[#allocation105_spill] sm:$0xff] %v10720_v13  ;;  %v5395_v13 = vsel %vm396_vm0, %v5363_v53, %v6563_v49 }
 0x655   : > { %5003 = vrot.lane.b32.xlu1 %v12288_v11, %s6603_s23  ;;  %v5428_v11 = vsel %vm5427_vm14, %v5395_v13, %v10244_v55  ;;  %v5429_v55 = vsel %vm5427_vm14, %v5396_v41, %v10242_v2 }
 0x656   : > { %5289 = vrot.lane.b32.xlu0 %v12292_v38, %s6597_s15  ;;  %v5460_v49 = vsel %vm3572_vm5, %v5428_v11, %v10290_v18  ;;  %v5461_v18 = vsel %vm3572_vm5, %v5429_v55, %v10292_v43  ;;  %v12300_v55 = vld [vmem:[#allocation18_spill] sm:$0xff] }
 0x657   : > { %v5078_v30 = vpop.permute.xlu1 %5077  ;;  %v5493_v63 = vsel %vm5492_vm15, %v5460_v49, %v10306_v51  ;;  %v5494_v11 = vsel %vm5492_vm15, %v5461_v18, %v10308_v14  ;;  %v12297_v49 = vld [vmem:[#allocation143_spill] sm:$0xff] }
 0x658   : > { %v5172_v59 = vpop.permute.xlu0 %5171  ;;  %v5525_v53 = vsel %vm3605_vm6, %v5493_v63, %v5076_v16  ;;  %v5526_v2 = vsel %vm3605_vm6, %v5494_v11, %v5078_v30  ;;  %v12298_v14 = vld [vmem:[#allocation51_spill] sm:$0xff]  ;;  %v12299_v30 = vld [vmem:[#allocation44_spill] sm:$0xff] }
 0x659   : > { %5005 = vrot.lane.b32.xlu1 %v12292_v38, %s6603_s23  ;;  %v12296_v38 = vld [vmem:[#allocation65_spill] sm:$0xff]  ;;  %v5558_v27 = vsel %vm5557_vm1, %v5525_v53, %v5172_v59 }
 0x65a   : > { %5099 = vrot.lane.b32.xlu0 %v12294_v57, %s6596_s12 }
 0x65b   : > { %v4888_v28 = vpop.permute.xlu1 %4887 }
 0x65c   : > { %v5174_v20 = vpop.permute.xlu0 %5173 }
 0x65d   : > { %5101 = vrot.lane.b32.xlu1 %v12296_v38, %s6596_s12  ;;  %v5559_v16 = vsel %vm5557_vm1, %v5526_v2, %v5174_v20 }
 0x65e   : > { %5195 = vrot.lane.b32.xlu0 %v12295_v39, %s6604_s19 }
 0x65f   : > { %v5268_v13 = vpop.permute.xlu1 %5267 }
 0x660   : > { %v4890_v60 = vpop.permute.xlu0 %4889  ;;  %v5590_v51 = vsel %vm3638_vm7, %v5558_v27, %v5268_v13  ;;  %v5365_v27 = vsel %vm2367_vm4, %v12300_v55, %v10252_v52  ;;  %v12301_v13 = vld [vmem:[#allocation130_spill] sm:$0xff] }
 0x661   : > { %4911 = vrot.lane.b32.xlu1 %v12295_v39, %s6590_s22  ;;  %6433 = vmatprep.mubr.msk.f32.mxu0 %vm5627_vm2, %v5590_v51  ;;  %v5397_v18 = vsel %vm396_vm0, %v5365_v27, %v10274_v34  ;;  %v12305_v34 = vld [vmem:[#allocation6_spill] sm:$0xff] }
 0x662   : > { %5197 = vrot.lane.b32.xlu0 %v12297_v49, %s6604_s19  ;;  %v5430_v51 = vsel %vm5427_vm14, %v5397_v18, %v10327_v24 }
 0x663   : > { %v4984_v41 = vpop.permute.xlu1 %4983  ;;  %v5462_v2 = vsel %vm3572_vm5, %v5430_v51, %v4888_v28 }
 0x664   : > { %v5270_v59 = vpop.permute.xlu0 %5269 }
 0x665   : > { %v5591_v43 = vsel %vm3638_vm7, %v5559_v16, %v5270_v59  ;;  %5291 = vrot.lane.b32.xlu1 %v12298_v14, %s6597_s15  ;;  %v12302_v16 = vld [vmem:[#allocation20_spill] sm:$0xff]  ;;  %v5495_v59 = vsel %vm5492_vm15, %v5462_v2, %v4984_v41  ;;  %v12306_v2 = vld [vmem:[#allocation23_spill] sm:$0xff] }
 0x666   : > { %4913 = vrot.lane.b32.xlu0 %v12297_v49, %s6590_s22  ;;  %6434 = vmatmul.mubr.msk.f32.vlgmr.msra.gmra.mrb[8].mxu0 %vm5627_vm2, %v5591_v43  ;;  %v5366_v52 = vsel %vm2367_vm4, %v12302_v16, %v10254_v45  ;;  %v12303_v43 = vld [vmem:[#allocation55_spill] sm:$0xff] }
 0x667   : > { %v4986_v39 = vpop.permute.xlu1 %4985 }
 0x668   : > { %v5080_v63 = vpop.permute.xlu0 %5079 }
 0x669   : > { %5007 = vrot.lane.b32.xlu1 %v12298_v14, %s6603_s23  ;;  %v12304_v14 = vld [vmem:[#allocation67_spill] sm:$0xff]  ;;  %v5527_v24 = vsel %vm3605_vm6, %v5495_v59, %v5080_v63 }
 0x66a   : > { %5293 = vrot.lane.b32.xlu0 %v12299_v30, %s6597_s15 }
 0x66b   : > { %v5082_v53 = vpop.permute.xlu1 %5081 }
 0x66c   : > { %v5176_v20 = vpop.permute.xlu0 %5175 }
 0x66d   : > { %5009 = vrot.lane.b32.xlu1 %v12299_v30, %s6603_s23  ;;  %v5398_v30 = vsel %vm396_vm0, %v5366_v52, %v12305_v34  ;;  %v5560_v55 = vsel %vm5557_vm1, %v5527_v24, %v5176_v20  ;;  %v5367_v34 = vsel %vm2367_vm4, %v9796_v0, %v10344_v29 }
 0x66e   : > { %5103 = vrot.lane.b32.xlu0 %v12301_v13, %s6596_s12  ;;  %v5431_v28 = vsel %vm5427_vm14, %v5398_v30, %v10325_v10  ;;  %v12309_v30 = vld [vmem:[#allocation50_spill] sm:$0xff]  ;;  %v5399_v24 = vsel %vm396_vm0, %v5367_v34, %v10365_v5 }
 0x66f   : > { %v4892_v49 = vpop.permute.xlu1 %4891  ;;  %v5463_v41 = vsel %vm3572_vm5, %v5431_v28, %v4890_v60  ;;  %v5432_v28 = vsel %vm5427_vm14, %v5399_v24, %v10384_v54 }
 0x670   : > { %v5178_v11 = vpop.permute.xlu0 %5177  ;;  %v5496_v51 = vsel %vm5492_vm15, %v5463_v41, %v4986_v39  ;;  %v12307_v39 = vld [vmem:[#allocation35_spill] sm:$0xff]  ;;  %v5464_v41 = vsel %vm3572_vm5, %v5432_v28, %v4892_v49 }
 0x671   : > { %5105 = vrot.lane.b32.xlu1 %v12304_v14, %s6596_s12  ;;  %v5528_v63 = vsel %vm3605_vm6, %v5496_v51, %v5082_v53  ;;  %v12308_v53 = vld [vmem:[#allocation57_spill] sm:$0xff]  ;;  %v12311_v51 = vld [vmem:[#allocation152_spill] sm:$0xff] }
 0x672   : > { %5199 = vrot.lane.b32.xlu0 %v12303_v43, %s6604_s19  ;;  %v5561_v10 = vsel %vm5557_vm1, %v5528_v63, %v5178_v11  ;;  %v12313_v63 = vld [vmem:[#allocation77_spill] sm:$0xff] }
 0x673   : > { %v5272_v45 = vpop.permute.xlu1 %5271 }
 0x674   : > { %v4894_v27 = vpop.permute.xlu0 %4893  ;;  %v5592_v18 = vsel %vm3638_vm7, %v5560_v55, %v5272_v45 }
 0x675   : > { %4915 = vrot.lane.b32.xlu1 %v12303_v43, %s6590_s22  ;;  %6436 = vmatprep.mubr.msk.f32.mxu0 %vm5627_vm2, %v5592_v18  ;;  %v12310_v18 = vld [vmem:[#allocation95_spill] sm:$0xff] }
 0x676   : > { %5201 = vrot.lane.b32.xlu0 %v12306_v2, %s6604_s19  ;;  %v5368_v0 = vsel %vm2367_vm4, %v9766_v6, %v12310_v18  ;;  %v5369_v18 = vsel %vm2367_vm4, %v9843_v19, %v10401_v9  ;;  %v5370_v19 = vsel %vm2367_vm4, %v9778_v32, %v10403_v31 }
 0x677   : > { %v4988_v16 = vpop.permute.xlu1 %4987  ;;  %v5400_v5 = vsel %vm396_vm0, %v5368_v0, %v10363_v40  ;;  %v12317_v0 = vld [vmem:[#allocation48_spill] sm:$0xff] }
 0x678   : > { %v5274_v20 = vpop.permute.xlu0 %5273  ;;  %v5497_v29 = vsel %vm5492_vm15, %v5464_v41, %v4988_v16  ;;  %v5433_v49 = vsel %vm5427_vm14, %v5400_v5, %v12313_v63 }
 0x679   : > { %v5593_v60 = vsel %vm3638_vm7, %v5561_v10, %v5274_v20  ;;  %5295 = vrot.lane.b32.xlu1 %v12307_v39, %s6597_s15  ;;  %v5465_v16 = vsel %vm3572_vm5, %v5433_v49, %v4894_v27  ;;  %v12318_v49 = vld [vmem:[#allocation54_spill] sm:$0xff] }
 0x67a   : > { %4917 = vrot.lane.b32.xlu0 %v12306_v2, %s6590_s22  ;;  %6437 = vmatmul.mubr.msk.f32.gmra.mrb[10].mxu0 %vm5627_vm2, %v5593_v60  ;;  %v12312_v2 = vld [vmem:[#allocation45_spill] sm:$0xff] }
 0x67b   : > { %v4990_v59 = vpop.permute.xlu1 %4989 }
 0x67c   : > { %v5084_v52 = vpop.permute.xlu0 %5083 }
 0x67d   : > { %5011 = vrot.lane.b32.xlu1 %v12307_v39, %s6603_s23  ;;  %v5529_v54 = vsel %vm3605_vm6, %v5497_v29, %v5084_v52  ;;  %v5498_v39 = vsel %vm5492_vm15, %v5465_v16, %v4990_v59  ;;  %v12315_v59 = vld [vmem:[#allocation53_spill] sm:$0xff]  ;;  %v5401_v29 = vsel %vm396_vm0, %v5369_v18, %v10422_v37  ;;  %v12320_v37 = vld [vmem:[#allocation160_spill] sm:$0xff] }
 0x67e   : > { %5297 = vrot.lane.b32.xlu0 %v12308_v53, %s6597_s15 }
 0x67f   : > { %v5086_v43 = vpop.permute.xlu1 %5085 }
 0x680   : > { %v5180_v11 = vpop.permute.xlu0 %5179  ;;  %v5530_v40 = vsel %vm3605_vm6, %v5498_v39, %v5086_v43  ;;  %v12316_v43 = vld [vmem:[#allocation144_spill] sm:$0xff] }
 0x681   : > { %5013 = vrot.lane.b32.xlu1 %v12308_v53, %s6603_s23  ;;  %v5562_v10 = vsel %vm5557_vm1, %v5529_v54, %v5180_v11  ;;  %v12314_v53 = vld [vmem:[#allocation38_spill] sm:$0xff] }
 0x682   : > { %5107 = vrot.lane.b32.xlu0 %v12309_v30, %s6596_s12 }
 0x683   : > { %v4896_v45 = vpop.permute.xlu1 %4895 }
 0x684   : > { %v5182_v55 = vpop.permute.xlu0 %5181 }
 0x685   : > { %5109 = vrot.lane.b32.xlu1 %v12312_v2, %s6596_s12  ;;  %v5563_v52 = vsel %vm5557_vm1, %v5530_v40, %v5182_v55 }
 0x686   : > { %5203 = vrot.lane.b32.xlu0 %v12311_v51, %s6604_s19 }
 0x687   : > { %v5276_v6 = vpop.permute.xlu1 %5275 }
 0x688   : > { %v4898_v20 = vpop.permute.xlu0 %4897  ;;  %v5594_v60 = vsel %vm3638_vm7, %v5562_v10, %v5276_v6  ;;  %v12319_v10 = vld [vmem:[#allocation131_spill] sm:$0xff]  ;;  %v5402_v6 = vsel %vm396_vm0, %v5370_v19, %v12320_v37  ;;  %v12324_v19 = vld [vmem:[#allocation33_spill] sm:$0xff] }
 0x689   : > { %4919 = vrot.lane.b32.xlu1 %v12311_v51, %s6590_s22  ;;  %6439 = vmatprep.mubr.msk.f32.mxu0 %vm5627_vm2, %v5594_v60  ;;  %v5434_v51 = vsel %vm5427_vm14, %v5401_v29, %v10441_v23 }
 0x68a   : > { %5205 = vrot.lane.b32.xlu0 %v12314_v53, %s6604_s19  ;;  %v5466_v63 = vsel %vm3572_vm5, %v5434_v51, %v4896_v45  ;;  %v5435_v45 = vsel %vm5427_vm14, %v5402_v6, %v10439_v1 }
 0x68b   : > { %v4992_v34 = vpop.permute.xlu1 %4991  ;;  %v5467_v31 = vsel %vm3572_vm5, %v5435_v45, %v4898_v20 }
 0x68c   : > { %v5278_v11 = vpop.permute.xlu0 %5277  ;;  %v5499_v9 = vsel %vm5492_vm15, %v5466_v63, %v4992_v34  ;;  %v12321_v34 = vld [vmem:[#allocation137_spill] sm:$0xff] }
 0x68d   : > { %v5595_v27 = vsel %vm3638_vm7, %v5563_v52, %v5278_v11  ;;  %5299 = vrot.lane.b32.xlu1 %v12315_v59, %s6597_s15 }
 0x68e   : > { %4921 = vrot.lane.b32.xlu0 %v12314_v53, %s6590_s22  ;;  %6440 = vmatmul.mubr.msk.f32.gmra.mrb[12].mxu0 %vm5627_vm2, %v5595_v27  ;;  %v12322_v27 = vld [vmem:[#allocation126_spill] sm:$0xff] }
 0x68f   : > { %v4994_v28 = vpop.permute.xlu1 %4993 }
 0x690   : > { %v5088_v24 = vpop.permute.xlu0 %5087  ;;  %v5500_v53 = vsel %vm5492_vm15, %v5467_v31, %v4994_v28 }
 0x691   : > { %5015 = vrot.lane.b32.xlu1 %v12315_v59, %s6603_s23  ;;  %v5531_v23 = vsel %vm3605_vm6, %v5499_v9, %v5088_v24 }
 0x692   : > { %5301 = vrot.lane.b32.xlu0 %v12316_v43, %s6597_s15 }
 0x693   : > { %v5090_v41 = vpop.permute.xlu1 %5089 }
 0x694   : > { %v5184_v55 = vpop.permute.xlu0 %5183  ;;  %v5532_v40 = vsel %vm3605_vm6, %v5500_v53, %v5090_v41  ;;  %v12323_v41 = vld [vmem:[#allocation91_spill] sm:$0xff] }
 0x695   : > { %5017 = vrot.lane.b32.xlu1 %v12316_v43, %s6603_s23  ;;  %v5564_v16 = vsel %vm5557_vm1, %v5531_v23, %v5184_v55  ;;  %v5371_v55 = vsel %vm2367_vm4, %v9900_v4, %v10460_v50  ;;  %v5372_v4 = vsel %vm2367_vm4, %v9793_v46, %v10462_v17  ;;  %v12325_v23 = vld [vmem:[#allocation135_spill] sm:$0xff] }
 0x696   : > { %5111 = vrot.lane.b32.xlu0 %v12317_v0, %s6596_s12  ;;  %v5403_v18 = vsel %vm396_vm0, %v5371_v55, %v10483_v58  ;;  %v5404_v58 = vsel %vm396_vm0, %v5372_v4, %v10481_v8  ;;  %v12326_v8 = vld [vmem:[#allocation41_spill] sm:$0xff]  ;;  %v12327_v53 = vld [vmem:[#allocation75_spill] sm:$0xff] }
 0x697   : > { %v4900_v54 = vpop.permute.xlu1 %4899  ;;  %v5436_v29 = vsel %vm5427_vm14, %v5403_v18, %v10497_v47 }
 0x698   : > { %v5186_v5 = vpop.permute.xlu0 %5185  ;;  %v5468_v63 = vsel %vm3572_vm5, %v5436_v29, %v4900_v54  ;;  %v5437_v54 = vsel %vm5427_vm14, %v5404_v58, %v10495_v35  ;;  %v12332_v58 = vld [vmem:[#allocation13_spill] sm:$0xff] }
 0x699   : > { %5113 = vrot.lane.b32.xlu1 %v12319_v10, %s6596_s12  ;;  %v5565_v1 = vsel %vm5557_vm1, %v5532_v40, %v5186_v5  ;;  %v12328_v40 = vld [vmem:[#allocation56_spill] sm:$0xff] }
 0x69a   : > { %5207 = vrot.lane.b32.xlu0 %v12318_v49, %s6604_s19 }
 0x69b   : > { %v5280_v32 = vpop.permute.xlu1 %5279 }
 0x69c   : > { %v4902_v60 = vpop.permute.xlu0 %4901  ;;  %v5596_v39 = vsel %vm3638_vm7, %v5564_v16, %v5280_v32 }
 0x69d   : > { %4829 = vrot.lane.b32.xlu1 %v12319_v10, %s6602_s20  ;;  %6442 = vmatprep.mubr.msk.f32.mxu0 %vm5627_vm2, %v5596_v39  ;;  %v5469_v17 = vsel %vm3572_vm5, %v5437_v54, %v4902_v60 }
 0x69e   : > { %4923 = vrot.lane.b32.xlu0 %v12318_v49, %s6590_s22 }
 0x69f   : > { %v4996_v11 = vpop.permute.xlu1 %4995 }
 0x6a0   : > { %v5282_v52 = vpop.permute.xlu0 %5281  ;;  %v5501_v50 = vsel %vm5492_vm15, %v5468_v63, %v4996_v11  ;;  %v5373_v11 = vsel %vm2367_vm4, %v9950_v3, %v10503_v56  ;;  %v5374_v3 = vsel %vm2367_vm4, %v9825_v22, %v10505_v25 }
 0x6a1   : > { %v5597_v20 = vsel %vm3638_vm7, %v5565_v1, %v5282_v52  ;;  %5209 = vrot.lane.b32.xlu1 %v12322_v27, %s6604_s19 }
 0x6a2   : > { %5303 = vrot.lane.b32.xlu0 %v12321_v34, %s6597_s15  ;;  %6443 = vmatmul.mubr.msk.f32.gmra.mrb[14].mxu0 %vm5627_vm2, %v5597_v20  ;;  %v5405_v20 = vsel %vm396_vm0, %v5373_v11, %v10513_v21  ;;  %v5406_v21 = vsel %vm396_vm0, %v5374_v3, %v10511_v26 }
 0x6a3   : > { %v4998_v24 = vpop.permute.xlu1 %4997 }
 0x6a4   : > { %v5092_v59 = vpop.permute.xlu0 %5091  ;;  %v5502_v6 = vsel %vm5492_vm15, %v5469_v17, %v4998_v24 }
 0x6a5   : > { %4925 = vrot.lane.b32.xlu1 %v12322_v27, %s6590_s22  ;;  %v5533_v47 = vsel %vm3605_vm6, %v5501_v50, %v5092_v59  ;;  %v12331_v50 = vld [vmem:[#allocation88_spill] sm:$0xff] }
 0x6a6   : > { %5019 = vrot.lane.b32.xlu0 %v12321_v34, %s6603_s23  ;;  %v5438_v34 = vsel %vm5427_vm14, %v5405_v20, %v10521_v44 }
 0x6a7   : > { %v5094_v43 = vpop.permute.xlu1 %5093 }
 0x6a8   : > { %v5188_v28 = vpop.permute.xlu0 %5187  ;;  %v5534_v45 = vsel %vm3605_vm6, %v5502_v6, %v5094_v43  ;;  %v5439_v43 = vsel %vm5427_vm14, %v5406_v21, %v10519_v48  ;;  %v12335_v6 = vld [vmem:[#allocation86_spill] sm:$0xff]  ;;  %v12340_v21 = vld [vmem:[#allocation148_spill] sm:$0xff] }
 0x6a9   : > { %5305 = vrot.lane.b32.xlu1 %v12323_v41, %s6597_s15  ;;  %v5566_v9 = vsel %vm5557_vm1, %v5533_v47, %v5188_v28  ;;  %v12329_v28 = vld [vmem:[#allocation68_spill] sm:$0xff] }
 0x6aa   : > { %5021 = vrot.lane.b32.xlu0 %v12323_v41, %s6603_s23 }
 0x6ab   : > { %v4904_v5 = vpop.permute.xlu1 %4903 }
 0x6ac   : > { %v5190_v51 = vpop.permute.xlu0 %5189  ;;  %v5470_v24 = vsel %vm3572_vm5, %v5438_v34, %v4904_v5 }
 0x6ad   : > { %5115 = vrot.lane.b32.xlu1 %v12324_v19, %s6596_s12  ;;  %v5567_v35 = vsel %vm5557_vm1, %v5534_v45, %v5190_v51  ;;  %v12330_v51 = vld [vmem:[#allocation139_spill] sm:$0xff] }
 0x6ae   : > { %4831 = vrot.lane.b32.xlu0 %v12324_v19, %s6602_s20 }
 0x6af   : > { %v5284_v46 = vpop.permute.xlu1 %5283 }
 0x6b0   : > { %v4906_v49 = vpop.permute.xlu0 %4905  ;;  %v5598_v37 = vsel %vm3638_vm7, %v5566_v9, %v5284_v46  ;;  %v12333_v46 = vld [vmem:[#allocation66_spill] sm:$0xff] }
 0x6b1   : > { %5117 = vrot.lane.b32.xlu1 %v12326_v8, %s6596_s12  ;;  %6445 = vmatprep.mubr.msk.f32.mxu0 %vm5627_vm2, %v5598_v37  ;;  %v5471_v25 = vsel %vm3572_vm5, %v5439_v43, %v4906_v49  ;;  %v5375_v17 = vsel %vm2367_vm4, %v10007_v33, %v12333_v46  ;;  %v12334_v37 = vld [vmem:[#allocation71_spill] sm:$0xff]  ;;  %v12348_v46 = vld [vmem:[#allocation60_spill] sm:$0xff] }
 0x6b2   : > { %5211 = vrot.lane.b32.xlu0 %v12325_v23, %s6604_s19 }
 0x6b3   : > { %v5000_v32 = vpop.permute.xlu1 %4999 }
 0x6b4   : > { %v5286_v16 = vpop.permute.xlu0 %5285  ;;  %v5503_v56 = vsel %vm5492_vm15, %v5470_v24, %v5000_v32 }
 0x6b5   : > { %v5599_v60 = vsel %vm3638_vm7, %v5567_v35, %v5286_v16  ;;  %4833 = vrot.lane.b32.xlu1 %v12326_v8, %s6602_s20 }
 0x6b6   : > { %4927 = vrot.lane.b32.xlu0 %v12325_v23, %s6590_s22  ;;  %6446 = vmatmul.mubr.msk.f32.gmra.mrb[16].mxu0 %vm5627_vm2, %v5599_v60  ;;  %v5407_v23 = vsel %vm396_vm0, %v5375_v17, %v10537_v15  ;;  %v12336_v60 = vld [vmem:[#allocation74_spill] sm:$0xff]  ;;  %v12337_v15 = vld [vmem:[#allocation7_spill] sm:$0xff] }
 0x6b7   : > { %v5002_v39 = vpop.permute.xlu1 %5001  ;;  %v5440_v45 = vsel %vm5427_vm14, %v5407_v23, %v10545_v12  ;;  %v5376_v33 = vsel %vm2367_vm4, %v9859_v36, %v12336_v60 }
 0x6b8   : > { %v5096_v31 = vpop.permute.xlu0 %5095  ;;  %v5504_v29 = vsel %vm5492_vm15, %v5471_v25, %v5002_v39  ;;  %v5408_v39 = vsel %vm396_vm0, %v5376_v33, %v12337_v15  ;;  %v12349_v15 = vld [vmem:[#allocation46_spill] sm:$0xff] }
 0x6b9   : > { %5213 = vrot.lane.b32.xlu1 %v12328_v40, %s6604_s19  ;;  %v5535_v44 = vsel %vm3605_vm6, %v5503_v56, %v5096_v31 }
 0x6ba   : > { %5307 = vrot.lane.b32.xlu0 %v12327_v53, %s6597_s15 }
 0x6bb   : > { %v5098_v52 = vpop.permute.xlu1 %5097 }
 0x6bc   : > { %v5192_v1 = vpop.permute.xlu0 %5191  ;;  %v5536_v26 = vsel %vm3605_vm6, %v5504_v29, %v5098_v52 }
 0x6bd   : > { %4929 = vrot.lane.b32.xlu1 %v12328_v40, %s6590_s22  ;;  %v5568_v55 = vsel %vm5557_vm1, %v5535_v44, %v5192_v1 }
 0x6be   : > { %5023 = vrot.lane.b32.xlu0 %v12327_v53, %s6603_s23  ;;  %v12338_v53 = vld [vmem:[#allocation78_spill] sm:$0xff] }
 0x6bf   : > { %v4908_v59 = vpop.permute.xlu1 %4907  ;;  %v5441_v40 = vsel %vm5427_vm14, %v5408_v39, %v12338_v53  ;;  %v12350_v53 = vld [vmem:[#allocation80_spill] sm:$0xff] }
 0x6c0   : > { %v5194_v27 = vpop.permute.xlu0 %5193  ;;  %v5472_v32 = vsel %vm3572_vm5, %v5440_v45, %v4908_v59 }
 0x6c1   : > { %5309 = vrot.lane.b32.xlu1 %v12329_v28, %s6597_s15  ;;  %v5569_v48 = vsel %vm5557_vm1, %v5536_v26, %v5194_v27  ;;  %v12339_v27 = vld [vmem:[#allocation42_spill] sm:$0xff] }
 0x6c2   : > { %5025 = vrot.lane.b32.xlu0 %v12329_v28, %s6603_s23 }
 0x6c3   : > { %v5288_v22 = vpop.permute.xlu1 %5287 }
 0x6c4   : > { %v4910_v41 = vpop.permute.xlu0 %4909  ;;  %v5600_v18 = vsel %vm3638_vm7, %v5568_v55, %v5288_v22  ;;  %v12341_v55 = vld [vmem:[#allocation151_spill] sm:$0xff] }
 0x6c5   : > { %5119 = vrot.lane.b32.xlu1 %v12330_v51, %s6596_s12  ;;  %6448 = vmatprep.mubr.msk.f32.mxu0 %vm5627_vm2, %v5600_v18  ;;  %v5473_v11 = vsel %vm3572_vm5, %v5441_v40, %v4910_v41  ;;  %v12342_v41 = vld [vmem:[#allocation140_spill] sm:$0xff]  ;;  %v12343_v18 = vld [vmem:[#allocation161_spill] sm:$0xff] }
 0x6c6   : > { %4835 = vrot.lane.b32.xlu0 %v12330_v51, %s6602_s20  ;;  %v5377_v29 = vsel %vm2367_vm4, %v12278_v61, %v12343_v18  ;;  %v12358_v18 = vld [vmem:[#allocation157_spill] sm:$0xff] }
 0x6c7   : > { %v5004_v63 = vpop.permute.xlu1 %5003  ;;  %v5409_v26 = vsel %vm396_vm0, %v5377_v29, %v10561_v7  ;;  %v12347_v7 = vld [vmem:[#allocation72_spill] sm:$0xff] }
 0x6c8   : > { %v5290_v5 = vpop.permute.xlu0 %5289  ;;  %v5505_v31 = vsel %vm5492_vm15, %v5472_v32, %v5004_v63 }
 0x6c9   : > { %v5601_v4 = vsel %vm3638_vm7, %v5569_v48, %v5290_v5  ;;  %5121 = vrot.lane.b32.xlu1 %v12332_v58, %s6596_s12  ;;  %v5442_v48 = vsel %vm5427_vm14, %v5409_v26, %v10569_v62 }
 0x6ca   : > { %5215 = vrot.lane.b32.xlu0 %v12331_v50, %s6604_s19  ;;  %6449 = vmatmul.mubr.msk.f32.gmra.mrb[18].mxu0 %vm5627_vm2, %v5601_v4 }
 0x6cb   : > { %v5006_v54 = vpop.permute.xlu1 %5005 }
 0x6cc   : > { %v5100_v47 = vpop.permute.xlu0 %5099  ;;  %v5506_v34 = vsel %vm5492_vm15, %v5473_v11, %v5006_v54  ;;  %v12345_v54 = vld [vmem:[#allocation58_spill] sm:$0xff]  ;;  %v12352_v11 = vld [vmem:[#allocation63_spill] sm:$0xff] }
 0x6cd   : > { %4837 = vrot.lane.b32.xlu1 %v12332_v58, %s6602_s20  ;;  %v5537_v12 = vsel %vm3605_vm6, %v5505_v31, %v5100_v47 }
 0x6ce   : > { %4931 = vrot.lane.b32.xlu0 %v12331_v50, %s6590_s22  ;;  %v12344_v50 = vld [vmem:[#allocation37_spill] sm:$0xff] }
 0x6cf   : > { %v5102_v49 = vpop.permute.xlu1 %5101  ;;  %v5378_v61 = vsel %vm2367_vm4, %v12344_v50, %v10553_v42  ;;  %v12359_v50 = vld [vmem:[#allocation153_spill] sm:$0xff] }
 0x6d0   : > { %v5196_v9 = vpop.permute.xlu0 %5195  ;;  %v5538_v59 = vsel %vm3605_vm6, %v5506_v34, %v5102_v49  ;;  %v5410_v49 = vsel %vm396_vm0, %v5378_v61, %v12347_v7  ;;  %v12354_v34 = vld [vmem:[#allocation154_spill] sm:$0xff]  ;;  %v12360_v61 = vld [vmem:[#allocation76_spill] sm:$0xff] }
 0x6d1   : > { %5217 = vrot.lane.b32.xlu1 %v12335_v6, %s6604_s19  ;;  %v5570_v1 = vsel %vm5557_vm1, %v5537_v12, %v5196_v9  ;;  %v12346_v9 = vld [vmem:[#allocation83_spill] sm:$0xff]  ;;  %v5443_v17 = vsel %vm5427_vm14, %v5410_v49, %v12348_v46 }
 0x6d2   : > { %5311 = vrot.lane.b32.xlu0 %v12334_v37, %s6597_s15 }
 0x6d3   : > { %v4912_v16 = vpop.permute.xlu1 %4911 }
 0x6d4   : > { %v5198_v35 = vpop.permute.xlu0 %5197  ;;  %v5474_v4 = vsel %vm3572_vm5, %v5442_v48, %v4912_v16 }
 0x6d5   : > { %4933 = vrot.lane.b32.xlu1 %v12335_v6, %s6590_s22  ;;  %v5571_v24 = vsel %vm5557_vm1, %v5538_v59, %v5198_v35  ;;  %v12355_v59 = vld [vmem:[#allocation121_spill] sm:$0xff] }
 0x6d6   : > { %5027 = vrot.lane.b32.xlu0 %v12334_v37, %s6603_s23 }
 0x6d7   : > { %v5292_v36 = vpop.permute.xlu1 %5291 }
 0x6d8   : > { %v4914_v52 = vpop.permute.xlu0 %4913  ;;  %v5602_v20 = vsel %vm3638_vm7, %v5570_v1, %v5292_v36 }
 0x6d9   : > { %5313 = vrot.lane.b32.xlu1 %v12339_v27, %s6597_s15  ;;  %6451 = vmatprep.mubr.msk.f32.mxu0 %vm5627_vm2, %v5602_v20  ;;  %v5475_v23 = vsel %vm3572_vm5, %v5443_v17, %v4914_v52  ;;  %v12351_v52 = vld [vmem:[#allocation145_spill] sm:$0xff]  ;;  %v12353_v20 = vld [vmem:[#allocation158_spill] sm:$0xff] }
 0x6da   : > { %5029 = vrot.lane.b32.xlu0 %v12339_v27, %s6603_s23  ;;  %v5379_v36 = vsel %vm2367_vm4, %v12294_v57, %v12351_v52  ;;  %v12361_v17 = vld [vmem:[#allocation142_spill] sm:$0xff] }
 0x6db   : > { %v5008_v56 = vpop.permute.xlu1 %5007  ;;  %v5411_v27 = vsel %vm396_vm0, %v5379_v36, %v12354_v34  ;;  %v12368_v34 = vld [vmem:[#allocation93_spill] sm:$0xff] }
 0x6dc   : > { %v5294_v3 = vpop.permute.xlu0 %5293  ;;  %v5507_v47 = vsel %vm5492_vm15, %v5474_v4, %v5008_v56 }
 0x6dd   : > { %v5603_v28 = vsel %vm3638_vm7, %v5571_v24, %v5294_v3  ;;  %5123 = vrot.lane.b32.xlu1 %v12340_v21, %s6596_s12  ;;  %v5444_v24 = vsel %vm5427_vm14, %v5411_v27, %v12355_v59  ;;  %v5382_v27 = vsel %vm2367_vm4, %v12304_v14, %v12368_v34  ;;  %v12369_v59 = vld [vmem:[#allocation104_spill] sm:$0xff] }
 0x6de   : > { %4839 = vrot.lane.b32.xlu0 %v12340_v21, %s6602_s20  ;;  %6452 = vmatmul.mubr.msk.f32.gmra.mrb[20].mxu0 %vm5627_vm2, %v5603_v28 }
 0x6df   : > { %v5010_v43 = vpop.permute.xlu1 %5009 }
 0x6e0   : > { %v5104_v44 = vpop.permute.xlu0 %5103  ;;  %v5508_v35 = vsel %vm5492_vm15, %v5475_v23, %v5010_v43 }
 0x6e1   : > { %5125 = vrot.lane.b32.xlu1 %v12342_v41, %s6596_s12  ;;  %v5539_v62 = vsel %vm3605_vm6, %v5507_v47, %v5104_v44  ;;  %v12356_v44 = vld [vmem:[#allocation119_spill] sm:$0xff] }
 0x6e2   : > { %5219 = vrot.lane.b32.xlu0 %v12341_v55, %s6604_s19  ;;  %v5380_v57 = vsel %vm2367_vm4, %v12296_v38, %v12356_v44 }
 0x6e3   : > { %v5106_v25 = vpop.permute.xlu1 %5105 }
 0x6e4   : > { %v5200_v22 = vpop.permute.xlu0 %5199  ;;  %v5540_v16 = vsel %vm3605_vm6, %v5508_v35, %v5106_v25  ;;  %v12364_v35 = vld [vmem:[#allocation117_spill] sm:$0xff] }
 0x6e5   : > { %4841 = vrot.lane.b32.xlu1 %v12342_v41, %s6602_s20  ;;  %v5572_v37 = vsel %vm5557_vm1, %v5539_v62, %v5200_v22 }
 0x6e6   : > { %4935 = vrot.lane.b32.xlu0 %v12341_v55, %s6590_s22  ;;  %v12357_v55 = vld [vmem:[#allocation156_spill] sm:$0xff] }
 0x6e7   : > { %v4916_v63 = vpop.permute.xlu1 %4915  ;;  %v5412_v22 = vsel %vm396_vm0, %v5380_v57, %v12357_v55 }
 0x6e8   : > { %v5202_v5 = vpop.permute.xlu0 %5201  ;;  %v5476_v28 = vsel %vm3572_vm5, %v5444_v24, %v4916_v63  ;;  %v5445_v29 = vsel %vm5427_vm14, %v5412_v22, %v12358_v18  ;;  %v5414_v24 = vsel %vm396_vm0, %v5382_v27, %v12369_v59  ;;  %v12372_v22 = vld [vmem:[#allocation146_spill] sm:$0xff] }
 0x6e9   : > { %5221 = vrot.lane.b32.xlu1 %v12346_v9, %s6604_s19  ;;  %v5573_v32 = vsel %vm5557_vm1, %v5540_v16, %v5202_v5 }
 0x6ea   : > { %5315 = vrot.lane.b32.xlu0 %v12345_v54, %s6597_s15 }
 0x6eb   : > { %v5296_v42 = vpop.permute.xlu1 %5295 }
 0x6ec   : > { %v4918_v6 = vpop.permute.xlu0 %4917  ;;  %v5604_v45 = vsel %vm3638_vm7, %v5572_v37, %v5296_v42  ;;  %v12362_v42 = vld [vmem:[#allocation81_spill] sm:$0xff] }
 0x6ed   : > { %4937 = vrot.lane.b32.xlu1 %v12346_v9, %s6590_s22  ;;  %6454 = vmatprep.mubr.msk.f32.mxu0 %vm5627_vm2, %v5604_v45  ;;  %v5477_v5 = vsel %vm3572_vm5, %v5445_v29, %v4918_v6  ;;  %v5381_v23 = vsel %vm2367_vm4, %v12301_v13, %v12362_v42  ;;  %v12363_v45 = vld [vmem:[#allocation149_spill] sm:$0xff]  ;;  %v12366_v13 = vld [vmem:[#allocation30_spill] sm:$0xff] }
 0x6ee   : > { %5031 = vrot.lane.b32.xlu0 %v12345_v54, %s6603_s23  ;;  %v5413_v16 = vsel %vm396_vm0, %v5381_v23, %v12364_v35 }
 0x6ef   : > { %v5012_v33 = vpop.permute.xlu1 %5011 }
 0x6f0   : > { %v5298_v60 = vpop.permute.xlu0 %5297  ;;  %v5509_v43 = vsel %vm5492_vm15, %v5476_v28, %v5012_v33 }
 0x6f1   : > { %v5605_v31 = vsel %vm3638_vm7, %v5573_v32, %v5298_v60  ;;  %5317 = vrot.lane.b32.xlu1 %v12349_v15, %s6597_s15  ;;  %v12365_v32 = vld [vmem:[#allocation185_spill] sm:$0xff] }
 0x6f2   : > { %5033 = vrot.lane.b32.xlu0 %v12349_v15, %s6603_s23  ;;  %6455 = vmatmul.mubr.msk.f32.gmra.mrb[22].mxu0 %vm5627_vm2, %v5605_v31  ;;  %v5446_v60 = vsel %vm5427_vm14, %v5413_v16, %v12365_v32  ;;  %v12380_v32 = vld [vmem:[#allocation168_spill] sm:$0xff] }
 0x6f3   : > { %v5014_v12 = vpop.permute.xlu1 %5013 }
 0x6f4   : > { %v5108_v39 = vpop.permute.xlu0 %5107  ;;  %v5510_v4 = vsel %vm5492_vm15, %v5477_v5, %v5014_v12  ;;  %v12367_v12 = vld [vmem:[#allocation133_spill] sm:$0xff]  ;;  %v12373_v5 = vld [vmem:[#allocation150_spill] sm:$0xff] }
 0x6f5   : > { %5127 = vrot.lane.b32.xlu1 %v12350_v53, %s6596_s12  ;;  %v5541_v25 = vsel %vm3605_vm6, %v5509_v43, %v5108_v39  ;;  %v12371_v43 = vld [vmem:[#allocation138_spill] sm:$0xff] }
 0x6f6   : > { %4843 = vrot.lane.b32.xlu0 %v12350_v53, %s6602_s20 }
 0x6f7   : > { %v5110_v1 = vpop.permute.xlu1 %5109 }
 0x6f8   : > { %v5204_v40 = vpop.permute.xlu0 %5203  ;;  %v5542_v47 = vsel %vm3605_vm6, %v5510_v4, %v5110_v1 }
 0x6f9   : > { %5129 = vrot.lane.b32.xlu1 %v12353_v20, %s6596_s12  ;;  %v5574_v26 = vsel %vm5557_vm1, %v5541_v25, %v5204_v40 }
 0x6fa   : > { %5223 = vrot.lane.b32.xlu0 %v12352_v11, %s6604_s19 }
 0x6fb   : > { %v4920_v56 = vpop.permute.xlu1 %4919 }
 0x6fc   : > { %v5206_v3 = vpop.permute.xlu0 %5205  ;;  %v5478_v15 = vsel %vm3572_vm5, %v5446_v60, %v4920_v56  ;;  %v5384_v60 = vsel %vm2367_vm4, %v12312_v2, %v12380_v32 }
 0x6fd   : > { %4845 = vrot.lane.b32.xlu1 %v12353_v20, %s6602_s20  ;;  %v5575_v54 = vsel %vm5557_vm1, %v5542_v47, %v5206_v3  ;;  %v12370_v3 = vld [vmem:[#allocation163_spill] sm:$0xff]  ;;  %v12375_v47 = vld [vmem:[#allocation180_spill] sm:$0xff] }
 0x6fe   : > { %4939 = vrot.lane.b32.xlu0 %v12352_v11, %s6590_s22  ;;  %v5447_v56 = vsel %vm5427_vm14, %v5414_v24, %v12370_v3  ;;  %v11232_v3 = vld [vmem:[%s11501_s9] ss:$0 sm:$0xff] }
 0x6ff   : > { %v5300_v38 = vpop.permute.xlu1 %5299 }
 0x700   : > { %v4922_v48 = vpop.permute.xlu0 %4921  ;;  %v5606_v63 = vsel %vm3638_vm7, %v5574_v26, %v5300_v38 }
 0x701   : > { %5225 = vrot.lane.b32.xlu1 %v12360_v61, %s6604_s19  ;;  %6457 = vmatprep.mubr.msk.f32.mxu0 %vm5627_vm2, %v5606_v63  ;;  %v5479_v57 = vsel %vm3572_vm5, %v5447_v56, %v4922_v48 }
 0x702   : > { %5319 = vrot.lane.b32.xlu0 %v12359_v50, %s6597_s15 }
 0x703   : > { %v5016_v7 = vpop.permute.xlu1 %5015 }
 0x704   : > { %v5302_v9 = vpop.permute.xlu0 %5301  ;;  %v5511_v39 = vsel %vm5492_vm15, %v5478_v15, %v5016_v7  ;;  %v12377_v7 = vld [vmem:[#allocation4_spill] sm:$0xff] }
 0x705   : > { %v5607_v49 = vsel %vm3638_vm7, %v5575_v54, %v5302_v9  ;;  %4941 = vrot.lane.b32.xlu1 %v12360_v61, %s6590_s22  ;;  %v12376_v54 = vld [vmem:[#allocation61_spill] sm:$0xff] }
 0x706   : > { %5035 = vrot.lane.b32.xlu0 %v12359_v50, %s6603_s23  ;;  %6458 = vmatmul.mubr.msk.f32.gmra.mrb[24].mxu0 %vm5627_vm2, %v5607_v49  ;;  %v12374_v50 = vld [vmem:[#allocation106_spill] sm:$0xff]  ;;  %v12378_v49 = vld [vmem:[#allocation113_spill] sm:$0xff] }
 0x707   : > { %v5018_v46 = vpop.permute.xlu1 %5017  ;;  %v5383_v61 = vsel %vm2367_vm4, %v12309_v30, %v12374_v50  ;;  %v12379_v30 = vld [vmem:[#allocation5_spill] sm:$0xff] }
 0x708   : > { %v5112_v62 = vpop.permute.xlu0 %5111  ;;  %v5512_v14 = vsel %vm5492_vm15, %v5479_v57, %v5018_v46  ;;  %v5415_v9 = vsel %vm396_vm0, %v5383_v61, %v12376_v54 }
 0x709   : > { %5321 = vrot.lane.b32.xlu1 %v12361_v17, %s6597_s15  ;;  %v5543_v40 = vsel %vm3605_vm6, %v5511_v39, %v5112_v62  ;;  %v5448_v62 = vsel %vm5427_vm14, %v5415_v9, %v12378_v49 }
 0x70a   : > { %5037 = vrot.lane.b32.xlu0 %v12361_v17, %s6603_s23 }
 0x70b   : > { %v5114_v6 = vpop.permute.xlu1 %5113 }
 0x70c   : > { %v5208_v37 = vpop.permute.xlu0 %5207  ;;  %v5544_v55 = vsel %vm3605_vm6, %v5512_v14, %v5114_v6 }
 0x70d   : > { %5131 = vrot.lane.b32.xlu1 %v12363_v45, %s6596_s12  ;;  %v5576_v1 = vsel %vm5557_vm1, %v5543_v40, %v5208_v37 }
 0x70e   : > { %4847 = vrot.lane.b32.xlu0 %v12363_v45, %s6602_s20 }
 0x70f   : > { %v4830_v31 = vpop.permute.xlu1 %4829 }
 0x710   : > { %v4924_v33 = vpop.permute.xlu0 %4923 }
 0x711   : > { %5133 = vrot.lane.b32.xlu1 %v12366_v13, %s6596_s12  ;;  %v5480_v37 = vsel %vm3572_vm5, %v5448_v62, %v4924_v33  ;;  %v12381_v33 = vld [vmem:[#allocation103_spill] sm:$0xff]  ;;  %v12385_v62 = vld [vmem:[#allocation21_spill] sm:$0xff] }
 0x712   : > { %5227 = vrot.lane.b32.xlu0 %v12367_v12, %s6604_s19  ;;  %v5416_v15 = vsel %vm396_vm0, %v5384_v60, %v12381_v33 }
 0x713   : > { %v5210_v36 = vpop.permute.xlu1 %5209  ;;  %v5449_v39 = vsel %vm5427_vm14, %v5416_v15, %v4830_v31  ;;  %v11227_v31 = vld [vmem:[%s11500_s8] ss:$0 sm:$0xff] }
 0x714   : > { %v5304_v52 = vpop.permute.xlu0 %5303  ;;  %v5577_v25 = vsel %vm5557_vm1, %v5544_v55, %v5210_v36  ;;  %v12382_v55 = vld [vmem:[#allocation43_spill] sm:$0xff] }
 0x715   : > { %v5608_v11 = vsel %vm3638_vm7, %v5576_v1, %v5304_v52  ;;  %4849 = vrot.lane.b32.xlu1 %v12366_v13, %s6602_s20 }
 0x716   : > { %6460 = vmatprep.mubr.msk.f32.mxu0 %vm5627_vm2, %v5608_v11  ;;  %4943 = vrot.lane.b32.xlu0 %v12367_v12, %s6590_s22 }
 0x717   : > { %v4926_v44 = vpop.permute.xlu1 %4925 }
 0x718   : > { %v5020_v28 = vpop.permute.xlu0 %5019  ;;  %v5481_v40 = vsel %vm3572_vm5, %v5449_v39, %v4926_v44 }
 0x719   : > { %5229 = vrot.lane.b32.xlu1 %v12371_v43, %s6604_s19  ;;  %v5513_v6 = vsel %vm5492_vm15, %v5480_v37, %v5020_v28 }
 0x71a   : > { %5323 = vrot.lane.b32.xlu0 %v12372_v22, %s6597_s15 }
 0x71b   : > { %v5306_v29 = vpop.permute.xlu1 %5305 }
 0x71c   : > { %v5022_v18 = vpop.permute.xlu0 %5021  ;;  %v5609_v26 = vsel %vm3638_vm7, %v5577_v25, %v5306_v29 }
 0x71d   : > { %6461 = vmatmul.mubr.msk.f32.gmra.mrb[26].mxu0 %vm5627_vm2, %v5609_v26  ;;  %4945 = vrot.lane.b32.xlu1 %v12371_v43, %s6590_s22  ;;  %v5514_v1 = vsel %vm5492_vm15, %v5481_v40, %v5022_v18  ;;  %v12383_v18 = vld [vmem:[#allocation96_spill] sm:$0xff] }
 0x71e   : > { %5039 = vrot.lane.b32.xlu0 %v12372_v22, %s6603_s23  ;;  %v5385_v22 = vsel %vm2367_vm4, %v12317_v0, %v12382_v55  ;;  %v12388_v55 = vld [vmem:[#allocation164_spill] sm:$0xff] }
 0x71f   : > { %v5116_v38 = vpop.permute.xlu1 %5115  ;;  %v5417_v29 = vsel %vm396_vm0, %v5385_v22, %v12383_v18  ;;  %v5388_v22 = vsel %vm2367_vm4, %v12326_v8, %v12388_v55 }
 0x720   : > { %v4832_v48 = vpop.permute.xlu0 %4831  ;;  %v5545_v42 = vsel %vm3605_vm6, %v5513_v6, %v5116_v38 }
 0x721   : > { %5325 = vrot.lane.b32.xlu1 %v12373_v5, %s6597_s15  ;;  %v5450_v38 = vsel %vm5427_vm14, %v5417_v29, %v4832_v48 }
 0x722   : > { %5041 = vrot.lane.b32.xlu0 %v12373_v5, %s6603_s23 }
 0x723   : > { %v5118_v4 = vpop.permute.xlu1 %5117 }
 0x724   : > { %v5212_v63 = vpop.permute.xlu0 %5211  ;;  %v5546_v52 = vsel %vm3605_vm6, %v5514_v1, %v5118_v4 }
 0x725   : > { %6566 = vrot.lane.b32.xlu1 %v12375_v47, %s6596_s12  ;;  %v5578_v23 = vsel %vm5557_vm1, %v5545_v42, %v5212_v63  ;;  %v12384_v47 = vld [vmem:[#allocation183_spill] sm:$0xff] }
 0x726   : > { %6571 = vrot.lane.b32.xlu0 %v12377_v7, %s6604_s19  ;;  %v5386_v54 = vsel %vm2367_vm4, %v12319_v10, %v12384_v47 }
 0x727   : > { %v4834_v17 = vpop.permute.xlu1 %4833 }
 0x728   : > { %v4928_v46 = vpop.permute.xlu0 %4927 }
 0x729   : > { %6576 = vrot.lane.b32.xlu1 %v12379_v30, %s6597_s15  ;;  %v5482_v50 = vsel %vm3572_vm5, %v5450_v38, %v4928_v46  ;;  %v5418_v46 = vsel %vm396_vm0, %v5386_v54, %v12385_v62 }
 0x72a   : > { %v5451_v37 = vsel %vm5427_vm14, %v5418_v46, %v4834_v17 }
 0x72b   : > { %v5214_v35 = vpop.permute.xlu1 %5213 }
 0x72c   : > { %v5308_v45 = vpop.permute.xlu0 %5307  ;;  %v5579_v36 = vsel %vm5557_vm1, %v5546_v52, %v5214_v35 }
 0x72d   : > { %v5610_v16 = vsel %vm3638_vm7, %v5578_v23, %v5308_v45 }
 0x72e   : > { %6463 = vmatprep.mubr.msk.f32.mxu0 %vm5627_vm2, %v5610_v16 }
 0x72f   : > { %v4930_v12 = vpop.permute.xlu1 %4929 }
 0x730   : > { %v5024_v13 = vpop.permute.xlu0 %5023  ;;  %v5483_v42 = vsel %vm3572_vm5, %v5451_v37, %v4930_v12 }
 0x731   : > { %v5515_v61 = vsel %vm5492_vm15, %v5482_v50, %v5024_v13 }
 0x733   : > { %v5310_v2 = vpop.permute.xlu1 %5309 }
 0x734   : > { %v5026_v11 = vpop.permute.xlu0 %5025  ;;  %v5611_v34 = vsel %vm3638_vm7, %v5579_v36, %v5310_v2  ;;  %v12386_v2 = vld [vmem:[#allocation34_spill] sm:$0xff] }
 0x735   : > { %6464 = vmatmul.mubr.msk.f32.gmra.mrb[28].mxu0 %vm5627_vm2, %v5611_v34  ;;  %v5516_v23 = vsel %vm5492_vm15, %v5483_v42, %v5026_v11  ;;  %v5387_v34 = vsel %vm2367_vm4, %v12324_v19, %v12386_v2 }
 0x737   : > { %v5120_v59 = vpop.permute.xlu1 %5119 }
 0x738   : > { %v4836_v27 = vpop.permute.xlu0 %4835  ;;  %v5547_v0 = vsel %vm3605_vm6, %v5515_v61, %v5120_v59  ;;  %v12387_v59 = vld [vmem:[#allocation107_spill] sm:$0xff] }
 0x739   : > { %v6435_v24 = vpop.f32.mrb[8].mxu0 }
 0x73a   : > { %v5961_v56 = vmul.f32 %v6435_v24, %v11227_v31  ;;  %v5794_v28 = vpop.f32.mrb[9].mxu0  ;;  %v5419_v24 = vsel %vm396_vm0, %v5387_v34, %v12387_v59 }
 0x73b   : > { %v5960_v44 = vmul.f32 %v11227_v31, %v5794_v28  ;;  %v5122_v14 = vpop.permute.xlu1 %5121 }
 0x73c   : > { %v5216_v57 = vpop.permute.xlu0 %5215  ;;  %v6000_v43 = vadd.f32 %v11232_v3, %v5961_v56  ;;  %v5548_v10 = vsel %vm3605_vm6, %v5516_v23, %v5122_v14  ;;  %v5452_v56 = vsel %vm5427_vm14, %v5419_v24, %v4836_v27  ;;  %v12389_v27 = vld [vmem:[#allocation70_spill] sm:$0xff] }
 0x73d   : > { %v5999_v25 = vadd.f32 %v11232_v3, %v5960_v44  ;;  %v5580_v9 = vsel %vm5557_vm1, %v5547_v0, %v5216_v57 }
 0x73e   : > { %v6032_v26 = vmax.f32 %v6000_v43, 0.0 }
 0x73f   : > { %v6031_v5 = vmax.f32 %v5999_v25, 0.0  ;;  %v4838_v4 = vpop.permute.xlu1 %4837 }
 0x740   : > { %v4932_v63 = vpop.permute.xlu0 %4931  ;;  %6064 = vst.msk [vmem:[%s11242_s24 + $0x8] sm:$0xff] %vm2367_vm4, %v6032_v26  ;;  %v5420_v26 = vsel %vm396_vm0, %v5388_v22, %v12389_v27 }
 0x741   : > { %6063 = vst.msk [vmem:[%s11242_s24] sm:$0xff] %vm2367_vm4, %v6031_v5  ;;  %v5484_v57 = vsel %vm3572_vm5, %v5452_v56, %v4932_v63  ;;  %v5453_v38 = vsel %vm5427_vm14, %v5420_v26, %v4838_v4 }
 0x743   : > { %v5218_v7 = vpop.permute.xlu1 %5217 }
 0x744   : > { %v5312_v48 = vpop.permute.xlu0 %5311  ;;  %v5581_v45 = vsel %vm5557_vm1, %v5548_v10, %v5218_v7 }
 0x745   : > { %v5612_v49 = vsel %vm3638_vm7, %v5580_v9, %v5312_v48 }
 0x746   : > { %6466 = vmatprep.mubr.msk.f32.mxu0 %vm5627_vm2, %v5612_v49 }
 0x747   : > { %v4934_v30 = vpop.permute.xlu1 %4933 }
 0x748   : > { %v5028_v6 = vpop.permute.xlu0 %5027  ;;  %v5485_v50 = vsel %vm3572_vm5, %v5453_v38, %v4934_v30 }
 0x749   : > { %v5517_v14 = vsel %vm5492_vm15, %v5484_v57, %v5028_v6 }
 0x74b   : > { %v5314_v16 = vpop.permute.xlu1 %5313 }
 0x74c   : > { %v5030_v35 = vpop.permute.xlu0 %5029  ;;  %v5613_v32 = vsel %vm3638_vm7, %v5581_v45, %v5314_v16  ;;  %v12390_v45 = vld [vmem:[#allocation181_spill] sm:$0xff] }
 0x74d   : > { %v6438_v60 = vpop.f32.mrb[10].mxu0  ;;  %6467 = vmatmul.mubr.msk.f32.gmra.mrb[30].mxu0 %vm5627_vm2, %v5613_v32  ;;  %v5518_v61 = vsel %vm5492_vm15, %v5485_v50, %v5030_v35  ;;  %v5389_v35 = vsel %vm2367_vm4, %v12330_v51, %v12390_v45  ;;  %v12391_v16 = vld [vmem:[#allocation169_spill] sm:$0xff] }
 0x74e   : > { %v5963_v17 = vmul.f32 %v6438_v60, %v11227_v31  ;;  %v5804_v33 = vpop.f32.mrb[11].mxu0  ;;  %v5421_v32 = vsel %vm396_vm0, %v5389_v35, %v12391_v16 }
 0x74f   : > { %v5962_v15 = vmul.f32 %v11227_v31, %v5804_v33  ;;  %v5124_v13 = vpop.permute.xlu1 %5123 }
 0x750   : > { %v4840_v39 = vpop.permute.xlu0 %4839  ;;  %v6002_v12 = vadd.f32 %v11232_v3, %v5963_v17  ;;  %v5549_v43 = vsel %vm3605_vm6, %v5517_v14, %v5124_v13 }
 0x751   : > { %v6001_v40 = vadd.f32 %v11232_v3, %v5962_v15  ;;  %v5454_v60 = vsel %vm5427_vm14, %v5421_v32, %v4840_v39  ;;  %v12393_v39 = vld [vmem:[#allocation173_spill] sm:$0xff]  ;;  %v12397_v32 = vld [vmem:[#allocation19_spill] sm:$0xff] }
 0x752   : > { %v6034_v1 = vmax.f32 %v6002_v12, 0.0 }
 0x753   : > { %v6033_v52 = vmax.f32 %v6001_v40, 0.0  ;;  %v5126_v11 = vpop.permute.xlu1 %5125  ;;  %v12392_v40 = vld [vmem:[#allocation186_spill] sm:$0xff] }
 0x754   : > { %v5220_v36 = vpop.permute.xlu0 %5219  ;;  %6066 = vst.msk [vmem:[%s11242_s24 + $0x18] sm:$0xff] %vm2367_vm4, %v6034_v1  ;;  %v5550_v0 = vsel %vm3605_vm6, %v5518_v61, %v5126_v11  ;;  %v5390_v1 = vsel %vm2367_vm4, %v12332_v58, %v12392_v40  ;;  %v12394_v61 = vld [vmem:[#allocation111_spill] sm:$0xff] }
 0x755   : > { %6065 = vst.msk [vmem:[%s11242_s24 + $0x10] sm:$0xff] %vm2367_vm4, %v6033_v52  ;;  %v5582_v19 = vsel %vm5557_vm1, %v5549_v43, %v5220_v36  ;;  %v5422_v34 = vsel %vm396_vm0, %v5390_v1, %v12393_v39 }
 0x757   : > { %v4842_v44 = vpop.permute.xlu1 %4841 }
 0x758   : > { %v4936_v28 = vpop.permute.xlu0 %4935  ;;  %v5455_v56 = vsel %vm5427_vm14, %v5422_v34, %v4842_v44  ;;  %v12399_v34 = vld [vmem:[#allocation28_spill] sm:$0xff] }
 0x759   : > { %v5486_v15 = vsel %vm3572_vm5, %v5454_v60, %v4936_v28 }
 0x75b   : > { %v5222_v18 = vpop.permute.xlu1 %5221 }
 0x75c   : > { %v5316_v25 = vpop.permute.xlu0 %5315  ;;  %v5583_v9 = vsel %vm5557_vm1, %v5550_v0, %v5222_v18  ;;  %v12395_v0 = vld [vmem:[#allocation73_spill] sm:$0xff] }
 0x75d   : > { %v5614_v29 = vsel %vm3638_vm7, %v5582_v19, %v5316_v25 }
 0x75e   : > { %6469 = vmatprep.mubr.msk.f32.mxu0 %vm5627_vm2, %v5614_v29 }
 0x75f   : > { %v4938_v63 = vpop.permute.xlu1 %4937 }
 0x760   : > { %v5032_v5 = vpop.permute.xlu0 %5031  ;;  %v5487_v14 = vsel %vm3572_vm5, %v5455_v56, %v4938_v63 }
 0x761   : > { %v6441_v8 = vpop.f32.mrb[12].mxu0  ;;  %v5519_v13 = vsel %vm5492_vm15, %v5486_v15, %v5032_v5 }
 0x762   : > { %v5965_v47 = vmul.f32 %v6441_v8, %v11227_v31  ;;  %v5814_v54 = vpop.f32.mrb[13].mxu0  ;;  %v5391_v8 = vsel %vm2367_vm4, %v12340_v21, %v12394_v61 }
 0x763   : > { %v5964_v48 = vmul.f32 %v11227_v31, %v5814_v54  ;;  %v5318_v4 = vpop.permute.xlu1 %5317 }
 0x764   : > { %v5034_v7 = vpop.permute.xlu0 %5033  ;;  %v6004_v49 = vadd.f32 %v11232_v3, %v5965_v47  ;;  %v5615_v62 = vsel %vm3638_vm7, %v5583_v9, %v5318_v4  ;;  %v5423_v47 = vsel %vm396_vm0, %v5391_v8, %v12395_v0 }
 0x765   : > { %v6003_v46 = vadd.f32 %v11232_v3, %v5964_v48  ;;  %6470 = vmatmul.mubr.msk.f32.gmra.mrb[32].mxu0 %vm5627_vm2, %v5615_v62  ;;  %v5520_v55 = vsel %vm5492_vm15, %v5487_v14, %v5034_v7 }
 0x766   : > { %v6036_v37 = vmax.f32 %v6004_v49, 0.0 }
 0x767   : > { %v6035_v6 = vmax.f32 %v6003_v46, 0.0  ;;  %v5128_v42 = vpop.permute.xlu1 %5127 }
 0x768   : > { %v4844_v30 = vpop.permute.xlu0 %4843  ;;  %6068 = vst.msk [vmem:[%s11242_s24 + $0x28] sm:$0xff] %vm2367_vm4, %v6036_v37  ;;  %v5551_v12 = vsel %vm3605_vm6, %v5519_v13, %v5128_v42  ;;  %v12396_v37 = vld [vmem:[#allocation16_spill] sm:$0xff] }
 0x769   : > { %6067 = vst.msk [vmem:[%s11242_s24 + $0x20] sm:$0xff] %vm2367_vm4, %v6035_v6  ;;  %v5456_v9 = vsel %vm5427_vm14, %v5423_v47, %v4844_v30  ;;  %v5392_v6 = vsel %vm2367_vm4, %v12342_v41, %v12396_v37 }
 0x76a   : > { %v5424_v60 = vsel %vm396_vm0, %v5392_v6, %v12397_v32 }
 0x76b   : > { %v5130_v10 = vpop.permute.xlu1 %5129 }
 0x76c   : > { %v5224_v23 = vpop.permute.xlu0 %5223  ;;  %v5552_v19 = vsel %vm3605_vm6, %v5520_v55, %v5130_v10 }
 0x76d   : > { %v5584_v52 = vsel %vm5557_vm1, %v5551_v12, %v5224_v23 }
 0x76f   : > { %v4846_v33 = vpop.permute.xlu1 %4845 }
 0x770   : > { %v4940_v17 = vpop.permute.xlu0 %4939 }
 0x771   : > { %v5488_v7 = vsel %vm3572_vm5, %v5456_v9, %v4940_v17  ;;  %v5457_v17 = vsel %vm5427_vm14, %v5424_v60, %v4846_v33 }
 0x773   : > { %v5226_v36 = vpop.permute.xlu1 %5225 }
 0x774   : > { %v5320_v51 = vpop.permute.xlu0 %5319  ;;  %v5585_v18 = vsel %vm5557_vm1, %v5552_v19, %v5226_v36 }
 0x775   : > { %v5616_v11 = vsel %vm3638_vm7, %v5584_v52, %v5320_v51  ;;  %v6444_v2 = vpop.f32.mrb[14].mxu0  ;;  %v12398_v51 = vld [vmem:[#allocation8_spill] sm:$0xff] }
 0x776   : > { %6472 = vmatprep.mubr.msk.f32.mxu0 %vm5627_vm2, %v5616_v11  ;;  %v5967_v59 = vmul.f32 %v6444_v2, %v11227_v31  ;;  %v5824_v24 = vpop.f32.mrb[15].mxu0  ;;  %v5394_v36 = vsel %vm2367_vm4, %v12353_v20, %v12398_v51 }
 0x777   : > { %v5966_v58 = vmul.f32 %v11227_v31, %v5824_v24  ;;  %v4942_v57 = vpop.permute.xlu1 %4941  ;;  %v12400_v24 = vld [vmem:[#allocation105_spill] sm:$0xff] }
 0x778   : > { %v5036_v28 = vpop.permute.xlu0 %5035  ;;  %v6006_v43 = vadd.f32 %v11232_v3, %v5967_v59  ;;  %v5489_v12 = vsel %vm3572_vm5, %v5457_v17, %v4942_v57  ;;  %v5393_v59 = vsel %vm2367_vm4, %v12350_v53, %v12399_v34 }
 0x779   : > { %v6005_v22 = vadd.f32 %v11232_v3, %v5966_v58  ;;  %v5521_v49 = vsel %vm5492_vm15, %v5488_v7, %v5036_v28  ;;  %v5425_v56 = vsel %vm396_vm0, %v5393_v59, %v12400_v24  ;;  %v12401_v58 = vld [vmem:[#allocation84_spill] sm:$0xff] }
 0x77a   : > { %v6038_v25 = vmax.f32 %v6006_v43, 0.0  ;;  %v5426_v28 = vsel %vm396_vm0, %v5394_v36, %v12401_v58 }
 0x77b   : > { %v6037_v29 = vmax.f32 %v6005_v22, 0.0  ;;  %v5322_v27 = vpop.permute.xlu1 %5321 }
 0x77c   : > { %v5038_v44 = vpop.permute.xlu0 %5037  ;;  %6070 = vst.msk [vmem:[%s11242_s24 + $0x38] sm:$0xff] %vm2367_vm4, %v6038_v25  ;;  %v5617_v26 = vsel %vm3638_vm7, %v5585_v18, %v5322_v27 }
 0x77d   : > { %6069 = vst.msk [vmem:[%s11242_s24 + $0x30] sm:$0xff] %vm2367_vm4, %v6037_v29  ;;  %6473 = vmatmul.mubr.msk.f32.gmra.mrb[34].mxu0 %vm5627_vm2, %v5617_v26  ;;  %v5522_v1 = vsel %vm5492_vm15, %v5489_v12, %v5038_v44 }
 0x77f   : > { %v5132_v5 = vpop.permute.xlu1 %5131 }
 0x780   : > { %v4848_v38 = vpop.permute.xlu0 %4847  ;;  %v5553_v21 = vsel %vm3605_vm6, %v5521_v49, %v5132_v5 }
 0x781   : > { %v5458_v20 = vsel %vm5427_vm14, %v5425_v56, %v4848_v38 }
 0x783   : > { %v5134_v63 = vpop.permute.xlu1 %5133 }
 0x784   : > { %v5228_v50 = vpop.permute.xlu0 %5227  ;;  %v5554_v52 = vsel %vm3605_vm6, %v5522_v1, %v5134_v63 }
 0x785   : > { %v5586_v30 = vsel %vm5557_vm1, %v5553_v21, %v5228_v50 }
 0x787   : > { %v4850_v54 = vpop.permute.xlu1 %4849 }
 0x788   : > { %v4944_v48 = vpop.permute.xlu0 %4943  ;;  %v5459_v57 = vsel %vm5427_vm14, %v5426_v28, %v4850_v54 }
 0x789   : > { %v6447_v4 = vpop.f32.mrb[16].mxu0  ;;  %v5490_v43 = vsel %vm3572_vm5, %v5458_v20, %v4944_v48 }
 0x78a   : > { %v5969_v62 = vmul.f32 %v6447_v4, %v11227_v31  ;;  %v5834_v46 = vpop.f32.mrb[17].mxu0 }
 0x78b   : > { %v5968_v42 = vmul.f32 %v11227_v31, %v5834_v46  ;;  %v5230_v23 = vpop.permute.xlu1 %5229 }
 0x78c   : > { %v6008_v10 = vadd.f32 %v11232_v3, %v5969_v62  ;;  %v5324_v45 = vpop.permute.xlu0 %5323  ;;  %v5587_v11 = vsel %vm5557_vm1, %v5554_v52, %v5230_v23 }
 0x78d   : > { %v6007_v35 = vadd.f32 %v11232_v3, %v5968_v42  ;;  %v5618_v16 = vsel %vm3638_vm7, %v5586_v30, %v5324_v45 }
 0x78e   : > { %v6040_v41 = vmax.f32 %v6008_v10, 0.0  ;;  %6475 = vmatprep.mubr.msk.f32.mxu0 %vm5627_vm2, %v5618_v16 }
 0x78f   : > { %v6039_v15 = vmax.f32 %v6007_v35, 0.0  ;;  %v4946_v13 = vpop.permute.xlu1 %4945 }
 0x790   : > { %6072 = vst.msk [vmem:[%s11242_s24 + $0x48] sm:$0xff] %vm2367_vm4, %v6040_v41  ;;  %v5040_v40 = vpop.permute.xlu0 %5039  ;;  %v5491_v55 = vsel %vm3572_vm5, %v5459_v57, %v4946_v13 }
 0x791   : > { %6071 = vst.msk [vmem:[%s11242_s24 + $0x40] sm:$0xff] %vm2367_vm4, %v6039_v15  ;;  %v5523_v25 = vsel %vm5492_vm15, %v5490_v43, %v5040_v40 }
 0x793   : > { %v5326_v33 = vpop.permute.xlu1 %5325 }
 0x794   : > { %v5619_v2 = vsel %vm3638_vm7, %v5587_v11, %v5326_v33  ;;  %v5042_v39 = vpop.permute.xlu0 %5041 }
 0x795   : > { %6476 = vmatmul.mubr.msk.f32.gmra.mrb[36].mxu0 %vm5627_vm2, %v5619_v2  ;;  %v5524_v18 = vsel %vm5492_vm15, %v5491_v55, %v5042_v39 }
 0x797   : > { %v6567_v14 = vpop.permute.xlu1 %6566 }
 0x798   : > { %v6569_v22 = vunpack.i.h.bf16 %v6567_v14  ;;  %v6568_v19 = vunpack.i.l.bf16 %v6567_v14  ;;  %v6572_v53 = vpop.permute.xlu0 %6571 }
 0x799   : > { %v6574_v29 = vunpack.i.h.bf16 %v6572_v53  ;;  %v6573_v44 = vunpack.i.l.bf16 %v6572_v53 }
 0x79a   : > { %v5555_v27 = vsel %vm3605_vm6, %v5523_v25, %v6568_v19  ;;  %v5556_v26 = vsel %vm3605_vm6, %v5524_v18, %v6569_v22 }
 0x79b   : > { %v6577_v38 = vpop.permute.xlu1 %6576  ;;  %v5589_v50 = vsel %vm5557_vm1, %v5556_v26, %v6574_v29  ;;  %v5588_v61 = vsel %vm5557_vm1, %v5555_v27, %v6573_v44 }
 0x79c   : > { %v6579_v5 = vunpack.i.h.bf16 %v6577_v38  ;;  %v6578_v63 = vunpack.i.l.bf16 %v6577_v38 }
 0x79d   : > { %v6450_v8 = vpop.f32.mrb[18].mxu0 }
 0x79e   : > { %v5971_v0 = vmul.f32 %v6450_v8, %v11227_v31  ;;  %v5844_v47 = vpop.f32.mrb[19].mxu0  ;;  %v5620_v54 = vsel %vm3638_vm7, %v5588_v61, %v6578_v63  ;;  %v5621_v9 = vsel %vm3638_vm7, %v5589_v50, %v6579_v5 }
 0x79f   : > { %v5970_v48 = vmul.f32 %v11227_v31, %v5844_v47  ;;  %6478 = vmatprep.mubr.msk.f32.mxu0 %vm5627_vm2, %v5620_v54 }
 0x7a0   : > { %v6010_v7 = vadd.f32 %v11232_v3, %v5971_v0  ;;  %6479 = vmatmul.mubr.msk.f32.gmra.mrb[38].mxu0 %vm5627_vm2, %v5621_v9 }
 0x7a1   : > { %v6009_v4 = vadd.f32 %v11232_v3, %v5970_v48 }
 0x7a2   : > { %v6042_v49 = vmax.f32 %v6010_v7, 0.0 }
 0x7a3   : > { %v6041_v62 = vmax.f32 %v6009_v4, 0.0 }
 0x7a4   : > { %6074 = vst.msk [vmem:[%s11242_s24 + $0x58] sm:$0xff] %vm2367_vm4, %v6042_v49 }
 0x7a5   : > { %6073 = vst.msk [vmem:[%s11242_s24 + $0x50] sm:$0xff] %vm2367_vm4, %v6041_v62 }
 0x7b1   : > { %v6453_v46 = vpop.f32.mrb[20].mxu0 }
 0x7b2   : > { %v5973_v37 = vmul.f32 %v6453_v46, %v11227_v31  ;;  %v5854_v6 = vpop.f32.mrb[21].mxu0 }
 0x7b3   : > { %v5972_v21 = vmul.f32 %v11227_v31, %v5854_v6 }
 0x7b4   : > { %v6012_v42 = vadd.f32 %v11232_v3, %v5973_v37 }
 0x7b5   : > { %v6011_v23 = vadd.f32 %v11232_v3, %v5972_v21 }
 0x7b6   : > { %v6044_v30 = vmax.f32 %v6012_v42, 0.0 }
 0x7b7   : > { %v6043_v10 = vmax.f32 %v6011_v23, 0.0 }
 0x7b8   : > { %6076 = vst.msk [vmem:[%s11242_s24 + $0x68] sm:$0xff] %vm2367_vm4, %v6044_v30 }
 0x7b9   : > { %6075 = vst.msk [vmem:[%s11242_s24 + $0x60] sm:$0xff] %vm2367_vm4, %v6043_v10 }
 0x7c5   : > { %v6456_v45 = vpop.f32.mrb[22].mxu0 }
 0x7c6   : > { %v5975_v35 = vmul.f32 %v6456_v45, %v11227_v31  ;;  %v5864_v16 = vpop.f32.mrb[23].mxu0 }
 0x7c7   : > { %v5974_v32 = vmul.f32 %v11227_v31, %v5864_v16 }
 0x7c8   : > { %v6014_v60 = vadd.f32 %v11232_v3, %v5975_v35 }
 0x7c9   : > { %v6013_v41 = vadd.f32 %v11232_v3, %v5974_v32 }
 0x7ca   : > { %v6046_v17 = vmax.f32 %v6014_v60, 0.0 }
 0x7cb   : > { %v6045_v15 = vmax.f32 %v6013_v41, 0.0 }
 0x7cc   : > { %6078 = vst.msk [vmem:[%s11242_s24 + $0x78] sm:$0xff] %vm2367_vm4, %v6046_v17 }
 0x7cd   : > { %6077 = vst.msk [vmem:[%s11242_s24 + $0x70] sm:$0xff] %vm2367_vm4, %v6045_v15 }
 0x7d9   : > { %v6459_v13 = vpop.f32.mrb[24].mxu0 }
 0x7da   : > { %v5977_v12 = vmul.f32 %v6459_v13, %v11227_v31  ;;  %v5874_v40 = vpop.f32.mrb[25].mxu0 }
 0x7db   : > { %v5976_v1 = vmul.f32 %v11227_v31, %v5874_v40 }
 0x7dc   : > { %v6016_v52 = vadd.f32 %v11232_v3, %v5977_v12 }
 0x7dd   : > { %v6015_v51 = vadd.f32 %v11232_v3, %v5976_v1 }
 0x7de   : > { %v6048_v36 = vmax.f32 %v6016_v52, 0.0 }
 0x7df   : > { %v6047_v11 = vmax.f32 %v6015_v51, 0.0 }
 0x7e0   : > { %6080 = vst.msk [vmem:[%s11242_s24 + $0x88] sm:$0xff] %vm2367_vm4, %v6048_v36 }
 0x7e1   : > { %6079 = vst.msk [vmem:[%s11242_s24 + $0x80] sm:$0xff] %vm2367_vm4, %v6047_v11 }
 0x7f0   : > { %v6462_v33 = vpop.f32.mrb[26].mxu0 }
 0x7f1   : > { %v5979_v2 = vmul.f32 %v6462_v33, %v11227_v31  ;;  %v5884_v39 = vpop.f32.mrb[27].mxu0 }
 0x7f2   : > { %v5978_v34 = vmul.f32 %v11227_v31, %v5884_v39 }
 0x7f3   : > { %v6018_v59 = vadd.f32 %v11232_v3, %v5979_v2 }
 0x7f4   : > { %v6017_v24 = vadd.f32 %v11232_v3, %v5978_v34 }
 0x7f5   : > { %v6050_v56 = vmax.f32 %v6018_v59, 0.0 }
 0x7f6   : > { %v6049_v58 = vmax.f32 %v6017_v24, 0.0 }
 0x7f7   : > { %6082 = vst.msk [vmem:[%s11242_s24 + $0x98] sm:$0xff] %vm2367_vm4, %v6050_v56 }
 0x7f8   : > { %6081 = vst.msk [vmem:[%s11242_s24 + $0x90] sm:$0xff] %vm2367_vm4, %v6049_v58 }
 0x808   : > { %v6465_v28 = vpop.f32.mrb[28].mxu0 }
 0x809   : > { %v5981_v20 = vmul.f32 %v6465_v28, %v11227_v31  ;;  %v5894_v57 = vpop.f32.mrb[29].mxu0 }
 0x80a   : > { %v5980_v14 = vmul.f32 %v11227_v31, %v5894_v57 }
 0x80b   : > { %v6020_v43 = vadd.f32 %v11232_v3, %v5981_v20 }
 0x80c   : > { %v6019_v55 = vadd.f32 %v11232_v3, %v5980_v14 }
 0x80d   : > { %v6052_v22 = vmax.f32 %v6020_v43, 0.0 }
 0x80e   : > { %v6051_v19 = vmax.f32 %v6019_v55, 0.0 }
 0x80f   : > { %6084 = vst.msk [vmem:[%s11242_s24 + $0xa8] sm:$0xff] %vm2367_vm4, %v6052_v22 }
 0x810   : > { %6083 = vst.msk [vmem:[%s11242_s24 + $0xa0] sm:$0xff] %vm2367_vm4, %v6051_v19 }
 0x820   : > { %v6468_v53 = vpop.f32.mrb[30].mxu0 }
 0x821   : > { %v5983_v25 = vmul.f32 %v6468_v53, %v11227_v31  ;;  %v5904_v18 = vpop.f32.mrb[31].mxu0 }
 0x822   : > { %v5982_v29 = vmul.f32 %v11227_v31, %v5904_v18 }
 0x823   : > { %v6022_v44 = vadd.f32 %v11232_v3, %v5983_v25 }
 0x824   : > { %v6021_v27 = vadd.f32 %v11232_v3, %v5982_v29 }
 0x825   : > { %v6054_v26 = vmax.f32 %v6022_v44, 0.0 }
 0x826   : > { %v6053_v38 = vmax.f32 %v6021_v27, 0.0 }
 0x827   : > { %6086 = vst.msk [vmem:[%s11242_s24 + $0xb8] sm:$0xff] %vm2367_vm4, %v6054_v26 }
 0x828   : > { %6085 = vst.msk [vmem:[%s11242_s24 + $0xb0] sm:$0xff] %vm2367_vm4, %v6053_v38 }
 0x838   : > { %v6471_v5 = vpop.f32.mrb[32].mxu0 }
 0x839   : > { %v5985_v63 = vmul.f32 %v6471_v5, %v11227_v31  ;;  %v5914_v50 = vpop.f32.mrb[33].mxu0 }
 0x83a   : > { %v5984_v61 = vmul.f32 %v11227_v31, %v5914_v50 }
 0x83b   : > { %v6024_v8 = vadd.f32 %v11232_v3, %v5985_v63 }
 0x83c   : > { %v6023_v0 = vadd.f32 %v11232_v3, %v5984_v61 }
 0x83d   : > { %v6056_v47 = vmax.f32 %v6024_v8, 0.0 }
 0x83e   : > { %v6055_v54 = vmax.f32 %v6023_v0, 0.0 }
 0x83f   : > { %6088 = vst.msk [vmem:[%s11242_s24 + $0xc8] sm:$0xff] %vm2367_vm4, %v6056_v47 }
 0x840   : > { %6087 = vst.msk [vmem:[%s11242_s24 + $0xc0] sm:$0xff] %vm2367_vm4, %v6055_v54 }
 0x850   : > { %v6474_v9 = vpop.f32.mrb[34].mxu0 }
 0x851   : > { %v5987_v48 = vmul.f32 %v6474_v9, %v11227_v31  ;;  %v5924_v7 = vpop.f32.mrb[35].mxu0 }
 0x852   : > { %v5986_v4 = vmul.f32 %v11227_v31, %v5924_v7 }
 0x853   : > { %v6026_v49 = vadd.f32 %v11232_v3, %v5987_v48 }
 0x854   : > { %v6025_v62 = vadd.f32 %v11232_v3, %v5986_v4 }
 0x855   : > { %v6058_v46 = vmax.f32 %v6026_v49, 0.0 }
 0x856   : > { %v6057_v37 = vmax.f32 %v6025_v62, 0.0 }
 0x857   : > { %6090 = vst.msk [vmem:[%s11242_s24 + $0xd8] sm:$0xff] %vm2367_vm4, %v6058_v46 }
 0x858   : > { %6089 = vst.msk [vmem:[%s11242_s24 + $0xd0] sm:$0xff] %vm2367_vm4, %v6057_v37 }
 0x868   : > { %v6477_v6 = vpop.f32.mrb[36].mxu0 }
 0x869   : > { %v5989_v21 = vmul.f32 %v6477_v6, %v11227_v31  ;;  %v5934_v42 = vpop.f32.mrb[37].mxu0 }
 0x86a   : > { %v5988_v23 = vmul.f32 %v11227_v31, %v5934_v42 }
 0x86b   : > { %v6028_v30 = vadd.f32 %v11232_v3, %v5989_v21 }
 0x86c   : > { %v6027_v10 = vadd.f32 %v11232_v3, %v5988_v23 }
 0x86d   : > { %v6060_v45 = vmax.f32 %v6028_v30, 0.0 }
 0x86e   : > { %v6059_v35 = vmax.f32 %v6027_v10, 0.0 }
 0x86f   : > { %6092 = vst.msk [vmem:[%s11242_s24 + $0xe8] sm:$0xff] %vm2367_vm4, %v6060_v45 }
 0x870   : > { %6091 = vst.msk [vmem:[%s11242_s24 + $0xe0] sm:$0xff] %vm2367_vm4, %v6059_v35 }
 0x873   : > { %v6480_v16 = vpop.f32.mrb[38].mxu0 }
 0x874   : > { %v5991_v32 = vmul.f32 %v6480_v16, %v11227_v31  ;;  %v5944_v60 = vpop.f32.mrb[39].mxu0 }
 0x875   : > { %v5990_v41 = vmul.f32 %v11227_v31, %v5944_v60 }
 0x876   : > { %v6030_v17 = vadd.f32 %v11232_v3, %v5991_v32 }
 0x877   : > { %v6029_v15 = vadd.f32 %v11232_v3, %v5990_v41 }
 0x878   : > { %v6062_v13 = vmax.f32 %v6030_v17, 0.0 }
 0x879   : > { %v6061_v12 = vmax.f32 %v6029_v15, 0.0 }
 0x87a   : > { %6094 = vst.msk [vmem:[%s11242_s24 + $0xf8] sm:$0xff] %vm2367_vm4, %v6062_v13 }
 0x87b   : > { %6093 = vst.msk [vmem:[%s11242_s24 + $0xf0] sm:$0xff] %vm2367_vm4, %v6061_v12 }
 0x87c PF: > { %s20_s13 = sadd.s32 1, %s6586_s13  }
 0x87d   : > { %p17_p4 = scmp.ge.s32.totalorder %s20_s13, 4  }
 0x87f   :  { %19 = sbr.rel (!%p17_p4) target bundleno = 1 (0x1), region = 93 }

</bundles_post_ra>
